<compile_context>
chip_gen: v5e
topology: v5e:2x2
jax: 0.10.0
libtpu: 0.0.40
codegen_flags: <defaults>
</compile_context>

<pallas_src>
import functools
import math

import jax
import jax.numpy as jnp
from jax import lax
from jax.experimental import pallas as pl
from jax.experimental.pallas import tpu as pltpu


def _round_up(x, m):
    return (x + m - 1) // m * m


def _fused_block_kernel(x_ref, w1_ref, b1_ref, w2_ref, b2_ref, mask_ref,
                        alpha_ref, o_ref, h1_scr, *, starts, n_cols, lpad):
    """One batch sample: PReLU(conv2(PReLU(conv1(x)))) entirely in VMEM.

    x_ref   : (1, CinP, EXT)    bf16  flattened padded volume (+aligned zero halos)
    w1_ref  : (27, CoutP, CinP) bf16  per-tap conv1 weights
    w2_ref  : (27, CoutP, CoutP) bf16 per-tap conv2 weights
    b1/b2   : (CoutP, 1) f32
    mask_ref: (1, n_cols) f32   1.0 at interior voxels of the padded grid
    alpha   : (1,) f32 in SMEM  shared PReLU slope
    o_ref   : (1, CoutP, n_cols) f32
    h1_scr  : (CoutP, EXT) bf16 VMEM scratch (zero-halo-padded h1 for conv2)
    """
    alpha = alpha_ref[0]
    xv = x_ref[0]                                     # (CinP, EXT) bf16
    cout_p = o_ref.shape[1]

    # ---- conv1: 27 shifted-tap matmuls, f32 accumulation on the MXU ----
    acc = jnp.zeros((cout_p, n_cols), jnp.float32)
    for t, s in enumerate(starts):                    # static unroll, static slices
        acc += jnp.dot(w1_ref[t], xv[:, s:s + n_cols],
                       preferred_element_type=jnp.float32)
    h1 = acc + b1_ref[...]
    h1 = jnp.where(h1 > 0, h1, alpha * h1)            # PReLU (shared alpha)
    h1 = h1 * mask_ref[...]                           # zero padded-grid border
                                                      # (= conv2's zero padding)

    # stage zero-halo-padded h1 in VMEM; it never goes to HBM.
    ext = h1_scr.shape[1]
    h1_scr[:, :lpad] = jnp.zeros((cout_p, lpad), h1_scr.dtype)
    h1_scr[:, lpad:lpad + n_cols] = h1.astype(h1_scr.dtype)   # aligned, unmasked
    right = ext - lpad - n_cols
    if right > 0:
        h1_scr[:, lpad + n_cols:] = jnp.zeros((cout_p, right), h1_scr.dtype)
    h1v = h1_scr[...]                                 # (CoutP, EXT) bf16

    # ---- conv2: same shifted-tap accumulation over h1 ----
    acc2 = jnp.zeros((cout_p, n_cols), jnp.float32)
    for t, s in enumerate(starts):
        acc2 += jnp.dot(w2_ref[t], h1v[:, s:s + n_cols],
                        preferred_element_type=jnp.float32)
    h2 = acc2 + b2_ref[...]
    h2 = jnp.where(h2 > 0, h2, alpha * h2)            # PReLU (shared alpha)
    o_ref[0] = h2.astype(o_ref.dtype)                 # lane-dense unmasked store


def block_forward(x, params):
    """x: (N, Cin, D, H, W) float32 (NCDHW, like PyTorch). Returns NCDHW float32."""
    n, cin, d, h, w = x.shape
    cout = params["w1"].shape[0]
    dp, hp, wp = d + 2, h + 2, w + 2
    p_cols = dp * hp * wp                      # one output column per padded voxel
    n_cols = _round_up(p_cols, 128)            # lane-dense compute/output width
    maxoff = hp * wp + wp + 1                  # largest |flat tap offset|
    lpad = _round_up(maxoff, 128)              # lane-aligned left zero halo
    ext = _round_up(lpad + n_cols + maxoff, 128)
    cin_p = _round_up(cin, 8)
    cout_p = _round_up(cout, 8)

    # ---- host-side layout plumbing only (pad + flatten; no im2col blow-up) ----
    xp = jnp.pad(x, ((0, 0), (0, cin_p - cin), (1, 1), (1, 1), (1, 1)))
    x_ext = jnp.pad(xp.reshape(n, cin_p, p_cols),
                    ((0, 0), (0, 0), (lpad, ext - lpad - p_cols)))
    x_ext = x_ext.astype(jnp.bfloat16)

    def tap_weights(wt, ci_pad):               # (Cout, Ci, 3,3,3) -> (27, CoutP, CiP)
        t = jnp.transpose(wt, (2, 3, 4, 0, 1)).reshape(27, wt.shape[0], wt.shape[1])
        t = jnp.pad(t, ((0, 0), (0, cout_p - wt.shape[0]), (0, ci_pad - wt.shape[1])))
        return t.astype(jnp.bfloat16)

    w1t = tap_weights(params["w1"], cin_p)
    w2t = tap_weights(params["w2"], cout_p)
    b1 = jnp.pad(params["b1"], (0, cout_p - cout)).reshape(cout_p, 1).astype(jnp.float32)
    b2 = jnp.pad(params["b2"], (0, cout_p - cout)).reshape(cout_p, 1).astype(jnp.float32)
    mask = jnp.pad(jnp.ones((d, h, w), jnp.float32),
                   ((1, 1), (1, 1), (1, 1))).reshape(1, p_cols)
    mask = jnp.pad(mask, ((0, 0), (0, n_cols - p_cols)))
    alpha = jnp.asarray(params["alpha"], jnp.float32).reshape(1)

    # static flat offsets of the 27 taps relative to an output voxel
    starts = tuple(lpad + (kd - 1) * hp * wp + (kh - 1) * wp + (kw - 1)
                   for kd in range(3) for kh in range(3) for kw in range(3))

    kernel = functools.partial(_fused_block_kernel,
                               starts=starts, n_cols=n_cols, lpad=lpad)

    out = pl.pallas_call(
        kernel,
        out_shape=jax.ShapeDtypeStruct((n, cout_p, n_cols), jnp.float32),
        grid_spec=pltpu.PrefetchScalarGridSpec(
            num_scalar_prefetch=0,
            grid=(n,),
            in_specs=[
                pl.BlockSpec((1, cin_p, ext), lambda b: (b, 0, 0)),       # x
                pl.BlockSpec((27, cout_p, cin_p), lambda b: (0, 0, 0)),   # w1 taps
                pl.BlockSpec((cout_p, 1), lambda b: (0, 0)),              # b1
                pl.BlockSpec((27, cout_p, cout_p), lambda b: (0, 0, 0)),  # w2 taps
                pl.BlockSpec((cout_p, 1), lambda b: (0, 0)),              # b2
                pl.BlockSpec((1, n_cols), lambda b: (0, 0)),              # interior mask
                pl.BlockSpec(memory_space=pltpu.MemorySpace.SMEM),        # alpha
            ],
            out_specs=pl.BlockSpec((1, cout_p, n_cols), lambda b: (b, 0, 0)),
            scratch_shapes=[pltpu.VMEM((cout_p, ext), jnp.bfloat16)],
        ),
        compiler_params=pltpu.CompilerParams(
            dimension_semantics=("parallel",)),
    )(x_ext, w1t, b1, w2t, b2, mask, alpha)

    out = out[:, :, :p_cols].reshape(n, cout_p, dp, hp, wp)
    return out[:, :cout, 1:-1, 1:-1, 1:-1]            # drop channel/spatial padding


def init_params(key, in_ch, out_ch):
    # Deterministic synthetic init (PyTorch-like uniform fan-in bounds).
    k1, k2, k3, k4 = jax.random.split(key, 4)
    bound1 = 1.0 / math.sqrt(in_ch * 27)
    bound2 = 1.0 / math.sqrt(out_ch * 27)
    return dict(
        w1=jax.random.uniform(k1, (out_ch, in_ch, 3, 3, 3), jnp.float32,
                              -bound1, bound1),
        b1=jax.random.uniform(k2, (out_ch,), jnp.float32, -bound1, bound1),
        w2=jax.random.uniform(k3, (out_ch, out_ch, 3, 3, 3), jnp.float32,
                              -bound2, bound2),
        b2=jax.random.uniform(k4, (out_ch,), jnp.float32, -bound2, bound2),
        alpha=jnp.float32(0.25),  # nn.PReLU default: one shared parameter, 0.25
    )


def _reference_block(x, params):
    # Pure-XLA f32 reference (matches the PyTorch forward; BN unused there).
    dn = ("NCDHW", "OIDHW", "NCDHW")

    def conv(v, wt, b):
        y = lax.conv_general_dilated(v, wt, window_strides=(1, 1, 1),
                                     padding=((1, 1), (1, 1), (1, 1)),
                                     dimension_numbers=dn)
        return y + b.reshape(1, -1, 1, 1, 1)

    def prelu(v):
        return jnp.where(v > 0, v, params["alpha"] * v)

    return prelu(conv(prelu(conv(x, params["w1"], params["b1"])),
                      params["w2"], params["b2"]))


if __name__ == "__main__":
    # TODO(synk): self.BN (BatchNorm3d) is constructed in the PyTorch module but
    # never used in its forward(), so it is intentionally not implemented here.
    key = jax.random.PRNGKey(0)
    kx, kp = jax.random.split(key)
    N, Cin, Cout, D, H, W = 2, 4, 8, 8, 8, 8
    x = jax.random.normal(kx, (N, Cin, D, H, W), jnp.float32)   # NCDHW like PyTorch
    params = init_params(kp, Cin, Cout)

    y = jax.jit(block_forward)(x, params)
    y = jax.block_until_ready(y)
    assert y.shape == (N, Cout, D, H, W)
    assert y.dtype == jnp.float32
    assert bool(jnp.all(jnp.isfinite(y)))

    # loose sanity check vs f32 XLA reference (kernel matmul operands are bf16)
    y_ref = jax.block_until_ready(jax.jit(_reference_block)(x, params))
    err = float(jnp.max(jnp.abs(y - y_ref)))
    assert err < 0.1, f"max abs err {err}"

    print("KERNEL_OK")
</pallas_src>

<mosaic_0001>
module attributes {stable_mosaic.version = 11 : i64} {
  func.func @_fused_block_kernel(%arg0: i32, %arg1: memref<1x8x1280xbf16, #tpu.memory_space<vmem>>, %arg2: memref<27x8x8xbf16, #tpu.memory_space<vmem>>, %arg3: memref<8x1xf32, #tpu.memory_space<vmem>>, %arg4: memref<27x8x8xbf16, #tpu.memory_space<vmem>>, %arg5: memref<8x1xf32, #tpu.memory_space<vmem>>, %arg6: memref<1x1024xf32, #tpu.memory_space<vmem>>, %arg7: memref<1xf32, #tpu.memory_space<smem>>, %arg8: memref<1x8x1024xf32, #tpu.memory_space<vmem>>, %arg9: memref<8x1280xbf16, #tpu.memory_space<vmem>>) attributes {dimension_semantics = [#tpu.dimension_semantics<parallel>], iteration_bounds = array<i64: 2>, scalar_prefetch = 0 : i64, scratch_operands = 1 : i64, tpu.core_type = #tpu.core_type<tc>, window_params = [{transform_indices = @transform_0, window_bounds = array<i64: 1, 8, 1280>}, {pipeline_mode = #tpu.pipeline_mode<synchronous>, transform_indices = @transform_1, window_bounds = array<i64: 27, 8, 8>}, {pipeline_mode = #tpu.pipeline_mode<synchronous>, transform_indices = @transform_2, window_bounds = array<i64: 8, 1>}, {pipeline_mode = #tpu.pipeline_mode<synchronous>, transform_indices = @transform_3, window_bounds = array<i64: 27, 8, 8>}, {pipeline_mode = #tpu.pipeline_mode<synchronous>, transform_indices = @transform_4, window_bounds = array<i64: 8, 1>}, {pipeline_mode = #tpu.pipeline_mode<synchronous>, transform_indices = @transform_5, window_bounds = array<i64: 1, 1024>}, {transform_indices = @transform_6, window_bounds = array<i64: 1>}, {transform_indices = @transform_7, window_bounds = array<i64: 1, 8, 1024>}]} {
    %c0 = arith.constant 0 : index
    %0 = memref.load %arg7[%c0] : memref<1xf32, #tpu.memory_space<smem>>
    %c0_0 = arith.constant 0 : index
    %c0_1 = arith.constant 0 : index
    %c0_2 = arith.constant 0 : index
    %1 = vector.load %arg1[%c0_0, %c0_1, %c0_2] : memref<1x8x1280xbf16, #tpu.memory_space<vmem>>, vector<1x8x1280xbf16>
    %2 = vector.shape_cast %1 : vector<1x8x1280xbf16> to vector<8x1280xbf16>
    %cst = arith.constant 0.000000e+00 : f32
    %3 = vector.broadcast %cst : f32 to vector<8x1024xf32>
    %c0_3 = arith.constant 0 : index
    %c0_4 = arith.constant 0 : index
    %c0_5 = arith.constant 0 : index
    %4 = vector.load %arg2[%c0_3, %c0_4, %c0_5] : memref<27x8x8xbf16, #tpu.memory_space<vmem>>, vector<1x8x8xbf16>
    %5 = vector.shape_cast %4 : vector<1x8x8xbf16> to vector<8x8xbf16>
    %6 = vector.extract_strided_slice %2 {offsets = [0, 17], sizes = [8, 1024], strides = [1, 1]} : vector<8x1280xbf16> to vector<8x1024xbf16>
    %cst_6 = arith.constant dense<0.000000e+00> : vector<8x1024xf32>
    %7 = tpu.matmul %5, %6, %cst_6 {dimension_numbers = #tpu.dot_dimension_numbers<[1], [0], [0], [1], [0, 0, 1, 1], [], []>} : vector<8x8xbf16>, vector<8x1024xbf16>, vector<8x1024xf32> -> vector<8x1024xf32>
    %8 = arith.addf %3, %7 : vector<8x1024xf32>
    %c1 = arith.constant 1 : index
    %c0_7 = arith.constant 0 : index
    %c0_8 = arith.constant 0 : index
    %9 = vector.load %arg2[%c1, %c0_7, %c0_8] : memref<27x8x8xbf16, #tpu.memory_space<vmem>>, vector<1x8x8xbf16>
    %10 = vector.shape_cast %9 : vector<1x8x8xbf16> to vector<8x8xbf16>
    %11 = vector.extract_strided_slice %2 {offsets = [0, 18], sizes = [8, 1024], strides = [1, 1]} : vector<8x1280xbf16> to vector<8x1024xbf16>
    %cst_9 = arith.constant dense<0.000000e+00> : vector<8x1024xf32>
    %12 = tpu.matmul %10, %11, %cst_9 {dimension_numbers = #tpu.dot_dimension_numbers<[1], [0], [0], [1], [0, 0, 1, 1], [], []>} : vector<8x8xbf16>, vector<8x1024xbf16>, vector<8x1024xf32> -> vector<8x1024xf32>
    %13 = arith.addf %8, %12 : vector<8x1024xf32>
    %c2 = arith.constant 2 : index
    %c0_10 = arith.constant 0 : index
    %c0_11 = arith.constant 0 : index
    %14 = vector.load %arg2[%c2, %c0_10, %c0_11] : memref<27x8x8xbf16, #tpu.memory_space<vmem>>, vector<1x8x8xbf16>
    %15 = vector.shape_cast %14 : vector<1x8x8xbf16> to vector<8x8xbf16>
    %16 = vector.extract_strided_slice %2 {offsets = [0, 19], sizes = [8, 1024], strides = [1, 1]} : vector<8x1280xbf16> to vector<8x1024xbf16>
    %cst_12 = arith.constant dense<0.000000e+00> : vector<8x1024xf32>
    %17 = tpu.matmul %15, %16, %cst_12 {dimension_numbers = #tpu.dot_dimension_numbers<[1], [0], [0], [1], [0, 0, 1, 1], [], []>} : vector<8x8xbf16>, vector<8x1024xbf16>, vector<8x1024xf32> -> vector<8x1024xf32>
    %18 = arith.addf %13, %17 : vector<8x1024xf32>
    %c3 = arith.constant 3 : index
    %c0_13 = arith.constant 0 : index
    %c0_14 = arith.constant 0 : index
    %19 = vector.load %arg2[%c3, %c0_13, %c0_14] : memref<27x8x8xbf16, #tpu.memory_space<vmem>>, vector<1x8x8xbf16>
    %20 = vector.shape_cast %19 : vector<1x8x8xbf16> to vector<8x8xbf16>
    %21 = vector.extract_strided_slice %2 {offsets = [0, 27], sizes = [8, 1024], strides = [1, 1]} : vector<8x1280xbf16> to vector<8x1024xbf16>
    %cst_15 = arith.constant dense<0.000000e+00> : vector<8x1024xf32>
    %22 = tpu.matmul %20, %21, %cst_15 {dimension_numbers = #tpu.dot_dimension_numbers<[1], [0], [0], [1], [0, 0, 1, 1], [], []>} : vector<8x8xbf16>, vector<8x1024xbf16>, vector<8x1024xf32> -> vector<8x1024xf32>
    %23 = arith.addf %18, %22 : vector<8x1024xf32>
    %c4 = arith.constant 4 : index
    %c0_16 = arith.constant 0 : index
    %c0_17 = arith.constant 0 : index
    %24 = vector.load %arg2[%c4, %c0_16, %c0_17] : memref<27x8x8xbf16, #tpu.memory_space<vmem>>, vector<1x8x8xbf16>
    %25 = vector.shape_cast %24 : vector<1x8x8xbf16> to vector<8x8xbf16>
    %26 = vector.extract_strided_slice %2 {offsets = [0, 28], sizes = [8, 1024], strides = [1, 1]} : vector<8x1280xbf16> to vector<8x1024xbf16>
    %cst_18 = arith.constant dense<0.000000e+00> : vector<8x1024xf32>
    %27 = tpu.matmul %25, %26, %cst_18 {dimension_numbers = #tpu.dot_dimension_numbers<[1], [0], [0], [1], [0, 0, 1, 1], [], []>} : vector<8x8xbf16>, vector<8x1024xbf16>, vector<8x1024xf32> -> vector<8x1024xf32>
    %28 = arith.addf %23, %27 : vector<8x1024xf32>
    %c5 = arith.constant 5 : index
    %c0_19 = arith.constant 0 : index
    %c0_20 = arith.constant 0 : index
    %29 = vector.load %arg2[%c5, %c0_19, %c0_20] : memref<27x8x8xbf16, #tpu.memory_space<vmem>>, vector<1x8x8xbf16>
    %30 = vector.shape_cast %29 : vector<1x8x8xbf16> to vector<8x8xbf16>
    %31 = vector.extract_strided_slice %2 {offsets = [0, 29], sizes = [8, 1024], strides = [1, 1]} : vector<8x1280xbf16> to vector<8x1024xbf16>
    %cst_21 = arith.constant dense<0.000000e+00> : vector<8x1024xf32>
    %32 = tpu.matmul %30, %31, %cst_21 {dimension_numbers = #tpu.dot_dimension_numbers<[1], [0], [0], [1], [0, 0, 1, 1], [], []>} : vector<8x8xbf16>, vector<8x1024xbf16>, vector<8x1024xf32> -> vector<8x1024xf32>
    %33 = arith.addf %28, %32 : vector<8x1024xf32>
    %c6 = arith.constant 6 : index
    %c0_22 = arith.constant 0 : index
    %c0_23 = arith.constant 0 : index
    %34 = vector.load %arg2[%c6, %c0_22, %c0_23] : memref<27x8x8xbf16, #tpu.memory_space<vmem>>, vector<1x8x8xbf16>
    %35 = vector.shape_cast %34 : vector<1x8x8xbf16> to vector<8x8xbf16>
    %36 = vector.extract_strided_slice %2 {offsets = [0, 37], sizes = [8, 1024], strides = [1, 1]} : vector<8x1280xbf16> to vector<8x1024xbf16>
    %cst_24 = arith.constant dense<0.000000e+00> : vector<8x1024xf32>
    %37 = tpu.matmul %35, %36, %cst_24 {dimension_numbers = #tpu.dot_dimension_numbers<[1], [0], [0], [1], [0, 0, 1, 1], [], []>} : vector<8x8xbf16>, vector<8x1024xbf16>, vector<8x1024xf32> -> vector<8x1024xf32>
    %38 = arith.addf %33, %37 : vector<8x1024xf32>
    %c7 = arith.constant 7 : index
    %c0_25 = arith.constant 0 : index
    %c0_26 = arith.constant 0 : index
    %39 = vector.load %arg2[%c7, %c0_25, %c0_26] : memref<27x8x8xbf16, #tpu.memory_space<vmem>>, vector<1x8x8xbf16>
    %40 = vector.shape_cast %39 : vector<1x8x8xbf16> to vector<8x8xbf16>
    %41 = vector.extract_strided_slice %2 {offsets = [0, 38], sizes = [8, 1024], strides = [1, 1]} : vector<8x1280xbf16> to vector<8x1024xbf16>
    %cst_27 = arith.constant dense<0.000000e+00> : vector<8x1024xf32>
    %42 = tpu.matmul %40, %41, %cst_27 {dimension_numbers = #tpu.dot_dimension_numbers<[1], [0], [0], [1], [0, 0, 1, 1], [], []>} : vector<8x8xbf16>, vector<8x1024xbf16>, vector<8x1024xf32> -> vector<8x1024xf32>
    %43 = arith.addf %38, %42 : vector<8x1024xf32>
    %c8 = arith.constant 8 : index
    %c0_28 = arith.constant 0 : index
    %c0_29 = arith.constant 0 : index
    %44 = vector.load %arg2[%c8, %c0_28, %c0_29] : memref<27x8x8xbf16, #tpu.memory_space<vmem>>, vector<1x8x8xbf16>
    %45 = vector.shape_cast %44 : vector<1x8x8xbf16> to vector<8x8xbf16>
    %46 = vector.extract_strided_slice %2 {offsets = [0, 39], sizes = [8, 1024], strides = [1, 1]} : vector<8x1280xbf16> to vector<8x1024xbf16>
    %cst_30 = arith.constant dense<0.000000e+00> : vector<8x1024xf32>
    %47 = tpu.matmul %45, %46, %cst_30 {dimension_numbers = #tpu.dot_dimension_numbers<[1], [0], [0], [1], [0, 0, 1, 1], [], []>} : vector<8x8xbf16>, vector<8x1024xbf16>, vector<8x1024xf32> -> vector<8x1024xf32>
    %48 = arith.addf %43, %47 : vector<8x1024xf32>
    %c9 = arith.constant 9 : index
    %c0_31 = arith.constant 0 : index
    %c0_32 = arith.constant 0 : index
    %49 = vector.load %arg2[%c9, %c0_31, %c0_32] : memref<27x8x8xbf16, #tpu.memory_space<vmem>>, vector<1x8x8xbf16>
    %50 = vector.shape_cast %49 : vector<1x8x8xbf16> to vector<8x8xbf16>
    %51 = vector.extract_strided_slice %2 {offsets = [0, 117], sizes = [8, 1024], strides = [1, 1]} : vector<8x1280xbf16> to vector<8x1024xbf16>
    %cst_33 = arith.constant dense<0.000000e+00> : vector<8x1024xf32>
    %52 = tpu.matmul %50, %51, %cst_33 {dimension_numbers = #tpu.dot_dimension_numbers<[1], [0], [0], [1], [0, 0, 1, 1], [], []>} : vector<8x8xbf16>, vector<8x1024xbf16>, vector<8x1024xf32> -> vector<8x1024xf32>
    %53 = arith.addf %48, %52 : vector<8x1024xf32>
    %c10 = arith.constant 10 : index
    %c0_34 = arith.constant 0 : index
    %c0_35 = arith.constant 0 : index
    %54 = vector.load %arg2[%c10, %c0_34, %c0_35] : memref<27x8x8xbf16, #tpu.memory_space<vmem>>, vector<1x8x8xbf16>
    %55 = vector.shape_cast %54 : vector<1x8x8xbf16> to vector<8x8xbf16>
    %56 = vector.extract_strided_slice %2 {offsets = [0, 118], sizes = [8, 1024], strides = [1, 1]} : vector<8x1280xbf16> to vector<8x1024xbf16>
    %cst_36 = arith.constant dense<0.000000e+00> : vector<8x1024xf32>
    %57 = tpu.matmul %55, %56, %cst_36 {dimension_numbers = #tpu.dot_dimension_numbers<[1], [0], [0], [1], [0, 0, 1, 1], [], []>} : vector<8x8xbf16>, vector<8x1024xbf16>, vector<8x1024xf32> -> vector<8x1024xf32>
    %58 = arith.addf %53, %57 : vector<8x1024xf32>
    %c11 = arith.constant 11 : index
    %c0_37 = arith.constant 0 : index
    %c0_38 = arith.constant 0 : index
    %59 = vector.load %arg2[%c11, %c0_37, %c0_38] : memref<27x8x8xbf16, #tpu.memory_space<vmem>>, vector<1x8x8xbf16>
    %60 = vector.shape_cast %59 : vector<1x8x8xbf16> to vector<8x8xbf16>
    %61 = vector.extract_strided_slice %2 {offsets = [0, 119], sizes = [8, 1024], strides = [1, 1]} : vector<8x1280xbf16> to vector<8x1024xbf16>
    %cst_39 = arith.constant dense<0.000000e+00> : vector<8x1024xf32>
    %62 = tpu.matmul %60, %61, %cst_39 {dimension_numbers = #tpu.dot_dimension_numbers<[1], [0], [0], [1], [0, 0, 1, 1], [], []>} : vector<8x8xbf16>, vector<8x1024xbf16>, vector<8x1024xf32> -> vector<8x1024xf32>
    %63 = arith.addf %58, %62 : vector<8x1024xf32>
    %c12 = arith.constant 12 : index
    %c0_40 = arith.constant 0 : index
    %c0_41 = arith.constant 0 : index
    %64 = vector.load %arg2[%c12, %c0_40, %c0_41] : memref<27x8x8xbf16, #tpu.memory_space<vmem>>, vector<1x8x8xbf16>
    %65 = vector.shape_cast %64 : vector<1x8x8xbf16> to vector<8x8xbf16>
    %66 = vector.extract_strided_slice %2 {offsets = [0, 127], sizes = [8, 1024], strides = [1, 1]} : vector<8x1280xbf16> to vector<8x1024xbf16>
    %cst_42 = arith.constant dense<0.000000e+00> : vector<8x1024xf32>
    %67 = tpu.matmul %65, %66, %cst_42 {dimension_numbers = #tpu.dot_dimension_numbers<[1], [0], [0], [1], [0, 0, 1, 1], [], []>} : vector<8x8xbf16>, vector<8x1024xbf16>, vector<8x1024xf32> -> vector<8x1024xf32>
    %68 = arith.addf %63, %67 : vector<8x1024xf32>
    %c13 = arith.constant 13 : index
    %c0_43 = arith.constant 0 : index
    %c0_44 = arith.constant 0 : index
    %69 = vector.load %arg2[%c13, %c0_43, %c0_44] : memref<27x8x8xbf16, #tpu.memory_space<vmem>>, vector<1x8x8xbf16>
    %70 = vector.shape_cast %69 : vector<1x8x8xbf16> to vector<8x8xbf16>
    %71 = vector.extract_strided_slice %2 {offsets = [0, 128], sizes = [8, 1024], strides = [1, 1]} : vector<8x1280xbf16> to vector<8x1024xbf16>
    %cst_45 = arith.constant dense<0.000000e+00> : vector<8x1024xf32>
    %72 = tpu.matmul %70, %71, %cst_45 {dimension_numbers = #tpu.dot_dimension_numbers<[1], [0], [0], [1], [0, 0, 1, 1], [], []>} : vector<8x8xbf16>, vector<8x1024xbf16>, vector<8x1024xf32> -> vector<8x1024xf32>
    %73 = arith.addf %68, %72 : vector<8x1024xf32>
    %c14 = arith.constant 14 : index
    %c0_46 = arith.constant 0 : index
    %c0_47 = arith.constant 0 : index
    %74 = vector.load %arg2[%c14, %c0_46, %c0_47] : memref<27x8x8xbf16, #tpu.memory_space<vmem>>, vector<1x8x8xbf16>
    %75 = vector.shape_cast %74 : vector<1x8x8xbf16> to vector<8x8xbf16>
    %76 = vector.extract_strided_slice %2 {offsets = [0, 129], sizes = [8, 1024], strides = [1, 1]} : vector<8x1280xbf16> to vector<8x1024xbf16>
    %cst_48 = arith.constant dense<0.000000e+00> : vector<8x1024xf32>
    %77 = tpu.matmul %75, %76, %cst_48 {dimension_numbers = #tpu.dot_dimension_numbers<[1], [0], [0], [1], [0, 0, 1, 1], [], []>} : vector<8x8xbf16>, vector<8x1024xbf16>, vector<8x1024xf32> -> vector<8x1024xf32>
    %78 = arith.addf %73, %77 : vector<8x1024xf32>
    %c15 = arith.constant 15 : index
    %c0_49 = arith.constant 0 : index
    %c0_50 = arith.constant 0 : index
    %79 = vector.load %arg2[%c15, %c0_49, %c0_50] : memref<27x8x8xbf16, #tpu.memory_space<vmem>>, vector<1x8x8xbf16>
    %80 = vector.shape_cast %79 : vector<1x8x8xbf16> to vector<8x8xbf16>
    %81 = vector.extract_strided_slice %2 {offsets = [0, 137], sizes = [8, 1024], strides = [1, 1]} : vector<8x1280xbf16> to vector<8x1024xbf16>
    %cst_51 = arith.constant dense<0.000000e+00> : vector<8x1024xf32>
    %82 = tpu.matmul %80, %81, %cst_51 {dimension_numbers = #tpu.dot_dimension_numbers<[1], [0], [0], [1], [0, 0, 1, 1], [], []>} : vector<8x8xbf16>, vector<8x1024xbf16>, vector<8x1024xf32> -> vector<8x1024xf32>
    %83 = arith.addf %78, %82 : vector<8x1024xf32>
    %c16 = arith.constant 16 : index
    %c0_52 = arith.constant 0 : index
    %c0_53 = arith.constant 0 : index
    %84 = vector.load %arg2[%c16, %c0_52, %c0_53] : memref<27x8x8xbf16, #tpu.memory_space<vmem>>, vector<1x8x8xbf16>
    %85 = vector.shape_cast %84 : vector<1x8x8xbf16> to vector<8x8xbf16>
    %86 = vector.extract_strided_slice %2 {offsets = [0, 138], sizes = [8, 1024], strides = [1, 1]} : vector<8x1280xbf16> to vector<8x1024xbf16>
    %cst_54 = arith.constant dense<0.000000e+00> : vector<8x1024xf32>
    %87 = tpu.matmul %85, %86, %cst_54 {dimension_numbers = #tpu.dot_dimension_numbers<[1], [0], [0], [1], [0, 0, 1, 1], [], []>} : vector<8x8xbf16>, vector<8x1024xbf16>, vector<8x1024xf32> -> vector<8x1024xf32>
    %88 = arith.addf %83, %87 : vector<8x1024xf32>
    %c17 = arith.constant 17 : index
    %c0_55 = arith.constant 0 : index
    %c0_56 = arith.constant 0 : index
    %89 = vector.load %arg2[%c17, %c0_55, %c0_56] : memref<27x8x8xbf16, #tpu.memory_space<vmem>>, vector<1x8x8xbf16>
    %90 = vector.shape_cast %89 : vector<1x8x8xbf16> to vector<8x8xbf16>
    %91 = vector.extract_strided_slice %2 {offsets = [0, 139], sizes = [8, 1024], strides = [1, 1]} : vector<8x1280xbf16> to vector<8x1024xbf16>
    %cst_57 = arith.constant dense<0.000000e+00> : vector<8x1024xf32>
    %92 = tpu.matmul %90, %91, %cst_57 {dimension_numbers = #tpu.dot_dimension_numbers<[1], [0], [0], [1], [0, 0, 1, 1], [], []>} : vector<8x8xbf16>, vector<8x1024xbf16>, vector<8x1024xf32> -> vector<8x1024xf32>
    %93 = arith.addf %88, %92 : vector<8x1024xf32>
    %c18 = arith.constant 18 : index
    %c0_58 = arith.constant 0 : index
    %c0_59 = arith.constant 0 : index
    %94 = vector.load %arg2[%c18, %c0_58, %c0_59] : memref<27x8x8xbf16, #tpu.memory_space<vmem>>, vector<1x8x8xbf16>
    %95 = vector.shape_cast %94 : vector<1x8x8xbf16> to vector<8x8xbf16>
    %96 = vector.extract_strided_slice %2 {offsets = [0, 217], sizes = [8, 1024], strides = [1, 1]} : vector<8x1280xbf16> to vector<8x1024xbf16>
    %cst_60 = arith.constant dense<0.000000e+00> : vector<8x1024xf32>
    %97 = tpu.matmul %95, %96, %cst_60 {dimension_numbers = #tpu.dot_dimension_numbers<[1], [0], [0], [1], [0, 0, 1, 1], [], []>} : vector<8x8xbf16>, vector<8x1024xbf16>, vector<8x1024xf32> -> vector<8x1024xf32>
    %98 = arith.addf %93, %97 : vector<8x1024xf32>
    %c19 = arith.constant 19 : index
    %c0_61 = arith.constant 0 : index
    %c0_62 = arith.constant 0 : index
    %99 = vector.load %arg2[%c19, %c0_61, %c0_62] : memref<27x8x8xbf16, #tpu.memory_space<vmem>>, vector<1x8x8xbf16>
    %100 = vector.shape_cast %99 : vector<1x8x8xbf16> to vector<8x8xbf16>
    %101 = vector.extract_strided_slice %2 {offsets = [0, 218], sizes = [8, 1024], strides = [1, 1]} : vector<8x1280xbf16> to vector<8x1024xbf16>
    %cst_63 = arith.constant dense<0.000000e+00> : vector<8x1024xf32>
    %102 = tpu.matmul %100, %101, %cst_63 {dimension_numbers = #tpu.dot_dimension_numbers<[1], [0], [0], [1], [0, 0, 1, 1], [], []>} : vector<8x8xbf16>, vector<8x1024xbf16>, vector<8x1024xf32> -> vector<8x1024xf32>
    %103 = arith.addf %98, %102 : vector<8x1024xf32>
    %c20 = arith.constant 20 : index
    %c0_64 = arith.constant 0 : index
    %c0_65 = arith.constant 0 : index
    %104 = vector.load %arg2[%c20, %c0_64, %c0_65] : memref<27x8x8xbf16, #tpu.memory_space<vmem>>, vector<1x8x8xbf16>
    %105 = vector.shape_cast %104 : vector<1x8x8xbf16> to vector<8x8xbf16>
    %106 = vector.extract_strided_slice %2 {offsets = [0, 219], sizes = [8, 1024], strides = [1, 1]} : vector<8x1280xbf16> to vector<8x1024xbf16>
    %cst_66 = arith.constant dense<0.000000e+00> : vector<8x1024xf32>
    %107 = tpu.matmul %105, %106, %cst_66 {dimension_numbers = #tpu.dot_dimension_numbers<[1], [0], [0], [1], [0, 0, 1, 1], [], []>} : vector<8x8xbf16>, vector<8x1024xbf16>, vector<8x1024xf32> -> vector<8x1024xf32>
    %108 = arith.addf %103, %107 : vector<8x1024xf32>
    %c21 = arith.constant 21 : index
    %c0_67 = arith.constant 0 : index
    %c0_68 = arith.constant 0 : index
    %109 = vector.load %arg2[%c21, %c0_67, %c0_68] : memref<27x8x8xbf16, #tpu.memory_space<vmem>>, vector<1x8x8xbf16>
    %110 = vector.shape_cast %109 : vector<1x8x8xbf16> to vector<8x8xbf16>
    %111 = vector.extract_strided_slice %2 {offsets = [0, 227], sizes = [8, 1024], strides = [1, 1]} : vector<8x1280xbf16> to vector<8x1024xbf16>
    %cst_69 = arith.constant dense<0.000000e+00> : vector<8x1024xf32>
    %112 = tpu.matmul %110, %111, %cst_69 {dimension_numbers = #tpu.dot_dimension_numbers<[1], [0], [0], [1], [0, 0, 1, 1], [], []>} : vector<8x8xbf16>, vector<8x1024xbf16>, vector<8x1024xf32> -> vector<8x1024xf32>
    %113 = arith.addf %108, %112 : vector<8x1024xf32>
    %c22 = arith.constant 22 : index
    %c0_70 = arith.constant 0 : index
    %c0_71 = arith.constant 0 : index
    %114 = vector.load %arg2[%c22, %c0_70, %c0_71] : memref<27x8x8xbf16, #tpu.memory_space<vmem>>, vector<1x8x8xbf16>
    %115 = vector.shape_cast %114 : vector<1x8x8xbf16> to vector<8x8xbf16>
    %116 = vector.extract_strided_slice %2 {offsets = [0, 228], sizes = [8, 1024], strides = [1, 1]} : vector<8x1280xbf16> to vector<8x1024xbf16>
    %cst_72 = arith.constant dense<0.000000e+00> : vector<8x1024xf32>
    %117 = tpu.matmul %115, %116, %cst_72 {dimension_numbers = #tpu.dot_dimension_numbers<[1], [0], [0], [1], [0, 0, 1, 1], [], []>} : vector<8x8xbf16>, vector<8x1024xbf16>, vector<8x1024xf32> -> vector<8x1024xf32>
    %118 = arith.addf %113, %117 : vector<8x1024xf32>
    %c23 = arith.constant 23 : index
    %c0_73 = arith.constant 0 : index
    %c0_74 = arith.constant 0 : index
    %119 = vector.load %arg2[%c23, %c0_73, %c0_74] : memref<27x8x8xbf16, #tpu.memory_space<vmem>>, vector<1x8x8xbf16>
    %120 = vector.shape_cast %119 : vector<1x8x8xbf16> to vector<8x8xbf16>
    %121 = vector.extract_strided_slice %2 {offsets = [0, 229], sizes = [8, 1024], strides = [1, 1]} : vector<8x1280xbf16> to vector<8x1024xbf16>
    %cst_75 = arith.constant dense<0.000000e+00> : vector<8x1024xf32>
    %122 = tpu.matmul %120, %121, %cst_75 {dimension_numbers = #tpu.dot_dimension_numbers<[1], [0], [0], [1], [0, 0, 1, 1], [], []>} : vector<8x8xbf16>, vector<8x1024xbf16>, vector<8x1024xf32> -> vector<8x1024xf32>
    %123 = arith.addf %118, %122 : vector<8x1024xf32>
    %c24 = arith.constant 24 : index
    %c0_76 = arith.constant 0 : index
    %c0_77 = arith.constant 0 : index
    %124 = vector.load %arg2[%c24, %c0_76, %c0_77] : memref<27x8x8xbf16, #tpu.memory_space<vmem>>, vector<1x8x8xbf16>
    %125 = vector.shape_cast %124 : vector<1x8x8xbf16> to vector<8x8xbf16>
    %126 = vector.extract_strided_slice %2 {offsets = [0, 237], sizes = [8, 1024], strides = [1, 1]} : vector<8x1280xbf16> to vector<8x1024xbf16>
    %cst_78 = arith.constant dense<0.000000e+00> : vector<8x1024xf32>
    %127 = tpu.matmul %125, %126, %cst_78 {dimension_numbers = #tpu.dot_dimension_numbers<[1], [0], [0], [1], [0, 0, 1, 1], [], []>} : vector<8x8xbf16>, vector<8x1024xbf16>, vector<8x1024xf32> -> vector<8x1024xf32>
    %128 = arith.addf %123, %127 : vector<8x1024xf32>
    %c25 = arith.constant 25 : index
    %c0_79 = arith.constant 0 : index
    %c0_80 = arith.constant 0 : index
    %129 = vector.load %arg2[%c25, %c0_79, %c0_80] : memref<27x8x8xbf16, #tpu.memory_space<vmem>>, vector<1x8x8xbf16>
    %130 = vector.shape_cast %129 : vector<1x8x8xbf16> to vector<8x8xbf16>
    %131 = vector.extract_strided_slice %2 {offsets = [0, 238], sizes = [8, 1024], strides = [1, 1]} : vector<8x1280xbf16> to vector<8x1024xbf16>
    %cst_81 = arith.constant dense<0.000000e+00> : vector<8x1024xf32>
    %132 = tpu.matmul %130, %131, %cst_81 {dimension_numbers = #tpu.dot_dimension_numbers<[1], [0], [0], [1], [0, 0, 1, 1], [], []>} : vector<8x8xbf16>, vector<8x1024xbf16>, vector<8x1024xf32> -> vector<8x1024xf32>
    %133 = arith.addf %128, %132 : vector<8x1024xf32>
    %c26 = arith.constant 26 : index
    %c0_82 = arith.constant 0 : index
    %c0_83 = arith.constant 0 : index
    %134 = vector.load %arg2[%c26, %c0_82, %c0_83] : memref<27x8x8xbf16, #tpu.memory_space<vmem>>, vector<1x8x8xbf16>
    %135 = vector.shape_cast %134 : vector<1x8x8xbf16> to vector<8x8xbf16>
    %136 = vector.extract_strided_slice %2 {offsets = [0, 239], sizes = [8, 1024], strides = [1, 1]} : vector<8x1280xbf16> to vector<8x1024xbf16>
    %cst_84 = arith.constant dense<0.000000e+00> : vector<8x1024xf32>
    %137 = tpu.matmul %135, %136, %cst_84 {dimension_numbers = #tpu.dot_dimension_numbers<[1], [0], [0], [1], [0, 0, 1, 1], [], []>} : vector<8x8xbf16>, vector<8x1024xbf16>, vector<8x1024xf32> -> vector<8x1024xf32>
    %138 = arith.addf %133, %137 : vector<8x1024xf32>
    %c0_85 = arith.constant 0 : index
    %c0_86 = arith.constant 0 : index
    %139 = vector.load %arg3[%c0_85, %c0_86] : memref<8x1xf32, #tpu.memory_space<vmem>>, vector<8x1xf32>
    %140 = vector.broadcast %139 : vector<8x1xf32> to vector<8x1024xf32>
    %141 = arith.addf %138, %140 : vector<8x1024xf32>
    %cst_87 = arith.constant 0.000000e+00 : f32
    %142 = vector.broadcast %cst_87 : f32 to vector<8x1024xf32>
    %143 = arith.cmpf ogt, %141, %142 : vector<8x1024xf32>
    %144 = vector.broadcast %0 : f32 to vector<8x1024xf32>
    %145 = arith.mulf %144, %141 : vector<8x1024xf32>
    %146 = arith.select %143, %141, %145 : vector<8x1024xi1>, vector<8x1024xf32>
    %c0_88 = arith.constant 0 : index
    %c0_89 = arith.constant 0 : index
    %147 = vector.load %arg6[%c0_88, %c0_89] : memref<1x1024xf32, #tpu.memory_space<vmem>>, vector<1x1024xf32>
    %148 = vector.broadcast %147 : vector<1x1024xf32> to vector<8x1024xf32>
    %149 = arith.mulf %146, %148 : vector<8x1024xf32>
    %cst_90 = arith.constant 0.000000e+00 : bf16
    %150 = vector.broadcast %cst_90 : bf16 to vector<8x128xbf16>
    %c0_91 = arith.constant 0 : index
    %c0_92 = arith.constant 0 : index
    %151 = vector.load %arg9[%c0_91, %c0_92] : memref<8x1280xbf16, #tpu.memory_space<vmem>>, vector<8x128xbf16>
    tpu.vector_store %arg9[%c0_91, %c0_92], %150 {strides = array<i32>} : memref<8x1280xbf16, #tpu.memory_space<vmem>>, vector<8x128xbf16>,
    %152 = arith.truncf %149 : vector<8x1024xf32> to vector<8x1024xbf16>
    %c0_93 = arith.constant 0 : index
    %c128 = arith.constant 128 : index
    %153 = vector.load %arg9[%c0_93, %c128] : memref<8x1280xbf16, #tpu.memory_space<vmem>>, vector<8x1024xbf16>
    tpu.vector_store %arg9[%c0_93, %c128], %152 {strides = array<i32>} : memref<8x1280xbf16, #tpu.memory_space<vmem>>, vector<8x1024xbf16>,
    %cst_94 = arith.constant 0.000000e+00 : bf16
    %154 = vector.broadcast %cst_94 : bf16 to vector<8x128xbf16>
    %c0_95 = arith.constant 0 : index
    %c1152 = arith.constant 1152 : index
    %155 = vector.load %arg9[%c0_95, %c1152] : memref<8x1280xbf16, #tpu.memory_space<vmem>>, vector<8x128xbf16>
    tpu.vector_store %arg9[%c0_95, %c1152], %154 {strides = array<i32>} : memref<8x1280xbf16, #tpu.memory_space<vmem>>, vector<8x128xbf16>,
    %c0_96 = arith.constant 0 : index
    %c0_97 = arith.constant 0 : index
    %156 = vector.load %arg9[%c0_96, %c0_97] : memref<8x1280xbf16, #tpu.memory_space<vmem>>, vector<8x1280xbf16>
    %cst_98 = arith.constant 0.000000e+00 : f32
    %157 = vector.broadcast %cst_98 : f32 to vector<8x1024xf32>
    %c0_99 = arith.constant 0 : index
    %c0_100 = arith.constant 0 : index
    %c0_101 = arith.constant 0 : index
    %158 = vector.load %arg4[%c0_99, %c0_100, %c0_101] : memref<27x8x8xbf16, #tpu.memory_space<vmem>>, vector<1x8x8xbf16>
    %159 = vector.shape_cast %158 : vector<1x8x8xbf16> to vector<8x8xbf16>
    %160 = vector.extract_strided_slice %156 {offsets = [0, 17], sizes = [8, 1024], strides = [1, 1]} : vector<8x1280xbf16> to vector<8x1024xbf16>
    %cst_102 = arith.constant dense<0.000000e+00> : vector<8x1024xf32>
    %161 = tpu.matmul %159, %160, %cst_102 {dimension_numbers = #tpu.dot_dimension_numbers<[1], [0], [0], [1], [0, 0, 1, 1], [], []>} : vector<8x8xbf16>, vector<8x1024xbf16>, vector<8x1024xf32> -> vector<8x1024xf32>
    %162 = arith.addf %157, %161 : vector<8x1024xf32>
    %c1_103 = arith.constant 1 : index
    %c0_104 = arith.constant 0 : index
    %c0_105 = arith.constant 0 : index
    %163 = vector.load %arg4[%c1_103, %c0_104, %c0_105] : memref<27x8x8xbf16, #tpu.memory_space<vmem>>, vector<1x8x8xbf16>
    %164 = vector.shape_cast %163 : vector<1x8x8xbf16> to vector<8x8xbf16>
    %165 = vector.extract_strided_slice %156 {offsets = [0, 18], sizes = [8, 1024], strides = [1, 1]} : vector<8x1280xbf16> to vector<8x1024xbf16>
    %cst_106 = arith.constant dense<0.000000e+00> : vector<8x1024xf32>
    %166 = tpu.matmul %164, %165, %cst_106 {dimension_numbers = #tpu.dot_dimension_numbers<[1], [0], [0], [1], [0, 0, 1, 1], [], []>} : vector<8x8xbf16>, vector<8x1024xbf16>, vector<8x1024xf32> -> vector<8x1024xf32>
    %167 = arith.addf %162, %166 : vector<8x1024xf32>
    %c2_107 = arith.constant 2 : index
    %c0_108 = arith.constant 0 : index
    %c0_109 = arith.constant 0 : index
    %168 = vector.load %arg4[%c2_107, %c0_108, %c0_109] : memref<27x8x8xbf16, #tpu.memory_space<vmem>>, vector<1x8x8xbf16>
    %169 = vector.shape_cast %168 : vector<1x8x8xbf16> to vector<8x8xbf16>
    %170 = vector.extract_strided_slice %156 {offsets = [0, 19], sizes = [8, 1024], strides = [1, 1]} : vector<8x1280xbf16> to vector<8x1024xbf16>
    %cst_110 = arith.constant dense<0.000000e+00> : vector<8x1024xf32>
    %171 = tpu.matmul %169, %170, %cst_110 {dimension_numbers = #tpu.dot_dimension_numbers<[1], [0], [0], [1], [0, 0, 1, 1], [], []>} : vector<8x8xbf16>, vector<8x1024xbf16>, vector<8x1024xf32> -> vector<8x1024xf32>
    %172 = arith.addf %167, %171 : vector<8x1024xf32>
    %c3_111 = arith.constant 3 : index
    %c0_112 = arith.constant 0 : index
    %c0_113 = arith.constant 0 : index
    %173 = vector.load %arg4[%c3_111, %c0_112, %c0_113] : memref<27x8x8xbf16, #tpu.memory_space<vmem>>, vector<1x8x8xbf16>
    %174 = vector.shape_cast %173 : vector<1x8x8xbf16> to vector<8x8xbf16>
    %175 = vector.extract_strided_slice %156 {offsets = [0, 27], sizes = [8, 1024], strides = [1, 1]} : vector<8x1280xbf16> to vector<8x1024xbf16>
    %cst_114 = arith.constant dense<0.000000e+00> : vector<8x1024xf32>
    %176 = tpu.matmul %174, %175, %cst_114 {dimension_numbers = #tpu.dot_dimension_numbers<[1], [0], [0], [1], [0, 0, 1, 1], [], []>} : vector<8x8xbf16>, vector<8x1024xbf16>, vector<8x1024xf32> -> vector<8x1024xf32>
    %177 = arith.addf %172, %176 : vector<8x1024xf32>
    %c4_115 = arith.constant 4 : index
    %c0_116 = arith.constant 0 : index
    %c0_117 = arith.constant 0 : index
    %178 = vector.load %arg4[%c4_115, %c0_116, %c0_117] : memref<27x8x8xbf16, #tpu.memory_space<vmem>>, vector<1x8x8xbf16>
    %179 = vector.shape_cast %178 : vector<1x8x8xbf16> to vector<8x8xbf16>
    %180 = vector.extract_strided_slice %156 {offsets = [0, 28], sizes = [8, 1024], strides = [1, 1]} : vector<8x1280xbf16> to vector<8x1024xbf16>
    %cst_118 = arith.constant dense<0.000000e+00> : vector<8x1024xf32>
    %181 = tpu.matmul %179, %180, %cst_118 {dimension_numbers = #tpu.dot_dimension_numbers<[1], [0], [0], [1], [0, 0, 1, 1], [], []>} : vector<8x8xbf16>, vector<8x1024xbf16>, vector<8x1024xf32> -> vector<8x1024xf32>
    %182 = arith.addf %177, %181 : vector<8x1024xf32>
    %c5_119 = arith.constant 5 : index
    %c0_120 = arith.constant 0 : index
    %c0_121 = arith.constant 0 : index
    %183 = vector.load %arg4[%c5_119, %c0_120, %c0_121] : memref<27x8x8xbf16, #tpu.memory_space<vmem>>, vector<1x8x8xbf16>
    %184 = vector.shape_cast %183 : vector<1x8x8xbf16> to vector<8x8xbf16>
    %185 = vector.extract_strided_slice %156 {offsets = [0, 29], sizes = [8, 1024], strides = [1, 1]} : vector<8x1280xbf16> to vector<8x1024xbf16>
    %cst_122 = arith.constant dense<0.000000e+00> : vector<8x1024xf32>
    %186 = tpu.matmul %184, %185, %cst_122 {dimension_numbers = #tpu.dot_dimension_numbers<[1], [0], [0], [1], [0, 0, 1, 1], [], []>} : vector<8x8xbf16>, vector<8x1024xbf16>, vector<8x1024xf32> -> vector<8x1024xf32>
    %187 = arith.addf %182, %186 : vector<8x1024xf32>
    %c6_123 = arith.constant 6 : index
    %c0_124 = arith.constant 0 : index
    %c0_125 = arith.constant 0 : index
    %188 = vector.load %arg4[%c6_123, %c0_124, %c0_125] : memref<27x8x8xbf16, #tpu.memory_space<vmem>>, vector<1x8x8xbf16>
    %189 = vector.shape_cast %188 : vector<1x8x8xbf16> to vector<8x8xbf16>
    %190 = vector.extract_strided_slice %156 {offsets = [0, 37], sizes = [8, 1024], strides = [1, 1]} : vector<8x1280xbf16> to vector<8x1024xbf16>
    %cst_126 = arith.constant dense<0.000000e+00> : vector<8x1024xf32>
    %191 = tpu.matmul %189, %190, %cst_126 {dimension_numbers = #tpu.dot_dimension_numbers<[1], [0], [0], [1], [0, 0, 1, 1], [], []>} : vector<8x8xbf16>, vector<8x1024xbf16>, vector<8x1024xf32> -> vector<8x1024xf32>
    %192 = arith.addf %187, %191 : vector<8x1024xf32>
    %c7_127 = arith.constant 7 : index
    %c0_128 = arith.constant 0 : index
    %c0_129 = arith.constant 0 : index
    %193 = vector.load %arg4[%c7_127, %c0_128, %c0_129] : memref<27x8x8xbf16, #tpu.memory_space<vmem>>, vector<1x8x8xbf16>
    %194 = vector.shape_cast %193 : vector<1x8x8xbf16> to vector<8x8xbf16>
    %195 = vector.extract_strided_slice %156 {offsets = [0, 38], sizes = [8, 1024], strides = [1, 1]} : vector<8x1280xbf16> to vector<8x1024xbf16>
    %cst_130 = arith.constant dense<0.000000e+00> : vector<8x1024xf32>
    %196 = tpu.matmul %194, %195, %cst_130 {dimension_numbers = #tpu.dot_dimension_numbers<[1], [0], [0], [1], [0, 0, 1, 1], [], []>} : vector<8x8xbf16>, vector<8x1024xbf16>, vector<8x1024xf32> -> vector<8x1024xf32>
    %197 = arith.addf %192, %196 : vector<8x1024xf32>
    %c8_131 = arith.constant 8 : index
    %c0_132 = arith.constant 0 : index
    %c0_133 = arith.constant 0 : index
    %198 = vector.load %arg4[%c8_131, %c0_132, %c0_133] : memref<27x8x8xbf16, #tpu.memory_space<vmem>>, vector<1x8x8xbf16>
    %199 = vector.shape_cast %198 : vector<1x8x8xbf16> to vector<8x8xbf16>
    %200 = vector.extract_strided_slice %156 {offsets = [0, 39], sizes = [8, 1024], strides = [1, 1]} : vector<8x1280xbf16> to vector<8x1024xbf16>
    %cst_134 = arith.constant dense<0.000000e+00> : vector<8x1024xf32>
    %201 = tpu.matmul %199, %200, %cst_134 {dimension_numbers = #tpu.dot_dimension_numbers<[1], [0], [0], [1], [0, 0, 1, 1], [], []>} : vector<8x8xbf16>, vector<8x1024xbf16>, vector<8x1024xf32> -> vector<8x1024xf32>
    %202 = arith.addf %197, %201 : vector<8x1024xf32>
    %c9_135 = arith.constant 9 : index
    %c0_136 = arith.constant 0 : index
    %c0_137 = arith.constant 0 : index
    %203 = vector.load %arg4[%c9_135, %c0_136, %c0_137] : memref<27x8x8xbf16, #tpu.memory_space<vmem>>, vector<1x8x8xbf16>
    %204 = vector.shape_cast %203 : vector<1x8x8xbf16> to vector<8x8xbf16>
    %205 = vector.extract_strided_slice %156 {offsets = [0, 117], sizes = [8, 1024], strides = [1, 1]} : vector<8x1280xbf16> to vector<8x1024xbf16>
    %cst_138 = arith.constant dense<0.000000e+00> : vector<8x1024xf32>
    %206 = tpu.matmul %204, %205, %cst_138 {dimension_numbers = #tpu.dot_dimension_numbers<[1], [0], [0], [1], [0, 0, 1, 1], [], []>} : vector<8x8xbf16>, vector<8x1024xbf16>, vector<8x1024xf32> -> vector<8x1024xf32>
    %207 = arith.addf %202, %206 : vector<8x1024xf32>
    %c10_139 = arith.constant 10 : index
    %c0_140 = arith.constant 0 : index
    %c0_141 = arith.constant 0 : index
    %208 = vector.load %arg4[%c10_139, %c0_140, %c0_141] : memref<27x8x8xbf16, #tpu.memory_space<vmem>>, vector<1x8x8xbf16>
    %209 = vector.shape_cast %208 : vector<1x8x8xbf16> to vector<8x8xbf16>
    %210 = vector.extract_strided_slice %156 {offsets = [0, 118], sizes = [8, 1024], strides = [1, 1]} : vector<8x1280xbf16> to vector<8x1024xbf16>
    %cst_142 = arith.constant dense<0.000000e+00> : vector<8x1024xf32>
    %211 = tpu.matmul %209, %210, %cst_142 {dimension_numbers = #tpu.dot_dimension_numbers<[1], [0], [0], [1], [0, 0, 1, 1], [], []>} : vector<8x8xbf16>, vector<8x1024xbf16>, vector<8x1024xf32> -> vector<8x1024xf32>
    %212 = arith.addf %207, %211 : vector<8x1024xf32>
    %c11_143 = arith.constant 11 : index
    %c0_144 = arith.constant 0 : index
    %c0_145 = arith.constant 0 : index
    %213 = vector.load %arg4[%c11_143, %c0_144, %c0_145] : memref<27x8x8xbf16, #tpu.memory_space<vmem>>, vector<1x8x8xbf16>
    %214 = vector.shape_cast %213 : vector<1x8x8xbf16> to vector<8x8xbf16>
    %215 = vector.extract_strided_slice %156 {offsets = [0, 119], sizes = [8, 1024], strides = [1, 1]} : vector<8x1280xbf16> to vector<8x1024xbf16>
    %cst_146 = arith.constant dense<0.000000e+00> : vector<8x1024xf32>
    %216 = tpu.matmul %214, %215, %cst_146 {dimension_numbers = #tpu.dot_dimension_numbers<[1], [0], [0], [1], [0, 0, 1, 1], [], []>} : vector<8x8xbf16>, vector<8x1024xbf16>, vector<8x1024xf32> -> vector<8x1024xf32>
    %217 = arith.addf %212, %216 : vector<8x1024xf32>
    %c12_147 = arith.constant 12 : index
    %c0_148 = arith.constant 0 : index
    %c0_149 = arith.constant 0 : index
    %218 = vector.load %arg4[%c12_147, %c0_148, %c0_149] : memref<27x8x8xbf16, #tpu.memory_space<vmem>>, vector<1x8x8xbf16>
    %219 = vector.shape_cast %218 : vector<1x8x8xbf16> to vector<8x8xbf16>
    %220 = vector.extract_strided_slice %156 {offsets = [0, 127], sizes = [8, 1024], strides = [1, 1]} : vector<8x1280xbf16> to vector<8x1024xbf16>
    %cst_150 = arith.constant dense<0.000000e+00> : vector<8x1024xf32>
    %221 = tpu.matmul %219, %220, %cst_150 {dimension_numbers = #tpu.dot_dimension_numbers<[1], [0], [0], [1], [0, 0, 1, 1], [], []>} : vector<8x8xbf16>, vector<8x1024xbf16>, vector<8x1024xf32> -> vector<8x1024xf32>
    %222 = arith.addf %217, %221 : vector<8x1024xf32>
    %c13_151 = arith.constant 13 : index
    %c0_152 = arith.constant 0 : index
    %c0_153 = arith.constant 0 : index
    %223 = vector.load %arg4[%c13_151, %c0_152, %c0_153] : memref<27x8x8xbf16, #tpu.memory_space<vmem>>, vector<1x8x8xbf16>
    %224 = vector.shape_cast %223 : vector<1x8x8xbf16> to vector<8x8xbf16>
    %225 = vector.extract_strided_slice %156 {offsets = [0, 128], sizes = [8, 1024], strides = [1, 1]} : vector<8x1280xbf16> to vector<8x1024xbf16>
    %cst_154 = arith.constant dense<0.000000e+00> : vector<8x1024xf32>
    %226 = tpu.matmul %224, %225, %cst_154 {dimension_numbers = #tpu.dot_dimension_numbers<[1], [0], [0], [1], [0, 0, 1, 1], [], []>} : vector<8x8xbf16>, vector<8x1024xbf16>, vector<8x1024xf32> -> vector<8x1024xf32>
    %227 = arith.addf %222, %226 : vector<8x1024xf32>
    %c14_155 = arith.constant 14 : index
    %c0_156 = arith.constant 0 : index
    %c0_157 = arith.constant 0 : index
    %228 = vector.load %arg4[%c14_155, %c0_156, %c0_157] : memref<27x8x8xbf16, #tpu.memory_space<vmem>>, vector<1x8x8xbf16>
    %229 = vector.shape_cast %228 : vector<1x8x8xbf16> to vector<8x8xbf16>
    %230 = vector.extract_strided_slice %156 {offsets = [0, 129], sizes = [8, 1024], strides = [1, 1]} : vector<8x1280xbf16> to vector<8x1024xbf16>
    %cst_158 = arith.constant dense<0.000000e+00> : vector<8x1024xf32>
    %231 = tpu.matmul %229, %230, %cst_158 {dimension_numbers = #tpu.dot_dimension_numbers<[1], [0], [0], [1], [0, 0, 1, 1], [], []>} : vector<8x8xbf16>, vector<8x1024xbf16>, vector<8x1024xf32> -> vector<8x1024xf32>
    %232 = arith.addf %227, %231 : vector<8x1024xf32>
    %c15_159 = arith.constant 15 : index
    %c0_160 = arith.constant 0 : index
    %c0_161 = arith.constant 0 : index
    %233 = vector.load %arg4[%c15_159, %c0_160, %c0_161] : memref<27x8x8xbf16, #tpu.memory_space<vmem>>, vector<1x8x8xbf16>
    %234 = vector.shape_cast %233 : vector<1x8x8xbf16> to vector<8x8xbf16>
    %235 = vector.extract_strided_slice %156 {offsets = [0, 137], sizes = [8, 1024], strides = [1, 1]} : vector<8x1280xbf16> to vector<8x1024xbf16>
    %cst_162 = arith.constant dense<0.000000e+00> : vector<8x1024xf32>
    %236 = tpu.matmul %234, %235, %cst_162 {dimension_numbers = #tpu.dot_dimension_numbers<[1], [0], [0], [1], [0, 0, 1, 1], [], []>} : vector<8x8xbf16>, vector<8x1024xbf16>, vector<8x1024xf32> -> vector<8x1024xf32>
    %237 = arith.addf %232, %236 : vector<8x1024xf32>
    %c16_163 = arith.constant 16 : index
    %c0_164 = arith.constant 0 : index
    %c0_165 = arith.constant 0 : index
    %238 = vector.load %arg4[%c16_163, %c0_164, %c0_165] : memref<27x8x8xbf16, #tpu.memory_space<vmem>>, vector<1x8x8xbf16>
    %239 = vector.shape_cast %238 : vector<1x8x8xbf16> to vector<8x8xbf16>
    %240 = vector.extract_strided_slice %156 {offsets = [0, 138], sizes = [8, 1024], strides = [1, 1]} : vector<8x1280xbf16> to vector<8x1024xbf16>
    %cst_166 = arith.constant dense<0.000000e+00> : vector<8x1024xf32>
    %241 = tpu.matmul %239, %240, %cst_166 {dimension_numbers = #tpu.dot_dimension_numbers<[1], [0], [0], [1], [0, 0, 1, 1], [], []>} : vector<8x8xbf16>, vector<8x1024xbf16>, vector<8x1024xf32> -> vector<8x1024xf32>
    %242 = arith.addf %237, %241 : vector<8x1024xf32>
    %c17_167 = arith.constant 17 : index
    %c0_168 = arith.constant 0 : index
    %c0_169 = arith.constant 0 : index
    %243 = vector.load %arg4[%c17_167, %c0_168, %c0_169] : memref<27x8x8xbf16, #tpu.memory_space<vmem>>, vector<1x8x8xbf16>
    %244 = vector.shape_cast %243 : vector<1x8x8xbf16> to vector<8x8xbf16>
    %245 = vector.extract_strided_slice %156 {offsets = [0, 139], sizes = [8, 1024], strides = [1, 1]} : vector<8x1280xbf16> to vector<8x1024xbf16>
    %cst_170 = arith.constant dense<0.000000e+00> : vector<8x1024xf32>
    %246 = tpu.matmul %244, %245, %cst_170 {dimension_numbers = #tpu.dot_dimension_numbers<[1], [0], [0], [1], [0, 0, 1, 1], [], []>} : vector<8x8xbf16>, vector<8x1024xbf16>, vector<8x1024xf32> -> vector<8x1024xf32>
    %247 = arith.addf %242, %246 : vector<8x1024xf32>
    %c18_171 = arith.constant 18 : index
    %c0_172 = arith.constant 0 : index
    %c0_173 = arith.constant 0 : index
    %248 = vector.load %arg4[%c18_171, %c0_172, %c0_173] : memref<27x8x8xbf16, #tpu.memory_space<vmem>>, vector<1x8x8xbf16>
    %249 = vector.shape_cast %248 : vector<1x8x8xbf16> to vector<8x8xbf16>
    %250 = vector.extract_strided_slice %156 {offsets = [0, 217], sizes = [8, 1024], strides = [1, 1]} : vector<8x1280xbf16> to vector<8x1024xbf16>
    %cst_174 = arith.constant dense<0.000000e+00> : vector<8x1024xf32>
    %251 = tpu.matmul %249, %250, %cst_174 {dimension_numbers = #tpu.dot_dimension_numbers<[1], [0], [0], [1], [0, 0, 1, 1], [], []>} : vector<8x8xbf16>, vector<8x1024xbf16>, vector<8x1024xf32> -> vector<8x1024xf32>
    %252 = arith.addf %247, %251 : vector<8x1024xf32>
    %c19_175 = arith.constant 19 : index
    %c0_176 = arith.constant 0 : index
    %c0_177 = arith.constant 0 : index
    %253 = vector.load %arg4[%c19_175, %c0_176, %c0_177] : memref<27x8x8xbf16, #tpu.memory_space<vmem>>, vector<1x8x8xbf16>
    %254 = vector.shape_cast %253 : vector<1x8x8xbf16> to vector<8x8xbf16>
    %255 = vector.extract_strided_slice %156 {offsets = [0, 218], sizes = [8, 1024], strides = [1, 1]} : vector<8x1280xbf16> to vector<8x1024xbf16>
    %cst_178 = arith.constant dense<0.000000e+00> : vector<8x1024xf32>
    %256 = tpu.matmul %254, %255, %cst_178 {dimension_numbers = #tpu.dot_dimension_numbers<[1], [0], [0], [1], [0, 0, 1, 1], [], []>} : vector<8x8xbf16>, vector<8x1024xbf16>, vector<8x1024xf32> -> vector<8x1024xf32>
    %257 = arith.addf %252, %256 : vector<8x1024xf32>
    %c20_179 = arith.constant 20 : index
    %c0_180 = arith.constant 0 : index
    %c0_181 = arith.constant 0 : index
    %258 = vector.load %arg4[%c20_179, %c0_180, %c0_181] : memref<27x8x8xbf16, #tpu.memory_space<vmem>>, vector<1x8x8xbf16>
    %259 = vector.shape_cast %258 : vector<1x8x8xbf16> to vector<8x8xbf16>
    %260 = vector.extract_strided_slice %156 {offsets = [0, 219], sizes = [8, 1024], strides = [1, 1]} : vector<8x1280xbf16> to vector<8x1024xbf16>
    %cst_182 = arith.constant dense<0.000000e+00> : vector<8x1024xf32>
    %261 = tpu.matmul %259, %260, %cst_182 {dimension_numbers = #tpu.dot_dimension_numbers<[1], [0], [0], [1], [0, 0, 1, 1], [], []>} : vector<8x8xbf16>, vector<8x1024xbf16>, vector<8x1024xf32> -> vector<8x1024xf32>
    %262 = arith.addf %257, %261 : vector<8x1024xf32>
    %c21_183 = arith.constant 21 : index
    %c0_184 = arith.constant 0 : index
    %c0_185 = arith.constant 0 : index
    %263 = vector.load %arg4[%c21_183, %c0_184, %c0_185] : memref<27x8x8xbf16, #tpu.memory_space<vmem>>, vector<1x8x8xbf16>
    %264 = vector.shape_cast %263 : vector<1x8x8xbf16> to vector<8x8xbf16>
    %265 = vector.extract_strided_slice %156 {offsets = [0, 227], sizes = [8, 1024], strides = [1, 1]} : vector<8x1280xbf16> to vector<8x1024xbf16>
    %cst_186 = arith.constant dense<0.000000e+00> : vector<8x1024xf32>
    %266 = tpu.matmul %264, %265, %cst_186 {dimension_numbers = #tpu.dot_dimension_numbers<[1], [0], [0], [1], [0, 0, 1, 1], [], []>} : vector<8x8xbf16>, vector<8x1024xbf16>, vector<8x1024xf32> -> vector<8x1024xf32>
    %267 = arith.addf %262, %266 : vector<8x1024xf32>
    %c22_187 = arith.constant 22 : index
    %c0_188 = arith.constant 0 : index
    %c0_189 = arith.constant 0 : index
    %268 = vector.load %arg4[%c22_187, %c0_188, %c0_189] : memref<27x8x8xbf16, #tpu.memory_space<vmem>>, vector<1x8x8xbf16>
    %269 = vector.shape_cast %268 : vector<1x8x8xbf16> to vector<8x8xbf16>
    %270 = vector.extract_strided_slice %156 {offsets = [0, 228], sizes = [8, 1024], strides = [1, 1]} : vector<8x1280xbf16> to vector<8x1024xbf16>
    %cst_190 = arith.constant dense<0.000000e+00> : vector<8x1024xf32>
    %271 = tpu.matmul %269, %270, %cst_190 {dimension_numbers = #tpu.dot_dimension_numbers<[1], [0], [0], [1], [0, 0, 1, 1], [], []>} : vector<8x8xbf16>, vector<8x1024xbf16>, vector<8x1024xf32> -> vector<8x1024xf32>
    %272 = arith.addf %267, %271 : vector<8x1024xf32>
    %c23_191 = arith.constant 23 : index
    %c0_192 = arith.constant 0 : index
    %c0_193 = arith.constant 0 : index
    %273 = vector.load %arg4[%c23_191, %c0_192, %c0_193] : memref<27x8x8xbf16, #tpu.memory_space<vmem>>, vector<1x8x8xbf16>
    %274 = vector.shape_cast %273 : vector<1x8x8xbf16> to vector<8x8xbf16>
    %275 = vector.extract_strided_slice %156 {offsets = [0, 229], sizes = [8, 1024], strides = [1, 1]} : vector<8x1280xbf16> to vector<8x1024xbf16>
    %cst_194 = arith.constant dense<0.000000e+00> : vector<8x1024xf32>
    %276 = tpu.matmul %274, %275, %cst_194 {dimension_numbers = #tpu.dot_dimension_numbers<[1], [0], [0], [1], [0, 0, 1, 1], [], []>} : vector<8x8xbf16>, vector<8x1024xbf16>, vector<8x1024xf32> -> vector<8x1024xf32>
    %277 = arith.addf %272, %276 : vector<8x1024xf32>
    %c24_195 = arith.constant 24 : index
    %c0_196 = arith.constant 0 : index
    %c0_197 = arith.constant 0 : index
    %278 = vector.load %arg4[%c24_195, %c0_196, %c0_197] : memref<27x8x8xbf16, #tpu.memory_space<vmem>>, vector<1x8x8xbf16>
    %279 = vector.shape_cast %278 : vector<1x8x8xbf16> to vector<8x8xbf16>
    %280 = vector.extract_strided_slice %156 {offsets = [0, 237], sizes = [8, 1024], strides = [1, 1]} : vector<8x1280xbf16> to vector<8x1024xbf16>
    %cst_198 = arith.constant dense<0.000000e+00> : vector<8x1024xf32>
    %281 = tpu.matmul %279, %280, %cst_198 {dimension_numbers = #tpu.dot_dimension_numbers<[1], [0], [0], [1], [0, 0, 1, 1], [], []>} : vector<8x8xbf16>, vector<8x1024xbf16>, vector<8x1024xf32> -> vector<8x1024xf32>
    %282 = arith.addf %277, %281 : vector<8x1024xf32>
    %c25_199 = arith.constant 25 : index
    %c0_200 = arith.constant 0 : index
    %c0_201 = arith.constant 0 : index
    %283 = vector.load %arg4[%c25_199, %c0_200, %c0_201] : memref<27x8x8xbf16, #tpu.memory_space<vmem>>, vector<1x8x8xbf16>
    %284 = vector.shape_cast %283 : vector<1x8x8xbf16> to vector<8x8xbf16>
    %285 = vector.extract_strided_slice %156 {offsets = [0, 238], sizes = [8, 1024], strides = [1, 1]} : vector<8x1280xbf16> to vector<8x1024xbf16>
    %cst_202 = arith.constant dense<0.000000e+00> : vector<8x1024xf32>
    %286 = tpu.matmul %284, %285, %cst_202 {dimension_numbers = #tpu.dot_dimension_numbers<[1], [0], [0], [1], [0, 0, 1, 1], [], []>} : vector<8x8xbf16>, vector<8x1024xbf16>, vector<8x1024xf32> -> vector<8x1024xf32>
    %287 = arith.addf %282, %286 : vector<8x1024xf32>
    %c26_203 = arith.constant 26 : index
    %c0_204 = arith.constant 0 : index
    %c0_205 = arith.constant 0 : index
    %288 = vector.load %arg4[%c26_203, %c0_204, %c0_205] : memref<27x8x8xbf16, #tpu.memory_space<vmem>>, vector<1x8x8xbf16>
    %289 = vector.shape_cast %288 : vector<1x8x8xbf16> to vector<8x8xbf16>
    %290 = vector.extract_strided_slice %156 {offsets = [0, 239], sizes = [8, 1024], strides = [1, 1]} : vector<8x1280xbf16> to vector<8x1024xbf16>
    %cst_206 = arith.constant dense<0.000000e+00> : vector<8x1024xf32>
    %291 = tpu.matmul %289, %290, %cst_206 {dimension_numbers = #tpu.dot_dimension_numbers<[1], [0], [0], [1], [0, 0, 1, 1], [], []>} : vector<8x8xbf16>, vector<8x1024xbf16>, vector<8x1024xf32> -> vector<8x1024xf32>
    %292 = arith.addf %287, %291 : vector<8x1024xf32>
    %c0_207 = arith.constant 0 : index
    %c0_208 = arith.constant 0 : index
    %293 = vector.load %arg5[%c0_207, %c0_208] : memref<8x1xf32, #tpu.memory_space<vmem>>, vector<8x1xf32>
    %294 = vector.broadcast %293 : vector<8x1xf32> to vector<8x1024xf32>
    %295 = arith.addf %292, %294 : vector<8x1024xf32>
    %cst_209 = arith.constant 0.000000e+00 : f32
    %296 = vector.broadcast %cst_209 : f32 to vector<8x1024xf32>
    %297 = arith.cmpf ogt, %295, %296 : vector<8x1024xf32>
    %298 = vector.broadcast %0 : f32 to vector<8x1024xf32>
    %299 = arith.mulf %298, %295 : vector<8x1024xf32>
    %300 = arith.select %297, %295, %299 : vector<8x1024xi1>, vector<8x1024xf32>
    %c0_210 = arith.constant 0 : index
    %c0_211 = arith.constant 0 : index
    %c0_212 = arith.constant 0 : index
    %301 = vector.load %arg8[%c0_210, %c0_211, %c0_212] : memref<1x8x1024xf32, #tpu.memory_space<vmem>>, vector<1x8x1024xf32>
    %302 = vector.shape_cast %301 : vector<1x8x1024xf32> to vector<8x1024xf32>
    %303 = vector.shape_cast %300 : vector<8x1024xf32> to vector<1x8x1024xf32>
    tpu.vector_store %arg8[%c0_210, %c0_211, %c0_212], %303 {strides = array<i32>} : memref<1x8x1024xf32, #tpu.memory_space<vmem>>, vector<1x8x1024xf32>,
    return
  }
  func.func @transform_0(%arg0: i32) -> (i32, i32, i32) {
    %c0_i32 = arith.constant 0 : i32
    %c0_i32_0 = arith.constant 0 : i32
    %c0_i32_1 = arith.constant 0 : i32
    return %arg0, %c0_i32, %c0_i32_0 : i32, i32, i32
  }
  func.func @transform_1(%arg0: i32) -> (i32, i32, i32) {
    %c0_i32 = arith.constant 0 : i32
    %c0_i32_0 = arith.constant 0 : i32
    %c0_i32_1 = arith.constant 0 : i32
    %c0_i32_2 = arith.constant 0 : i32
    return %c0_i32, %c0_i32_0, %c0_i32_1 : i32, i32, i32
  }
  func.func @transform_2(%arg0: i32) -> (i32, i32) {
    %c0_i32 = arith.constant 0 : i32
    %c0_i32_0 = arith.constant 0 : i32
    %c0_i32_1 = arith.constant 0 : i32
    return %c0_i32, %c0_i32_0 : i32, i32
  }
  func.func @transform_3(%arg0: i32) -> (i32, i32, i32) {
    %c0_i32 = arith.constant 0 : i32
    %c0_i32_0 = arith.constant 0 : i32
    %c0_i32_1 = arith.constant 0 : i32
    %c0_i32_2 = arith.constant 0 : i32
    return %c0_i32, %c0_i32_0, %c0_i32_1 : i32, i32, i32
  }
  func.func @transform_4(%arg0: i32) -> (i32, i32) {
    %c0_i32 = arith.constant 0 : i32
    %c0_i32_0 = arith.constant 0 : i32
    %c0_i32_1 = arith.constant 0 : i32
    return %c0_i32, %c0_i32_0 : i32, i32
  }
  func.func @transform_5(%arg0: i32) -> (i32, i32) {
    %c0_i32 = arith.constant 0 : i32
    %c0_i32_0 = arith.constant 0 : i32
    %c0_i32_1 = arith.constant 0 : i32
    return %c0_i32, %c0_i32_0 : i32, i32
  }
  func.func @transform_6(%arg0: i32) -> i32 {
    %c0_i32 = arith.constant 0 : i32
    %c0_i32_0 = arith.constant 0 : i32
    return %c0_i32 : i32
  }
  func.func @transform_7(%arg0: i32) -> (i32, i32, i32) {
    %c0_i32 = arith.constant 0 : i32
    %c0_i32_0 = arith.constant 0 : i32
    %c0_i32_1 = arith.constant 0 : i32
    return %arg0, %c0_i32, %c0_i32_0 : i32, i32, i32
  }
}

</mosaic_0001>

<bundles_post_ra>
// kernel: block_forward.1
= control target key start
LH: loop header
LB: loop body
LE: loop exit
PB: predicated region body
PF: predicated region fallthrough
CT: control target
= control target key end

     0   :  { %s10090_s26 = smov 0   ;;  %s13786_s0 = inlined_call_operand.vmem [shape: bf16[2,8,1280], index: 0, kind: input, shape index: {}]   ;;  %s13787_s1 = inlined_call_operand.vmem [shape: bf16[27,8,8], index: 1, kind: input, shape index: {}]   ;;  %s13788_s2 = inlined_call_operand.vmem [shape: f32[8,1], index: 2, kind: input, shape index: {}]   ;;  %s13789_s3 = inlined_call_operand.vmem [shape: bf16[27,8,8], index: 3, kind: input, shape index: {}]   ;;  %s13790_s4 = inlined_call_operand.vmem [shape: f32[8,1], index: 4, kind: input, shape index: {}]   ;;  %s13791_s5 = inlined_call_operand.vmem [shape: f32[1,1024], index: 5, kind: input, shape index: {}]   ;;  %s13792_s6 = inlined_call_operand.<no memory space> [shape: f32[1], index: 6, kind: input, shape index: {}]   ;;  %s13793_s7 = inlined_call_operand.vmem [shape: f32[2,8,1024], index: 7, kind: output, shape index: {}]  }
   0x1   :  { %12 = sst [smem:[#allocation3]] %s13792_s6 }
   0x2 LB: > { %s9478_s27 = sadd.s32 4294967295, %s10018_s26   ;;  %p9482_p0 = scmp.ge.s32.totalorder %s10018_s26, 1  ;;  %s10018_s26 = sphi %s10090_s26, %s18_s26  }
   0x3   : > { %p238_p1 = scmp.lt.s32.totalorder %s10018_s26, 3 }
   0x5   : > { %p239_p2 = pnand %p9482_p0, %p238_p1 }
   0x6   : > { %p270_p3 = scmp.lt.s32.totalorder (!%p239_p2), %s9478_s27, 1  ;;  %s10020_s8 = smov (!%p239_p2), 110  }
   0x7   : > { %242 = sbr.rel (%p239_p2) target bundleno = 2256 (0x8d0), region = 48  ;;  %s10021_s9 = smov (!%p239_p2), 111  }
   0x8   : > { %s10022_s10 = smov (!%p239_p2), 109   ;;  %s10023_s11 = smov (!%p239_p2), 101  }
   0x9   : > { %s10024_s12 = smov (!%p239_p2), 100   ;;  %s10025_s13 = smov (!%p239_p2), 99  }
   0xa   : > { %s10026_s16 = smov (!%p239_p2), 91   ;;  %s10027_s19 = smov (!%p239_p2), 90  }
   0xb   : > { %s10028_s22 = smov (!%p239_p2), 89   ;;  %s10029_s23 = smov (!%p239_p2), 11  }
   0xc   : > { %s13951_s27 = smov (!%p270_p3, %s9478_s27), 1  ;;  %vm331_vm0 = vcmask 900096   ;;  %vm344_vm1 = vcmask 1043456   ;;  %v9486_v40 = vld [vmem:[%s13787_s1 + $0x4] sm:$0xf]  ;;  %vm340_vm2 = vcmask 64512  }
   0xd   : > { %s9973_s6 = smul.u32 40, %s13951_s27  ;;  %vm491_vm3 = vcmask 908288   ;;  %vm651_vm4 = vcmask 891904   ;;  %vm819_vm5 = vcmask 826368   ;;  %vm987_vm6 = vcmask 818176   ;;  %s10031_s14 = smov 9  }
   0xe   : > { %vm1155_vm7 = vcmask 809984   ;;  %vm1323_vm8 = vcmask 744448   ;;  %s10032_s18 = smov 1   ;;  %vm1491_vm9 = vcmask 736256   ;;  %s10033_s24 = smov 127   ;;  %vm1659_vm10 = vcmask 728064  }
   0xf   : > { %s10104_s30 = scalar_lea.vmem %s13786_s0, %s9973_s6  ;;  %s10030_s6 = smov 10   ;;  %vm1827_vm11 = vcmask 89088   ;;  %vm1995_vm12 = vcmask 80896   ;;  %vm13822_vm13 = vcmask 72704   ;;  %vm13821_vm14 = vcmask 7168  }
  0x10   : > { %v283_v0 = vld [vmem:[%s10104_s30 + $0x8] sm:$0xff]  ;;  %v282_v1 = vld [vmem:[%s10104_s30] sm:$0xff]  ;;  %v284_v4 = vld [vmem:[%s10104_s30 + $0x10] sm:$0xff]  ;;  %s10034_s29 = smov 119   ;;  %s10035_s20 = smov 118   ;;  %vm13796_vm15 = vcmask 1039360  }
  0x11   : > { %v297_v2 = vunpack.c.l.b16 %v283_v0  ;;  %v295_v3 = vunpack.c.l.b16 %v282_v1  ;;  %v299_v5 = vunpack.c.l.b16 %v284_v4  ;;  %v296_v9 = vunpack.c.h.b16 %v282_v1  ;;  %v285_v14 = vld [vmem:[%s10104_s30 + $0x18] sm:$0xff]  ;;  %v286_v16 = vld [vmem:[%s10104_s30 + $0x20] sm:$0xff]  ;;  %s13794_s28 = smov 117   ;;  %s13797_s21 = smov 39  }
  0x12   : > { %v298_v10 = vunpack.c.h.b16 %v283_v0  ;;  %v300_v11 = vunpack.c.h.b16 %v284_v4  ;;  %v301_v17 = vunpack.c.l.b16 %v285_v14  ;;  %v302_v18 = vunpack.c.h.b16 %v285_v14  ;;  %s13800_s15 = smov 38   ;;  %s10039_s25 = smov 37  }
  0x13   : > { %v10109_v6 = vpack.c.b16 %v297_v2, %v297_v2  ;;  %v10111_v7 = vpack.c.b16 %v295_v3, %v295_v3  ;;  %v10113_v8 = vpack.c.b16 %v299_v5, %v299_v5  ;;  %v10121_v12 = vpack.c.b16 %v296_v9, %v296_v9  ;;  %s281_s17 = sld [smem:[#allocation3]] }
  0x14   : > { %v10123_v13 = vpack.c.b16 %v298_v10, %v298_v10  ;;  %v10126_v15 = vpack.c.b16 %v300_v11, %v300_v11  ;;  %v303_v19 = vunpack.c.l.b16 %v286_v16  ;;  %v10135_v20 = vpack.c.b16 %v301_v17, %v301_v17  ;;  %v287_v16 = vld [vmem:[%s13787_s1] sm:$0xf] }
  0x15   : > { %317 = vrot.lane.b32.xlu1 %v10109_v6, %s10020_s8  ;;  %313 = vrot.lane.b32.xlu0 %v10111_v7, %s10020_s8  ;;  %v10137_v21 = vpack.c.b16 %v302_v18, %v302_v18 }
  0x16   : > { %321 = vrot.lane.b32.xlu2 %v10113_v8, %s10020_s8  ;;  %v10139_v22 = vpack.c.b16 %v303_v19, %v303_v19 }
  0x1d   : > { %319 = vrot.lane.b32.xlu1 %v10123_v13, %s10020_s8  ;;  %315 = vrot.lane.b32.xlu0 %v10121_v12, %s10020_s8 }
  0x1e   : > { %323 = vrot.lane.b32.xlu2 %v10126_v15, %s10020_s8 }
  0x25   : > { %325 = vrot.lane.b32.xlu0 %v10135_v20, %s10020_s8  ;;  %327 = vrot.lane.b32.xlu1 %v10137_v21, %s10020_s8 }
  0x26   : > { %329 = vrot.lane.b32.xlu2 %v10139_v22, %s10020_s8 }
  0x2d   : > { %475 = vrot.lane.b32.xlu1 %v10121_v12, %s10021_s9  ;;  %473 = vrot.lane.b32.xlu0 %v10111_v7, %s10021_s9 }
  0x2e   : > { %477 = vrot.lane.b32.xlu2 %v10109_v6, %s10021_s9 }
  0x35   : > { %481 = vrot.lane.b32.xlu1 %v10113_v8, %s10021_s9  ;;  %479 = vrot.lane.b32.xlu0 %v10123_v13, %s10021_s9 }
  0x36   : > { %483 = vrot.lane.b32.xlu2 %v10126_v15, %s10021_s9 }
  0x3d   : > { %485 = vrot.lane.b32.xlu0 %v10135_v20, %s10021_s9  ;;  %487 = vrot.lane.b32.xlu1 %v10137_v21, %s10021_s9 }
  0x3e   : > { %489 = vrot.lane.b32.xlu2 %v10139_v22, %s10021_s9 }
  0x45   : > { %635 = vrot.lane.b32.xlu1 %v10121_v12, %s10022_s10  ;;  %633 = vrot.lane.b32.xlu0 %v10111_v7, %s10022_s10 }
  0x46   : > { %637 = vrot.lane.b32.xlu2 %v10109_v6, %s10022_s10 }
  0x4d   : > { %641 = vrot.lane.b32.xlu1 %v10113_v8, %s10022_s10  ;;  %639 = vrot.lane.b32.xlu0 %v10123_v13, %s10022_s10 }
  0x4e   : > { %643 = vrot.lane.b32.xlu2 %v10126_v15, %s10022_s10 }
  0x55   : > { %645 = vrot.lane.b32.xlu0 %v10135_v20, %s10022_s10  ;;  %647 = vrot.lane.b32.xlu1 %v10137_v21, %s10022_s10 }
  0x56   : > { %649 = vrot.lane.b32.xlu2 %v10139_v22, %s10022_s10 }
  0x5d   : > { %803 = vrot.lane.b32.xlu1 %v10121_v12, %s10023_s11  ;;  %801 = vrot.lane.b32.xlu0 %v10111_v7, %s10023_s11 }
  0x5e   : > { %805 = vrot.lane.b32.xlu2 %v10109_v6, %s10023_s11 }
  0x65   : > { %809 = vrot.lane.b32.xlu1 %v10113_v8, %s10023_s11  ;;  %807 = vrot.lane.b32.xlu0 %v10123_v13, %s10023_s11 }
  0x66   : > { %811 = vrot.lane.b32.xlu2 %v10126_v15, %s10023_s11 }
  0x6d   : > { %813 = vrot.lane.b32.xlu0 %v10135_v20, %s10023_s11  ;;  %815 = vrot.lane.b32.xlu1 %v10137_v21, %s10023_s11 }
  0x6e   : > { %817 = vrot.lane.b32.xlu2 %v10139_v22, %s10023_s11 }
  0x70   : > { %v322_v23 = vpop.permute.xlu2 %321 }
  0x75   : > { %971 = vrot.lane.b32.xlu1 %v10121_v12, %s10024_s12  ;;  %969 = vrot.lane.b32.xlu0 %v10111_v7, %s10024_s12 }
  0x76   : > { %973 = vrot.lane.b32.xlu2 %v10109_v6, %s10024_s12 }
  0x78   : > { %v324_v26 = vpop.permute.xlu2 %323 }
  0x79   : > { %v336_v27 = vsel %vm331_vm0, %v322_v23, %v324_v26 }
  0x7a   : > { %v358_v30 = vsel %vm344_vm1, %v336_v27, 0 }
  0x7d   : > { %977 = vrot.lane.b32.xlu1 %v10113_v8, %s10024_s12  ;;  %975 = vrot.lane.b32.xlu0 %v10123_v13, %s10024_s12 }
  0x7e   : > { %979 = vrot.lane.b32.xlu2 %v10126_v15, %s10024_s12 }
  0x80   : > { %v330_v35 = vpop.permute.xlu2 %329 }
  0x85   : > { %981 = vrot.lane.b32.xlu0 %v10135_v20, %s10024_s12  ;;  %983 = vrot.lane.b32.xlu1 %v10137_v21, %s10024_s12 }
  0x86   : > { %985 = vrot.lane.b32.xlu2 %v10139_v22, %s10024_s12 }
  0x87   : > { %v318_v24 = vpop.permute.xlu1 %317  ;;  %v314_v25 = vpop.permute.xlu0 %313 }
  0x88   : > { %v478_v46 = vpop.permute.xlu2 %477 }
  0x8d   : > { %1139 = vrot.lane.b32.xlu1 %v10121_v12, %s10025_s13  ;;  %1137 = vrot.lane.b32.xlu0 %v10111_v7, %s10025_s13 }
  0x8e   : > { %1141 = vrot.lane.b32.xlu2 %v10109_v6, %s10025_s13 }
  0x8f   : > { %v320_v28 = vpop.permute.xlu1 %319  ;;  %v316_v29 = vpop.permute.xlu0 %315 }
  0x90   : > { %v332_v31 = vsel %vm331_vm0, %v314_v25, %v316_v29  ;;  %v333_v32 = vsel %vm331_vm0, %v316_v29, %v318_v24  ;;  %v334_v33 = vsel %vm331_vm0, %v318_v24, %v320_v28  ;;  %v335_v34 = vsel %vm331_vm0, %v320_v28, %v322_v23  ;;  %v484_v56 = vpop.permute.xlu2 %483 }
  0x91   : > { %v346_v36 = vsel %vm344_vm1, %v332_v31, 0  ;;  %v349_v37 = vsel %vm344_vm1, %v333_v32, 0  ;;  %v352_v38 = vsel %vm344_vm1, %v334_v33, 0  ;;  %v355_v39 = vsel %vm344_vm1, %v335_v34, 0 }
  0x92   : > { %376 = vmatpush.bf16.msra.mxu0 %v346_v36  ;;  %389 = vmatpush.bf16.msra.mxu1 %v349_v37 }
  0x93   : > { %402 = vmatpush.bf16.msra.mxu2 %v352_v38  ;;  %415 = vmatpush.bf16.msra.mxu3 %v355_v39 }
  0x95   : > { %9487 = vmatmul.msk.bf16.vlgmr.msra.gmra.mxu0 %vm340_vm2, %v9486_v40  ;;  %9488 = vmatmul.msk.bf16.vlgmr.msra.gmra.mxu1 %vm340_vm2, %v9486_v40 }
  0x96   : > { %428 = vmatpush.bf16.msrb.mxu0 %v358_v30  ;;  %9489 = vmatmul.msk.bf16.vlgmr.msra.gmra.mxu2 %vm340_vm2, %v9486_v40 }
  0x97   : > { %9490 = vmatmul.msk.bf16.vlgmr.msra.gmra.mxu3 %vm340_vm2, %v9486_v40  ;;  %v326_v41 = vpop.permute.xlu0 %325  ;;  %v328_v42 = vpop.permute.xlu1 %327  ;;  %1145 = vrot.lane.b32.xlu1 %v10113_v8, %s10025_s13 }
  0x98   : > { %1143 = vrot.lane.b32.xlu0 %v10123_v13, %s10025_s13  ;;  %v337_v43 = vsel %vm331_vm0, %v324_v26, %v326_v41  ;;  %v338_v44 = vsel %vm331_vm0, %v326_v41, %v328_v42  ;;  %v339_v45 = vsel %vm331_vm0, %v328_v42, %v330_v35  ;;  %1147 = vrot.lane.b32.xlu2 %v10126_v15, %s10025_s13  ;;  %v490_v1 = vpop.permute.xlu2 %489 }
  0x99   : > { %v361_v47 = vsel %vm344_vm1, %v337_v43, 0  ;;  %v364_v48 = vsel %vm344_vm1, %v338_v44, 0  ;;  %v367_v49 = vsel %vm344_vm1, %v339_v45, 0 }
  0x9a   : > { %441 = vmatpush.bf16.msrb.mxu1 %v361_v47  ;;  %454 = vmatpush.bf16.msrb.mxu2 %v364_v48 }
  0x9b   : > { %467 = vmatpush.bf16.msrb.mxu3 %v367_v49 }
  0x9f   : > { %v476_v50 = vpop.permute.xlu1 %475  ;;  %v474_v51 = vpop.permute.xlu0 %473  ;;  %1151 = vrot.lane.b32.xlu1 %v10137_v21, %s10025_s13 }
  0xa0   : > { %1149 = vrot.lane.b32.xlu0 %v10135_v20, %s10025_s13  ;;  %v492_v52 = vsel %vm491_vm3, %v474_v51, %v476_v50  ;;  %v493_v53 = vsel %vm491_vm3, %v476_v50, %v478_v46  ;;  %1153 = vrot.lane.b32.xlu2 %v10139_v22, %s10025_s13  ;;  %v638_v17 = vpop.permute.xlu2 %637  ;;  %v9503_v50 = vld [vmem:[%s13787_s1 + $0x8] sm:$0xf] }
  0xa1   : > { %v504_v54 = vsel %vm344_vm1, %v492_v52, 0  ;;  %v507_v55 = vsel %vm344_vm1, %v493_v53, 0 }
  0xa2   : > { %534 = vmatpush.bf16.msra.mxu0 %v504_v54  ;;  %547 = vmatpush.bf16.msra.mxu1 %v507_v55 }
  0xa5   : > { %9491 = vmatmul.msk.bf16.vlgmr.msrb.gmra.mxu0 %vm340_vm2, %v9486_v40  ;;  %9492 = vmatmul.msk.bf16.vlgmr.msrb.gmra.mxu1 %vm340_vm2, %v9486_v40 }
  0xa6   : > { %9493 = vmatmul.msk.bf16.vlgmr.msrb.gmra.mxu2 %vm340_vm2, %v9486_v40 }
  0xa7   : > { %9494 = vmatmul.msk.bf16.vlgmr.msrb.gmra.mxu3 %vm340_vm2, %v9486_v40  ;;  %v482_v57 = vpop.permute.xlu1 %481  ;;  %v480_v58 = vpop.permute.xlu0 %479  ;;  %1307 = vrot.lane.b32.xlu1 %v10121_v12, %s10026_s16 }
  0xa8   : > { %1305 = vrot.lane.b32.xlu0 %v10111_v7, %s10026_s16  ;;  %v494_v59 = vsel %vm491_vm3, %v478_v46, %v480_v58  ;;  %v495_v60 = vsel %vm491_vm3, %v480_v58, %v482_v57  ;;  %v496_v61 = vsel %vm491_vm3, %v482_v57, %v484_v56  ;;  %1309 = vrot.lane.b32.xlu2 %v10109_v6, %s10026_s16  ;;  %v644_v27 = vpop.permute.xlu2 %643 }
  0xa9   : > { %v510_v62 = vsel %vm344_vm1, %v494_v59, 0  ;;  %v513_v63 = vsel %vm344_vm1, %v495_v60, 0  ;;  %v516_v0 = vsel %vm344_vm1, %v496_v61, 0 }
  0xaa   : > { %560 = vmatpush.bf16.msra.mxu2 %v510_v62  ;;  %573 = vmatpush.bf16.msra.mxu3 %v513_v63 }
  0xab   : > { %586 = vmatpush.bf16.msrb.mxu0 %v516_v0 }
  0xaf   : > { %v486_v2 = vpop.permute.xlu0 %485  ;;  %v488_v3 = vpop.permute.xlu1 %487  ;;  %1313 = vrot.lane.b32.xlu1 %v10113_v8, %s10026_s16 }
  0xb0   : > { %1311 = vrot.lane.b32.xlu0 %v10123_v13, %s10026_s16  ;;  %v497_v4 = vsel %vm491_vm3, %v484_v56, %v486_v2  ;;  %v498_v5 = vsel %vm491_vm3, %v486_v2, %v488_v3  ;;  %v499_v9 = vsel %vm491_vm3, %v488_v3, %v490_v1  ;;  %1315 = vrot.lane.b32.xlu2 %v10126_v15, %s10026_s16  ;;  %v650_v36 = vpop.permute.xlu2 %649 }
  0xb1   : > { %v519_v10 = vsel %vm344_vm1, %v497_v4, 0  ;;  %v522_v11 = vsel %vm344_vm1, %v498_v5, 0  ;;  %v525_v14 = vsel %vm344_vm1, %v499_v9, 0 }
  0xb2   : > { %599 = vmatpush.bf16.msrb.mxu1 %v519_v10  ;;  %612 = vmatpush.bf16.msrb.mxu2 %v522_v11 }
  0xb3   : > { %625 = vmatpush.bf16.msrb.mxu3 %v525_v14 }
  0xb5   : > { %9495 = vmatmul.msk.bf16.vlgmr.msra.gmra.mxu0 %vm340_vm2, %v287_v16  ;;  %9496 = vmatmul.msk.bf16.vlgmr.msra.gmra.mxu1 %vm340_vm2, %v287_v16 }
  0xb6   : > { %9497 = vmatmul.msk.bf16.vlgmr.msra.gmra.mxu2 %vm340_vm2, %v287_v16 }
  0xb7   : > { %9498 = vmatmul.msk.bf16.vlgmr.msra.gmra.mxu3 %vm340_vm2, %v287_v16  ;;  %v636_v18 = vpop.permute.xlu1 %635  ;;  %v634_v19 = vpop.permute.xlu0 %633  ;;  %1319 = vrot.lane.b32.xlu1 %v10137_v21, %s10026_s16 }
  0xb8   : > { %1317 = vrot.lane.b32.xlu0 %v10135_v20, %s10026_s16  ;;  %v652_v23 = vsel %vm651_vm4, %v634_v19, %v636_v18  ;;  %v653_v24 = vsel %vm651_vm4, %v636_v18, %v638_v17  ;;  %1321 = vrot.lane.b32.xlu2 %v10139_v22, %s10026_s16  ;;  %v806_v45 = vpop.permute.xlu2 %805 }
  0xb9   : > { %v664_v25 = vsel %vm344_vm1, %v652_v23, 0  ;;  %v667_v26 = vsel %vm344_vm1, %v653_v24, 0  ;;  %v9512_v23 = vld [vmem:[%s13787_s1 + $0xc] sm:$0xf] }
  0xba   : > { %694 = vmatpush.bf16.msra.mxu0 %v664_v25  ;;  %707 = vmatpush.bf16.msra.mxu1 %v667_v26 }
  0xbf   : > { %v642_v28 = vpop.permute.xlu1 %641  ;;  %v640_v29 = vpop.permute.xlu0 %639  ;;  %1475 = vrot.lane.b32.xlu1 %v10121_v12, %s10027_s19 }
  0xc0   : > { %1473 = vrot.lane.b32.xlu0 %v10111_v7, %s10027_s19  ;;  %v654_v30 = vsel %vm651_vm4, %v638_v17, %v640_v29  ;;  %v655_v31 = vsel %vm651_vm4, %v640_v29, %v642_v28  ;;  %1477 = vrot.lane.b32.xlu2 %v10109_v6, %s10027_s19  ;;  %v656_v32 = vsel %vm651_vm4, %v642_v28, %v644_v27  ;;  %v812_v53 = vpop.permute.xlu2 %811 }
  0xc1   : > { %v670_v33 = vsel %vm344_vm1, %v654_v30, 0  ;;  %v673_v34 = vsel %vm344_vm1, %v655_v31, 0  ;;  %v676_v35 = vsel %vm344_vm1, %v656_v32, 0 }
  0xc2   : > { %720 = vmatpush.bf16.msra.mxu2 %v670_v33  ;;  %733 = vmatpush.bf16.msra.mxu3 %v673_v34 }
  0xc5   : > { %9499 = vmatmul.msk.bf16.vlgmr.msrb.gmra.mxu0 %vm340_vm2, %v287_v16  ;;  %9500 = vmatmul.msk.bf16.vlgmr.msrb.gmra.mxu1 %vm340_vm2, %v287_v16 }
  0xc6   : > { %9501 = vmatmul.msk.bf16.vlgmr.msrb.gmra.mxu2 %vm340_vm2, %v287_v16  ;;  %746 = vmatpush.bf16.msrb.mxu0 %v676_v35 }
  0xc7   : > { %9502 = vmatmul.msk.bf16.vlgmr.msrb.gmra.mxu3 %vm340_vm2, %v287_v16  ;;  %v646_v37 = vpop.permute.xlu0 %645  ;;  %v648_v38 = vpop.permute.xlu1 %647  ;;  %1481 = vrot.lane.b32.xlu1 %v10113_v8, %s10027_s19 }
  0xc8   : > { %v657_v39 = vsel %vm651_vm4, %v644_v27, %v646_v37  ;;  %v658_v40 = vsel %vm651_vm4, %v646_v37, %v648_v38  ;;  %v659_v41 = vsel %vm651_vm4, %v648_v38, %v650_v36  ;;  %1479 = vrot.lane.b32.xlu0 %v10123_v13, %s10027_s19  ;;  %1483 = vrot.lane.b32.xlu2 %v10126_v15, %s10027_s19  ;;  %v818_v60 = vpop.permute.xlu2 %817 }
  0xc9   : > { %v679_v42 = vsel %vm344_vm1, %v657_v39, 0  ;;  %v682_v43 = vsel %vm344_vm1, %v658_v40, 0  ;;  %v685_v44 = vsel %vm344_vm1, %v659_v41, 0 }
  0xca   : > { %759 = vmatpush.bf16.msrb.mxu1 %v679_v42  ;;  %772 = vmatpush.bf16.msrb.mxu2 %v682_v43 }
  0xcb   : > { %785 = vmatpush.bf16.msrb.mxu3 %v685_v44 }
  0xcf   : > { %v804_v46 = vpop.permute.xlu1 %803  ;;  %v802_v47 = vpop.permute.xlu0 %801  ;;  %1487 = vrot.lane.b32.xlu1 %v10137_v21, %s10027_s19 }
  0xd0   : > { %1485 = vrot.lane.b32.xlu0 %v10135_v20, %s10027_s19  ;;  %1489 = vrot.lane.b32.xlu2 %v10139_v22, %s10027_s19  ;;  %v820_v48 = vsel %vm819_vm5, %v802_v47, %v804_v46  ;;  %v821_v49 = vsel %vm819_vm5, %v804_v46, %v806_v45  ;;  %v974_v14 = vpop.permute.xlu2 %973 }
  0xd1   : > { %v832_v51 = vsel %vm344_vm1, %v820_v48, 0  ;;  %v835_v52 = vsel %vm344_vm1, %v821_v49, 0 }
  0xd5   : > { %9504 = vmatmul.msk.bf16.vlgmr.msra.gmra.mxu0 %vm340_vm2, %v9503_v50  ;;  %9505 = vmatmul.msk.bf16.vlgmr.msra.gmra.mxu1 %vm340_vm2, %v9503_v50 }
  0xd6   : > { %9506 = vmatmul.msk.bf16.vlgmr.msra.gmra.mxu2 %vm340_vm2, %v9503_v50  ;;  %862 = vmatpush.bf16.msra.mxu0 %v832_v51  ;;  %v9521_v51 = vld [vmem:[%s13787_s1 + $0x10] sm:$0xf] }
  0xd7   : > { %9507 = vmatmul.msk.bf16.vlgmr.msra.gmra.mxu3 %vm340_vm2, %v9503_v50  ;;  %875 = vmatpush.bf16.msra.mxu1 %v835_v52  ;;  %v810_v54 = vpop.permute.xlu1 %809  ;;  %v808_v55 = vpop.permute.xlu0 %807 }
  0xd8   : > { %v822_v56 = vsel %vm819_vm5, %v806_v45, %v808_v55  ;;  %v823_v57 = vsel %vm819_vm5, %v808_v55, %v810_v54  ;;  %1643 = vrot.lane.b32.xlu1 %v10121_v12, %s10028_s22  ;;  %1641 = vrot.lane.b32.xlu0 %v10111_v7, %s10028_s22  ;;  %v824_v63 = vsel %vm819_vm5, %v810_v54, %v812_v53  ;;  %v980_v30 = vpop.permute.xlu2 %979 }
  0xd9   : > { %v838_v58 = vsel %vm344_vm1, %v822_v56, 0  ;;  %v841_v59 = vsel %vm344_vm1, %v823_v57, 0  ;;  %1645 = vrot.lane.b32.xlu2 %v10109_v6, %s10028_s22  ;;  %v844_v3 = vsel %vm344_vm1, %v824_v63, 0 }
  0xda   : > { %888 = vmatpush.bf16.msra.mxu2 %v838_v58  ;;  %901 = vmatpush.bf16.msra.mxu3 %v841_v59 }
  0xdf   : > { %v814_v61 = vpop.permute.xlu0 %813  ;;  %v816_v62 = vpop.permute.xlu1 %815 }
  0xe0   : > { %1649 = vrot.lane.b32.xlu1 %v10113_v8, %s10028_s22  ;;  %1647 = vrot.lane.b32.xlu0 %v10123_v13, %s10028_s22  ;;  %v825_v0 = vsel %vm819_vm5, %v812_v53, %v814_v61  ;;  %v826_v1 = vsel %vm819_vm5, %v814_v61, %v816_v62  ;;  %v827_v2 = vsel %vm819_vm5, %v816_v62, %v818_v60  ;;  %v986_v33 = vpop.permute.xlu2 %985 }
  0xe1   : > { %1651 = vrot.lane.b32.xlu2 %v10126_v15, %s10028_s22  ;;  %v847_v4 = vsel %vm344_vm1, %v825_v0, 0  ;;  %v850_v5 = vsel %vm344_vm1, %v826_v1, 0  ;;  %v853_v9 = vsel %vm344_vm1, %v827_v2, 0 }
  0xe5   : > { %9508 = vmatmul.msk.bf16.vlgmr.msrb.gmra.mxu0 %vm340_vm2, %v9503_v50  ;;  %9509 = vmatmul.msk.bf16.vlgmr.msrb.gmra.mxu1 %vm340_vm2, %v9503_v50 }
  0xe6   : > { %9510 = vmatmul.msk.bf16.vlgmr.msrb.gmra.mxu2 %vm340_vm2, %v9503_v50  ;;  %914 = vmatpush.bf16.msrb.mxu0 %v844_v3 }
  0xe7   : > { %9511 = vmatmul.msk.bf16.vlgmr.msrb.gmra.mxu3 %vm340_vm2, %v9503_v50  ;;  %927 = vmatpush.bf16.msrb.mxu1 %v847_v4  ;;  %v972_v10 = vpop.permute.xlu1 %971  ;;  %v970_v11 = vpop.permute.xlu0 %969 }
  0xe8   : > { %940 = vmatpush.bf16.msrb.mxu2 %v850_v5  ;;  %953 = vmatpush.bf16.msrb.mxu3 %v853_v9  ;;  %v988_v18 = vsel %vm987_vm6, %v970_v11, %v972_v10  ;;  %v989_v19 = vsel %vm987_vm6, %v972_v10, %v974_v14  ;;  %v1142_v44 = vpop.permute.xlu2 %1141 }
  0xe9   : > { %1653 = vrot.lane.b32.xlu0 %v10135_v20, %s10028_s22  ;;  %1655 = vrot.lane.b32.xlu1 %v10137_v21, %s10028_s22  ;;  %v1000_v26 = vsel %vm344_vm1, %v988_v18, 0  ;;  %v1003_v27 = vsel %vm344_vm1, %v989_v19, 0 }
  0xea   : > { %1657 = vrot.lane.b32.xlu2 %v10139_v22, %s10028_s22 }
  0xef   : > { %v978_v16 = vpop.permute.xlu1 %977  ;;  %v976_v17 = vpop.permute.xlu0 %975 }
  0xf0   : > { %v990_v24 = vsel %vm987_vm6, %v974_v14, %v976_v17  ;;  %v991_v25 = vsel %vm987_vm6, %v976_v17, %v978_v16  ;;  %v992_v34 = vsel %vm987_vm6, %v978_v16, %v980_v30 }
  0xf1   : > { %1811 = vrot.lane.b32.xlu1 %v10121_v12, %s10029_s23  ;;  %1809 = vrot.lane.b32.xlu0 %v10111_v7, %s10029_s23  ;;  %v1006_v28 = vsel %vm344_vm1, %v990_v24, 0  ;;  %v1009_v29 = vsel %vm344_vm1, %v991_v25, 0  ;;  %v1012_v38 = vsel %vm344_vm1, %v992_v34, 0 }
  0xf2   : > { %1813 = vrot.lane.b32.xlu2 %v10109_v6, %s10029_s23  ;;  %v1148_v58 = vpop.permute.xlu2 %1147 }
  0xf5   : > { %9513 = vmatmul.msk.bf16.vlgmr.msra.gmra.mxu0 %vm340_vm2, %v9512_v23  ;;  %9514 = vmatmul.msk.bf16.vlgmr.msra.gmra.mxu1 %vm340_vm2, %v9512_v23 }
  0xf6   : > { %9515 = vmatmul.msk.bf16.vlgmr.msra.gmra.mxu2 %vm340_vm2, %v9512_v23  ;;  %1030 = vmatpush.bf16.msra.mxu0 %v1000_v26 }
  0xf7   : > { %9516 = vmatmul.msk.bf16.vlgmr.msra.gmra.mxu3 %vm340_vm2, %v9512_v23  ;;  %1043 = vmatpush.bf16.msra.mxu1 %v1003_v27  ;;  %v984_v31 = vpop.permute.xlu1 %983  ;;  %v982_v32 = vpop.permute.xlu0 %981 }
  0xf8   : > { %1056 = vmatpush.bf16.msra.mxu2 %v1006_v28  ;;  %1069 = vmatpush.bf16.msra.mxu3 %v1009_v29  ;;  %v993_v35 = vsel %vm987_vm6, %v980_v30, %v982_v32  ;;  %v994_v36 = vsel %vm987_vm6, %v982_v32, %v984_v31  ;;  %v995_v37 = vsel %vm987_vm6, %v984_v31, %v986_v33 }
  0xf9   : > { %1817 = vrot.lane.b32.xlu1 %v10113_v8, %s10029_s23  ;;  %1815 = vrot.lane.b32.xlu0 %v10123_v13, %s10029_s23  ;;  %v1015_v39 = vsel %vm344_vm1, %v993_v35, 0  ;;  %v1018_v40 = vsel %vm344_vm1, %v994_v36, 0  ;;  %v1021_v41 = vsel %vm344_vm1, %v995_v37, 0 }
  0xfa   : > { %1819 = vrot.lane.b32.xlu2 %v10126_v15, %s10029_s23  ;;  %v1154_v1 = vpop.permute.xlu2 %1153 }
  0xff   : > { %v1140_v42 = vpop.permute.xlu1 %1139  ;;  %v1138_v43 = vpop.permute.xlu0 %1137 }
 0x100   : > { %v1156_v47 = vsel %vm1155_vm7, %v1138_v43, %v1140_v42  ;;  %v1157_v48 = vsel %vm1155_vm7, %v1140_v42, %v1142_v44 }
 0x101   : > { %1821 = vrot.lane.b32.xlu0 %v10135_v20, %s10029_s23  ;;  %1823 = vrot.lane.b32.xlu1 %v10137_v21, %s10029_s23  ;;  %v1168_v54 = vsel %vm344_vm1, %v1156_v47, 0  ;;  %v1171_v55 = vsel %vm344_vm1, %v1157_v48, 0 }
 0x102   : > { %1825 = vrot.lane.b32.xlu2 %v10139_v22, %s10029_s23  ;;  %v1310_v29 = vpop.permute.xlu2 %1309 }
 0x105   : > { %9517 = vmatmul.msk.bf16.vlgmr.msrb.gmra.mxu0 %vm340_vm2, %v9512_v23  ;;  %9518 = vmatmul.msk.bf16.vlgmr.msrb.gmra.mxu1 %vm340_vm2, %v9512_v23 }
 0x106   : > { %9519 = vmatmul.msk.bf16.vlgmr.msrb.gmra.mxu2 %vm340_vm2, %v9512_v23  ;;  %1082 = vmatpush.bf16.msrb.mxu0 %v1012_v38  ;;  %v9530_v38 = vld [vmem:[%s13787_s1 + $0x14] sm:$0xf] }
 0x107   : > { %9520 = vmatmul.msk.bf16.vlgmr.msrb.gmra.mxu3 %vm340_vm2, %v9512_v23  ;;  %1095 = vmatpush.bf16.msrb.mxu1 %v1015_v39 }
 0x108   : > { %1108 = vmatpush.bf16.msrb.mxu2 %v1018_v40  ;;  %1121 = vmatpush.bf16.msrb.mxu3 %v1021_v41 }
 0x109   : > { %1979 = vrot.lane.b32.xlu1 %v10121_v12, %s10030_s6  ;;  %1977 = vrot.lane.b32.xlu0 %v10111_v7, %s10030_s6  ;;  %v1146_v45 = vpop.permute.xlu1 %1145 }
 0x10a   : > { %1981 = vrot.lane.b32.xlu2 %v10109_v6, %s10030_s6  ;;  %v1144_v46 = vpop.permute.xlu0 %1143  ;;  %v1160_v4 = vsel %vm1155_vm7, %v1146_v45, %v1148_v58  ;;  %v1316_v47 = vpop.permute.xlu2 %1315 }
 0x10b   : > { %v1158_v52 = vsel %vm1155_vm7, %v1142_v44, %v1144_v46  ;;  %v1159_v53 = vsel %vm1155_vm7, %v1144_v46, %v1146_v45  ;;  %v1180_v16 = vsel %vm344_vm1, %v1160_v4, 0 }
 0x10c   : > { %v1174_v56 = vsel %vm344_vm1, %v1158_v52, 0  ;;  %v1177_v57 = vsel %vm344_vm1, %v1159_v53, 0 }
 0x111   : > { %1985 = vrot.lane.b32.xlu1 %v10113_v8, %s10030_s6  ;;  %1983 = vrot.lane.b32.xlu0 %v10123_v13, %s10030_s6  ;;  %v1152_v63 = vpop.permute.xlu1 %1151 }
 0x112   : > { %v10445_v49 = vpop.f32.mrf.mxu0  ;;  %v10447_v50 = vpop.f32.mrf.mxu1  ;;  %1987 = vrot.lane.b32.xlu2 %v10126_v15, %s10030_s6  ;;  %v1163_v14 = vsel %vm1155_vm7, %v1152_v63, %v1154_v1 }
 0x113   : > { %v1150_v0 = vpop.permute.xlu0 %1149  ;;  %v1189_v19 = vsel %vm344_vm1, %v1163_v14, 0 }
 0x114   : > { %v1161_v5 = vsel %vm1155_vm7, %v1148_v58, %v1150_v0  ;;  %v1162_v11 = vsel %vm1155_vm7, %v1150_v0, %v1152_v63 }
 0x115   : > { %9522 = vmatmul.msk.bf16.vlgmr.msra.gmra.mxu0 %vm340_vm2, %v9521_v51  ;;  %9523 = vmatmul.msk.bf16.vlgmr.msra.gmra.mxu1 %vm340_vm2, %v9521_v51  ;;  %v1183_v17 = vsel %vm344_vm1, %v1161_v5, 0  ;;  %v1186_v18 = vsel %vm344_vm1, %v1162_v11, 0 }
 0x116   : > { %9524 = vmatmul.msk.bf16.vlgmr.msra.gmra.mxu2 %vm340_vm2, %v9521_v51  ;;  %1198 = vmatpush.bf16.msra.mxu0 %v1168_v54 }
 0x117   : > { %9525 = vmatmul.msk.bf16.vlgmr.msra.gmra.mxu3 %vm340_vm2, %v9521_v51  ;;  %1211 = vmatpush.bf16.msra.mxu1 %v1171_v55 }
 0x118   : > { %1224 = vmatpush.bf16.msra.mxu2 %v1174_v56  ;;  %1237 = vmatpush.bf16.msra.mxu3 %v1177_v57  ;;  %v1322_v56 = vpop.permute.xlu2 %1321 }
 0x119   : > { %v10464_v59 = vpop.f32.mrf.mxu2  ;;  %1989 = vrot.lane.b32.xlu0 %v10135_v20, %s10030_s6  ;;  %1991 = vrot.lane.b32.xlu1 %v10137_v21, %s10030_s6  ;;  %v1308_v23 = vpop.permute.xlu1 %1307 }
 0x11a   : > { %v10466_v60 = vpop.f32.mrf.mxu3  ;;  %v380_v61 = vpop.f32.mrf.mxu0  ;;  %1993 = vrot.lane.b32.xlu2 %v10139_v22, %s10030_s6  ;;  %v1325_v35 = vsel %vm1323_vm8, %v1308_v23, %v1310_v29 }
 0x11b   : > { %v393_v62 = vpop.f32.mrf.mxu1  ;;  %v1306_v24 = vpop.permute.xlu0 %1305  ;;  %v1339_v44 = vsel %vm344_vm1, %v1325_v35, 0 }
 0x11c   : > { %v1324_v34 = vsel %vm1323_vm8, %v1306_v24, %v1308_v23 }
 0x11d   : > { %v1336_v43 = vsel %vm344_vm1, %v1324_v34, 0 }
 0x120   : > { %v1478_v23 = vpop.permute.xlu2 %1477 }
 0x121   : > { %v406_v2 = vpop.f32.mrf.mxu2  ;;  %2147 = vrot.lane.b32.xlu1 %v10121_v12, %s10031_s14  ;;  %2145 = vrot.lane.b32.xlu0 %v10111_v7, %s10031_s14  ;;  %v1314_v30 = vpop.permute.xlu1 %1313 }
 0x122   : > { %v419_v3 = vpop.f32.mrf.mxu3  ;;  %v10480_v9 = vpop.f32.mrf.mxu0  ;;  %2149 = vrot.lane.b32.xlu2 %v10109_v6, %s10031_s14  ;;  %v1328_v61 = vsel %vm1323_vm8, %v1314_v30, %v1316_v47 }
 0x123   : > { %v10482_v10 = vpop.f32.mrf.mxu1  ;;  %v1312_v31 = vpop.permute.xlu0 %1311  ;;  %v1348_v2 = vsel %vm344_vm1, %v1328_v61, 0 }
 0x124   : > { %v1326_v39 = vsel %vm1323_vm8, %v1310_v29, %v1312_v31  ;;  %v1327_v40 = vsel %vm1323_vm8, %v1312_v31, %v1314_v30 }
 0x125   : > { %9526 = vmatmul.msk.bf16.vlgmr.msrb.gmra.mxu0 %vm340_vm2, %v9521_v51  ;;  %9527 = vmatmul.msk.bf16.vlgmr.msrb.gmra.mxu1 %vm340_vm2, %v9521_v51  ;;  %v1342_v45 = vsel %vm344_vm1, %v1326_v39, 0  ;;  %v1345_v46 = vsel %vm344_vm1, %v1327_v40, 0 }
 0x126   : > { %9528 = vmatmul.msk.bf16.vlgmr.msrb.gmra.mxu2 %vm340_vm2, %v9521_v51  ;;  %1250 = vmatpush.bf16.msrb.mxu0 %v1180_v16 }
 0x127   : > { %9529 = vmatmul.msk.bf16.vlgmr.msrb.gmra.mxu3 %vm340_vm2, %v9521_v51  ;;  %1263 = vmatpush.bf16.msrb.mxu1 %v1183_v17 }
 0x128   : > { %1276 = vmatpush.bf16.msrb.mxu2 %v1186_v18  ;;  %1289 = vmatpush.bf16.msrb.mxu3 %v1189_v19 }
 0x129   : > { %v10496_v25 = vpop.f32.mrf.mxu2  ;;  %2153 = vrot.lane.b32.xlu1 %v10113_v8, %s10031_s14  ;;  %2151 = vrot.lane.b32.xlu0 %v10123_v13, %s10031_s14  ;;  %v1320_v54 = vpop.permute.xlu1 %1319 }
 0x12a   : > { %v10498_v26 = vpop.f32.mrf.mxu3  ;;  %v432_v27 = vpop.f32.mrf.mxu0  ;;  %2155 = vrot.lane.b32.xlu2 %v10126_v15, %s10031_s14  ;;  %v1331_v63 = vsel %vm1323_vm8, %v1320_v54, %v1322_v56 }
 0x12b   : > { %v445_v28 = vpop.f32.mrf.mxu1  ;;  %v1318_v55 = vpop.permute.xlu0 %1317  ;;  %v1357_v5 = vsel %vm344_vm1, %v1331_v63, 0 }
 0x12c   : > { %v1330_v62 = vsel %vm1323_vm8, %v1318_v55, %v1320_v54 }
 0x12d   : > { %v1354_v4 = vsel %vm344_vm1, %v1330_v62, 0 }
 0x131   : > { %v458_v32 = vpop.f32.mrf.mxu2  ;;  %2157 = vrot.lane.b32.xlu0 %v10135_v20, %s10031_s14  ;;  %2159 = vrot.lane.b32.xlu1 %v10137_v21, %s10031_s14 }
 0x132   : > { %v471_v33 = vpop.f32.mrf.mxu3  ;;  %v536_v36 = vpop.f32.mrf.mxu0  ;;  %2161 = vrot.lane.b32.xlu2 %v10139_v22, %s10031_s14 }
 0x133   : > { %v549_v37 = vpop.f32.mrf.mxu1  ;;  %v10520_v41 = vadd.f32 %v536_v36, %v10445_v49  ;;  %v1474_v11 = vpop.permute.xlu0 %1473 }
 0x134   : > { %v10523_v42 = vadd.f32 %v549_v37, %v10447_v50 }
 0x135   : > { %9531 = vmatmul.msk.bf16.vlgmr.msra.gmra.mxu0 %vm340_vm2, %v9530_v38  ;;  %9532 = vmatmul.msk.bf16.vlgmr.msra.gmra.mxu1 %vm340_vm2, %v9530_v38 }
 0x136   : > { %9533 = vmatmul.msk.bf16.vlgmr.msra.gmra.mxu2 %vm340_vm2, %v9530_v38  ;;  %1366 = vmatpush.bf16.msra.mxu0 %v1336_v43 }
 0x137   : > { %9534 = vmatmul.msk.bf16.vlgmr.msra.gmra.mxu3 %vm340_vm2, %v9530_v38  ;;  %1379 = vmatpush.bf16.msra.mxu1 %v1339_v44 }
 0x138   : > { %1392 = vmatpush.bf16.msra.mxu2 %v1342_v45  ;;  %1405 = vmatpush.bf16.msra.mxu3 %v1345_v46 }
 0x139   : > { %v562_v48 = vpop.f32.mrf.mxu2  ;;  %2315 = vrot.lane.b32.xlu1 %v10121_v12, %s10032_s18  ;;  %2313 = vrot.lane.b32.xlu0 %v10111_v7, %s10032_s18  ;;  %v1329_v7 = vsel %vm1323_vm8, %v1316_v47, %v1318_v55 }
 0x13a   : > { %v575_v49 = vpop.f32.mrf.mxu3  ;;  %v10538_v50 = vadd.f32 %v562_v48, %v10464_v59  ;;  %v538_v52 = vpop.f32.mrf.mxu0  ;;  %2317 = vrot.lane.b32.xlu2 %v10109_v6, %s10032_s18  ;;  %v1351_v3 = vsel %vm344_vm1, %v1329_v7, 0 }
 0x13b   : > { %v10541_v51 = vadd.f32 %v575_v49, %v10466_v60  ;;  %v551_v53 = vpop.f32.mrf.mxu1  ;;  %v1480_v27 = vpop.permute.xlu0 %1479 }
 0x13c   : > { %v1494_v33 = vsel %vm1491_vm9, %v1478_v23, %v1480_v27 }
 0x13d   : > { %v1510_v39 = vsel %vm344_vm1, %v1494_v33, 0 }
 0x141   : > { %v564_v57 = vpop.f32.mrf.mxu2  ;;  %2321 = vrot.lane.b32.xlu1 %v10113_v8, %s10032_s18  ;;  %2319 = vrot.lane.b32.xlu0 %v10123_v13, %s10032_s18 }
 0x142   : > { %v577_v58 = vpop.f32.mrf.mxu3  ;;  %v588_v59 = vpop.f32.mrf.mxu0  ;;  %2323 = vrot.lane.b32.xlu2 %v10126_v15, %s10032_s18 }
 0x143   : > { %v601_v60 = vpop.f32.mrf.mxu1  ;;  %v10556_v0 = vadd.f32 %v588_v59, %v10480_v9  ;;  %v1476_v9 = vpop.permute.xlu1 %1475 }
 0x144   : > { %v10559_v1 = vadd.f32 %v601_v60, %v10482_v10  ;;  %v1492_v30 = vsel %vm1491_vm9, %v1474_v11, %v1476_v9  ;;  %v1493_v31 = vsel %vm1491_vm9, %v1476_v9, %v1478_v23  ;;  %v1486_v49 = vpop.permute.xlu0 %1485 }
 0x145   : > { %9535 = vmatmul.msk.bf16.vlgmr.msrb.gmra.mxu0 %vm340_vm2, %v9530_v38  ;;  %9536 = vmatmul.msk.bf16.vlgmr.msrb.gmra.mxu1 %vm340_vm2, %v9530_v38  ;;  %v1504_v37 = vsel %vm344_vm1, %v1492_v30, 0 }
 0x146   : > { %9537 = vmatmul.msk.bf16.vlgmr.msrb.gmra.mxu2 %vm340_vm2, %v9530_v38  ;;  %1418 = vmatpush.bf16.msrb.mxu0 %v1348_v2 }
 0x147   : > { %9538 = vmatmul.msk.bf16.vlgmr.msrb.gmra.mxu3 %vm340_vm2, %v9530_v38  ;;  %1431 = vmatpush.bf16.msrb.mxu1 %v1351_v3  ;;  %v1507_v38 = vsel %vm344_vm1, %v1493_v31, 0 }
 0x148   : > { %1444 = vmatpush.bf16.msrb.mxu2 %v1354_v4  ;;  %1457 = vmatpush.bf16.msrb.mxu3 %v1357_v5 }
 0x149   : > { %v614_v10 = vpop.f32.mrf.mxu2  ;;  %2325 = vrot.lane.b32.xlu0 %v10135_v20, %s10032_s18  ;;  %2327 = vrot.lane.b32.xlu1 %v10137_v21, %s10032_s18 }
 0x14a   : > { %v627_v14 = vpop.f32.mrf.mxu3  ;;  %v10574_v16 = vadd.f32 %v614_v10, %v10496_v25  ;;  %v590_v18 = vpop.f32.mrf.mxu0  ;;  %2329 = vrot.lane.b32.xlu2 %v10139_v22, %s10032_s18 }
 0x14b   : > { %v10577_v17 = vadd.f32 %v627_v14, %v10498_v26  ;;  %v603_v19 = vpop.f32.mrf.mxu1  ;;  %v1482_v24 = vpop.permute.xlu1 %1481  ;;  %v9539_v26 = vld [vmem:[%s13787_s1 + $0x18] sm:$0xf] }
 0x14c   : > { %v1495_v34 = vsel %vm1491_vm9, %v1480_v27, %v1482_v24 }
 0x14d   : > { %v1513_v40 = vsel %vm344_vm1, %v1495_v34, 0 }
 0x151   : > { %v616_v28 = vpop.f32.mrf.mxu2  ;;  %2626 = vrot.lane.b32.xlu1 %v10109_v6, %s10033_s24  ;;  %2624 = vrot.lane.b32.xlu0 %v10121_v12, %s10033_s24 }
 0x152   : > { %v629_v29 = vpop.f32.mrf.mxu3  ;;  %v696_v25 = vpop.f32.mrf.mxu0  ;;  %2628 = vrot.lane.b32.xlu2 %v10123_v13, %s10033_s24 }
 0x153   : > { %v709_v32 = vpop.f32.mrf.mxu1  ;;  %v10589_v35 = vadd.f32 %v696_v25, %v10520_v41  ;;  %v1484_v41 = vpop.permute.xlu2 %1483 }
 0x154   : > { %v10592_v36 = vadd.f32 %v709_v32, %v10523_v42  ;;  %v1488_v48 = vpop.permute.xlu1 %1487  ;;  %v1496_v55 = vsel %vm1491_vm9, %v1482_v24, %v1484_v41 }
 0x155   : > { %9540 = vmatmul.msk.bf16.vlgmr.msra.gmra.mxu0 %vm340_vm2, %v9539_v26  ;;  %9541 = vmatmul.msk.bf16.vlgmr.msra.gmra.mxu1 %vm340_vm2, %v9539_v26  ;;  %v1498_v57 = vsel %vm1491_vm9, %v1486_v49, %v1488_v48  ;;  %v1516_v59 = vsel %vm344_vm1, %v1496_v55, 0 }
 0x156   : > { %9542 = vmatmul.msk.bf16.vlgmr.msra.gmra.mxu2 %vm340_vm2, %v9539_v26  ;;  %1534 = vmatpush.bf16.msra.mxu0 %v1504_v37  ;;  %v1522_v62 = vsel %vm344_vm1, %v1498_v57, 0 }
 0x157   : > { %9543 = vmatmul.msk.bf16.vlgmr.msra.gmra.mxu3 %vm340_vm2, %v9539_v26  ;;  %1547 = vmatpush.bf16.msra.mxu1 %v1507_v38 }
 0x158   : > { %1560 = vmatpush.bf16.msra.mxu2 %v1510_v39  ;;  %1573 = vmatpush.bf16.msra.mxu3 %v1513_v40 }
 0x159   : > { %v722_v42 = vpop.f32.mrf.mxu2  ;;  %2632 = vrot.lane.b32.xlu1 %v10126_v15, %s10033_s24  ;;  %2630 = vrot.lane.b32.xlu0 %v10113_v8, %s10033_s24 }
 0x15a   : > { %v735_v43 = vpop.f32.mrf.mxu3  ;;  %v10609_v44 = vadd.f32 %v722_v42, %v10538_v50  ;;  %v698_v46 = vpop.f32.mrf.mxu0  ;;  %v1497_v50 = vsel %vm1491_vm9, %v1484_v41, %v1486_v49  ;;  %2634 = vrot.lane.b32.xlu2 %v10135_v20, %s10033_s24 }
 0x15b   : > { %v10612_v45 = vadd.f32 %v735_v43, %v10541_v51  ;;  %v711_v47 = vpop.f32.mrf.mxu1  ;;  %v1490_v52 = vpop.permute.xlu2 %1489  ;;  %v1519_v60 = vsel %vm344_vm1, %v1497_v50, 0 }
 0x15c   : > { %v1499_v58 = vsel %vm1491_vm9, %v1488_v48, %v1490_v52 }
 0x15d   : > { %v1525_v63 = vsel %vm344_vm1, %v1499_v58, 0 }
 0x161   : > { %v724_v53 = vpop.f32.mrf.mxu2  ;;  %2636 = vrot.lane.b32.xlu0 %v10137_v21, %s10033_s24  ;;  %2638 = vrot.lane.b32.xlu1 %v10139_v22, %s10033_s24 }
 0x162   : > { %v737_v54 = vpop.f32.mrf.mxu3  ;;  %v748_v51 = vpop.f32.mrf.mxu0 }
 0x163   : > { %v761_v56 = vpop.f32.mrf.mxu1  ;;  %v10625_v61 = vadd.f32 %v748_v51, %v10556_v0  ;;  %v1644_v0 = vpop.permute.xlu1 %1643 }
 0x164   : > { %v10628_v7 = vadd.f32 %v761_v56, %v10559_v1  ;;  %v1642_v1 = vpop.permute.xlu0 %1641  ;;  %v1646_v10 = vpop.permute.xlu2 %1645 }
 0x165   : > { %9544 = vmatmul.msk.bf16.vlgmr.msrb.gmra.mxu0 %vm340_vm2, %v9539_v26  ;;  %9545 = vmatmul.msk.bf16.vlgmr.msrb.gmra.mxu1 %vm340_vm2, %v9539_v26  ;;  %v1660_v24 = vsel %vm1659_vm10, %v1642_v1, %v1644_v0  ;;  %v1661_v27 = vsel %vm1659_vm10, %v1644_v0, %v1646_v10 }
 0x166   : > { %9546 = vmatmul.msk.bf16.vlgmr.msrb.gmra.mxu2 %vm340_vm2, %v9539_v26  ;;  %1586 = vmatpush.bf16.msrb.mxu0 %v1516_v59  ;;  %v1672_v32 = vsel %vm344_vm1, %v1660_v24, 0 }
 0x167   : > { %9547 = vmatmul.msk.bf16.vlgmr.msrb.gmra.mxu3 %vm340_vm2, %v9539_v26  ;;  %1599 = vmatpush.bf16.msrb.mxu1 %v1519_v60  ;;  %v1675_v26 = vsel %vm344_vm1, %v1661_v27, 0 }
 0x168   : > { %1612 = vmatpush.bf16.msrb.mxu2 %v1522_v62  ;;  %1625 = vmatpush.bf16.msrb.mxu3 %v1525_v63 }
 0x169   : > { %v774_v2 = vpop.f32.mrf.mxu2  ;;  %2794 = vrot.lane.b32.xlu1 %v10109_v6, %s10034_s29  ;;  %2792 = vrot.lane.b32.xlu0 %v10121_v12, %s10034_s29 }
 0x16a   : > { %v787_v3 = vpop.f32.mrf.mxu3  ;;  %v10643_v4 = vadd.f32 %v774_v2, %v10574_v16  ;;  %v750_v9 = vpop.f32.mrf.mxu0  ;;  %v9548_v16 = vld [vmem:[%s13787_s1 + $0x1c] sm:$0xf] }
 0x16b   : > { %v10646_v5 = vadd.f32 %v787_v3, %v10577_v17  ;;  %v763_v11 = vpop.f32.mrf.mxu1  ;;  %v1650_v14 = vpop.permute.xlu1 %1649 }
 0x16c   : > { %v1648_v18 = vpop.permute.xlu0 %1647 }
 0x16d   : > { %v1662_v17 = vsel %vm1659_vm10, %v1646_v10, %v1648_v18  ;;  %v1663_v30 = vsel %vm1659_vm10, %v1648_v18, %v1650_v14 }
 0x16e   : > { %v1678_v33 = vsel %vm344_vm1, %v1662_v17, 0  ;;  %v1681_v34 = vsel %vm344_vm1, %v1663_v30, 0 }
 0x171   : > { %v776_v19 = vpop.f32.mrf.mxu2  ;;  %2800 = vrot.lane.b32.xlu1 %v10126_v15, %s10034_s29  ;;  %2798 = vrot.lane.b32.xlu0 %v10113_v8, %s10034_s29 }
 0x172   : > { %v789_v23 = vpop.f32.mrf.mxu3  ;;  %v864_v28 = vpop.f32.mrf.mxu0 }
 0x173   : > { %v877_v29 = vpop.f32.mrf.mxu1  ;;  %v10656_v31 = vadd.f32 %v864_v28, %v10589_v35  ;;  %v1652_v35 = vpop.permute.xlu2 %1651 }
 0x174   : > { %v10659_v25 = vadd.f32 %v877_v29, %v10592_v36  ;;  %v1656_v42 = vpop.permute.xlu1 %1655  ;;  %v1654_v43 = vpop.permute.xlu0 %1653  ;;  %v1664_v49 = vsel %vm1659_vm10, %v1650_v14, %v1652_v35 }
 0x175   : > { %9549 = vmatmul.msk.bf16.vlgmr.msra.gmra.mxu0 %vm340_vm2, %v9548_v16  ;;  %9550 = vmatmul.msk.bf16.vlgmr.msra.gmra.mxu1 %vm340_vm2, %v9548_v16  ;;  %v1666_v53 = vsel %vm1659_vm10, %v1654_v43, %v1656_v42  ;;  %v1684_v51 = vsel %vm344_vm1, %v1664_v49, 0 }
 0x176   : > { %9551 = vmatmul.msk.bf16.vlgmr.msra.gmra.mxu2 %vm340_vm2, %v9548_v16  ;;  %1702 = vmatpush.bf16.msra.mxu0 %v1672_v32  ;;  %v1690_v57 = vsel %vm344_vm1, %v1666_v53, 0 }
 0x177   : > { %9552 = vmatmul.msk.bf16.vlgmr.msra.gmra.mxu3 %vm340_vm2, %v9548_v16  ;;  %1715 = vmatpush.bf16.msra.mxu1 %v1675_v26 }
 0x178   : > { %1728 = vmatpush.bf16.msra.mxu2 %v1678_v33  ;;  %1741 = vmatpush.bf16.msra.mxu3 %v1681_v34 }
 0x179   : > { %v890_v36 = vpop.f32.mrf.mxu2  ;;  %2804 = vrot.lane.b32.xlu0 %v10137_v21, %s10034_s29  ;;  %2806 = vrot.lane.b32.xlu1 %v10139_v22, %s10034_s29 }
 0x17a   : > { %v903_v37 = vpop.f32.mrf.mxu3  ;;  %v10674_v38 = vadd.f32 %v890_v36, %v10609_v44  ;;  %v866_v40 = vpop.f32.mrf.mxu0  ;;  %v1665_v44 = vsel %vm1659_vm10, %v1652_v35, %v1654_v43 }
 0x17b   : > { %v10677_v39 = vadd.f32 %v903_v37, %v10612_v45  ;;  %v879_v41 = vpop.f32.mrf.mxu1  ;;  %v1658_v46 = vpop.permute.xlu2 %1657  ;;  %v1687_v56 = vsel %vm344_vm1, %v1665_v44, 0 }
 0x17c   : > { %v1667_v54 = vsel %vm1659_vm10, %v1656_v42, %v1658_v46 }
 0x17d   : > { %v1693_v58 = vsel %vm344_vm1, %v1667_v54, 0 }
 0x181   : > { %v892_v47 = vpop.f32.mrf.mxu2  ;;  %2962 = vrot.lane.b32.xlu1 %v10109_v6, %s10035_s20  ;;  %2960 = vrot.lane.b32.xlu0 %v10121_v12, %s10035_s20 }
 0x182   : > { %v905_v48 = vpop.f32.mrf.mxu3  ;;  %v916_v52 = vpop.f32.mrf.mxu0 }
 0x183   : > { %v929_v45 = vpop.f32.mrf.mxu1  ;;  %v10688_v55 = vadd.f32 %v916_v52, %v10625_v61  ;;  %v1812_v61 = vpop.permute.xlu1 %1811 }
 0x184   : > { %v10691_v50 = vadd.f32 %v929_v45, %v10628_v7  ;;  %v1810_v7 = vpop.permute.xlu0 %1809  ;;  %v1814_v2 = vpop.permute.xlu2 %1813 }
 0x185   : > { %9553 = vmatmul.msk.bf16.vlgmr.msrb.gmra.mxu0 %vm340_vm2, %v9548_v16  ;;  %9554 = vmatmul.msk.bf16.vlgmr.msrb.gmra.mxu1 %vm340_vm2, %v9548_v16  ;;  %v1828_v14 = vsel %vm1827_vm11, %v1810_v7, %v1812_v61  ;;  %v1829_v18 = vsel %vm1827_vm11, %v1812_v61, %v1814_v2 }
 0x186   : > { %9555 = vmatmul.msk.bf16.vlgmr.msrb.gmra.mxu2 %vm340_vm2, %v9548_v16  ;;  %1754 = vmatpush.bf16.msrb.mxu0 %v1684_v51  ;;  %v1840_v29 = vsel %vm344_vm1, %v1828_v14, 0 }
 0x187   : > { %9556 = vmatmul.msk.bf16.vlgmr.msrb.gmra.mxu3 %vm340_vm2, %v9548_v16  ;;  %1767 = vmatpush.bf16.msrb.mxu1 %v1687_v56  ;;  %v1843_v16 = vsel %vm344_vm1, %v1829_v18, 0 }
 0x188   : > { %1780 = vmatpush.bf16.msrb.mxu2 %v1690_v57  ;;  %1793 = vmatpush.bf16.msrb.mxu3 %v1693_v58 }
 0x189   : > { %v942_v59 = vpop.f32.mrf.mxu2  ;;  %2968 = vrot.lane.b32.xlu1 %v10126_v15, %s10035_s20  ;;  %2966 = vrot.lane.b32.xlu0 %v10113_v8, %s10035_s20 }
 0x18a   : > { %v955_v60 = vpop.f32.mrf.mxu3  ;;  %v10706_v62 = vadd.f32 %v942_v59, %v10643_v4  ;;  %v918_v0 = vpop.f32.mrf.mxu0  ;;  %v9557_v4 = vld [vmem:[%s13787_s1 + $0x20] sm:$0xf] }
 0x18b   : > { %v10709_v63 = vadd.f32 %v955_v60, %v10646_v5  ;;  %v931_v1 = vpop.f32.mrf.mxu1  ;;  %v1818_v3 = vpop.permute.xlu1 %1817 }
 0x18c   : > { %v1816_v9 = vpop.permute.xlu0 %1815 }
 0x18d   : > { %v1830_v5 = vsel %vm1827_vm11, %v1814_v2, %v1816_v9  ;;  %v1831_v24 = vsel %vm1827_vm11, %v1816_v9, %v1818_v3 }
 0x18e   : > { %v1846_v17 = vsel %vm344_vm1, %v1830_v5, 0  ;;  %v1849_v30 = vsel %vm344_vm1, %v1831_v24, 0 }
 0x191   : > { %v944_v11 = vpop.f32.mrf.mxu2  ;;  %2972 = vrot.lane.b32.xlu0 %v10137_v21, %s10035_s20  ;;  %2974 = vrot.lane.b32.xlu1 %v10139_v22, %s10035_s20 }
 0x192   : > { %v957_v10 = vpop.f32.mrf.mxu3  ;;  %v1032_v19 = vpop.f32.mrf.mxu0 }
 0x193   : > { %v1045_v23 = vpop.f32.mrf.mxu1  ;;  %v10719_v27 = vadd.f32 %v1032_v19, %v10656_v31  ;;  %v1820_v31 = vpop.permute.xlu2 %1819 }
 0x194   : > { %v10722_v28 = vadd.f32 %v1045_v23, %v10659_v25  ;;  %v1824_v36 = vpop.permute.xlu1 %1823  ;;  %v1822_v37 = vpop.permute.xlu0 %1821  ;;  %v1832_v43 = vsel %vm1827_vm11, %v1818_v3, %v1820_v31 }
 0x195   : > { %9558 = vmatmul.msk.bf16.vlgmr.msra.gmra.mxu0 %vm340_vm2, %v9557_v4  ;;  %9559 = vmatmul.msk.bf16.vlgmr.msra.gmra.mxu1 %vm340_vm2, %v9557_v4  ;;  %v1834_v47 = vsel %vm1827_vm11, %v1822_v37, %v1824_v36  ;;  %v1852_v52 = vsel %vm344_vm1, %v1832_v43, 0 }
 0x196   : > { %9560 = vmatmul.msk.bf16.vlgmr.msra.gmra.mxu2 %vm340_vm2, %v9557_v4  ;;  %1870 = vmatpush.bf16.msra.mxu0 %v1840_v29  ;;  %v1858_v53 = vsel %vm344_vm1, %v1834_v47, 0 }
 0x197   : > { %9561 = vmatmul.msk.bf16.vlgmr.msra.gmra.mxu3 %vm340_vm2, %v9557_v4  ;;  %1883 = vmatpush.bf16.msra.mxu1 %v1843_v16 }
 0x198   : > { %1896 = vmatpush.bf16.msra.mxu2 %v1846_v17  ;;  %1909 = vmatpush.bf16.msra.mxu3 %v1849_v30 }
 0x199   : > { %v1058_v25 = vpop.f32.mrf.mxu2  ;;  %3130 = vrot.lane.b32.xlu1 %v10109_v6, %s13794_s28  ;;  %3128 = vrot.lane.b32.xlu0 %v10121_v12, %s13794_s28 }
 0x19a   : > { %v1071_v32 = vpop.f32.mrf.mxu3  ;;  %v10737_v26 = vadd.f32 %v1058_v25, %v10674_v38  ;;  %v1034_v34 = vpop.f32.mrf.mxu0  ;;  %v1833_v38 = vsel %vm1827_vm11, %v1820_v31, %v1822_v37 }
 0x19b   : > { %v10740_v33 = vadd.f32 %v1071_v32, %v10677_v39  ;;  %v1047_v35 = vpop.f32.mrf.mxu1  ;;  %v1826_v40 = vpop.permute.xlu2 %1825  ;;  %v1855_v45 = vsel %vm344_vm1, %v1833_v38, 0 }
 0x19c   : > { %v1835_v48 = vsel %vm1827_vm11, %v1824_v36, %v1826_v40 }
 0x19d   : > { %v1861_v54 = vsel %vm344_vm1, %v1835_v48, 0 }
 0x1a1   : > { %v1060_v41 = vpop.f32.mrf.mxu2  ;;  %3136 = vrot.lane.b32.xlu1 %v10126_v15, %s13794_s28  ;;  %3134 = vrot.lane.b32.xlu0 %v10113_v8, %s13794_s28 }
 0x1a2   : > { %v1073_v42 = vpop.f32.mrf.mxu3  ;;  %v1084_v46 = vpop.f32.mrf.mxu0 }
 0x1a3   : > { %v1097_v39 = vpop.f32.mrf.mxu1  ;;  %v10751_v49 = vadd.f32 %v1084_v46, %v10688_v55  ;;  %v1980_v55 = vpop.permute.xlu1 %1979 }
 0x1a4   : > { %v10754_v44 = vadd.f32 %v1097_v39, %v10691_v50  ;;  %v1978_v50 = vpop.permute.xlu0 %1977  ;;  %v1982_v59 = vpop.permute.xlu2 %1981 }
 0x1a5   : > { %9562 = vmatmul.msk.bf16.vlgmr.msrb.gmra.mxu0 %vm340_vm2, %v9557_v4  ;;  %9563 = vmatmul.msk.bf16.vlgmr.msrb.gmra.mxu1 %vm340_vm2, %v9557_v4  ;;  %v1996_v3 = vsel %vm1995_vm12, %v1978_v50, %v1980_v55  ;;  %v1997_v9 = vsel %vm1995_vm12, %v1980_v55, %v1982_v59 }
 0x1a6   : > { %9564 = vmatmul.msk.bf16.vlgmr.msrb.gmra.mxu2 %vm340_vm2, %v9557_v4  ;;  %1922 = vmatpush.bf16.msrb.mxu0 %v1852_v52  ;;  %v2008_v23 = vsel %vm344_vm1, %v1996_v3, 0 }
 0x1a7   : > { %9565 = vmatmul.msk.bf16.vlgmr.msrb.gmra.mxu3 %vm340_vm2, %v9557_v4  ;;  %1935 = vmatpush.bf16.msrb.mxu1 %v1855_v45  ;;  %v2011_v4 = vsel %vm344_vm1, %v1997_v9, 0 }
 0x1a8   : > { %1948 = vmatpush.bf16.msrb.mxu2 %v1858_v53  ;;  %1961 = vmatpush.bf16.msrb.mxu3 %v1861_v54 }
 0x1a9   : > { %v1110_v51 = vpop.f32.mrf.mxu2  ;;  %3140 = vrot.lane.b32.xlu0 %v10137_v21, %s13794_s28  ;;  %3142 = vrot.lane.b32.xlu1 %v10139_v22, %s13794_s28 }
 0x1aa   : > { %v1123_v56 = vpop.f32.mrf.mxu3  ;;  %v10769_v57 = vadd.f32 %v1110_v51, %v10706_v62  ;;  %v1086_v61 = vpop.f32.mrf.mxu0  ;;  %v9566_v62 = vld [vmem:[%s13787_s1 + $0x24] sm:$0xf] }
 0x1ab   : > { %v10772_v58 = vadd.f32 %v1123_v56, %v10709_v63  ;;  %v1099_v7 = vpop.f32.mrf.mxu1  ;;  %v1986_v60 = vpop.permute.xlu1 %1985 }
 0x1ac   : > { %v1984_v0 = vpop.permute.xlu0 %1983 }
 0x1ad   : > { %v1998_v63 = vsel %vm1995_vm12, %v1982_v59, %v1984_v0  ;;  %v1999_v14 = vsel %vm1995_vm12, %v1984_v0, %v1986_v60 }
 0x1ae   : > { %v2014_v5 = vsel %vm344_vm1, %v1998_v63, 0  ;;  %v2017_v24 = vsel %vm344_vm1, %v1999_v14, 0 }
 0x1b1   : > { %v1112_v1 = vpop.f32.mrf.mxu2  ;;  %3298 = vrot.lane.b32.xlu1 %v10109_v6, %s13797_s21  ;;  %3296 = vrot.lane.b32.xlu0 %v10121_v12, %s13797_s21 }
 0x1b2   : > { %v1125_v2 = vpop.f32.mrf.mxu3  ;;  %v1200_v11 = vpop.f32.mrf.mxu0 }
 0x1b3   : > { %v1213_v10 = vpop.f32.mrf.mxu1  ;;  %v10782_v18 = vadd.f32 %v1200_v11, %v10719_v27  ;;  %v1988_v27 = vpop.permute.xlu2 %1987 }
 0x1b4   : > { %v10785_v19 = vadd.f32 %v1213_v10, %v10722_v28  ;;  %v1992_v25 = vpop.permute.xlu1 %1991  ;;  %v1990_v32 = vpop.permute.xlu0 %1989  ;;  %v2000_v37 = vsel %vm1995_vm12, %v1986_v60, %v1988_v27 }
 0x1b5   : > { %9567 = vmatmul.msk.bf16.vlgmr.msra.gmra.mxu0 %vm340_vm2, %v9566_v62  ;;  %9568 = vmatmul.msk.bf16.vlgmr.msra.gmra.mxu1 %vm340_vm2, %v9566_v62  ;;  %v2002_v41 = vsel %vm1995_vm12, %v1990_v32, %v1992_v25  ;;  %v2020_v46 = vsel %vm344_vm1, %v2000_v37, 0  ;;  %v10011_v37 = vld [vmem:[%s10104_s30 + $0x20] sm:$0xff]  ;;  %s13862_s30 = smov 17  }
 0x1b6   : > { %9569 = vmatmul.msk.bf16.vlgmr.msra.gmra.mxu2 %vm340_vm2, %v9566_v62  ;;  %2038 = vmatpush.bf16.msra.mxu0 %v2008_v23  ;;  %v2026_v47 = vsel %vm344_vm1, %v2002_v41, 0 }
 0x1b7   : > { %9570 = vmatmul.msk.bf16.vlgmr.msra.gmra.mxu3 %vm340_vm2, %v9566_v62  ;;  %2051 = vmatpush.bf16.msra.mxu1 %v2011_v4 }
 0x1b8   : > { %2064 = vmatpush.bf16.msra.mxu2 %v2014_v5  ;;  %2077 = vmatpush.bf16.msra.mxu3 %v2017_v24 }
 0x1b9   : > { %v1226_v28 = vpop.f32.mrf.mxu2  ;;  %3304 = vrot.lane.b32.xlu1 %v10126_v15, %s13797_s21  ;;  %3302 = vrot.lane.b32.xlu0 %v10113_v8, %s13797_s21 }
 0x1ba   : > { %v1239_v29 = vpop.f32.mrf.mxu3  ;;  %v10800_v16 = vadd.f32 %v1226_v28, %v10737_v26  ;;  %v1202_v30 = vpop.f32.mrf.mxu0  ;;  %v2001_v26 = vsel %vm1995_vm12, %v1988_v27, %v1990_v32 }
 0x1bb   : > { %v10803_v17 = vadd.f32 %v1239_v29, %v10740_v33  ;;  %v1215_v31 = vpop.f32.mrf.mxu1  ;;  %v1994_v34 = vpop.permute.xlu2 %1993  ;;  %v2023_v39 = vsel %vm344_vm1, %v2001_v26, 0  ;;  %v2622_v26 = vunpack.c.h.b16 %v10011_v37 }
 0x1bc   : > { %v2003_v42 = vsel %vm1995_vm12, %v1992_v25, %v1994_v34 }
 0x1bd   : > { %v2029_v48 = vsel %vm344_vm1, %v2003_v42, 0 }
 0x1c1   : > { %v1228_v35 = vpop.f32.mrf.mxu2  ;;  %3308 = vrot.lane.b32.xlu0 %v10137_v21, %s13797_s21  ;;  %3310 = vrot.lane.b32.xlu1 %v10139_v22, %s13797_s21 }
 0x1c2   : > { %v1241_v36 = vpop.f32.mrf.mxu3  ;;  %v1252_v40 = vpop.f32.mrf.mxu0 }
 0x1c3   : > { %v1265_v33 = vpop.f32.mrf.mxu1  ;;  %v10814_v43 = vadd.f32 %v1252_v40, %v10751_v49  ;;  %v2148_v49 = vpop.permute.xlu1 %2147 }
 0x1c4   : > { %v10817_v38 = vadd.f32 %v1265_v33, %v10754_v44  ;;  %v2146_v44 = vpop.permute.xlu0 %2145  ;;  %v2150_v51 = vpop.permute.xlu2 %2149 }
 0x1c5   : > { %9571 = vmatmul.msk.bf16.vlgmr.msrb.gmra.mxu0 %vm340_vm2, %v9566_v62  ;;  %9572 = vmatmul.msk.bf16.vlgmr.msrb.gmra.mxu1 %vm340_vm2, %v9566_v62  ;;  %v2164_v60 = vsel %vm13822_vm13, %v2146_v44, %v2148_v49  ;;  %v2165_v0 = vsel %vm13822_vm13, %v2148_v49, %v2150_v51 }
 0x1c6   : > { %9573 = vmatmul.msk.bf16.vlgmr.msrb.gmra.mxu2 %vm340_vm2, %v9566_v62  ;;  %2090 = vmatpush.bf16.msrb.mxu0 %v2020_v46  ;;  %v2176_v10 = vsel %vm344_vm1, %v2164_v60, 0 }
 0x1c7   : > { %9574 = vmatmul.msk.bf16.vlgmr.msrb.gmra.mxu3 %vm340_vm2, %v9566_v62  ;;  %2103 = vmatpush.bf16.msrb.mxu1 %v2023_v39  ;;  %v2179_v62 = vsel %vm344_vm1, %v2165_v0, 0 }
 0x1c8   : > { %2116 = vmatpush.bf16.msrb.mxu2 %v2026_v47  ;;  %2129 = vmatpush.bf16.msrb.mxu3 %v2029_v48 }
 0x1c9   : > { %v1278_v52 = vpop.f32.mrf.mxu2  ;;  %3466 = vrot.lane.b32.xlu1 %v10109_v6, %s13800_s15  ;;  %3464 = vrot.lane.b32.xlu0 %v10121_v12, %s13800_s15 }
 0x1ca   : > { %v1291_v45 = vpop.f32.mrf.mxu3  ;;  %v10832_v53 = vadd.f32 %v1278_v52, %v10769_v57  ;;  %v1254_v55 = vpop.f32.mrf.mxu0  ;;  %v9575_v57 = vld [vmem:[%s13787_s1 + $0x28] sm:$0xf] }
 0x1cb   : > { %v10835_v54 = vadd.f32 %v1291_v45, %v10772_v58  ;;  %v1267_v50 = vpop.f32.mrf.mxu1  ;;  %v2154_v56 = vpop.permute.xlu1 %2153 }
 0x1cc   : > { %v2152_v61 = vpop.permute.xlu0 %2151 }
 0x1cd   : > { %v2166_v58 = vsel %vm13822_vm13, %v2150_v51, %v2152_v61  ;;  %v2167_v3 = vsel %vm13822_vm13, %v2152_v61, %v2154_v56 }
 0x1ce   : > { %v2182_v63 = vsel %vm344_vm1, %v2166_v58, 0  ;;  %v2185_v14 = vsel %vm344_vm1, %v2167_v3, 0 }
 0x1d1   : > { %v1280_v7 = vpop.f32.mrf.mxu2  ;;  %3472 = vrot.lane.b32.xlu1 %v10126_v15, %s13800_s15  ;;  %3470 = vrot.lane.b32.xlu0 %v10113_v8, %s13800_s15 }
 0x1d2   : > { %v1293_v59 = vpop.f32.mrf.mxu3  ;;  %v1368_v1 = vpop.f32.mrf.mxu0 }
 0x1d3   : > { %v1381_v2 = vpop.f32.mrf.mxu1  ;;  %v10845_v9 = vadd.f32 %v1368_v1, %v10782_v18  ;;  %v2156_v18 = vpop.permute.xlu2 %2155 }
 0x1d4   : > { %v10848_v11 = vadd.f32 %v1381_v2, %v10785_v19  ;;  %v2160_v28 = vpop.permute.xlu1 %2159  ;;  %v2158_v29 = vpop.permute.xlu0 %2157 }
 0x1d5   : > { %9576 = vmatmul.msk.bf16.vlgmr.msra.gmra.mxu0 %vm340_vm2, %v9575_v57  ;;  %9577 = vmatmul.msk.bf16.vlgmr.msra.gmra.mxu1 %vm340_vm2, %v9575_v57  ;;  %v2169_v32 = vsel %vm13822_vm13, %v2156_v18, %v2158_v29  ;;  %v2170_v35 = vsel %vm13822_vm13, %v2158_v29, %v2160_v28 }
 0x1d6   : > { %9578 = vmatmul.msk.bf16.vlgmr.msra.gmra.mxu2 %vm340_vm2, %v9575_v57  ;;  %2206 = vmatpush.bf16.msra.mxu0 %v2176_v10  ;;  %v2191_v42 = vsel %vm344_vm1, %v2169_v32, 0 }
 0x1d7   : > { %9579 = vmatmul.msk.bf16.vlgmr.msra.gmra.mxu3 %vm340_vm2, %v9575_v57  ;;  %2219 = vmatpush.bf16.msra.mxu1 %v2179_v62 }
 0x1d8   : > { %2232 = vmatpush.bf16.msra.mxu2 %v2182_v63  ;;  %2245 = vmatpush.bf16.msra.mxu3 %v2185_v14 }
 0x1d9   : > { %v1394_v19 = vpop.f32.mrf.mxu2  ;;  %3476 = vrot.lane.b32.xlu0 %v10137_v21, %s13800_s15  ;;  %3478 = vrot.lane.b32.xlu1 %v10139_v22, %s13800_s15 }
 0x1da   : > { %v1407_v23 = vpop.f32.mrf.mxu3  ;;  %v10863_v4 = vadd.f32 %v1394_v19, %v10800_v16  ;;  %v1370_v24 = vpop.f32.mrf.mxu0  ;;  %v2168_v16 = vsel %vm13822_vm13, %v2154_v56, %v2156_v18 }
 0x1db   : > { %v10866_v5 = vadd.f32 %v1407_v23, %v10803_v17  ;;  %v1383_v27 = vpop.f32.mrf.mxu1  ;;  %v2162_v30 = vpop.permute.xlu2 %2161  ;;  %v2188_v41 = vsel %vm344_vm1, %v2168_v16, 0 }
 0x1dc   : > { %v2171_v36 = vsel %vm13822_vm13, %v2160_v28, %v2162_v30  ;;  %v2316_v39 = vpop.permute.xlu1 %2315  ;;  %v2314_v47 = vpop.permute.xlu0 %2313 }
 0x1dd   : > { %v2197_v46 = vsel %vm344_vm1, %v2171_v36, 0  ;;  %v2332_v59 = vsel %vm13821_vm14, %v2314_v47, %v2316_v39 }
 0x1de   : > { %v2344_v3 = vsel %vm344_vm1, %v2332_v59, 0 }
 0x1e1   : > { %v1396_v31 = vpop.f32.mrf.mxu2  ;;  %3634 = vrot.lane.b32.xlu1 %v10109_v6, %s10039_s25  ;;  %3632 = vrot.lane.b32.xlu0 %v10121_v12, %s10039_s25 }
 0x1e2   : > { %v1409_v25 = vpop.f32.mrf.mxu3  ;;  %v1420_v17 = vpop.f32.mrf.mxu0 }
 0x1e3   : > { %v1433_v34 = vpop.f32.mrf.mxu1  ;;  %v10878_v40 = vadd.f32 %v1420_v17, %v10814_v43  ;;  %v2194_v43 = vsel %vm344_vm1, %v2170_v35, 0  ;;  %v2318_v50 = vpop.permute.xlu2 %2317 }
 0x1e4   : > { %v10881_v33 = vadd.f32 %v1433_v34, %v10817_v38  ;;  %v10893_v38 = vpack.c.b16 %v2622_v26, %v2622_v26  ;;  %v2322_v51 = vpop.permute.xlu1 %2321  ;;  %v2320_v56 = vpop.permute.xlu0 %2319  ;;  %v2333_v60 = vsel %vm13821_vm14, %v2316_v39, %v2318_v50 }
 0x1e5   : > { %9580 = vmatmul.msk.bf16.vlgmr.msrb.gmra.mxu0 %vm340_vm2, %v9575_v57  ;;  %9581 = vmatmul.msk.bf16.vlgmr.msrb.gmra.mxu1 %vm340_vm2, %v9575_v57  ;;  %v2334_v1 = vsel %vm13821_vm14, %v2318_v50, %v2320_v56  ;;  %v2335_v2 = vsel %vm13821_vm14, %v2320_v56, %v2322_v51  ;;  %v2347_v10 = vsel %vm344_vm1, %v2333_v60, 0  ;;  %v2491_v56 = vsel %vm344_vm1, %v10123_v13, 0 }
 0x1e6   : > { %9582 = vmatmul.msk.bf16.vlgmr.msrb.gmra.mxu2 %vm340_vm2, %v9575_v57  ;;  %2258 = vmatpush.bf16.msrb.mxu0 %v2188_v41 }
 0x1e7   : > { %9583 = vmatmul.msk.bf16.vlgmr.msrb.gmra.mxu3 %vm340_vm2, %v9575_v57  ;;  %2271 = vmatpush.bf16.msrb.mxu1 %v2191_v42 }
 0x1e8   : > { %2284 = vmatpush.bf16.msrb.mxu2 %v2194_v43  ;;  %2297 = vmatpush.bf16.msrb.mxu3 %v2197_v46 }
 0x1e9   : > { %v1446_v48 = vpop.f32.mrf.mxu2  ;;  %2640 = vrot.lane.b32.xlu2 %v10893_v38, %s10033_s24  ;;  %3640 = vrot.lane.b32.xlu1 %v10126_v15, %s10039_s25 }
 0x1ea   : > { %v1459_v49 = vpop.f32.mrf.mxu3  ;;  %v10900_v44 = vadd.f32 %v1446_v48, %v10832_v53  ;;  %v1422_v45 = vpop.f32.mrf.mxu0  ;;  %3638 = vrot.lane.b32.xlu0 %v10113_v8, %s10039_s25 }
 0x1eb   : > { %v10903_v52 = vadd.f32 %v1459_v49, %v10835_v54  ;;  %v1435_v55 = vpop.f32.mrf.mxu1  ;;  %v9584_v54 = vld [vmem:[%s13787_s1 + $0x2c] sm:$0xf]  ;;  %v2324_v62 = vpop.permute.xlu2 %2323 }
 0x1ec   : > { %v2326_v27 = vpop.permute.xlu0 %2325  ;;  %v2328_v29 = vpop.permute.xlu1 %2327  ;;  %v2336_v25 = vsel %vm13821_vm14, %v2322_v51, %v2324_v62  ;;  %v9593_v55 = vld [vmem:[%s13787_s1 + $0x30] sm:$0xf]  ;;  %v2488_v51 = vsel %vm344_vm1, %v10109_v6, 0 }
 0x1ed   : > { %v2338_v32 = vsel %vm13821_vm14, %v2326_v27, %v2328_v29  ;;  %v2356_v36 = vsel %vm344_vm1, %v2336_v25, 0 }
 0x1ee   : > { %v2362_v26 = vsel %vm344_vm1, %v2338_v32, 0 }
 0x1f1   : > { %v1448_v61 = vpop.f32.mrf.mxu2  ;;  %2796 = vrot.lane.b32.xlu2 %v10123_v13, %s10034_s29  ;;  %3646 = vrot.lane.b32.xlu1 %v10139_v22, %s10039_s25 }
 0x1f2   : > { %v1461_v7 = vpop.f32.mrf.mxu3  ;;  %v1536_v53 = vpop.f32.mrf.mxu0  ;;  %v2494_v61 = vsel %vm344_vm1, %v10113_v8, 0  ;;  %3644 = vrot.lane.b32.xlu0 %v10137_v21, %s10039_s25 }
 0x1f3   : > { %v1549_v0 = vpop.f32.mrf.mxu1  ;;  %v10915_v57 = vadd.f32 %v1536_v53, %v10845_v9  ;;  %v2350_v9 = vsel %vm344_vm1, %v2334_v1, 0  ;;  %v2330_v28 = vpop.permute.xlu2 %2329 }
 0x1f4   : > { %v10918_v58 = vadd.f32 %v1549_v0, %v10848_v11  ;;  %v2353_v11 = vsel %vm344_vm1, %v2335_v2, 0  ;;  %v2339_v17 = vsel %vm13821_vm14, %v2328_v29, %v2330_v28 }
 0x1f5   : > { %9585 = vmatmul.msk.bf16.vlgmr.msra.gmra.mxu0 %vm340_vm2, %v9584_v54  ;;  %9586 = vmatmul.msk.bf16.vlgmr.msra.gmra.mxu1 %vm340_vm2, %v9584_v54 }
 0x1f6   : > { %9587 = vmatmul.msk.bf16.vlgmr.msra.gmra.mxu2 %vm340_vm2, %v9584_v54  ;;  %2374 = vmatpush.bf16.msra.mxu0 %v2344_v3 }
 0x1f7   : > { %9588 = vmatmul.msk.bf16.vlgmr.msra.gmra.mxu3 %vm340_vm2, %v9584_v54  ;;  %2387 = vmatpush.bf16.msra.mxu1 %v2347_v10 }
 0x1f8   : > { %2400 = vmatpush.bf16.msra.mxu2 %v2350_v9  ;;  %2413 = vmatpush.bf16.msra.mxu3 %v2353_v11  ;;  %v2497_v9 = vsel %vm344_vm1, %v10126_v15, 0  ;;  %v2500_v11 = vsel %vm344_vm1, %v10135_v20, 0 }
 0x1f9   : > { %v1562_v63 = vpop.f32.mrf.mxu2  ;;  %2802 = vrot.lane.b32.xlu2 %v10135_v20, %s10034_s29 }
 0x1fa   : > { %v1575_v14 = vpop.f32.mrf.mxu3  ;;  %v10935_v18 = vadd.f32 %v1562_v63, %v10863_v4  ;;  %v1538_v23 = vpop.f32.mrf.mxu0  ;;  %v2337_v4 = vsel %vm13821_vm14, %v2324_v62, %v2326_v27  ;;  %v2503_v62 = vsel %vm344_vm1, %v10137_v21, 0  ;;  %v2506_v63 = vsel %vm344_vm1, %v10139_v22, 0 }
 0x1fb   : > { %v10938_v19 = vadd.f32 %v1575_v14, %v10866_v5  ;;  %v1551_v24 = vpop.f32.mrf.mxu1  ;;  %v2359_v37 = vsel %vm344_vm1, %v2337_v4, 0  ;;  %v2627_v14 = vpop.permute.xlu1 %2626 }
 0x201   : > { %v1564_v30 = vpop.f32.mrf.mxu2  ;;  %2808 = vrot.lane.b32.xlu2 %v10893_v38, %s10034_s29 }
 0x202   : > { %v1577_v31 = vpop.f32.mrf.mxu3  ;;  %v1588_v5 = vpop.f32.mrf.mxu0 }
 0x203   : > { %v1601_v16 = vpop.f32.mrf.mxu1  ;;  %v1635_v34 = vadd.f32 %v1588_v5, %v10878_v40  ;;  %v2365_v40 = vsel %vm344_vm1, %v2339_v17, 0  ;;  %v2629_v30 = vpop.permute.xlu2 %2628 }
 0x204   : > { %v1636_v35 = vadd.f32 %v1601_v16, %v10881_v33  ;;  %v2633_v31 = vpop.permute.xlu1 %2632  ;;  %v2644_v32 = vsel %vm13796_vm15, %v2627_v14, %v2629_v30 }
 0x205   : > { %9589 = vmatmul.msk.bf16.vlgmr.msrb.gmra.mxu0 %vm340_vm2, %v9584_v54  ;;  %9590 = vmatmul.msk.bf16.vlgmr.msrb.gmra.mxu1 %vm340_vm2, %v9584_v54 }
 0x206   : > { %9591 = vmatmul.msk.bf16.vlgmr.msrb.gmra.mxu2 %vm340_vm2, %v9584_v54  ;;  %2426 = vmatpush.bf16.msrb.mxu0 %v2356_v36 }
 0x207   : > { %9592 = vmatmul.msk.bf16.vlgmr.msrb.gmra.mxu3 %vm340_vm2, %v9584_v54  ;;  %2439 = vmatpush.bf16.msrb.mxu1 %v2359_v37 }
 0x208   : > { %2452 = vmatpush.bf16.msrb.mxu2 %v2362_v26  ;;  %2465 = vmatpush.bf16.msrb.mxu3 %v2365_v40 }
 0x209   : > { %v1614_v33 = vpop.f32.mrf.mxu2  ;;  %2964 = vrot.lane.b32.xlu2 %v10123_v13, %s10035_s20 }
 0x20a   : > { %v1627_v41 = vpop.f32.mrf.mxu3  ;;  %v1637_v42 = vadd.f32 %v1614_v33, %v10900_v44  ;;  %v1590_v46 = vpop.f32.mrf.mxu0 }
 0x20b   : > { %v1638_v43 = vadd.f32 %v1627_v41, %v10903_v52  ;;  %v1603_v39 = vpop.f32.mrf.mxu1  ;;  %v2485_v52 = vsel %vm344_vm1, %v10121_v12, 0  ;;  %v2658_v41 = vsel %vm344_vm1, %v2644_v32, 0 }
 0x211   : > { %v1616_v47 = vpop.f32.mrf.mxu2  ;;  %2970 = vrot.lane.b32.xlu2 %v10135_v20, %s10035_s20 }
 0x212   : > { %v1629_v48 = vpop.f32.mrf.mxu3  ;;  %v1704_v49 = vpop.f32.mrf.mxu0 }
 0x213   : > { %v1717_v45 = vpop.f32.mrf.mxu1  ;;  %v10974_v50 = vadd.f32 %v1704_v49, %v10915_v57 }
 0x214   : > { %v10977_v44 = vadd.f32 %v1717_v45, %v10918_v58 }
 0x215   : > { %9594 = vmatmul.msk.bf16.vlgmr.msra.gmra.mxu0 %vm340_vm2, %v9593_v55  ;;  %9595 = vmatmul.msk.bf16.vlgmr.msra.gmra.mxu1 %vm340_vm2, %v9593_v55 }
 0x216   : > { %9596 = vmatmul.msk.bf16.vlgmr.msra.gmra.mxu2 %vm340_vm2, %v9593_v55  ;;  %2515 = vmatpush.bf16.msra.mxu0 %v2485_v52 }
 0x217   : > { %9597 = vmatmul.msk.bf16.vlgmr.msra.gmra.mxu3 %vm340_vm2, %v9593_v55  ;;  %2528 = vmatpush.bf16.msra.mxu1 %v2488_v51 }
 0x218   : > { %2541 = vmatpush.bf16.msra.mxu2 %v2491_v56  ;;  %2554 = vmatpush.bf16.msra.mxu3 %v2494_v61 }
 0x219   : > { %v1730_v7 = vpop.f32.mrf.mxu2  ;;  %2976 = vrot.lane.b32.xlu2 %v10893_v38, %s10035_s20 }
 0x21a   : > { %v1743_v59 = vpop.f32.mrf.mxu3  ;;  %v10998_v60 = vadd.f32 %v1730_v7, %v10935_v18  ;;  %v1706_v0 = vpop.f32.mrf.mxu0 }
 0x21b   : > { %v11001_v53 = vadd.f32 %v1743_v59, %v10938_v19  ;;  %v1719_v54 = vpop.f32.mrf.mxu1  ;;  %v2625_v18 = vpop.permute.xlu0 %2624 }
 0x21c   : > { %v2643_v16 = vsel %vm13796_vm15, %v2625_v18, %v2627_v14 }
 0x21d   : > { %v2655_v33 = vsel %vm344_vm1, %v2643_v16, 0 }
 0x221   : > { %v1732_v1 = vpop.f32.mrf.mxu2  ;;  %3132 = vrot.lane.b32.xlu2 %v10123_v13, %s13794_s28 }
 0x222   : > { %v1745_v2 = vpop.f32.mrf.mxu3  ;;  %v1756_v57 = vpop.f32.mrf.mxu0 }
 0x223   : > { %v1769_v58 = vpop.f32.mrf.mxu1  ;;  %v11009_v3 = vadd.f32 %v1756_v57, %v1635_v34  ;;  %v2631_v25 = vpop.permute.xlu0 %2630 }
 0x224   : > { %v11011_v10 = vadd.f32 %v1769_v58, %v1636_v35  ;;  %v9602_v35 = vld [vmem:[%s13787_s1 + $0x34] sm:$0xf]  ;;  %v2645_v36 = vsel %vm13796_vm15, %v2629_v30, %v2631_v25  ;;  %v2646_v37 = vsel %vm13796_vm15, %v2631_v25, %v2633_v31 }
 0x225   : > { %9598 = vmatmul.msk.bf16.vlgmr.msrb.gmra.mxu0 %vm340_vm2, %v9593_v55  ;;  %9599 = vmatmul.msk.bf16.vlgmr.msrb.gmra.mxu1 %vm340_vm2, %v9593_v55 }
 0x226   : > { %9600 = vmatmul.msk.bf16.vlgmr.msrb.gmra.mxu2 %vm340_vm2, %v9593_v55  ;;  %2567 = vmatpush.bf16.msrb.mxu0 %v2497_v9 }
 0x227   : > { %9601 = vmatmul.msk.bf16.vlgmr.msrb.gmra.mxu3 %vm340_vm2, %v9593_v55  ;;  %2580 = vmatpush.bf16.msrb.mxu1 %v2500_v11  ;;  %v2635_v55 = vpop.permute.xlu2 %2634 }
 0x228   : > { %2593 = vmatpush.bf16.msrb.mxu2 %v2503_v62  ;;  %2606 = vmatpush.bf16.msrb.mxu3 %v2506_v63  ;;  %v2647_v56 = vsel %vm13796_vm15, %v2633_v31, %v2635_v55 }
 0x229   : > { %v1782_v19 = vpop.f32.mrf.mxu2  ;;  %3138 = vrot.lane.b32.xlu2 %v10135_v20, %s13794_s28  ;;  %v2667_v1 = vsel %vm344_vm1, %v2647_v56, 0 }
 0x22a   : > { %v1795_v23 = vpop.f32.mrf.mxu3  ;;  %v11031_v24 = vadd.f32 %v1782_v19, %v1637_v42  ;;  %v1758_v28 = vpop.f32.mrf.mxu0  ;;  %v2661_v42 = vsel %vm344_vm1, %v2645_v36, 0 }
 0x22b   : > { %v11033_v27 = vadd.f32 %v1795_v23, %v1638_v43  ;;  %v1771_v29 = vpop.f32.mrf.mxu1  ;;  %v2664_v43 = vsel %vm344_vm1, %v2646_v37, 0 }
 0x231   : > { %v1784_v4 = vpop.f32.mrf.mxu2  ;;  %3144 = vrot.lane.b32.xlu2 %v10893_v38, %s13794_s28  ;;  %s13803_s28 = smov 29  }
 0x232   : > { %v1797_v5 = vpop.f32.mrf.mxu3  ;;  %v1872_v17 = vpop.f32.mrf.mxu0  ;;  %3802 = vrot.lane.b32.xlu1 %v10109_v6, %s13803_s28  ;;  %3800 = vrot.lane.b32.xlu0 %v10121_v12, %s13803_s28 }
 0x233   : > { %v1885_v34 = vpop.f32.mrf.mxu1  ;;  %v11045_v26 = vadd.f32 %v1872_v17, %v10974_v50  ;;  %v2639_v50 = vpop.permute.xlu1 %2638 }
 0x234   : > { %v11048_v40 = vadd.f32 %v1885_v34, %v10977_v44  ;;  %v2637_v44 = vpop.permute.xlu0 %2636 }
 0x235   : > { %9603 = vmatmul.msk.bf16.vlgmr.msra.gmra.mxu0 %vm340_vm2, %v9602_v35  ;;  %9604 = vmatmul.msk.bf16.vlgmr.msra.gmra.mxu1 %vm340_vm2, %v9602_v35  ;;  %v2648_v61 = vsel %vm13796_vm15, %v2635_v55, %v2637_v44 }
 0x236   : > { %9605 = vmatmul.msk.bf16.vlgmr.msra.gmra.mxu2 %vm340_vm2, %v9602_v35  ;;  %2685 = vmatpush.bf16.msra.mxu0 %v2655_v33  ;;  %v2670_v2 = vsel %vm344_vm1, %v2648_v61, 0 }
 0x237   : > { %9606 = vmatmul.msk.bf16.vlgmr.msra.gmra.mxu3 %vm340_vm2, %v9602_v35  ;;  %2698 = vmatpush.bf16.msra.mxu1 %v2658_v41 }
 0x238   : > { %2711 = vmatpush.bf16.msra.mxu2 %v2661_v42  ;;  %2724 = vmatpush.bf16.msra.mxu3 %v2664_v43 }
 0x239   : > { %v1898_v46 = vpop.f32.mrf.mxu2  ;;  %3300 = vrot.lane.b32.xlu2 %v10123_v13, %s13797_s21 }
 0x23a   : > { %v1911_v39 = vpop.f32.mrf.mxu3  ;;  %v11065_v47 = vadd.f32 %v1898_v46, %v10998_v60  ;;  %v1874_v49 = vpop.f32.mrf.mxu0  ;;  %3808 = vrot.lane.b32.xlu1 %v10126_v15, %s13803_s28  ;;  %3806 = vrot.lane.b32.xlu0 %v10113_v8, %s13803_s28  ;;  %v2649_v60 = vsel %vm13796_vm15, %v2637_v44, %v2639_v50 }
 0x23b   : > { %v11068_v48 = vadd.f32 %v1911_v39, %v11001_v53  ;;  %v1887_v45 = vpop.f32.mrf.mxu1  ;;  %v2673_v58 = vsel %vm344_vm1, %v2649_v60, 0 }
 0x23c   : > { %v2793_v9 = vpop.permute.xlu0 %2792 }
 0x241   : > { %v1900_v52 = vpop.f32.mrf.mxu2  ;;  %3306 = vrot.lane.b32.xlu2 %v10135_v20, %s13797_s21 }
 0x242   : > { %v1913_v51 = vpop.f32.mrf.mxu3  ;;  %v1924_v7 = vpop.f32.mrf.mxu0  ;;  %3812 = vrot.lane.b32.xlu0 %v10137_v21, %s13803_s28  ;;  %3814 = vrot.lane.b32.xlu1 %v10139_v22, %s13803_s28 }
 0x243   : > { %v1937_v59 = vpop.f32.mrf.mxu1  ;;  %v11080_v53 = vadd.f32 %v1924_v7, %v11009_v3  ;;  %v2641_v54 = vpop.permute.xlu2 %2640 }
 0x244   : > { %v11083_v0 = vadd.f32 %v1937_v59, %v11011_v10  ;;  %v2650_v57 = vsel %vm13796_vm15, %v2639_v50, %v2641_v54  ;;  %v2795_v10 = vpop.permute.xlu1 %2794  ;;  %vm13799_vm15 = vcmask 973824   ;;  %v2799_v29 = vpop.permute.xlu0 %2798 }
 0x245   : > { %9607 = vmatmul.msk.bf16.vlgmr.msrb.gmra.mxu0 %vm340_vm2, %v9602_v35  ;;  %9608 = vmatmul.msk.bf16.vlgmr.msrb.gmra.mxu1 %vm340_vm2, %v9602_v35  ;;  %v2676_v3 = vsel %vm344_vm1, %v2650_v57, 0  ;;  %v2811_v25 = vsel %vm13799_vm15, %v2793_v9, %v2795_v10 }
 0x246   : > { %9609 = vmatmul.msk.bf16.vlgmr.msrb.gmra.mxu2 %vm340_vm2, %v9602_v35  ;;  %2737 = vmatpush.bf16.msrb.mxu0 %v2667_v1 }
 0x247   : > { %9610 = vmatmul.msk.bf16.vlgmr.msrb.gmra.mxu3 %vm340_vm2, %v9602_v35  ;;  %2750 = vmatpush.bf16.msrb.mxu1 %v2670_v2  ;;  %v2823_v35 = vsel %vm344_vm1, %v2811_v25, 0 }
 0x248   : > { %2763 = vmatpush.bf16.msrb.mxu2 %v2673_v58  ;;  %2776 = vmatpush.bf16.msrb.mxu3 %v2676_v3 }
 0x249   : > { %v1950_v11 = vpop.f32.mrf.mxu2  ;;  %3312 = vrot.lane.b32.xlu2 %v10893_v38, %s13797_s21  ;;  %s13806_s21 = smov 28  }
 0x24a   : > { %v1963_v62 = vpop.f32.mrf.mxu3  ;;  %v11101_v63 = vadd.f32 %v1950_v11, %v11031_v24  ;;  %v1926_v18 = vpop.f32.mrf.mxu0  ;;  %3970 = vrot.lane.b32.xlu1 %v10109_v6, %s13806_s21  ;;  %3968 = vrot.lane.b32.xlu0 %v10121_v12, %s13806_s21 }
 0x24b   : > { %v11104_v14 = vadd.f32 %v1963_v62, %v11033_v27  ;;  %v1939_v19 = vpop.f32.mrf.mxu1  ;;  %v2797_v23 = vpop.permute.xlu2 %2796  ;;  %v9611_v27 = vld [vmem:[%s13787_s1 + $0x38] sm:$0xf] }
 0x24c   : > { %v2801_v28 = vpop.permute.xlu1 %2800  ;;  %v2812_v4 = vsel %vm13799_vm15, %v2795_v10, %v2797_v23  ;;  %v2813_v16 = vsel %vm13799_vm15, %v2797_v23, %v2799_v29  ;;  %v2805_v45 = vpop.permute.xlu0 %2804 }
 0x24d   : > { %v2814_v32 = vsel %vm13799_vm15, %v2799_v29, %v2801_v28  ;;  %v2826_v36 = vsel %vm344_vm1, %v2812_v4, 0  ;;  %v2829_v37 = vsel %vm344_vm1, %v2813_v16, 0 }
 0x251   : > { %v1952_v30 = vpop.f32.mrf.mxu2  ;;  %3468 = vrot.lane.b32.xlu2 %v10123_v13, %s13800_s15 }
 0x252   : > { %v1965_v31 = vpop.f32.mrf.mxu3  ;;  %v2040_v24 = vpop.f32.mrf.mxu0  ;;  %3976 = vrot.lane.b32.xlu1 %v10126_v15, %s13806_s21  ;;  %3974 = vrot.lane.b32.xlu0 %v10113_v8, %s13806_s21 }
 0x253   : > { %v2053_v5 = vpop.f32.mrf.mxu1  ;;  %v11116_v17 = vadd.f32 %v2040_v24, %v11045_v26  ;;  %v2832_v26 = vsel %vm344_vm1, %v2814_v32, 0 }
 0x254   : > { %v11119_v34 = vadd.f32 %v2053_v5, %v11048_v40  ;;  %v2803_v40 = vpop.permute.xlu2 %2802  ;;  %v2807_v49 = vpop.permute.xlu1 %2806 }
 0x255   : > { %9612 = vmatmul.msk.bf16.vlgmr.msra.gmra.mxu0 %vm340_vm2, %v9611_v27  ;;  %9613 = vmatmul.msk.bf16.vlgmr.msra.gmra.mxu1 %vm340_vm2, %v9611_v27  ;;  %v2815_v52 = vsel %vm13799_vm15, %v2801_v28, %v2803_v40  ;;  %v2817_v56 = vsel %vm13799_vm15, %v2805_v45, %v2807_v49  ;;  %v2961_v2 = vpop.permute.xlu0 %2960 }
 0x256   : > { %9614 = vmatmul.msk.bf16.vlgmr.msra.gmra.mxu2 %vm340_vm2, %v9611_v27  ;;  %2853 = vmatpush.bf16.msra.mxu0 %v2823_v35  ;;  %v2835_v60 = vsel %vm344_vm1, %v2815_v52, 0 }
 0x257   : > { %9615 = vmatmul.msk.bf16.vlgmr.msra.gmra.mxu3 %vm340_vm2, %v9611_v27  ;;  %2866 = vmatpush.bf16.msra.mxu1 %v2826_v36 }
 0x258   : > { %2879 = vmatpush.bf16.msra.mxu2 %v2829_v37  ;;  %2892 = vmatpush.bf16.msra.mxu3 %v2832_v26 }
 0x259   : > { %v2066_v33 = vpop.f32.mrf.mxu2  ;;  %3474 = vrot.lane.b32.xlu2 %v10135_v20, %s13800_s15 }
 0x25a   : > { %v2079_v41 = vpop.f32.mrf.mxu3  ;;  %v11136_v42 = vadd.f32 %v2066_v33, %v11065_v47  ;;  %v2042_v46 = vpop.f32.mrf.mxu0  ;;  %v2816_v47 = vsel %vm13799_vm15, %v2803_v40, %v2805_v45  ;;  %3980 = vrot.lane.b32.xlu0 %v10137_v21, %s13806_s21  ;;  %3982 = vrot.lane.b32.xlu1 %v10139_v22, %s13806_s21 }
 0x25b   : > { %v11139_v43 = vadd.f32 %v2079_v41, %v11068_v48  ;;  %v2055_v39 = vpop.f32.mrf.mxu1  ;;  %v2838_v54 = vsel %vm344_vm1, %v2816_v47, 0 }
 0x25c   : > { %v2809_v55 = vpop.permute.xlu2 %2808 }
 0x25d   : > { %v2818_v61 = vsel %vm13799_vm15, %v2807_v49, %v2809_v55  ;;  %vm13802_vm15 = vcmask 965632   ;;  %v2967_v19 = vpop.permute.xlu0 %2966 }
 0x25e   : > { %v2844_v1 = vsel %vm344_vm1, %v2818_v61, 0 }
 0x261   : > { %v2068_v50 = vpop.f32.mrf.mxu2  ;;  %3480 = vrot.lane.b32.xlu2 %v10893_v38, %s13800_s15  ;;  %s13809_s15 = smov 27  }
 0x262   : > { %v2081_v44 = vpop.f32.mrf.mxu3  ;;  %v2092_v48 = vpop.f32.mrf.mxu0  ;;  %4138 = vrot.lane.b32.xlu1 %v10109_v6, %s13809_s15  ;;  %4136 = vrot.lane.b32.xlu0 %v10121_v12, %s13809_s15 }
 0x263   : > { %v2105_v51 = vpop.f32.mrf.mxu1  ;;  %v11152_v7 = vadd.f32 %v2092_v48, %v11080_v53  ;;  %v2841_v53 = vsel %vm344_vm1, %v2817_v56, 0 }
 0x264   : > { %v11155_v59 = vadd.f32 %v2105_v51, %v11083_v0  ;;  %v2963_v0 = vpop.permute.xlu1 %2962  ;;  %v2965_v62 = vpop.permute.xlu2 %2964 }
 0x265   : > { %9616 = vmatmul.msk.bf16.vlgmr.msrb.gmra.mxu0 %vm340_vm2, %v9611_v27  ;;  %9617 = vmatmul.msk.bf16.vlgmr.msrb.gmra.mxu1 %vm340_vm2, %v9611_v27  ;;  %v2979_v29 = vsel %vm13802_vm15, %v2961_v2, %v2963_v0  ;;  %v2980_v30 = vsel %vm13802_vm15, %v2963_v0, %v2965_v62  ;;  %v2981_v25 = vsel %vm13802_vm15, %v2965_v62, %v2967_v19  ;;  %v2973_v46 = vpop.permute.xlu0 %2972 }
 0x266   : > { %9618 = vmatmul.msk.bf16.vlgmr.msrb.gmra.mxu2 %vm340_vm2, %v9611_v27  ;;  %2905 = vmatpush.bf16.msrb.mxu0 %v2835_v60  ;;  %v2994_v16 = vsel %vm344_vm1, %v2980_v30, 0  ;;  %v2997_v32 = vsel %vm344_vm1, %v2981_v25, 0 }
 0x267   : > { %9619 = vmatmul.msk.bf16.vlgmr.msrb.gmra.mxu3 %vm340_vm2, %v9611_v27  ;;  %2918 = vmatpush.bf16.msrb.mxu1 %v2838_v54  ;;  %v2991_v27 = vsel %vm344_vm1, %v2979_v29, 0 }
 0x268   : > { %2931 = vmatpush.bf16.msrb.mxu2 %v2841_v53  ;;  %2944 = vmatpush.bf16.msrb.mxu3 %v2844_v1 }
 0x269   : > { %v2118_v57 = vpop.f32.mrf.mxu2  ;;  %3636 = vrot.lane.b32.xlu2 %v10123_v13, %s10039_s25 }
 0x26a   : > { %v2131_v58 = vpop.f32.mrf.mxu3  ;;  %v11172_v3 = vadd.f32 %v2118_v57, %v11101_v63  ;;  %v2094_v9 = vpop.f32.mrf.mxu0  ;;  %4144 = vrot.lane.b32.xlu1 %v10126_v15, %s13809_s15  ;;  %4142 = vrot.lane.b32.xlu0 %v10113_v8, %s13809_s15 }
 0x26b   : > { %v11175_v10 = vadd.f32 %v2131_v58, %v11104_v14  ;;  %v2107_v11 = vpop.f32.mrf.mxu1  ;;  %v9620_v14 = vld [vmem:[%s13787_s1 + $0x3c] sm:$0xf] }
 0x26c   : > { %v2969_v18 = vpop.permute.xlu1 %2968 }
 0x26d   : > { %v2982_v4 = vsel %vm13802_vm15, %v2967_v19, %v2969_v18  ;;  %v3129_v60 = vpop.permute.xlu0 %3128 }
 0x271   : > { %v2120_v23 = vpop.f32.mrf.mxu2  ;;  %3642 = vrot.lane.b32.xlu2 %v10135_v20, %s10039_s25 }
 0x272   : > { %v2133_v28 = vpop.f32.mrf.mxu3  ;;  %v2208_v63 = vpop.f32.mrf.mxu0  ;;  %4148 = vrot.lane.b32.xlu0 %v10137_v21, %s13809_s15  ;;  %4150 = vrot.lane.b32.xlu1 %v10139_v22, %s13809_s15 }
 0x273   : > { %v2221_v31 = vpop.f32.mrf.mxu1  ;;  %v11187_v24 = vadd.f32 %v2208_v63, %v11116_v17  ;;  %v3000_v17 = vsel %vm344_vm1, %v2982_v4, 0 }
 0x274   : > { %v11190_v5 = vadd.f32 %v2221_v31, %v11119_v34  ;;  %v2971_v34 = vpop.permute.xlu2 %2970  ;;  %v2975_v41 = vpop.permute.xlu1 %2974 }
 0x275   : > { %9621 = vmatmul.msk.bf16.vlgmr.msra.gmra.mxu0 %vm340_vm2, %v9620_v14  ;;  %9622 = vmatmul.msk.bf16.vlgmr.msra.gmra.mxu1 %vm340_vm2, %v9620_v14  ;;  %v2983_v55 = vsel %vm13802_vm15, %v2969_v18, %v2971_v34  ;;  %v2985_v44 = vsel %vm13802_vm15, %v2973_v46, %v2975_v41  ;;  %v3135_v11 = vpop.permute.xlu0 %3134 }
 0x276   : > { %9623 = vmatmul.msk.bf16.vlgmr.msra.gmra.mxu2 %vm340_vm2, %v9620_v14  ;;  %3021 = vmatpush.bf16.msra.mxu0 %v2991_v27  ;;  %v3003_v51 = vsel %vm344_vm1, %v2983_v55, 0  ;;  %v3009_v61 = vsel %vm344_vm1, %v2985_v44, 0 }
 0x277   : > { %9624 = vmatmul.msk.bf16.vlgmr.msra.gmra.mxu3 %vm340_vm2, %v9620_v14  ;;  %3034 = vmatpush.bf16.msra.mxu1 %v2994_v16 }
 0x278   : > { %3047 = vmatpush.bf16.msra.mxu2 %v2997_v32  ;;  %3060 = vmatpush.bf16.msra.mxu3 %v3000_v17 }
 0x279   : > { %v2234_v35 = vpop.f32.mrf.mxu2  ;;  %3648 = vrot.lane.b32.xlu2 %v10893_v38, %s10039_s25 }
 0x27a   : > { %v2247_v36 = vpop.f32.mrf.mxu3  ;;  %v11207_v37 = vadd.f32 %v2234_v35, %v11136_v42  ;;  %v2210_v40 = vpop.f32.mrf.mxu0  ;;  %v2984_v42 = vsel %vm13802_vm15, %v2971_v34, %v2973_v46 }
 0x27b   : > { %v11210_v26 = vadd.f32 %v2247_v36, %v11139_v43  ;;  %v2223_v33 = vpop.f32.mrf.mxu1  ;;  %v3006_v56 = vsel %vm344_vm1, %v2984_v42, 0 }
 0x27c   : > { %v2977_v39 = vpop.permute.xlu2 %2976 }
 0x27d   : > { %v2986_v52 = vsel %vm13802_vm15, %v2975_v41, %v2977_v39  ;;  %vm13805_vm15 = vcmask 957440   ;;  %v3141_v40 = vpop.permute.xlu0 %3140 }
 0x281   : > { %v2236_v49 = vpop.f32.mrf.mxu2  ;;  %3804 = vrot.lane.b32.xlu2 %v10123_v13, %s13803_s28 }
 0x282   : > { %v2249_v45 = vpop.f32.mrf.mxu3  ;;  %v2260_v43 = vpop.f32.mrf.mxu0 }
 0x283   : > { %v2273_v50 = vpop.f32.mrf.mxu1  ;;  %v11223_v47 = vadd.f32 %v2260_v43, %v11152_v7  ;;  %v3012_v7 = vsel %vm344_vm1, %v2986_v52, 0 }
 0x284   : > { %v11226_v48 = vadd.f32 %v2273_v50, %v11155_v59  ;;  %v3131_v59 = vpop.permute.xlu1 %3130  ;;  %v3133_v58 = vpop.permute.xlu2 %3132 }
 0x285   : > { %9625 = vmatmul.msk.bf16.vlgmr.msrb.gmra.mxu0 %vm340_vm2, %v9620_v14  ;;  %9626 = vmatmul.msk.bf16.vlgmr.msrb.gmra.mxu1 %vm340_vm2, %v9620_v14  ;;  %v3147_v19 = vsel %vm13805_vm15, %v3129_v60, %v3131_v59  ;;  %v3148_v23 = vsel %vm13805_vm15, %v3131_v59, %v3133_v58  ;;  %v3149_v29 = vsel %vm13805_vm15, %v3133_v58, %v3135_v11 }
 0x286   : > { %9627 = vmatmul.msk.bf16.vlgmr.msrb.gmra.mxu2 %vm340_vm2, %v9620_v14  ;;  %3073 = vmatpush.bf16.msrb.mxu0 %v3003_v51  ;;  %v3162_v25 = vsel %vm344_vm1, %v3148_v23, 0  ;;  %v3165_v4 = vsel %vm344_vm1, %v3149_v29, 0  ;;  %v3297_v51 = vpop.permute.xlu0 %3296 }
 0x287   : > { %9628 = vmatmul.msk.bf16.vlgmr.msrb.gmra.mxu3 %vm340_vm2, %v9620_v14  ;;  %3086 = vmatpush.bf16.msrb.mxu1 %v3006_v56  ;;  %v3159_v14 = vsel %vm344_vm1, %v3147_v19, 0 }
 0x288   : > { %3099 = vmatpush.bf16.msrb.mxu2 %v3009_v61  ;;  %3112 = vmatpush.bf16.msrb.mxu3 %v3012_v7 }
 0x289   : > { %v2286_v54 = vpop.f32.mrf.mxu2  ;;  %3810 = vrot.lane.b32.xlu2 %v10135_v20, %s13803_s28 }
 0x28a   : > { %v2299_v53 = vpop.f32.mrf.mxu3  ;;  %v11243_v1 = vadd.f32 %v2286_v54, %v11172_v3  ;;  %v2262_v2 = vpop.f32.mrf.mxu0 }
 0x28b   : > { %v11246_v0 = vadd.f32 %v2299_v53, %v11175_v10  ;;  %v2275_v57 = vpop.f32.mrf.mxu1  ;;  %v9629_v10 = vld [vmem:[%s13787_s1 + $0x40] sm:$0xf] }
 0x28c   : > { %v3137_v9 = vpop.permute.xlu1 %3136 }
 0x28d   : > { %v3150_v30 = vsel %vm13805_vm15, %v3135_v11, %v3137_v9 }
 0x28e   : > { %v3303_v57 = vpop.permute.xlu0 %3302 }
 0x291   : > { %v2288_v62 = vpop.f32.mrf.mxu2  ;;  %3816 = vrot.lane.b32.xlu2 %v10893_v38, %s13803_s28  ;;  %s10043_s28 = smov 19  }
 0x292   : > { %v2301_v18 = vpop.f32.mrf.mxu3  ;;  %v2376_v3 = vpop.f32.mrf.mxu0  ;;  %4306 = vrot.lane.b32.xlu1 %v10109_v6, %s10043_s28  ;;  %4304 = vrot.lane.b32.xlu0 %v10121_v12, %s10043_s28 }
 0x293   : > { %v2389_v28 = vpop.f32.mrf.mxu1  ;;  %v11258_v63 = vadd.f32 %v2376_v3, %v11187_v24  ;;  %v3168_v24 = vsel %vm344_vm1, %v3150_v30, 0 }
 0x294   : > { %v11261_v31 = vadd.f32 %v2389_v28, %v11190_v5  ;;  %v3139_v5 = vpop.permute.xlu2 %3138  ;;  %v3143_v36 = vpop.permute.xlu1 %3142 }
 0x295   : > { %9630 = vmatmul.msk.bf16.vlgmr.msra.gmra.mxu0 %vm340_vm2, %v9629_v10  ;;  %9631 = vmatmul.msk.bf16.vlgmr.msra.gmra.mxu1 %vm340_vm2, %v9629_v10  ;;  %v3151_v39 = vsel %vm13805_vm15, %v3137_v9, %v3139_v5  ;;  %v3153_v45 = vsel %vm13805_vm15, %v3141_v40, %v3143_v36 }
 0x296   : > { %9632 = vmatmul.msk.bf16.vlgmr.msra.gmra.mxu2 %vm340_vm2, %v9629_v10  ;;  %3189 = vmatpush.bf16.msra.mxu0 %v3159_v14  ;;  %v3171_v50 = vsel %vm344_vm1, %v3151_v39, 0  ;;  %v3177_v52 = vsel %vm344_vm1, %v3153_v45, 0 }
 0x297   : > { %9633 = vmatmul.msk.bf16.vlgmr.msra.gmra.mxu3 %vm340_vm2, %v9629_v10  ;;  %3202 = vmatpush.bf16.msra.mxu1 %v3162_v25 }
 0x298   : > { %3215 = vmatpush.bf16.msra.mxu2 %v3165_v4  ;;  %3228 = vmatpush.bf16.msra.mxu3 %v3168_v24 }
 0x299   : > { %v2402_v27 = vpop.f32.mrf.mxu2  ;;  %3972 = vrot.lane.b32.xlu2 %v10123_v13, %s13806_s21 }
 0x29a   : > { %v2415_v16 = vpop.f32.mrf.mxu3  ;;  %v11278_v32 = vadd.f32 %v2402_v27, %v11207_v37  ;;  %v2378_v34 = vpop.f32.mrf.mxu0  ;;  %4312 = vrot.lane.b32.xlu1 %v10126_v15, %s10043_s28  ;;  %4310 = vrot.lane.b32.xlu0 %v10113_v8, %s10043_s28  ;;  %v3152_v37 = vsel %vm13805_vm15, %v3139_v5, %v3141_v40 }
 0x29b   : > { %v11281_v17 = vadd.f32 %v2415_v16, %v11210_v26  ;;  %v2391_v35 = vpop.f32.mrf.mxu1  ;;  %v3174_v44 = vsel %vm344_vm1, %v3152_v37, 0  ;;  %v3309_v34 = vpop.permute.xlu0 %3308 }
 0x29c   : > { %v3145_v33 = vpop.permute.xlu2 %3144 }
 0x29d   : > { %v3154_v55 = vsel %vm13805_vm15, %v3143_v36, %v3145_v33  ;;  %vm13808_vm15 = vcmask 318464  }
 0x2a1   : > { %v2404_v41 = vpop.f32.mrf.mxu2  ;;  %3978 = vrot.lane.b32.xlu2 %v10135_v20, %s13806_s21 }
 0x2a2   : > { %v2417_v46 = vpop.f32.mrf.mxu3  ;;  %v2428_v26 = vpop.f32.mrf.mxu0  ;;  %4316 = vrot.lane.b32.xlu0 %v10137_v21, %s10043_s28  ;;  %4318 = vrot.lane.b32.xlu1 %v10139_v22, %s10043_s28 }
 0x2a3   : > { %v2441_v49 = vpop.f32.mrf.mxu1  ;;  %v11294_v42 = vadd.f32 %v2428_v26, %v11223_v47  ;;  %v3180_v47 = vsel %vm344_vm1, %v3154_v55, 0 }
 0x2a4   : > { %v11297_v43 = vadd.f32 %v2441_v49, %v11226_v48  ;;  %v3299_v48 = vpop.permute.xlu1 %3298  ;;  %v3301_v53 = vpop.permute.xlu2 %3300 }
 0x2a5   : > { %9634 = vmatmul.msk.bf16.vlgmr.msrb.gmra.mxu0 %vm340_vm2, %v9629_v10  ;;  %9635 = vmatmul.msk.bf16.vlgmr.msrb.gmra.mxu1 %vm340_vm2, %v9629_v10  ;;  %v3315_v11 = vsel %vm13808_vm15, %v3297_v51, %v3299_v48  ;;  %v3316_v62 = vsel %vm13808_vm15, %v3299_v48, %v3301_v53  ;;  %v3317_v19 = vsel %vm13808_vm15, %v3301_v53, %v3303_v57 }
 0x2a6   : > { %9636 = vmatmul.msk.bf16.vlgmr.msrb.gmra.mxu2 %vm340_vm2, %v9629_v10  ;;  %3241 = vmatpush.bf16.msrb.mxu0 %v3171_v50  ;;  %v3330_v29 = vsel %vm344_vm1, %v3316_v62, 0  ;;  %v3333_v30 = vsel %vm344_vm1, %v3317_v19, 0  ;;  %v3465_v50 = vpop.permute.xlu0 %3464 }
 0x2a7   : > { %9637 = vmatmul.msk.bf16.vlgmr.msrb.gmra.mxu3 %vm340_vm2, %v9629_v10  ;;  %3254 = vmatpush.bf16.msrb.mxu1 %v3174_v44  ;;  %v3327_v10 = vsel %vm344_vm1, %v3315_v11, 0 }
 0x2a8   : > { %3267 = vmatpush.bf16.msrb.mxu2 %v3177_v52  ;;  %3280 = vmatpush.bf16.msrb.mxu3 %v3180_v47 }
 0x2a9   : > { %v2454_v56 = vpop.f32.mrf.mxu2  ;;  %3984 = vrot.lane.b32.xlu2 %v10893_v38, %s13806_s21  ;;  %s10044_s21 = smov 18  }
 0x2aa   : > { %v2467_v61 = vpop.f32.mrf.mxu3  ;;  %v11314_v7 = vadd.f32 %v2454_v56, %v11243_v1  ;;  %v2430_v60 = vpop.f32.mrf.mxu0  ;;  %4474 = vrot.lane.b32.xlu1 %v10109_v6, %s10044_s21  ;;  %4472 = vrot.lane.b32.xlu0 %v10121_v12, %s10044_s21 }
 0x2ab   : > { %v11317_v59 = vadd.f32 %v2467_v61, %v11246_v0  ;;  %v2443_v54 = vpop.f32.mrf.mxu1  ;;  %v9638_v0 = vld [vmem:[%s13787_s1 + $0x44] sm:$0xf] }
 0x2ac   : > { %v3305_v2 = vpop.permute.xlu1 %3304 }
 0x2ad   : > { %v3318_v23 = vsel %vm13808_vm15, %v3303_v57, %v3305_v2 }
 0x2ae   : > { %v3471_v54 = vpop.permute.xlu0 %3470 }
 0x2b1   : > { %v2456_v58 = vpop.f32.mrf.mxu2  ;;  %4140 = vrot.lane.b32.xlu2 %v10123_v13, %s13809_s15 }
 0x2b2   : > { %v2469_v9 = vpop.f32.mrf.mxu3  ;;  %v2517_v1 = vpop.f32.mrf.mxu0  ;;  %4480 = vrot.lane.b32.xlu1 %v10126_v15, %s10044_s21  ;;  %4478 = vrot.lane.b32.xlu0 %v10113_v8, %s10044_s21 }
 0x2b3   : > { %v2530_v18 = vpop.f32.mrf.mxu1  ;;  %v11329_v3 = vadd.f32 %v2517_v1, %v11258_v63  ;;  %v3336_v63 = vsel %vm344_vm1, %v3318_v23, 0 }
 0x2b4   : > { %v11332_v28 = vadd.f32 %v2530_v18, %v11261_v31  ;;  %v3307_v31 = vpop.permute.xlu2 %3306  ;;  %v3311_v16 = vpop.permute.xlu1 %3310 }
 0x2b5   : > { %9639 = vmatmul.msk.bf16.vlgmr.msra.gmra.mxu0 %vm340_vm2, %v9638_v0  ;;  %9640 = vmatmul.msk.bf16.vlgmr.msra.gmra.mxu1 %vm340_vm2, %v9638_v0  ;;  %v3319_v33 = vsel %vm13808_vm15, %v3305_v2, %v3307_v31  ;;  %v3321_v46 = vsel %vm13808_vm15, %v3309_v34, %v3311_v16 }
 0x2b6   : > { %9641 = vmatmul.msk.bf16.vlgmr.msra.gmra.mxu2 %vm340_vm2, %v9638_v0  ;;  %3357 = vmatpush.bf16.msra.mxu0 %v3327_v10  ;;  %v3339_v49 = vsel %vm344_vm1, %v3319_v33, 0  ;;  %v3345_v55 = vsel %vm344_vm1, %v3321_v46, 0 }
 0x2b7   : > { %9642 = vmatmul.msk.bf16.vlgmr.msra.gmra.mxu3 %vm340_vm2, %v9638_v0  ;;  %3370 = vmatpush.bf16.msra.mxu1 %v3330_v29 }
 0x2b8   : > { %3383 = vmatpush.bf16.msra.mxu2 %v3333_v30  ;;  %3396 = vmatpush.bf16.msra.mxu3 %v3336_v63 }
 0x2b9   : > { %v2543_v14 = vpop.f32.mrf.mxu2  ;;  %4146 = vrot.lane.b32.xlu2 %v10135_v20, %s13809_s15 }
 0x2ba   : > { %v2556_v25 = vpop.f32.mrf.mxu3  ;;  %v11349_v4 = vadd.f32 %v2543_v14, %v11278_v32  ;;  %v2519_v5 = vpop.f32.mrf.mxu0  ;;  %v3320_v32 = vsel %vm13808_vm15, %v3307_v31, %v3309_v34  ;;  %4484 = vrot.lane.b32.xlu0 %v10137_v21, %s10044_s21  ;;  %4486 = vrot.lane.b32.xlu1 %v10139_v22, %s10044_s21 }
 0x2bb   : > { %v11352_v24 = vadd.f32 %v2556_v25, %v11281_v17  ;;  %v2532_v27 = vpop.f32.mrf.mxu1  ;;  %v3342_v45 = vsel %vm344_vm1, %v3320_v32, 0  ;;  %v3477_v14 = vpop.permute.xlu0 %3476 }
 0x2bc   : > { %v3313_v35 = vpop.permute.xlu2 %3312 }
 0x2bd   : > { %v3322_v39 = vsel %vm13808_vm15, %v3311_v16, %v3313_v35  ;;  %vm13811_vm15 = vcmask 310272  }
 0x2c1   : > { %v2545_v36 = vpop.f32.mrf.mxu2  ;;  %4152 = vrot.lane.b32.xlu2 %v10893_v38, %s13809_s15  ;;  %s13818_s15 = smov 17  }
 0x2c2   : > { %v2558_v40 = vpop.f32.mrf.mxu3  ;;  %v2569_v17 = vpop.f32.mrf.mxu0  ;;  %4642 = vrot.lane.b32.xlu1 %v10109_v6, %s13818_s15  ;;  %4640 = vrot.lane.b32.xlu0 %v10121_v12, %s13818_s15 }
 0x2c3   : > { %v2582_v41 = vpop.f32.mrf.mxu1  ;;  %v11365_v37 = vadd.f32 %v2569_v17, %v11294_v42  ;;  %v3348_v42 = vsel %vm344_vm1, %v3322_v39, 0  ;;  %v3633_v46 = vpop.permute.xlu0 %3632 }
 0x2c4   : > { %v11368_v26 = vadd.f32 %v2582_v41, %v11297_v43  ;;  %v3467_v43 = vpop.permute.xlu1 %3466  ;;  %v3469_v61 = vpop.permute.xlu2 %3468 }
 0x2c5   : > { %9643 = vmatmul.msk.bf16.vlgmr.msrb.gmra.mxu0 %vm340_vm2, %v9638_v0  ;;  %9644 = vmatmul.msk.bf16.vlgmr.msrb.gmra.mxu1 %vm340_vm2, %v9638_v0  ;;  %v3483_v57 = vsel %vm13811_vm15, %v3465_v50, %v3467_v43  ;;  %v3484_v58 = vsel %vm13811_vm15, %v3467_v43, %v3469_v61  ;;  %v3485_v11 = vsel %vm13811_vm15, %v3469_v61, %v3471_v54 }
 0x2c6   : > { %9645 = vmatmul.msk.bf16.vlgmr.msrb.gmra.mxu2 %vm340_vm2, %v9638_v0  ;;  %3409 = vmatpush.bf16.msrb.mxu0 %v3339_v49  ;;  %v3498_v19 = vsel %vm344_vm1, %v3484_v58, 0  ;;  %v3501_v23 = vsel %vm344_vm1, %v3485_v11, 0 }
 0x2c7   : > { %9646 = vmatmul.msk.bf16.vlgmr.msrb.gmra.mxu3 %vm340_vm2, %v9638_v0  ;;  %3422 = vmatpush.bf16.msrb.mxu1 %v3342_v45  ;;  %v3495_v0 = vsel %vm344_vm1, %v3483_v57, 0 }
 0x2c8   : > { %3435 = vmatpush.bf16.msrb.mxu2 %v3345_v55  ;;  %3448 = vmatpush.bf16.msrb.mxu3 %v3348_v42 }
 0x2c9   : > { %v2595_v44 = vpop.f32.mrf.mxu2  ;;  %4308 = vrot.lane.b32.xlu2 %v10123_v13, %s10043_s28 }
 0x2ca   : > { %v2608_v52 = vpop.f32.mrf.mxu3  ;;  %v11385_v47 = vadd.f32 %v2595_v44, %v11314_v7  ;;  %v2571_v51 = vpop.f32.mrf.mxu0  ;;  %4648 = vrot.lane.b32.xlu1 %v10126_v15, %s13818_s15  ;;  %4646 = vrot.lane.b32.xlu0 %v10113_v8, %s13818_s15 }
 0x2cb   : > { %v11388_v48 = vadd.f32 %v2608_v52, %v11317_v59  ;;  %v2584_v56 = vpop.f32.mrf.mxu1  ;;  %v9647_v59 = vld [vmem:[%s13787_s1 + $0x48] sm:$0xf]  ;;  %v3639_v42 = vpop.permute.xlu0 %3638 }
 0x2cc   : > { %v3473_v60 = vpop.permute.xlu1 %3472 }
 0x2cd   : > { %v3486_v62 = vsel %vm13811_vm15, %v3471_v54, %v3473_v60 }
 0x2d1   : > { %v2597_v53 = vpop.f32.mrf.mxu2  ;;  %4314 = vrot.lane.b32.xlu2 %v10135_v20, %s10043_s28 }
 0x2d2   : > { %v2610_v2 = vpop.f32.mrf.mxu3  ;;  %v2687_v7 = vpop.f32.mrf.mxu0  ;;  %4654 = vrot.lane.b32.xlu1 %v10139_v22, %s13818_s15  ;;  %4652 = vrot.lane.b32.xlu0 %v10137_v21, %s13818_s15 }
 0x2d3   : > { %v2700_v9 = vpop.f32.mrf.mxu1  ;;  %v11400_v1 = vadd.f32 %v2687_v7, %v11329_v3  ;;  %v3504_v3 = vsel %vm344_vm1, %v3486_v62, 0 }
 0x2d4   : > { %v11403_v18 = vadd.f32 %v2700_v9, %v11332_v28  ;;  %v3475_v28 = vpop.permute.xlu2 %3474  ;;  %v3479_v31 = vpop.permute.xlu1 %3478 }
 0x2d5   : > { %9648 = vmatmul.msk.bf16.vlgmr.msra.gmra.mxu0 %vm340_vm2, %v9647_v59  ;;  %9649 = vmatmul.msk.bf16.vlgmr.msra.gmra.mxu1 %vm340_vm2, %v9647_v59  ;;  %v3487_v16 = vsel %vm13811_vm15, %v3473_v60, %v3475_v28  ;;  %v3489_v35 = vsel %vm13811_vm15, %v3477_v14, %v3479_v31 }
 0x2d6   : > { %9650 = vmatmul.msk.bf16.vlgmr.msra.gmra.mxu2 %vm340_vm2, %v9647_v59  ;;  %3525 = vmatpush.bf16.msra.mxu0 %v3495_v0  ;;  %v3507_v40 = vsel %vm344_vm1, %v3487_v16, 0  ;;  %v3513_v32 = vsel %vm344_vm1, %v3489_v35, 0 }
 0x2d7   : > { %9651 = vmatmul.msk.bf16.vlgmr.msra.gmra.mxu3 %vm340_vm2, %v9647_v59  ;;  %3538 = vmatpush.bf16.msra.mxu1 %v3498_v19  ;;  %v3645_v19 = vpop.permute.xlu0 %3644 }
 0x2d8   : > { %3551 = vmatpush.bf16.msra.mxu2 %v3501_v23  ;;  %3564 = vmatpush.bf16.msra.mxu3 %v3504_v3 }
 0x2d9   : > { %v2713_v6 = vpop.f32.mrf.mxu2  ;;  %4320 = vrot.lane.b32.xlu2 %v10893_v38, %s10043_s28 }
 0x2da   : > { %v2726_v10 = vpop.f32.mrf.mxu3  ;;  %v11420_v12 = vadd.f32 %v2713_v6, %v11349_v4  ;;  %v2689_v30 = vpop.f32.mrf.mxu0  ;;  %v3488_v4 = vsel %vm13811_vm15, %v3475_v28, %v3477_v14 }
 0x2db   : > { %v11423_v29 = vadd.f32 %v2726_v10, %v11352_v24  ;;  %v2702_v63 = vpop.f32.mrf.mxu1  ;;  %v3510_v33 = vsel %vm344_vm1, %v3488_v4, 0 }
 0x2dc   : > { %v3481_v25 = vpop.permute.xlu2 %3480  ;;  %v3635_v41 = vpop.permute.xlu1 %3634 }
 0x2dd   : > { %v3490_v15 = vsel %vm13811_vm15, %v3479_v31, %v3481_v25  ;;  %vm13812_vm15 = vcmask 302080  }
 0x2de   : > { %v3516_v17 = vsel %vm344_vm1, %v3490_v15, 0  ;;  %v3651_v44 = vsel %vm13812_vm15, %v3633_v46, %v3635_v41 }
 0x2df   : > { %v3663_v53 = vsel %vm344_vm1, %v3651_v44, 0  ;;  %v3801_v16 = vpop.permute.xlu0 %3800 }
 0x2e1   : > { %v2715_v5 = vpop.f32.mrf.mxu2  ;;  %4476 = vrot.lane.b32.xlu2 %v10123_v13, %s10044_s21 }
 0x2e2   : > { %v2728_v27 = vpop.f32.mrf.mxu3  ;;  %v2739_v24 = vpop.f32.mrf.mxu0 }
 0x2e3   : > { %v2752_v34 = vpop.f32.mrf.mxu1  ;;  %v11436_v36 = vadd.f32 %v2739_v24, %v11365_v37 }
 0x2e4   : > { %v11439_v8 = vadd.f32 %v2752_v34, %v11368_v26  ;;  %v3637_v45 = vpop.permute.xlu2 %3636  ;;  %v3641_v55 = vpop.permute.xlu1 %3640 }
 0x2e5   : > { %9652 = vmatmul.msk.bf16.vlgmr.msrb.gmra.mxu0 %vm340_vm2, %v9647_v59  ;;  %9653 = vmatmul.msk.bf16.vlgmr.msrb.gmra.mxu1 %vm340_vm2, %v9647_v59  ;;  %v3652_v52 = vsel %vm13812_vm15, %v3635_v41, %v3637_v45  ;;  %v3653_v56 = vsel %vm13812_vm15, %v3637_v45, %v3639_v42  ;;  %v3654_v61 = vsel %vm13812_vm15, %v3639_v42, %v3641_v55 }
 0x2e6   : > { %9654 = vmatmul.msk.bf16.vlgmr.msrb.gmra.mxu2 %vm340_vm2, %v9647_v59  ;;  %3577 = vmatpush.bf16.msrb.mxu0 %v3507_v40  ;;  %v3666_v2 = vsel %vm344_vm1, %v3652_v52, 0  ;;  %v3669_v57 = vsel %vm344_vm1, %v3653_v56, 0  ;;  %v3672_v58 = vsel %vm344_vm1, %v3654_v61, 0 }
 0x2e7   : > { %9655 = vmatmul.msk.bf16.vlgmr.msrb.gmra.mxu3 %vm340_vm2, %v9647_v59  ;;  %3590 = vmatpush.bf16.msrb.mxu1 %v3510_v33  ;;  %v3807_v33 = vpop.permute.xlu0 %3806 }
 0x2e8   : > { %3603 = vmatpush.bf16.msrb.mxu2 %v3513_v32  ;;  %3616 = vmatpush.bf16.msrb.mxu3 %v3516_v17 }
 0x2e9   : > { %v2765_v22 = vpop.f32.mrf.mxu2  ;;  %4482 = vrot.lane.b32.xlu2 %v10135_v20, %s10044_s21 }
 0x2ea   : > { %v2778_v21 = vpop.f32.mrf.mxu3  ;;  %v11456_v39 = vadd.f32 %v2765_v22, %v11385_v47  ;;  %v2741_v26 = vpop.f32.mrf.mxu0 }
 0x2eb   : > { %v11459_v37 = vadd.f32 %v2778_v21, %v11388_v48  ;;  %v2754_v49 = vpop.f32.mrf.mxu1  ;;  %v9656_v48 = vld [vmem:[%s13787_s1 + $0x4c] sm:$0xf]  ;;  %v9665_v21 = vld [vmem:[%s13787_s1 + $0x50] sm:$0xf] }
 0x2ec   : > { %v3643_v7 = vpop.permute.xlu2 %3642  ;;  %v3647_v0 = vpop.permute.xlu1 %3646 }
 0x2ed   : > { %v3655_v6 = vsel %vm13812_vm15, %v3641_v55, %v3643_v7  ;;  %v3656_v10 = vsel %vm13812_vm15, %v3643_v7, %v3645_v19  ;;  %v3657_v30 = vsel %vm13812_vm15, %v3645_v19, %v3647_v0 }
 0x2ee   : > { %v3675_v14 = vsel %vm344_vm1, %v3655_v6, 0  ;;  %v3678_v25 = vsel %vm344_vm1, %v3656_v10, 0 }
 0x2f1   : > { %v2767_v43 = vpop.f32.mrf.mxu2  ;;  %4488 = vrot.lane.b32.xlu2 %v10893_v38, %s10044_s21 }
 0x2f2   : > { %v2780_v50 = vpop.f32.mrf.mxu3  ;;  %v2855_v47 = vpop.f32.mrf.mxu0 }
 0x2f3   : > { %v2868_v51 = vpop.f32.mrf.mxu1  ;;  %v11471_v60 = vadd.f32 %v2855_v47, %v11400_v1 }
 0x2f4   : > { %v11474_v54 = vadd.f32 %v2868_v51, %v11403_v18  ;;  %v3649_v23 = vpop.permute.xlu2 %3648  ;;  %v3803_v27 = vpop.permute.xlu1 %3802 }
 0x2f5   : > { %9657 = vmatmul.msk.bf16.vlgmr.msra.gmra.mxu0 %vm340_vm2, %v9656_v48  ;;  %9658 = vmatmul.msk.bf16.vlgmr.msra.gmra.mxu1 %vm340_vm2, %v9656_v48 }
 0x2f6   : > { %9659 = vmatmul.msk.bf16.vlgmr.msra.gmra.mxu2 %vm340_vm2, %v9656_v48  ;;  %3693 = vmatpush.bf16.msra.mxu0 %v3663_v53 }
 0x2f7   : > { %9660 = vmatmul.msk.bf16.vlgmr.msra.gmra.mxu3 %vm340_vm2, %v9656_v48  ;;  %3706 = vmatpush.bf16.msra.mxu1 %v3666_v2 }
 0x2f8   : > { %3719 = vmatpush.bf16.msra.mxu2 %v3669_v57  ;;  %3732 = vmatpush.bf16.msra.mxu3 %v3672_v58 }
 0x2f9   : > { %v2881_v9 = vpop.f32.mrf.mxu2  ;;  %4644 = vrot.lane.b32.xlu2 %v10123_v13, %s13818_s15 }
 0x2fa   : > { %v2894_v59 = vpop.f32.mrf.mxu3  ;;  %v11487_v11 = vadd.f32 %v2881_v9, %v11420_v12  ;;  %v2857_v1 = vpop.f32.mrf.mxu0 }
 0x2fb   : > { %v11490_v62 = vadd.f32 %v2894_v59, %v11423_v29  ;;  %v2870_v18 = vpop.f32.mrf.mxu1  ;;  %v3658_v29 = vsel %vm13812_vm15, %v3647_v0, %v3649_v23  ;;  %vm13813_vm15 = vcmask 236544  }
 0x2fc   : > { %v3684_v5 = vsel %vm344_vm1, %v3658_v29, 0  ;;  %v3809_v40 = vpop.permute.xlu1 %3808  ;;  %v3819_v41 = vsel %vm13813_vm15, %v3801_v16, %v3803_v27 }
 0x2fd   : > { %v3831_v45 = vsel %vm344_vm1, %v3819_v41, 0 }
 0x301   : > { %v2883_v3 = vpop.f32.mrf.mxu2  ;;  %4650 = vrot.lane.b32.xlu2 %v10135_v20, %s13818_s15  ;;  %v3681_v20 = vsel %vm344_vm1, %v3657_v30, 0 }
 0x302   : > { %v2896_v28 = vpop.f32.mrf.mxu3  ;;  %v2907_v13 = vpop.f32.mrf.mxu0 }
 0x303   : > { %v2920_v12 = vpop.f32.mrf.mxu1  ;;  %v11499_v63 = vadd.f32 %v2907_v13, %v11436_v36 }
 0x304   : > { %v11502_v31 = vadd.f32 %v2920_v12, %v11439_v8  ;;  %v3805_v8 = vpop.permute.xlu2 %3804  ;;  %v3815_v61 = vpop.permute.xlu1 %3814 }
 0x305   : > { %9661 = vmatmul.msk.bf16.vlgmr.msrb.gmra.mxu0 %vm340_vm2, %v9656_v48  ;;  %9662 = vmatmul.msk.bf16.vlgmr.msrb.gmra.mxu1 %vm340_vm2, %v9656_v48  ;;  %v3820_v46 = vsel %vm13813_vm15, %v3803_v27, %v3805_v8 }
 0x306   : > { %9663 = vmatmul.msk.bf16.vlgmr.msrb.gmra.mxu2 %vm340_vm2, %v9656_v48  ;;  %3745 = vmatpush.bf16.msrb.mxu0 %v3675_v14  ;;  %v3834_v55 = vsel %vm344_vm1, %v3820_v46, 0 }
 0x307   : > { %9664 = vmatmul.msk.bf16.vlgmr.msrb.gmra.mxu3 %vm340_vm2, %v9656_v48  ;;  %3758 = vmatpush.bf16.msrb.mxu1 %v3678_v25 }
 0x308   : > { %3771 = vmatpush.bf16.msrb.mxu2 %v3681_v20  ;;  %3784 = vmatpush.bf16.msrb.mxu3 %v3684_v5 }
 0x309   : > { %v2933_v4 = vpop.f32.mrf.mxu2  ;;  %4656 = vrot.lane.b32.xlu2 %v10893_v38, %s13818_s15  ;;  %s13844_s15 = smov 27  }
 0x30a   : > { %v2946_v24 = vpop.f32.mrf.mxu3  ;;  %v11515_v34 = vadd.f32 %v2933_v4, %v11456_v39  ;;  %v2909_v15 = vpop.f32.mrf.mxu0  ;;  %v3821_v39 = vsel %vm13813_vm15, %v3805_v8, %v3807_v33 }
 0x30b   : > { %v11518_v35 = vadd.f32 %v2946_v24, %v11459_v37  ;;  %v2922_v36 = vpop.f32.mrf.mxu1  ;;  %v3822_v37 = vsel %vm13813_vm15, %v3807_v33, %v3809_v40  ;;  %v3837_v42 = vsel %vm344_vm1, %v3821_v39, 0  ;;  %v9674_v24 = vld [vmem:[%s13787_s1 + $0x54] sm:$0xf] }
 0x30c   : > { %v3840_v43 = vsel %vm344_vm1, %v3822_v37, 0  ;;  %v3811_v50 = vpop.permute.xlu2 %3810  ;;  %v3971_v3 = vpop.permute.xlu1 %3970 }
 0x30d   : > { %v3823_v57 = vsel %vm13813_vm15, %v3809_v40, %v3811_v50 }
 0x30e   : > { %v3843_v18 = vsel %vm344_vm1, %v3823_v57, 0 }
 0x311   : > { %v2935_v32 = vpop.f32.mrf.mxu2 }
 0x312   : > { %v2948_v17 = vpop.f32.mrf.mxu3  ;;  %v3023_v22 = vpop.f32.mrf.mxu0 }
 0x313   : > { %v3036_v38 = vpop.f32.mrf.mxu1  ;;  %v11528_v26 = vadd.f32 %v3023_v22, %v11471_v60  ;;  %v3813_v60 = vpop.permute.xlu0 %3812 }
 0x314   : > { %v11531_v49 = vadd.f32 %v3036_v38, %v11474_v54  ;;  %v3817_v54 = vpop.permute.xlu2 %3816  ;;  %v3824_v58 = vsel %vm13813_vm15, %v3811_v50, %v3813_v60  ;;  %v3825_v59 = vsel %vm13813_vm15, %v3813_v60, %v3815_v61 }
 0x315   : > { %9666 = vmatmul.msk.bf16.vlgmr.msra.gmra.mxu0 %vm340_vm2, %v9665_v21  ;;  %9667 = vmatmul.msk.bf16.vlgmr.msra.gmra.mxu1 %vm340_vm2, %v9665_v21  ;;  %v3846_v0 = vsel %vm344_vm1, %v3824_v58, 0  ;;  %v3849_v19 = vsel %vm344_vm1, %v3825_v59, 0 }
 0x316   : > { %9668 = vmatmul.msk.bf16.vlgmr.msra.gmra.mxu2 %vm340_vm2, %v9665_v21  ;;  %3861 = vmatpush.bf16.msra.mxu0 %v3831_v45 }
 0x317   : > { %9669 = vmatmul.msk.bf16.vlgmr.msra.gmra.mxu3 %vm340_vm2, %v9665_v21  ;;  %3874 = vmatpush.bf16.msra.mxu1 %v3834_v55 }
 0x318   : > { %3887 = vmatpush.bf16.msra.mxu2 %v3837_v42  ;;  %3900 = vmatpush.bf16.msra.mxu3 %v3840_v43 }
 0x319   : > { %v3049_v44 = vpop.f32.mrf.mxu2 }
 0x31a   : > { %v3062_v52 = vpop.f32.mrf.mxu3  ;;  %v11542_v47 = vadd.f32 %v3049_v44, %v11487_v11  ;;  %v3025_v48 = vpop.f32.mrf.mxu0  ;;  %v3826_v11 = vsel %vm13813_vm15, %v3815_v61, %v3817_v54  ;;  %vm13814_vm15 = vcmask 228352  }
 0x31b   : > { %v11545_v51 = vadd.f32 %v3062_v52, %v11490_v62  ;;  %v3038_v56 = vpop.f32.mrf.mxu1  ;;  %v3852_v23 = vsel %vm344_vm1, %v3826_v11, 0  ;;  %v3969_v28 = vpop.permute.xlu0 %3968 }
 0x31c   : > { %v3987_v5 = vsel %vm13814_vm15, %v3969_v28, %v3971_v3 }
 0x31d   : > { %v3999_v8 = vsel %vm344_vm1, %v3987_v5, 0 }
 0x321   : > { %v3051_v53 = vpop.f32.mrf.mxu2 }
 0x322   : > { %v3064_v2 = vpop.f32.mrf.mxu3  ;;  %v3075_v7 = vpop.f32.mrf.mxu0 }
 0x323   : > { %v3088_v9 = vpop.f32.mrf.mxu1  ;;  %v11552_v62 = vadd.f32 %v3075_v7, %v11499_v63  ;;  %v3973_v63 = vpop.permute.xlu2 %3972 }
 0x324   : > { %v11555_v1 = vadd.f32 %v3088_v9, %v11502_v31  ;;  %v3977_v31 = vpop.permute.xlu1 %3976  ;;  %v3975_v14 = vpop.permute.xlu0 %3974  ;;  %v3988_v27 = vsel %vm13814_vm15, %v3971_v3, %v3973_v63 }
 0x325   : > { %9670 = vmatmul.msk.bf16.vlgmr.msrb.gmra.mxu0 %vm340_vm2, %v9665_v21  ;;  %9671 = vmatmul.msk.bf16.vlgmr.msrb.gmra.mxu1 %vm340_vm2, %v9665_v21  ;;  %v4002_v40 = vsel %vm344_vm1, %v3988_v27, 0 }
 0x326   : > { %9672 = vmatmul.msk.bf16.vlgmr.msrb.gmra.mxu2 %vm340_vm2, %v9665_v21  ;;  %3913 = vmatpush.bf16.msrb.mxu0 %v3843_v18 }
 0x327   : > { %9673 = vmatmul.msk.bf16.vlgmr.msrb.gmra.mxu3 %vm340_vm2, %v9665_v21  ;;  %3926 = vmatpush.bf16.msrb.mxu1 %v3846_v0 }
 0x328   : > { %3939 = vmatpush.bf16.msrb.mxu2 %v3849_v19  ;;  %3952 = vmatpush.bf16.msrb.mxu3 %v3852_v23 }
 0x329   : > { %v3101_v6 = vpop.f32.mrf.mxu2 }
 0x32a   : > { %v3114_v10 = vpop.f32.mrf.mxu3  ;;  %v11566_v13 = vadd.f32 %v3101_v6, %v11515_v34  ;;  %v3077_v30 = vpop.f32.mrf.mxu0  ;;  %v3989_v34 = vsel %vm13814_vm15, %v3973_v63, %v3975_v14 }
 0x32b   : > { %v11569_v12 = vadd.f32 %v3114_v10, %v11518_v35  ;;  %v3090_v29 = vpop.f32.mrf.mxu1  ;;  %v3990_v35 = vsel %vm13814_vm15, %v3975_v14, %v3977_v31  ;;  %v4005_v33 = vsel %vm344_vm1, %v3989_v34, 0  ;;  %v3979_v17 = vpop.permute.xlu2 %3978  ;;  %v9683_v10 = vld [vmem:[%s13787_s1 + $0x58] sm:$0xf] }
 0x32c   : > { %v4008_v32 = vsel %vm344_vm1, %v3990_v35, 0  ;;  %v3983_v37 = vpop.permute.xlu1 %3982  ;;  %v3991_v42 = vsel %vm13814_vm15, %v3977_v31, %v3979_v17 }
 0x32d   : > { %v4011_v56 = vsel %vm344_vm1, %v3991_v42, 0 }
 0x331   : > { %v3103_v25 = vpop.f32.mrf.mxu2 }
 0x332   : > { %v3116_v20 = vpop.f32.mrf.mxu3  ;;  %v3191_v16 = vpop.f32.mrf.mxu0 }
 0x333   : > { %v3204_v4 = vpop.f32.mrf.mxu1  ;;  %v11579_v15 = vadd.f32 %v3191_v16, %v11528_v26  ;;  %v3981_v26 = vpop.permute.xlu0 %3980 }
 0x334   : > { %v11582_v36 = vadd.f32 %v3204_v4, %v11531_v49  ;;  %v3985_v49 = vpop.permute.xlu2 %3984  ;;  %v3992_v43 = vsel %vm13814_vm15, %v3979_v17, %v3981_v26  ;;  %v3993_v52 = vsel %vm13814_vm15, %v3981_v26, %v3983_v37  ;;  %v4139_v53 = vpop.permute.xlu1 %4138 }
 0x335   : > { %9675 = vmatmul.msk.bf16.vlgmr.msra.gmra.mxu0 %vm340_vm2, %v9674_v24  ;;  %9676 = vmatmul.msk.bf16.vlgmr.msra.gmra.mxu1 %vm340_vm2, %v9674_v24  ;;  %v4014_v61 = vsel %vm344_vm1, %v3992_v43, 0  ;;  %v4017_v60 = vsel %vm344_vm1, %v3993_v52, 0 }
 0x336   : > { %9677 = vmatmul.msk.bf16.vlgmr.msra.gmra.mxu2 %vm340_vm2, %v9674_v24  ;;  %4029 = vmatpush.bf16.msra.mxu0 %v3999_v8 }
 0x337   : > { %9678 = vmatmul.msk.bf16.vlgmr.msra.gmra.mxu3 %vm340_vm2, %v9674_v24  ;;  %4042 = vmatpush.bf16.msra.mxu1 %v4002_v40 }
 0x338   : > { %4055 = vmatpush.bf16.msra.mxu2 %v4005_v33  ;;  %4068 = vmatpush.bf16.msra.mxu3 %v4008_v32 }
 0x339   : > { %v3217_v41 = vpop.f32.mrf.mxu2 }
 0x33a   : > { %v3230_v46 = vpop.f32.mrf.mxu3  ;;  %v11593_v22 = vadd.f32 %v3217_v41, %v11542_v47  ;;  %v3193_v21 = vpop.f32.mrf.mxu0  ;;  %v3994_v47 = vsel %vm13814_vm15, %v3983_v37, %v3985_v49  ;;  %vm13815_vm15 = vcmask 220160  }
 0x33b   : > { %v11596_v38 = vadd.f32 %v3230_v46, %v11545_v51  ;;  %v3206_v39 = vpop.f32.mrf.mxu1  ;;  %v4020_v54 = vsel %vm344_vm1, %v3994_v47, 0  ;;  %v4137_v2 = vpop.permute.xlu0 %4136 }
 0x33c   : > { %v4155_v23 = vsel %vm13815_vm15, %v4137_v2, %v4139_v53 }
 0x33d   : > { %v4167_v63 = vsel %vm344_vm1, %v4155_v23, 0 }
 0x341   : > { %v3219_v45 = vpop.f32.mrf.mxu2 }
 0x342   : > { %v3232_v55 = vpop.f32.mrf.mxu3  ;;  %v3243_v50 = vpop.f32.mrf.mxu0 }
 0x343   : > { %v3256_v44 = vpop.f32.mrf.mxu1  ;;  %v11603_v51 = vadd.f32 %v3243_v50, %v11552_v62  ;;  %v4141_v62 = vpop.permute.xlu2 %4140 }
 0x344   : > { %v11606_v48 = vadd.f32 %v3256_v44, %v11555_v1  ;;  %v4145_v1 = vpop.permute.xlu1 %4144  ;;  %v4143_v18 = vpop.permute.xlu0 %4142  ;;  %v4156_v3 = vsel %vm13815_vm15, %v4139_v53, %v4141_v62 }
 0x345   : > { %9679 = vmatmul.msk.bf16.vlgmr.msrb.gmra.mxu0 %vm340_vm2, %v9674_v24  ;;  %9680 = vmatmul.msk.bf16.vlgmr.msrb.gmra.mxu1 %vm340_vm2, %v9674_v24  ;;  %v4170_v31 = vsel %vm344_vm1, %v4156_v3, 0 }
 0x346   : > { %9681 = vmatmul.msk.bf16.vlgmr.msrb.gmra.mxu2 %vm340_vm2, %v9674_v24  ;;  %4081 = vmatpush.bf16.msrb.mxu0 %v4011_v56 }
 0x347   : > { %9682 = vmatmul.msk.bf16.vlgmr.msrb.gmra.mxu3 %vm340_vm2, %v9674_v24  ;;  %4094 = vmatpush.bf16.msrb.mxu1 %v4014_v61 }
 0x348   : > { %4107 = vmatpush.bf16.msrb.mxu2 %v4017_v60  ;;  %4120 = vmatpush.bf16.msrb.mxu3 %v4020_v54 }
 0x349   : > { %v3269_v57 = vpop.f32.mrf.mxu2 }
 0x34a   : > { %v3282_v58 = vpop.f32.mrf.mxu3  ;;  %v11617_v7 = vadd.f32 %v3269_v57, %v11566_v13  ;;  %v3245_v59 = vpop.f32.mrf.mxu0  ;;  %v4157_v13 = vsel %vm13815_vm15, %v4141_v62, %v4143_v18 }
 0x34b   : > { %v11620_v9 = vadd.f32 %v3282_v58, %v11569_v12  ;;  %v3258_v11 = vpop.f32.mrf.mxu1  ;;  %v4158_v12 = vsel %vm13815_vm15, %v4143_v18, %v4145_v1  ;;  %v4173_v14 = vsel %vm344_vm1, %v4157_v13, 0  ;;  %v4147_v20 = vpop.permute.xlu2 %4146  ;;  %v9692_v58 = vld [vmem:[%s13787_s1 + $0x5c] sm:$0xf] }
 0x34c   : > { %v4176_v25 = vsel %vm344_vm1, %v4158_v12, 0  ;;  %v4151_v35 = vpop.permute.xlu1 %4150  ;;  %v4159_v33 = vsel %vm13815_vm15, %v4145_v1, %v4147_v20 }
 0x34d   : > { %v4179_v39 = vsel %vm344_vm1, %v4159_v33, 0 }
 0x351   : > { %v3271_v0 = vpop.f32.mrf.mxu2 }
 0x352   : > { %v3284_v19 = vpop.f32.mrf.mxu3  ;;  %v3359_v28 = vpop.f32.mrf.mxu0 }
 0x353   : > { %v3372_v6 = vpop.f32.mrf.mxu1  ;;  %v11630_v30 = vadd.f32 %v3359_v28, %v11579_v15  ;;  %v4149_v15 = vpop.permute.xlu0 %4148 }
 0x354   : > { %v11633_v29 = vadd.f32 %v3372_v6, %v11582_v36  ;;  %v4153_v36 = vpop.permute.xlu2 %4152  ;;  %v4160_v32 = vsel %vm13815_vm15, %v4147_v20, %v4149_v15  ;;  %v4161_v46 = vsel %vm13815_vm15, %v4149_v15, %v4151_v35  ;;  %v4307_v45 = vpop.permute.xlu1 %4306 }
 0x355   : > { %9684 = vmatmul.msk.bf16.vlgmr.msra.gmra.mxu0 %vm340_vm2, %v9683_v10  ;;  %9685 = vmatmul.msk.bf16.vlgmr.msra.gmra.mxu1 %vm340_vm2, %v9683_v10  ;;  %v4182_v37 = vsel %vm344_vm1, %v4160_v32, 0  ;;  %v4185_v26 = vsel %vm344_vm1, %v4161_v46, 0 }
 0x356   : > { %9686 = vmatmul.msk.bf16.vlgmr.msra.gmra.mxu2 %vm340_vm2, %v9683_v10  ;;  %4197 = vmatpush.bf16.msra.mxu0 %v4167_v63 }
 0x357   : > { %9687 = vmatmul.msk.bf16.vlgmr.msra.gmra.mxu3 %vm340_vm2, %v9683_v10  ;;  %4210 = vmatpush.bf16.msra.mxu1 %v4170_v31 }
 0x358   : > { %4223 = vmatpush.bf16.msra.mxu2 %v4173_v14  ;;  %4236 = vmatpush.bf16.msra.mxu3 %v4176_v25 }
 0x359   : > { %v3385_v5 = vpop.f32.mrf.mxu2 }
 0x35a   : > { %v3398_v27 = vpop.f32.mrf.mxu3  ;;  %v11644_v16 = vadd.f32 %v3385_v5, %v11593_v22  ;;  %v3361_v24 = vpop.f32.mrf.mxu0  ;;  %v4162_v22 = vsel %vm13815_vm15, %v4151_v35, %v4153_v36  ;;  %vm13816_vm15 = vcmask 154624  }
 0x35b   : > { %v11647_v4 = vadd.f32 %v3398_v27, %v11596_v38  ;;  %v3374_v34 = vpop.f32.mrf.mxu1  ;;  %v4188_v49 = vsel %vm344_vm1, %v4162_v22, 0  ;;  %v4305_v55 = vpop.permute.xlu0 %4304 }
 0x35c   : > { %v4323_v54 = vsel %vm13816_vm15, %v4305_v55, %v4307_v45 }
 0x35d   : > { %v4335_v62 = vsel %vm344_vm1, %v4323_v54, 0 }
 0x361   : > { %v3387_v8 = vpop.f32.mrf.mxu2 }
 0x362   : > { %v3400_v40 = vpop.f32.mrf.mxu3  ;;  %v3411_v17 = vpop.f32.mrf.mxu0 }
 0x363   : > { %v3424_v41 = vpop.f32.mrf.mxu1  ;;  %v11654_v38 = vadd.f32 %v3411_v17, %v11603_v51  ;;  %v4309_v51 = vpop.permute.xlu2 %4308 }
 0x364   : > { %v11657_v21 = vadd.f32 %v3424_v41, %v11606_v48  ;;  %v4313_v48 = vpop.permute.xlu1 %4312  ;;  %v4311_v56 = vpop.permute.xlu0 %4310  ;;  %v4324_v53 = vsel %vm13816_vm15, %v4307_v45, %v4309_v51 }
 0x365   : > { %9688 = vmatmul.msk.bf16.vlgmr.msrb.gmra.mxu0 %vm340_vm2, %v9683_v10  ;;  %9689 = vmatmul.msk.bf16.vlgmr.msrb.gmra.mxu1 %vm340_vm2, %v9683_v10  ;;  %v4338_v1 = vsel %vm344_vm1, %v4324_v53, 0 }
 0x366   : > { %9690 = vmatmul.msk.bf16.vlgmr.msrb.gmra.mxu2 %vm340_vm2, %v9683_v10  ;;  %4249 = vmatpush.bf16.msrb.mxu0 %v4179_v39 }
 0x367   : > { %9691 = vmatmul.msk.bf16.vlgmr.msrb.gmra.mxu3 %vm340_vm2, %v9683_v10  ;;  %4262 = vmatpush.bf16.msrb.mxu1 %v4182_v37 }
 0x368   : > { %4275 = vmatpush.bf16.msrb.mxu2 %v4185_v26  ;;  %4288 = vmatpush.bf16.msrb.mxu3 %v4188_v49 }
 0x369   : > { %v3437_v42 = vpop.f32.mrf.mxu2 }
 0x36a   : > { %v3450_v43 = vpop.f32.mrf.mxu3  ;;  %v11668_v50 = vadd.f32 %v3437_v42, %v11617_v7  ;;  %v3413_v52 = vpop.f32.mrf.mxu0  ;;  %v4325_v7 = vsel %vm13816_vm15, %v4309_v51, %v4311_v56 }
 0x36b   : > { %v11671_v44 = vadd.f32 %v3450_v43, %v11620_v9  ;;  %v3426_v47 = vpop.f32.mrf.mxu1  ;;  %v4326_v9 = vsel %vm13816_vm15, %v4311_v56, %v4313_v48  ;;  %v4341_v18 = vsel %vm344_vm1, %v4325_v7, 0  ;;  %v4315_v19 = vpop.permute.xlu2 %4314  ;;  %v9701_v43 = vld [vmem:[%s13787_s1 + $0x60] sm:$0xf] }
 0x36c   : > { %v4344_v0 = vsel %vm344_vm1, %v4326_v9, 0  ;;  %v4319_v12 = vpop.permute.xlu1 %4318  ;;  %v4327_v14 = vsel %vm13816_vm15, %v4313_v48, %v4315_v19 }
 0x36d   : > { %v4347_v34 = vsel %vm344_vm1, %v4327_v14, 0 }
 0x371   : > { %v3439_v61 = vpop.f32.mrf.mxu2 }
 0x372   : > { %v3452_v60 = vpop.f32.mrf.mxu3  ;;  %v3527_v2 = vpop.f32.mrf.mxu0 }
 0x373   : > { %v3540_v57 = vpop.f32.mrf.mxu1  ;;  %v11681_v59 = vadd.f32 %v3527_v2, %v11630_v30  ;;  %v4317_v30 = vpop.permute.xlu0 %4316 }
 0x374   : > { %v11684_v11 = vadd.f32 %v3540_v57, %v11633_v29  ;;  %v4321_v29 = vpop.permute.xlu2 %4320  ;;  %v4328_v25 = vsel %vm13816_vm15, %v4315_v19, %v4317_v30  ;;  %v4329_v27 = vsel %vm13816_vm15, %v4317_v30, %v4319_v12  ;;  %v4475_v8 = vpop.permute.xlu1 %4474 }
 0x375   : > { %9693 = vmatmul.msk.bf16.vlgmr.msra.gmra.mxu0 %vm340_vm2, %v9692_v58  ;;  %9694 = vmatmul.msk.bf16.vlgmr.msra.gmra.mxu1 %vm340_vm2, %v9692_v58  ;;  %v4350_v35 = vsel %vm344_vm1, %v4328_v25, 0  ;;  %v4353_v15 = vsel %vm344_vm1, %v4329_v27, 0 }
 0x376   : > { %9695 = vmatmul.msk.bf16.vlgmr.msra.gmra.mxu2 %vm340_vm2, %v9692_v58  ;;  %4365 = vmatpush.bf16.msra.mxu0 %v4335_v62 }
 0x377   : > { %9696 = vmatmul.msk.bf16.vlgmr.msra.gmra.mxu3 %vm340_vm2, %v9692_v58  ;;  %4378 = vmatpush.bf16.msra.mxu1 %v4338_v1 }
 0x378   : > { %4391 = vmatpush.bf16.msra.mxu2 %v4341_v18  ;;  %4404 = vmatpush.bf16.msra.mxu3 %v4344_v0 }
 0x379   : > { %v3553_v23 = vpop.f32.mrf.mxu2 }
 0x37a   : > { %v3566_v3 = vpop.f32.mrf.mxu3  ;;  %v11695_v28 = vadd.f32 %v3553_v23, %v11644_v16  ;;  %v3529_v10 = vpop.f32.mrf.mxu0  ;;  %v4330_v16 = vsel %vm13816_vm15, %v4319_v12, %v4321_v29  ;;  %vm13817_vm15 = vcmask 146432  }
 0x37b   : > { %v11698_v6 = vadd.f32 %v3566_v3, %v11647_v4  ;;  %v3542_v13 = vpop.f32.mrf.mxu1  ;;  %v4356_v36 = vsel %vm344_vm1, %v4330_v16, 0  ;;  %v4473_v40 = vpop.permute.xlu0 %4472 }
 0x37c   : > { %v4491_v49 = vsel %vm13817_vm15, %v4473_v40, %v4475_v8 }
 0x37d   : > { %v4503_v51 = vsel %vm344_vm1, %v4491_v49, 0 }
 0x381   : > { %v3555_v63 = vpop.f32.mrf.mxu2 }
 0x382   : > { %v3568_v31 = vpop.f32.mrf.mxu3  ;;  %v3579_v20 = vpop.f32.mrf.mxu0 }
 0x383   : > { %v3592_v5 = vpop.f32.mrf.mxu1  ;;  %v11705_v4 = vadd.f32 %v3579_v20, %v11654_v38  ;;  %v4477_v38 = vpop.permute.xlu2 %4476 }
 0x384   : > { %v11708_v24 = vadd.f32 %v3592_v5, %v11657_v21  ;;  %v4481_v21 = vpop.permute.xlu1 %4480  ;;  %v4479_v39 = vpop.permute.xlu0 %4478  ;;  %v4492_v45 = vsel %vm13817_vm15, %v4475_v8, %v4477_v38 }
 0x385   : > { %9697 = vmatmul.msk.bf16.vlgmr.msrb.gmra.mxu0 %vm340_vm2, %v9692_v58  ;;  %9698 = vmatmul.msk.bf16.vlgmr.msrb.gmra.mxu1 %vm340_vm2, %v9692_v58  ;;  %v4506_v48 = vsel %vm344_vm1, %v4492_v45, 0 }
 0x386   : > { %9699 = vmatmul.msk.bf16.vlgmr.msrb.gmra.mxu2 %vm340_vm2, %v9692_v58  ;;  %4417 = vmatpush.bf16.msrb.mxu0 %v4347_v34 }
 0x387   : > { %9700 = vmatmul.msk.bf16.vlgmr.msrb.gmra.mxu3 %vm340_vm2, %v9692_v58  ;;  %4430 = vmatpush.bf16.msrb.mxu1 %v4350_v35 }
 0x388   : > { %4443 = vmatpush.bf16.msrb.mxu2 %v4353_v15  ;;  %4456 = vmatpush.bf16.msrb.mxu3 %v4356_v36 }
 0x389   : > { %v3605_v33 = vpop.f32.mrf.mxu2 }
 0x38a   : > { %v3618_v32 = vpop.f32.mrf.mxu3  ;;  %v11719_v17 = vadd.f32 %v3605_v33, %v11668_v50  ;;  %v3581_v46 = vpop.f32.mrf.mxu0  ;;  %v4493_v50 = vsel %vm13817_vm15, %v4477_v38, %v4479_v39 }
 0x38b   : > { %v11722_v41 = vadd.f32 %v3618_v32, %v11671_v44  ;;  %v3594_v22 = vpop.f32.mrf.mxu1  ;;  %v4494_v44 = vsel %vm13817_vm15, %v4479_v39, %v4481_v21  ;;  %v4509_v56 = vsel %vm344_vm1, %v4493_v50, 0  ;;  %v4483_v60 = vpop.permute.xlu2 %4482  ;;  %v9710_v32 = vld [vmem:[%s13787_s1 + $0x64] sm:$0xf] }
 0x38c   : > { %v4512_v61 = vsel %vm344_vm1, %v4494_v44, 0  ;;  %v4487_v9 = vpop.permute.xlu1 %4486  ;;  %v4495_v18 = vsel %vm13817_vm15, %v4481_v21, %v4483_v60 }
 0x38d   : > { %v4515_v13 = vsel %vm344_vm1, %v4495_v18, 0 }
 0x391   : > { %v3607_v37 = vpop.f32.mrf.mxu2 }
 0x392   : > { %v3620_v26 = vpop.f32.mrf.mxu3  ;;  %v3695_v55 = vpop.f32.mrf.mxu0 }
 0x393   : > { %v3708_v42 = vpop.f32.mrf.mxu1  ;;  %v11732_v52 = vadd.f32 %v3695_v55, %v11681_v59  ;;  %v4485_v59 = vpop.permute.xlu0 %4484 }
 0x394   : > { %v11735_v47 = vadd.f32 %v3708_v42, %v11684_v11  ;;  %v4489_v11 = vpop.permute.xlu2 %4488  ;;  %v4496_v0 = vsel %vm13817_vm15, %v4483_v60, %v4485_v59  ;;  %v4497_v3 = vsel %vm13817_vm15, %v4485_v59, %v4487_v9  ;;  %v4643_v63 = vpop.permute.xlu1 %4642  ;;  %v4806_v60 = vld [vmem:[%s13788_s2] sm:$0xff] }
 0x395   : > { %9702 = vmatmul.msk.bf16.vlgmr.msra.gmra.mxu0 %vm340_vm2, %v9701_v43  ;;  %9703 = vmatmul.msk.bf16.vlgmr.msra.gmra.mxu1 %vm340_vm2, %v9701_v43  ;;  %v4518_v12 = vsel %vm344_vm1, %v4496_v0, 0  ;;  %v4521_v30 = vsel %vm344_vm1, %v4497_v3, 0 }
 0x396   : > { %9704 = vmatmul.msk.bf16.vlgmr.msra.gmra.mxu2 %vm340_vm2, %v9701_v43  ;;  %4533 = vmatpush.bf16.msra.mxu0 %v4503_v51 }
 0x397   : > { %9705 = vmatmul.msk.bf16.vlgmr.msra.gmra.mxu3 %vm340_vm2, %v9701_v43  ;;  %4546 = vmatpush.bf16.msra.mxu1 %v4506_v48 }
 0x398   : > { %4559 = vmatpush.bf16.msra.mxu2 %v4509_v56  ;;  %4572 = vmatpush.bf16.msra.mxu3 %v4512_v61 }
 0x399   : > { %v3721_v54 = vpop.f32.mrf.mxu2 }
 0x39a   : > { %v3734_v53 = vpop.f32.mrf.mxu3  ;;  %v11746_v2 = vadd.f32 %v3721_v54, %v11695_v28  ;;  %v3697_v58 = vpop.f32.mrf.mxu0  ;;  %v4498_v28 = vsel %vm13817_vm15, %v4487_v9, %v4489_v11  ;;  %vm13820_vm15 = vcmask 138240  }
 0x39b   : > { %v11749_v57 = vadd.f32 %v3734_v53, %v11698_v6  ;;  %v3710_v7 = vpop.f32.mrf.mxu1  ;;  %v4524_v29 = vsel %vm344_vm1, %v4498_v28, 0  ;;  %v4641_v31 = vpop.permute.xlu0 %4640  ;;  %v10046_v58 = vmov 0  }
 0x39c   : > { %v4659_v36 = vsel %vm13820_vm15, %v4641_v31, %v4643_v63  ;;  %10009 = vset.pattern.permute.xlu0 %v10046_v58  ;;  %4871 = vst [vmem:[#allocation2] sm:$0xf] %v10046_v58  ;;  %10010 = vset.pattern.permute.xlu2 %v10046_v58 }
 0x39d   : > { %v4671_v38 = vsel %vm344_vm1, %v4659_v36, 0  ;;  %4880 = vst [vmem:[#allocation2 + $0x24] sm:$0xf] %v10046_v58  ;;  %4809 = vperm.xlu0 %10009, %v4806_v60  }
 0x3a1   : > { %v3723_v62 = vpop.f32.mrf.mxu2 }
 0x3a2   : > { %v3736_v1 = vpop.f32.mrf.mxu3  ;;  %v3747_v19 = vpop.f32.mrf.mxu0 }
 0x3a3   : > { %v3760_v23 = vpop.f32.mrf.mxu1  ;;  %v11756_v6 = vadd.f32 %v3747_v19, %v11705_v4  ;;  %v4645_v4 = vpop.permute.xlu2 %4644 }
 0x3a4   : > { %v11759_v10 = vadd.f32 %v3760_v23, %v11708_v24  ;;  %v4649_v24 = vpop.permute.xlu1 %4648  ;;  %v4647_v34 = vpop.permute.xlu0 %4646  ;;  %v4660_v8 = vsel %vm13820_vm15, %v4643_v63, %v4645_v4 }
 0x3a5   : > { %9706 = vmatmul.msk.bf16.vlgmr.msrb.gmra.mxu0 %vm340_vm2, %v9701_v43  ;;  %9707 = vmatmul.msk.bf16.vlgmr.msrb.gmra.mxu1 %vm340_vm2, %v9701_v43  ;;  %v4674_v21 = vsel %vm344_vm1, %v4660_v8, 0 }
 0x3a6   : > { %9708 = vmatmul.msk.bf16.vlgmr.msrb.gmra.mxu2 %vm340_vm2, %v9701_v43  ;;  %4585 = vmatpush.bf16.msrb.mxu0 %v4515_v13 }
 0x3a7   : > { %9709 = vmatmul.msk.bf16.vlgmr.msrb.gmra.mxu3 %vm340_vm2, %v9701_v43  ;;  %4598 = vmatpush.bf16.msrb.mxu1 %v4518_v12 }
 0x3a8   : > { %4611 = vmatpush.bf16.msrb.mxu2 %v4521_v30  ;;  %4624 = vmatpush.bf16.msrb.mxu3 %v4524_v29  ;;  %v9719_v30 = vld [vmem:[%s13787_s1 + $0x68] sm:$0xf] }
 0x3a9   : > { %v3773_v14 = vpop.f32.mrf.mxu2 }
 0x3aa   : > { %v3786_v25 = vpop.f32.mrf.mxu3  ;;  %v11770_v20 = vadd.f32 %v3773_v14, %v11719_v17  ;;  %v3749_v27 = vpop.f32.mrf.mxu0  ;;  %v4661_v17 = vsel %vm13820_vm15, %v4645_v4, %v4647_v34 }
 0x3ab   : > { %v11773_v5 = vadd.f32 %v3786_v25, %v11722_v41  ;;  %v3762_v16 = vpop.f32.mrf.mxu1  ;;  %v4662_v41 = vsel %vm13820_vm15, %v4647_v34, %v4649_v24  ;;  %v4677_v39 = vsel %vm344_vm1, %v4661_v17, 0  ;;  %v4651_v26 = vpop.permute.xlu2 %4650 }
 0x3ac   : > { %v4680_v37 = vsel %vm344_vm1, %v4662_v41, 0  ;;  %v4653_v44 = vpop.permute.xlu0 %4652  ;;  %v4663_v56 = vsel %vm13820_vm15, %v4649_v24, %v4651_v26 }
 0x3ad   : > { %v4664_v61 = vsel %vm13820_vm15, %v4651_v26, %v4653_v44  ;;  %v4683_v59 = vsel %vm344_vm1, %v4663_v56, 0 }
 0x3ae   : > { %v4686_v11 = vsel %vm344_vm1, %v4664_v61, 0 }
 0x3b1   : > { %v3775_v35 = vpop.f32.mrf.mxu2 }
 0x3b2   : > { %v3788_v15 = vpop.f32.mrf.mxu3  ;;  %v3863_v40 = vpop.f32.mrf.mxu0 }
 0x3b3   : > { %v3876_v33 = vpop.f32.mrf.mxu1  ;;  %v11783_v46 = vadd.f32 %v3863_v40, %v11732_v52  ;;  %v4657_v52 = vpop.permute.xlu2 %4656 }
 0x3b4   : > { %v11786_v22 = vadd.f32 %v3876_v33, %v11735_v47  ;;  %v4655_v47 = vpop.permute.xlu1 %4654 }
 0x3b5   : > { %9711 = vmatmul.msk.bf16.vlgmr.msra.gmra.mxu0 %vm340_vm2, %v9710_v32  ;;  %9712 = vmatmul.msk.bf16.vlgmr.msra.gmra.mxu1 %vm340_vm2, %v9710_v32 }
 0x3b6   : > { %9713 = vmatmul.msk.bf16.vlgmr.msra.gmra.mxu2 %vm340_vm2, %v9710_v32  ;;  %4701 = vmatpush.bf16.msra.mxu0 %v4671_v38 }
 0x3b7   : > { %9714 = vmatmul.msk.bf16.vlgmr.msra.gmra.mxu3 %vm340_vm2, %v9710_v32  ;;  %4714 = vmatpush.bf16.msra.mxu1 %v4674_v21 }
 0x3b8   : > { %4727 = vmatpush.bf16.msra.mxu2 %v4677_v39  ;;  %4740 = vmatpush.bf16.msra.mxu3 %v4680_v37 }
 0x3b9   : > { %v3889_v49 = vpop.f32.mrf.mxu2 }
 0x3ba   : > { %v3902_v45 = vpop.f32.mrf.mxu3  ;;  %v3960_v55 = vadd.f32 %v3889_v49, %v11746_v2  ;;  %v3865_v43 = vpop.f32.mrf.mxu0  ;;  %v4666_v2 = vsel %vm13820_vm15, %v4655_v47, %v4657_v52 }
 0x3bb   : > { %v3961_v42 = vadd.f32 %v3902_v45, %v11749_v57  ;;  %v3878_v50 = vpop.f32.mrf.mxu1  ;;  %v4665_v57 = vsel %vm13820_vm15, %v4653_v44, %v4655_v47  ;;  %v4692_v1 = vsel %vm344_vm1, %v4666_v2, 0 }
 0x3bc   : > { %v4689_v62 = vsel %vm344_vm1, %v4665_v57, 0 }
 0x3c1   : > { %v3891_v51 = vpop.f32.mrf.mxu2 }
 0x3c2   : > { %v3904_v48 = vpop.f32.mrf.mxu3  ;;  %v3915_v54 = vpop.f32.mrf.mxu0 }
 0x3c3   : > { %v3928_v53 = vpop.f32.mrf.mxu1  ;;  %v3962_v7 = vadd.f32 %v3915_v54, %v11756_v6 }
 0x3c4   : > { %v3963_v9 = vadd.f32 %v3928_v53, %v11759_v10 }
 0x3c5   : > { %9715 = vmatmul.msk.bf16.vlgmr.msrb.gmra.mxu0 %vm340_vm2, %v9710_v32  ;;  %9716 = vmatmul.msk.bf16.vlgmr.msrb.gmra.mxu1 %vm340_vm2, %v9710_v32 }
 0x3c6   : > { %9717 = vmatmul.msk.bf16.vlgmr.msrb.gmra.mxu2 %vm340_vm2, %v9710_v32  ;;  %4753 = vmatpush.bf16.msrb.mxu0 %v4683_v59 }
 0x3c7   : > { %9718 = vmatmul.msk.bf16.vlgmr.msrb.gmra.mxu3 %vm340_vm2, %v9710_v32  ;;  %4766 = vmatpush.bf16.msrb.mxu1 %v4686_v11 }
 0x3c8   : > { %4779 = vmatpush.bf16.msrb.mxu2 %v4689_v62  ;;  %4792 = vmatpush.bf16.msrb.mxu3 %v4692_v1 }
 0x3c9   : > { %v3941_v18 = vpop.f32.mrf.mxu2 }
 0x3ca   : > { %v3954_v0 = vpop.f32.mrf.mxu3  ;;  %v3964_v19 = vadd.f32 %v3941_v18, %v11770_v20  ;;  %v3917_v3 = vpop.f32.mrf.mxu0 }
 0x3cb   : > { %v3965_v23 = vadd.f32 %v3954_v0, %v11773_v5  ;;  %v3930_v28 = vpop.f32.mrf.mxu1 }
 0x3d1   : > { %v3943_v6 = vpop.f32.mrf.mxu2 }
 0x3d2   : > { %v3956_v10 = vpop.f32.mrf.mxu3  ;;  %v4031_v13 = vpop.f32.mrf.mxu0 }
 0x3d3   : > { %v4044_v12 = vpop.f32.mrf.mxu1  ;;  %v4126_v29 = vadd.f32 %v4031_v13, %v11783_v46 }
 0x3d4   : > { %v4127_v63 = vadd.f32 %v4044_v12, %v11786_v22 }
 0x3d5   : > { %9720 = vmatmul.msk.bf16.vlgmr.msra.gmra.mxu0 %vm340_vm2, %v9719_v30  ;;  %9721 = vmatmul.msk.bf16.vlgmr.msra.gmra.mxu1 %vm340_vm2, %v9719_v30 }
 0x3d6   : > { %9722 = vmatmul.msk.bf16.vlgmr.msra.gmra.mxu2 %vm340_vm2, %v9719_v30 }
 0x3d7   : > { %9723 = vmatmul.msk.bf16.vlgmr.msra.gmra.mxu3 %vm340_vm2, %v9719_v30 }
 0x3d9   : > { %v4057_v31 = vpop.f32.mrf.mxu2 }
 0x3da   : > { %v4070_v14 = vpop.f32.mrf.mxu3  ;;  %v4128_v25 = vadd.f32 %v4057_v31, %v3960_v55  ;;  %v4033_v5 = vpop.f32.mrf.mxu0 }
 0x3db   : > { %v4129_v20 = vadd.f32 %v4070_v14, %v3961_v42  ;;  %v4046_v27 = vpop.f32.mrf.mxu1 }
 0x3e1   : > { %v4059_v16 = vpop.f32.mrf.mxu2 }
 0x3e2   : > { %v4072_v4 = vpop.f32.mrf.mxu3  ;;  %v4083_v24 = vpop.f32.mrf.mxu0 }
 0x3e3   : > { %v4096_v34 = vpop.f32.mrf.mxu1  ;;  %v4130_v35 = vadd.f32 %v4083_v24, %v3962_v7 }
 0x3e4   : > { %v4131_v15 = vadd.f32 %v4096_v34, %v3963_v9 }
 0x3e5   : > { %9724 = vmatmul.msk.bf16.vlgmr.msrb.gmra.mxu0 %vm340_vm2, %v9719_v30  ;;  %9725 = vmatmul.msk.bf16.vlgmr.msrb.gmra.mxu1 %vm340_vm2, %v9719_v30 }
 0x3e6   : > { %9726 = vmatmul.msk.bf16.vlgmr.msrb.gmra.mxu2 %vm340_vm2, %v9719_v30 }
 0x3e7   : > { %9727 = vmatmul.msk.bf16.vlgmr.msrb.gmra.mxu3 %vm340_vm2, %v9719_v30 }
 0x3e9   : > { %v4109_v36 = vpop.f32.mrf.mxu2 }
 0x3ea   : > { %v4122_v8 = vpop.f32.mrf.mxu3  ;;  %v4132_v40 = vadd.f32 %v4109_v36, %v3964_v19  ;;  %v4085_v32 = vpop.f32.mrf.mxu0 }
 0x3eb   : > { %v4133_v33 = vadd.f32 %v4122_v8, %v3965_v23  ;;  %v4098_v17 = vpop.f32.mrf.mxu1 }
 0x3f1   : > { %v4111_v41 = vpop.f32.mrf.mxu2 }
 0x3f2   : > { %v4124_v46 = vpop.f32.mrf.mxu3  ;;  %v4199_v22 = vpop.f32.mrf.mxu0 }
 0x3f3   : > { %v4212_v38 = vpop.f32.mrf.mxu1  ;;  %v4294_v21 = vadd.f32 %v4199_v22, %v4126_v29 }
 0x3f4   : > { %v4295_v39 = vadd.f32 %v4212_v38, %v4127_v63  ;;  %v11859_v38 = vld [vmem:[%s13791_s5] sm:$0xff] }
 0x3f9   : > { %v4225_v37 = vpop.f32.mrf.mxu2 }
 0x3fa   : > { %v4238_v26 = vpop.f32.mrf.mxu3  ;;  %v11830_v49 = vadd.f32 %v4225_v37, %v4128_v25  ;;  %v4201_v55 = vpop.f32.mrf.mxu0  ;;  %v11861_v37 = vstv %s281_s17 }
 0x3fb   : > { %v11832_v45 = vadd.f32 %v4238_v26, %v4129_v20  ;;  %v4214_v42 = vpop.f32.mrf.mxu1 }
 0x3fc   : > { %v4847_v42 = vperm.slane %v11859_v38, 0 }
 0x401   : > { %v4227_v43 = vpop.f32.mrf.mxu2 }
 0x402   : > { %v4240_v50 = vpop.f32.mrf.mxu3  ;;  %v4251_v44 = vpop.f32.mrf.mxu0  ;;  %v4848_v43 = vperm.slane %v11859_v38, 1 }
 0x403   : > { %v4264_v52 = vpop.f32.mrf.mxu1  ;;  %v11834_v47 = vadd.f32 %v4251_v44, %v4130_v35 }
 0x404   : > { %v11836_v51 = vadd.f32 %v4264_v52, %v4131_v15 }
 0x409   : > { %v4277_v48 = vpop.f32.mrf.mxu2 }
 0x40a   : > { %v4290_v56 = vpop.f32.mrf.mxu3  ;;  %v11838_v61 = vadd.f32 %v4277_v48, %v4132_v40  ;;  %v4253_v54 = vpop.f32.mrf.mxu0 }
 0x40b   : > { %v11840_v60 = vadd.f32 %v4290_v56, %v4133_v33  ;;  %v4266_v53 = vpop.f32.mrf.mxu1 }
 0x40f   : > { %v11854_v36 = vpop.permute.xlu0 %4809 }
 0x411   : > { %v4279_v2 = vpop.f32.mrf.mxu2 }
 0x412   : > { %v4292_v57 = vpop.f32.mrf.mxu3  ;;  %v4367_v58 = vpop.f32.mrf.mxu0 }
 0x413   : > { %v4380_v7 = vpop.f32.mrf.mxu1  ;;  %v4462_v35 = vadd.f32 %v4367_v58, %v4294_v21 }
 0x414   : > { %v4463_v15 = vadd.f32 %v4380_v7, %v4295_v39 }
 0x419   : > { %v4393_v9 = vpop.f32.mrf.mxu2 }
 0x41a   : > { %v4406_v59 = vpop.f32.mrf.mxu3  ;;  %v4369_v11 = vpop.f32.mrf.mxu0  ;;  %v4464_v26 = vadd.f32 %v4393_v9, %v11830_v49 }
 0x41b   : > { %v4382_v62 = vpop.f32.mrf.mxu1  ;;  %v4465_v55 = vadd.f32 %v4406_v59, %v11832_v45 }
 0x421   : > { %v4395_v1 = vpop.f32.mrf.mxu2 }
 0x422   : > { %v4408_v18 = vpop.f32.mrf.mxu3  ;;  %v11842_v0 = vpop.f32.mrf.mxu0  ;;  %v4849_v1 = vperm.slane %v11859_v38, 2 }
 0x423   : > { %v11844_v19 = vpop.f32.mrf.mxu1  ;;  %v4850_v18 = vperm.slane %v11859_v38, 3 }
 0x429   : > { %v11846_v23 = vpop.f32.mrf.mxu2 }
 0x42a   : > { %v11848_v3 = vpop.f32.mrf.mxu3  ;;  %v4421_v28 = vpop.f32.mrf.mxu0 }
 0x42b   : > { %v4434_v6 = vpop.f32.mrf.mxu1 }
 0x431   : > { %v4447_v10 = vpop.f32.mrf.mxu2 }
 0x432   : > { %v4460_v13 = vpop.f32.mrf.mxu3  ;;  %v4535_v12 = vpop.f32.mrf.mxu0  ;;  %v4466_v10 = vadd.f32 %v11842_v0, %v11834_v47 }
 0x433   : > { %v4548_v30 = vpop.f32.mrf.mxu1  ;;  %v4630_v8 = vadd.f32 %v4535_v12, %v4462_v35  ;;  %v4467_v13 = vadd.f32 %v11844_v19, %v11836_v51  ;;  %v4469_v19 = vadd.f32 %v11848_v3, %v11840_v60 }
 0x434   : > { %v4631_v40 = vadd.f32 %v4548_v30, %v4463_v15 }
 0x439   : > { %v4561_v29 = vpop.f32.mrf.mxu2 }
 0x43a   : > { %v4574_v63 = vpop.f32.mrf.mxu3  ;;  %v4537_v31 = vpop.f32.mrf.mxu0  ;;  %v4632_v52 = vadd.f32 %v4561_v29, %v4464_v26 }
 0x43b   : > { %v4550_v14 = vpop.f32.mrf.mxu1  ;;  %v4633_v48 = vadd.f32 %v4574_v63, %v4465_v55 }
 0x441   : > { %v4563_v25 = vpop.f32.mrf.mxu2 }
 0x442   : > { %v4576_v20 = vpop.f32.mrf.mxu3  ;;  %v4587_v5 = vpop.f32.mrf.mxu0 }
 0x443   : > { %v4600_v27 = vpop.f32.mrf.mxu1  ;;  %v4634_v29 = vadd.f32 %v4587_v5, %v4466_v10 }
 0x444   : > { %v4635_v63 = vadd.f32 %v4600_v27, %v4467_v13  ;;  %v4851_v27 = vperm.slane %v11859_v38, 4 }
 0x449   : > { %v11850_v16 = vpop.f32.mrf.mxu2 }
 0x44a   : > { %v11852_v4 = vpop.f32.mrf.mxu3  ;;  %v4589_v24 = vpop.f32.mrf.mxu0 }
 0x44b   : > { %v4602_v34 = vpop.f32.mrf.mxu1 }
 0x451   : > { %v4615_v33 = vpop.f32.mrf.mxu2 }
 0x452   : > { %v4628_v32 = vpop.f32.mrf.mxu3  ;;  %v4703_v17 = vpop.f32.mrf.mxu0  ;;  %v4852_v33 = vperm.slane %v11859_v38, 5 }
 0x453   : > { %v4716_v41 = vpop.f32.mrf.mxu1  ;;  %v4798_v46 = vadd.f32 %v4703_v17, %v4630_v8  ;;  %v4637_v17 = vadd.f32 %v11852_v4, %v4469_v19 }
 0x454   : > { %v4799_v22 = vadd.f32 %v4716_v41, %v4631_v40  ;;  %v4468_v40 = vadd.f32 %v11846_v23, %v11838_v61 }
 0x455   : > { %v4812_v21 = vadd.f32 %v11854_v36, %v4798_v46 }
 0x456   : > { %v4813_v39 = vadd.f32 %v11854_v36, %v4799_v22  ;;  %v4636_v23 = vadd.f32 %v11850_v16, %v4468_v40  ;;  %v9728_v40 = vld [vmem:[%s13789_s3 + $0x4] sm:$0xf] }
 0x457   : > { %vm4820_vm15 = vcmp.gt.f32.partialorder %v4812_v21, 0.0  ;;  %v4829_v50 = vmul.f32 %v11861_v37, %v4812_v21 }
 0x458   : > { %vm4821_vm14 = vcmp.gt.f32.partialorder %v4813_v39, 0.0  ;;  %v4830_v44 = vmul.f32 %v11861_v37, %v4813_v39 }
 0x459   : > { %v4837_v56 = vsel %vm4820_vm15, %v4812_v21, %v4829_v50  ;;  %v4729_v53 = vpop.f32.mrf.mxu2 }
 0x45a   : > { %v4838_v54 = vsel %vm4821_vm14, %v4813_v39, %v4830_v44  ;;  %v4742_v2 = vpop.f32.mrf.mxu3  ;;  %v4800_v57 = vadd.f32 %v4729_v53, %v4632_v52  ;;  %v4863_v49 = vmul.f32 %v4847_v42, %v4837_v56  ;;  %v4705_v7 = vpop.f32.mrf.mxu0  ;;  %v4853_v56 = vperm.slane %v11859_v38, 6 }
 0x45b   : > { %v4864_v58 = vmul.f32 %v4848_v43, %v4838_v54  ;;  %v4801_v45 = vadd.f32 %v4742_v2, %v4633_v48  ;;  %v4718_v9 = vpop.f32.mrf.mxu1  ;;  %v4854_v54 = vperm.slane %v11859_v38, 7 }
 0x45c   : > { %v4814_v59 = vadd.f32 %v11854_v36, %v4800_v57 }
 0x45d   : > { %v4872_v11 = vpack.c.bf16 %v4864_v58, %v4863_v49  ;;  %v4815_v62 = vadd.f32 %v11854_v36, %v4801_v45 }
 0x45e   : > { %vm4822_vm13 = vcmp.gt.f32.partialorder %v4814_v59, 0.0  ;;  %v4831_v28 = vmul.f32 %v11861_v37, %v4814_v59 }
 0x45f   : > { %4876 = vst [vmem:[#allocation2 + $0x4] sm:$0xff] %v4872_v11  ;;  %vm4823_vm14 = vcmp.gt.f32.partialorder %v4815_v62, 0.0  ;;  %v4832_v6 = vmul.f32 %v11861_v37, %v4815_v62 }
 0x460   : > { %v4839_v12 = vsel %vm4822_vm13, %v4814_v59, %v4831_v28 }
 0x461   : > { %v4840_v30 = vsel %vm4823_vm14, %v4815_v62, %v4832_v6  ;;  %v4865_v31 = vmul.f32 %v4849_v1, %v4839_v12  ;;  %v4731_v25 = vpop.f32.mrf.mxu2 }
 0x462   : > { %v4866_v14 = vmul.f32 %v4850_v18, %v4840_v30  ;;  %v4744_v20 = vpop.f32.mrf.mxu3  ;;  %v4755_v24 = vpop.f32.mrf.mxu0 }
 0x463   : > { %v4768_v34 = vpop.f32.mrf.mxu1  ;;  %v4802_v15 = vadd.f32 %v4755_v24, %v4634_v29 }
 0x464   : > { %v4873_v35 = vpack.c.bf16 %v4866_v14, %v4865_v31  ;;  %v4803_v8 = vadd.f32 %v4768_v34, %v4635_v63 }
 0x465   : > { %v4816_v51 = vadd.f32 %v11854_v36, %v4802_v15 }
 0x466   : > { %v4881_v47 = vld [vmem:[#allocation2] sm:$0xff]  ;;  %4877 = vst [vmem:[#allocation2 + $0xc] sm:$0xff] %v4873_v35  ;;  %v4817_v0 = vadd.f32 %v11854_v36, %v4803_v8 }
 0x467   : > { %v4895_v5 = vunpack.c.h.b16 %v4881_v47  ;;  %vm4824_vm13 = vcmp.gt.f32.partialorder %v4816_v51, 0.0  ;;  %v4833_v32 = vmul.f32 %v11861_v37, %v4816_v51  ;;  %v4894_v38 = vunpack.c.l.b16 %v4881_v47 }
 0x468   : > { %vm4825_vm15 = vcmp.gt.f32.partialorder %v4817_v0, 0.0  ;;  %v4834_v61 = vmul.f32 %v11861_v37, %v4817_v0 }
 0x469   : > { %v11893_v41 = vpack.c.b16 %v4895_v5, %v4895_v5  ;;  %v4841_v46 = vsel %vm4824_vm13, %v4816_v51, %v4833_v32  ;;  %v4781_v60 = vpop.f32.mrf.mxu2  ;;  %v11911_v18 = vpack.c.b16 %v4894_v38, %v4894_v38 }
 0x46a   : > { %v4842_v22 = vsel %vm4825_vm15, %v4817_v0, %v4834_v61  ;;  %v4794_v3 = vpop.f32.mrf.mxu3  ;;  %v4867_v21 = vmul.f32 %v4851_v27, %v4841_v46  ;;  %v4804_v26 = vadd.f32 %v4781_v60, %v4636_v23  ;;  %v4757_v42 = vpop.f32.mrf.mxu0 }
 0x46b   : > { %v4868_v39 = vmul.f32 %v4852_v33, %v4842_v22  ;;  %v4805_v55 = vadd.f32 %v4794_v3, %v4637_v17  ;;  %v4770_v43 = vpop.f32.mrf.mxu1  ;;  %4914 = vrot.lane.b32.xlu0 %v11893_v41, %s10020_s8 }
 0x46c   : > { %v4818_v16 = vadd.f32 %v11854_v36, %v4804_v26 }
 0x46d   : > { %v4882_v50 = vld [vmem:[#allocation2 + $0x8] sm:$0xff]  ;;  %v4874_v44 = vpack.c.bf16 %v4868_v39, %v4867_v21  ;;  %v4819_v4 = vadd.f32 %v11854_v36, %v4805_v55 }
 0x46e   : > { %v4896_v52 = vunpack.c.l.b16 %v4882_v50  ;;  %v4897_v48 = vunpack.c.h.b16 %v4882_v50  ;;  %vm4826_vm14 = vcmp.gt.f32.partialorder %v4818_v16, 0.0  ;;  %v4835_v53 = vmul.f32 %v11861_v37, %v4818_v16 }
 0x46f   : > { %4878 = vst [vmem:[#allocation2 + $0x14] sm:$0xff] %v4874_v44  ;;  %vm4827_vm13 = vcmp.gt.f32.partialorder %v4819_v4, 0.0  ;;  %v4836_v2 = vmul.f32 %v11861_v37, %v4819_v4 }
 0x470   : > { %v11903_v57 = vpack.c.b16 %v4896_v52, %v4896_v52  ;;  %v11905_v49 = vpack.c.b16 %v4897_v48, %v4897_v48  ;;  %v4843_v58 = vsel %vm4826_vm14, %v4818_v16, %v4835_v53 }
 0x471   : > { %v4844_v45 = vsel %vm4827_vm13, %v4819_v4, %v4836_v2  ;;  %v4869_v36 = vmul.f32 %v4853_v56, %v4843_v58  ;;  %v4783_v9 = vpop.f32.mrf.mxu2 }
 0x472   : > { %v4870_v7 = vmul.f32 %v4854_v54, %v4844_v45  ;;  %v4796_v59 = vpop.f32.mrf.mxu3  ;;  %4918 = vrot.lane.b32.xlu2 %v11905_v49, %s10020_s8  ;;  %4916 = vrot.lane.b32.xlu1 %v11903_v57, %s10020_s8 }
 0x474   : > { %v4875_v11 = vpack.c.bf16 %v4870_v7, %v4869_v36  ;;  %v4886_v7 = vld [vmem:[%s13789_s3] sm:$0xf] }
 0x476   : > { %v4883_v62 = vld [vmem:[#allocation2 + $0x10] sm:$0xff]  ;;  %4879 = vst [vmem:[#allocation2 + $0x1c] sm:$0xff] %v4875_v11 }
 0x477   : > { %v4898_v1 = vunpack.c.l.b16 %v4883_v62  ;;  %v4899_v14 = vunpack.c.h.b16 %v4883_v62 }
 0x479   : > { %v11913_v28 = vpack.c.b16 %v4898_v1, %v4898_v1  ;;  %v11934_v25 = vpack.c.b16 %v4899_v14, %v4899_v14 }
 0x47a   : > { %4912 = vrot.lane.b32.xlu2 %v11911_v18, %s10020_s8 }
 0x47b   : > { %4920 = vrot.lane.b32.xlu1 %v11913_v28, %s10020_s8 }
 0x47d   : > { %v4884_v6 = vld [vmem:[#allocation2 + $0x18] sm:$0xff]  ;;  %v11919_v10 = vld [vmem:[#allocation2 + $0x20] sm:$0xff] }
 0x47e   : > { %v4900_v13 = vunpack.c.l.b16 %v4884_v6  ;;  %v4901_v12 = vunpack.c.h.b16 %v4884_v6  ;;  %v4902_v30 = vunpack.c.l.b16 %v11919_v10 }
 0x480   : > { %v11922_v29 = vpack.c.b16 %v4901_v12, %v4901_v12  ;;  %v11924_v63 = vpack.c.b16 %v4902_v30, %v4902_v30  ;;  %v11926_v31 = vpack.c.b16 %v4900_v13, %v4900_v13 }
 0x482   : > { %4928 = vrot.lane.b32.xlu0 %v11924_v63, %s10020_s8  ;;  %4926 = vrot.lane.b32.xlu2 %v11922_v29, %s10020_s8 }
 0x483   : > { %4924 = vrot.lane.b32.xlu1 %v11926_v31, %s10020_s8 }
 0x48a   : > { %5075 = vrot.lane.b32.xlu0 %v11905_v49, %s10021_s9  ;;  %5073 = vrot.lane.b32.xlu2 %v11903_v57, %s10021_s9 }
 0x48b   : > { %4922 = vrot.lane.b32.xlu1 %v11934_v25, %s10020_s8  ;;  %s13823_s8 = smov 117  }
 0x492   : > { %5071 = vrot.lane.b32.xlu0 %v11893_v41, %s10021_s9  ;;  %5069 = vrot.lane.b32.xlu2 %v11911_v18, %s10021_s9 }
 0x493   : > { %5077 = vrot.lane.b32.xlu1 %v11913_v28, %s10021_s9 }
 0x49a   : > { %5085 = vrot.lane.b32.xlu0 %v11924_v63, %s10021_s9  ;;  %5083 = vrot.lane.b32.xlu2 %v11922_v29, %s10021_s9 }
 0x49b   : > { %5081 = vrot.lane.b32.xlu1 %v11926_v31, %s10021_s9 }
 0x4a2   : > { %5234 = vrot.lane.b32.xlu0 %v11905_v49, %s10022_s10  ;;  %5232 = vrot.lane.b32.xlu2 %v11903_v57, %s10022_s10 }
 0x4a3   : > { %5079 = vrot.lane.b32.xlu1 %v11934_v25, %s10021_s9 }
 0x4aa   : > { %5230 = vrot.lane.b32.xlu0 %v11893_v41, %s10022_s10  ;;  %5228 = vrot.lane.b32.xlu2 %v11911_v18, %s10022_s10 }
 0x4ab   : > { %5236 = vrot.lane.b32.xlu1 %v11913_v28, %s10022_s10 }
 0x4b2   : > { %5244 = vrot.lane.b32.xlu0 %v11924_v63, %s10022_s10  ;;  %5242 = vrot.lane.b32.xlu2 %v11922_v29, %s10022_s10 }
 0x4b3   : > { %5240 = vrot.lane.b32.xlu1 %v11926_v31, %s10022_s10 }
 0x4ba   : > { %5401 = vrot.lane.b32.xlu0 %v11905_v49, %s10023_s11  ;;  %5399 = vrot.lane.b32.xlu2 %v11903_v57, %s10023_s11 }
 0x4bb   : > { %5238 = vrot.lane.b32.xlu1 %v11934_v25, %s10022_s10  ;;  %s13824_s10 = smov 39  }
 0x4c2   : > { %5397 = vrot.lane.b32.xlu0 %v11893_v41, %s10023_s11  ;;  %5395 = vrot.lane.b32.xlu2 %v11911_v18, %s10023_s11 }
 0x4c3   : > { %5403 = vrot.lane.b32.xlu1 %v11913_v28, %s10023_s11 }
 0x4ca   : > { %5411 = vrot.lane.b32.xlu0 %v11924_v63, %s10023_s11  ;;  %5409 = vrot.lane.b32.xlu2 %v11922_v29, %s10023_s11 }
 0x4cb   : > { %5407 = vrot.lane.b32.xlu1 %v11926_v31, %s10023_s11 }
 0x4cc   : > { %v4919_v20 = vpop.permute.xlu2 %4918 }
 0x4d2   : > { %5568 = vrot.lane.b32.xlu0 %v11905_v49, %s10024_s12  ;;  %5566 = vrot.lane.b32.xlu2 %v11903_v57, %s10024_s12 }
 0x4d3   : > { %5405 = vrot.lane.b32.xlu1 %v11934_v25, %s10023_s11  ;;  %s13825_s11 = smov 38  }
 0x4d4   : > { %v4913_v24 = vpop.permute.xlu2 %4912 }
 0x4da   : > { %5564 = vrot.lane.b32.xlu0 %v11893_v41, %s10024_s12  ;;  %5562 = vrot.lane.b32.xlu2 %v11911_v18, %s10024_s12 }
 0x4db   : > { %5570 = vrot.lane.b32.xlu1 %v11913_v28, %s10024_s12 }
 0x4dc   : > { %v4927_v15 = vpop.permute.xlu2 %4926 }
 0x4dd   : > { %v4915_v34 = vpop.permute.xlu0 %4914 }
 0x4de   : > { %v4930_v35 = vsel %vm331_vm0, %v4913_v24, %v4915_v34 }
 0x4df   : > { %v4942_v8 = vsel %vm344_vm1, %v4930_v35, 0 }
 0x4e0   : > { %4972 = vmatpush.bf16.msra.mxu0 %v4942_v8 }
 0x4e2   : > { %5578 = vrot.lane.b32.xlu0 %v11924_v63, %s10024_s12  ;;  %5576 = vrot.lane.b32.xlu2 %v11922_v29, %s10024_s12 }
 0x4e3   : > { %5574 = vrot.lane.b32.xlu1 %v11926_v31, %s10024_s12  ;;  %9729 = vmatmul.msk.bf16.vlgmr.msra.gmra.mxu0 %vm340_vm2, %v9728_v40 }
 0x4e4   : > { %v4917_v47 = vpop.permute.xlu1 %4916  ;;  %v5074_v27 = vpop.permute.xlu2 %5073 }
 0x4e5   : > { %v4931_v51 = vsel %vm331_vm0, %v4915_v34, %v4917_v47  ;;  %v4932_v0 = vsel %vm331_vm0, %v4917_v47, %v4919_v20 }
 0x4e6   : > { %v4945_v19 = vsel %vm344_vm1, %v4931_v51, 0  ;;  %v4948_v5 = vsel %vm344_vm1, %v4932_v0, 0 }
 0x4e7   : > { %4985 = vmatpush.bf16.msra.mxu1 %v4945_v19  ;;  %4998 = vmatpush.bf16.msra.mxu2 %v4948_v5 }
 0x4ea   : > { %5735 = vrot.lane.b32.xlu0 %v11905_v49, %s10025_s13  ;;  %5733 = vrot.lane.b32.xlu2 %v11903_v57, %s10025_s13 }
 0x4eb   : > { %5572 = vrot.lane.b32.xlu1 %v11934_v25, %s10024_s12  ;;  %9731 = vmatmul.msk.bf16.vlgmr.msra.gmra.mxu2 %vm340_vm2, %v9728_v40 }
 0x4ec   : > { %9730 = vmatmul.msk.bf16.vlgmr.msra.gmra.mxu1 %vm340_vm2, %v9728_v40  ;;  %v5070_v23 = vpop.permute.xlu2 %5069 }
 0x4ed   : > { %v4921_v33 = vpop.permute.xlu1 %4920 }
 0x4ee   : > { %v4933_v32 = vsel %vm331_vm0, %v4919_v20, %v4921_v33 }
 0x4ef   : > { %v4951_v61 = vsel %vm344_vm1, %v4933_v32, 0 }
 0x4f0   : > { %5011 = vmatpush.bf16.msra.mxu3 %v4951_v61 }
 0x4f2   : > { %5731 = vrot.lane.b32.xlu0 %v11893_v41, %s10025_s13  ;;  %5729 = vrot.lane.b32.xlu2 %v11911_v18, %s10025_s13 }
 0x4f3   : > { %5737 = vrot.lane.b32.xlu1 %v11913_v28, %s10025_s13  ;;  %9732 = vmatmul.msk.bf16.vlgmr.msra.gmra.mxu3 %vm340_vm2, %v9728_v40 }
 0x4f4   : > { %v4929_v17 = vpop.permute.xlu0 %4928  ;;  %v5084_v26 = vpop.permute.xlu2 %5083 }
 0x4f5   : > { %v4937_v46 = vsel %vm331_vm0, %v4927_v15, %v4929_v17  ;;  %v4925_v22 = vpop.permute.xlu1 %4924 }
 0x4f6   : > { %v4963_v60 = vsel %vm344_vm1, %v4937_v46, 0  ;;  %v4936_v3 = vsel %vm331_vm0, %v4925_v22, %v4927_v15 }
 0x4f7   : > { %5063 = vmatpush.bf16.msrb.mxu3 %v4963_v60  ;;  %v4960_v21 = vsel %vm344_vm1, %v4936_v3, 0  ;;  %v9745_v60 = vld [vmem:[%s13789_s3 + $0x8] sm:$0xf] }
 0x4f8   : > { %5050 = vmatpush.bf16.msrb.mxu2 %v4960_v21 }
 0x4fa   : > { %5745 = vrot.lane.b32.xlu0 %v11924_v63, %s10025_s13  ;;  %5743 = vrot.lane.b32.xlu2 %v11922_v29, %s10025_s13 }
 0x4fb   : > { %5741 = vrot.lane.b32.xlu1 %v11926_v31, %s10025_s13  ;;  %9735 = vmatmul.msk.bf16.vlgmr.msrb.gmra.mxu2 %vm340_vm2, %v9728_v40 }
 0x4fc   : > { %v5076_v39 = vpop.permute.xlu0 %5075  ;;  %v5233_v45 = vpop.permute.xlu2 %5232 }
 0x4fd   : > { %v5089_v55 = vsel %vm491_vm3, %v5074_v27, %v5076_v39  ;;  %v4923_v42 = vpop.permute.xlu1 %4922 }
 0x4fe   : > { %v4934_v43 = vsel %vm331_vm0, %v4921_v33, %v4923_v42  ;;  %v4935_v50 = vsel %vm331_vm0, %v4923_v42, %v4925_v22  ;;  %v5105_v44 = vsel %vm344_vm1, %v5089_v55, 0  ;;  %vm13826_vm0 = vcmask 72704  }
 0x4ff   : > { %5155 = vmatpush.bf16.msra.mxu2 %v5105_v44  ;;  %v4954_v16 = vsel %vm344_vm1, %v4934_v43, 0  ;;  %v4957_v4 = vsel %vm344_vm1, %v4935_v50, 0 }
 0x500   : > { %5024 = vmatpush.bf16.msrb.mxu0 %v4954_v16  ;;  %5037 = vmatpush.bf16.msrb.mxu1 %v4957_v4 }
 0x502   : > { %5902 = vrot.lane.b32.xlu0 %v11905_v49, %s10026_s16  ;;  %5900 = vrot.lane.b32.xlu2 %v11903_v57, %s10026_s16 }
 0x503   : > { %5739 = vrot.lane.b32.xlu1 %v11934_v25, %s10025_s13  ;;  %9734 = vmatmul.msk.bf16.vlgmr.msrb.gmra.mxu1 %vm340_vm2, %v9728_v40 }
 0x504   : > { %v5072_v52 = vpop.permute.xlu0 %5071  ;;  %9733 = vmatmul.msk.bf16.vlgmr.msrb.gmra.mxu0 %vm340_vm2, %v9728_v40  ;;  %9736 = vmatmul.msk.bf16.vlgmr.msrb.gmra.mxu3 %vm340_vm2, %v9728_v40  ;;  %v5229_v6 = vpop.permute.xlu2 %5228 }
 0x505   : > { %v5087_v48 = vsel %vm491_vm3, %v5070_v23, %v5072_v52  ;;  %v5088_v56 = vsel %vm491_vm3, %v5072_v52, %v5074_v27  ;;  %v5078_v54 = vpop.permute.xlu1 %5077 }
 0x506   : > { %v5090_v53 = vsel %vm491_vm3, %v5076_v39, %v5078_v54  ;;  %v5099_v2 = vsel %vm344_vm1, %v5087_v48, 0  ;;  %v5102_v58 = vsel %vm344_vm1, %v5088_v56, 0 }
 0x507   : > { %5129 = vmatpush.bf16.msra.mxu0 %v5099_v2  ;;  %5142 = vmatpush.bf16.msra.mxu1 %v5102_v58  ;;  %v5108_v36 = vsel %vm344_vm1, %v5090_v53, 0 }
 0x508   : > { %5168 = vmatpush.bf16.msra.mxu3 %v5108_v36 }
 0x50a   : > { %5898 = vrot.lane.b32.xlu0 %v11893_v41, %s10026_s16  ;;  %5896 = vrot.lane.b32.xlu2 %v11911_v18, %s10026_s16 }
 0x50b   : > { %5904 = vrot.lane.b32.xlu1 %v11913_v28, %s10026_s16  ;;  %9739 = vmatmul.msk.bf16.vlgmr.msra.gmra.mxu2 %vm340_vm2, %v4886_v7 }
 0x50c   : > { %v5086_v9 = vpop.permute.xlu0 %5085  ;;  %v5243_v15 = vpop.permute.xlu2 %5242 }
 0x50d   : > { %v5094_v59 = vsel %vm491_vm3, %v5084_v26, %v5086_v9  ;;  %v5082_v38 = vpop.permute.xlu1 %5081 }
 0x50e   : > { %v5120_v11 = vsel %vm344_vm1, %v5094_v59, 0  ;;  %v5093_v62 = vsel %vm491_vm3, %v5082_v38, %v5084_v26 }
 0x50f   : > { %5220 = vmatpush.bf16.msrb.mxu3 %v5120_v11  ;;  %v5117_v1 = vsel %vm344_vm1, %v5093_v62, 0 }
 0x510   : > { %5207 = vmatpush.bf16.msrb.mxu2 %v5117_v1 }
 0x512   : > { %5912 = vrot.lane.b32.xlu0 %v11924_v63, %s10026_s16  ;;  %5910 = vrot.lane.b32.xlu2 %v11922_v29, %s10026_s16 }
 0x513   : > { %5908 = vrot.lane.b32.xlu1 %v11926_v31, %s10026_s16  ;;  %9738 = vmatmul.msk.bf16.vlgmr.msra.gmra.mxu1 %vm340_vm2, %v4886_v7 }
 0x514   : > { %v5235_v13 = vpop.permute.xlu0 %5234  ;;  %9737 = vmatmul.msk.bf16.vlgmr.msra.gmra.mxu0 %vm340_vm2, %v4886_v7  ;;  %9740 = vmatmul.msk.bf16.vlgmr.msra.gmra.mxu3 %vm340_vm2, %v4886_v7  ;;  %v5400_v32 = vpop.permute.xlu2 %5399 }
 0x515   : > { %v5248_v12 = vsel %vm651_vm4, %v5233_v45, %v5235_v13  ;;  %v5080_v30 = vpop.permute.xlu1 %5079 }
 0x516   : > { %v5091_v14 = vsel %vm491_vm3, %v5078_v54, %v5080_v30  ;;  %v5092_v20 = vsel %vm491_vm3, %v5080_v30, %v5082_v38  ;;  %v5264_v24 = vsel %vm344_vm1, %v5248_v12, 0  ;;  %vm13827_vm3 = vmmov %vm13826_vm0 }
 0x517   : > { %5314 = vmatpush.bf16.msra.mxu2 %v5264_v24  ;;  %v5111_v34 = vsel %vm344_vm1, %v5091_v14, 0  ;;  %v5114_v35 = vsel %vm344_vm1, %v5092_v20, 0  ;;  %v9754_v20 = vld [vmem:[%s13789_s3 + $0xc] sm:$0xf] }
 0x518   : > { %5181 = vmatpush.bf16.msrb.mxu0 %v5111_v34  ;;  %5194 = vmatpush.bf16.msrb.mxu1 %v5114_v35 }
 0x51a   : > { %6069 = vrot.lane.b32.xlu0 %v11905_v49, %s10027_s19  ;;  %6067 = vrot.lane.b32.xlu2 %v11903_v57, %s10027_s19 }
 0x51b   : > { %5906 = vrot.lane.b32.xlu1 %v11934_v25, %s10026_s16  ;;  %9743 = vmatmul.msk.bf16.vlgmr.msrb.gmra.mxu2 %vm340_vm2, %v4886_v7 }
 0x51c   : > { %v5231_v8 = vpop.permute.xlu0 %5230  ;;  %v5396_v43 = vpop.permute.xlu2 %5395 }
 0x51d   : > { %v5246_v40 = vsel %vm651_vm4, %v5229_v6, %v5231_v8  ;;  %v5247_v47 = vsel %vm651_vm4, %v5231_v8, %v5233_v45  ;;  %v5237_v51 = vpop.permute.xlu1 %5236 }
 0x51e   : > { %v5249_v0 = vsel %vm651_vm4, %v5235_v13, %v5237_v51  ;;  %v5258_v19 = vsel %vm344_vm1, %v5246_v40, 0  ;;  %v5261_v5 = vsel %vm344_vm1, %v5247_v47, 0 }
 0x51f   : > { %5288 = vmatpush.bf16.msra.mxu0 %v5258_v19  ;;  %5301 = vmatpush.bf16.msra.mxu1 %v5261_v5  ;;  %v5267_v27 = vsel %vm344_vm1, %v5249_v0, 0 }
 0x520   : > { %5327 = vmatpush.bf16.msra.mxu3 %v5267_v27 }
 0x522   : > { %6065 = vrot.lane.b32.xlu0 %v11893_v41, %s10027_s19  ;;  %6063 = vrot.lane.b32.xlu2 %v11911_v18, %s10027_s19 }
 0x523   : > { %6071 = vrot.lane.b32.xlu1 %v11913_v28, %s10027_s19  ;;  %9742 = vmatmul.msk.bf16.vlgmr.msrb.gmra.mxu1 %vm340_vm2, %v4886_v7 }
 0x524   : > { %v5245_v33 = vpop.permute.xlu0 %5244  ;;  %9741 = vmatmul.msk.bf16.vlgmr.msrb.gmra.mxu0 %vm340_vm2, %v4886_v7  ;;  %9744 = vmatmul.msk.bf16.vlgmr.msrb.gmra.mxu3 %vm340_vm2, %v4886_v7  ;;  %v5410_v58 = vpop.permute.xlu2 %5409 }
 0x525   : > { %v5253_v61 = vsel %vm651_vm4, %v5243_v15, %v5245_v33  ;;  %v5241_v23 = vpop.permute.xlu1 %5240 }
 0x526   : > { %v5279_v17 = vsel %vm344_vm1, %v5253_v61, 0  ;;  %v5252_v46 = vsel %vm651_vm4, %v5241_v23, %v5243_v15 }
 0x527   : > { %5379 = vmatpush.bf16.msrb.mxu3 %v5279_v17  ;;  %v5276_v22 = vsel %vm344_vm1, %v5252_v46, 0 }
 0x528   : > { %5366 = vmatpush.bf16.msrb.mxu2 %v5276_v22 }
 0x52a   : > { %6079 = vrot.lane.b32.xlu0 %v11924_v63, %s10027_s19  ;;  %6077 = vrot.lane.b32.xlu2 %v11922_v29, %s10027_s19 }
 0x52b   : > { %6075 = vrot.lane.b32.xlu1 %v11926_v31, %s10027_s19  ;;  %9748 = vmatmul.msk.bf16.vlgmr.msra.gmra.mxu2 %vm340_vm2, %v9745_v60 }
 0x52c   : > { %v5402_v3 = vpop.permute.xlu0 %5401  ;;  %v5567_v38 = vpop.permute.xlu2 %5566 }
 0x52d   : > { %v5415_v21 = vsel %vm819_vm5, %v5400_v32, %v5402_v3  ;;  %v5239_v39 = vpop.permute.xlu1 %5238 }
 0x52e   : > { %v5250_v26 = vsel %vm651_vm4, %v5237_v51, %v5239_v39  ;;  %v5251_v55 = vsel %vm651_vm4, %v5239_v39, %v5241_v23  ;;  %v5431_v42 = vsel %vm344_vm1, %v5415_v21, 0  ;;  %vm13828_vm4 = vmmov %vm13826_vm0 }
 0x52f   : > { %5481 = vmatpush.bf16.msra.mxu2 %v5431_v42  ;;  %v5270_v50 = vsel %vm344_vm1, %v5250_v26, 0  ;;  %v5273_v44 = vsel %vm344_vm1, %v5251_v55, 0 }
 0x530   : > { %5340 = vmatpush.bf16.msrb.mxu0 %v5270_v50  ;;  %5353 = vmatpush.bf16.msrb.mxu1 %v5273_v44 }
 0x532   : > { %6236 = vrot.lane.b32.xlu0 %v11905_v49, %s10028_s22  ;;  %6234 = vrot.lane.b32.xlu2 %v11903_v57, %s10028_s22 }
 0x533   : > { %6073 = vrot.lane.b32.xlu1 %v11934_v25, %s10027_s19  ;;  %9747 = vmatmul.msk.bf16.vlgmr.msra.gmra.mxu1 %vm340_vm2, %v9745_v60 }
 0x534   : > { %v5398_v16 = vpop.permute.xlu0 %5397  ;;  %9746 = vmatmul.msk.bf16.vlgmr.msra.gmra.mxu0 %vm340_vm2, %v9745_v60  ;;  %9749 = vmatmul.msk.bf16.vlgmr.msra.gmra.mxu3 %vm340_vm2, %v9745_v60  ;;  %v5563_v34 = vpop.permute.xlu2 %5562 }
 0x535   : > { %v5413_v4 = vsel %vm819_vm5, %v5396_v43, %v5398_v16  ;;  %v5414_v52 = vsel %vm819_vm5, %v5398_v16, %v5400_v32  ;;  %v5404_v48 = vpop.permute.xlu1 %5403  ;;  %v9763_v43 = vld [vmem:[%s13789_s3 + $0x10] sm:$0xf] }
 0x536   : > { %v5416_v56 = vsel %vm819_vm5, %v5402_v3, %v5404_v48  ;;  %v5425_v54 = vsel %vm344_vm1, %v5413_v4, 0  ;;  %v5428_v53 = vsel %vm344_vm1, %v5414_v52, 0 }
 0x537   : > { %5455 = vmatpush.bf16.msra.mxu0 %v5425_v54  ;;  %5468 = vmatpush.bf16.msra.mxu1 %v5428_v53  ;;  %v5434_v2 = vsel %vm344_vm1, %v5416_v56, 0 }
 0x538   : > { %5494 = vmatpush.bf16.msra.mxu3 %v5434_v2 }
 0x53a   : > { %6232 = vrot.lane.b32.xlu0 %v11893_v41, %s10028_s22  ;;  %6230 = vrot.lane.b32.xlu2 %v11911_v18, %s10028_s22 }
 0x53b   : > { %6238 = vrot.lane.b32.xlu1 %v11913_v28, %s10028_s22  ;;  %9752 = vmatmul.msk.bf16.vlgmr.msrb.gmra.mxu2 %vm340_vm2, %v9745_v60 }
 0x53c   : > { %v5412_v45 = vpop.permute.xlu0 %5411  ;;  %v5577_v27 = vpop.permute.xlu2 %5576 }
 0x53d   : > { %v5408_v36 = vpop.permute.xlu1 %5407  ;;  %v5420_v59 = vsel %vm819_vm5, %v5410_v58, %v5412_v45 }
 0x53e   : > { %v5419_v7 = vsel %vm819_vm5, %v5408_v36, %v5410_v58  ;;  %v5446_v11 = vsel %vm344_vm1, %v5420_v59, 0 }
 0x53f   : > { %v5443_v9 = vsel %vm344_vm1, %v5419_v7, 0 }
 0x540   : > { %5533 = vmatpush.bf16.msrb.mxu2 %v5443_v9 }
 0x542   : > { %6246 = vrot.lane.b32.xlu0 %v11924_v63, %s10028_s22  ;;  %6244 = vrot.lane.b32.xlu2 %v11922_v29, %s10028_s22 }
 0x543   : > { %6242 = vrot.lane.b32.xlu1 %v11926_v31, %s10028_s22  ;;  %9751 = vmatmul.msk.bf16.vlgmr.msrb.gmra.mxu1 %vm340_vm2, %v9745_v60 }
 0x544   : > { %v5569_v62 = vpop.permute.xlu0 %5568  ;;  %9750 = vmatmul.msk.bf16.vlgmr.msrb.gmra.mxu0 %vm340_vm2, %v9745_v60  ;;  %9753 = vmatmul.msk.bf16.vlgmr.msrb.gmra.mxu3 %vm340_vm2, %v9745_v60  ;;  %v5734_v3 = vpop.permute.xlu2 %5733 }
 0x545   : > { %5546 = vmatpush.bf16.msrb.mxu3 %v5446_v11  ;;  %v5406_v1 = vpop.permute.xlu1 %5405  ;;  %v5582_v14 = vsel %vm987_vm6, %v5567_v38, %v5569_v62 }
 0x546   : > { %v5417_v6 = vsel %vm819_vm5, %v5404_v48, %v5406_v1  ;;  %v5418_v13 = vsel %vm819_vm5, %v5406_v1, %v5408_v36  ;;  %v5598_v24 = vsel %vm344_vm1, %v5582_v14, 0  ;;  %vm13829_vm5 = vmmov %vm13826_vm0 }
 0x547   : > { %v5437_v12 = vsel %vm344_vm1, %v5417_v6, 0  ;;  %v5440_v30 = vsel %vm344_vm1, %v5418_v13, 0 }
 0x548   : > { %5507 = vmatpush.bf16.msrb.mxu0 %v5437_v12  ;;  %5520 = vmatpush.bf16.msrb.mxu1 %v5440_v30 }
 0x54a   : > { %6403 = vrot.lane.b32.xlu0 %v11905_v49, %s10029_s23  ;;  %6401 = vrot.lane.b32.xlu2 %v11903_v57, %s10029_s23 }
 0x54b   : > { %6240 = vrot.lane.b32.xlu1 %v11934_v25, %s10028_s22  ;;  %9757 = vmatmul.msk.bf16.vlgmr.msra.gmra.mxu2 %vm340_vm2, %v9754_v20  ;;  %s13838_s22 = smov 29  }
 0x54c   : > { %5648 = vmatpush.bf16.msra.mxu2 %v5598_v24  ;;  %v5565_v15 = vpop.permute.xlu0 %5564  ;;  %v5730_v52 = vpop.permute.xlu2 %5729 }
 0x54d   : > { %v5571_v35 = vpop.permute.xlu1 %5570  ;;  %v5580_v8 = vsel %vm987_vm6, %v5563_v34, %v5565_v15  ;;  %v5581_v40 = vsel %vm987_vm6, %v5565_v15, %v5567_v38 }
 0x54e   : > { %v5583_v47 = vsel %vm987_vm6, %v5569_v62, %v5571_v35  ;;  %v5592_v51 = vsel %vm344_vm1, %v5580_v8, 0  ;;  %v5595_v0 = vsel %vm344_vm1, %v5581_v40, 0 }
 0x54f   : > { %v5601_v19 = vsel %vm344_vm1, %v5583_v47, 0 }
 0x552   : > { %6399 = vrot.lane.b32.xlu0 %v11893_v41, %s10029_s23  ;;  %6397 = vrot.lane.b32.xlu2 %v11911_v18, %s10029_s23 }
 0x553   : > { %6405 = vrot.lane.b32.xlu1 %v11913_v28, %s10029_s23  ;;  %9756 = vmatmul.msk.bf16.vlgmr.msra.gmra.mxu1 %vm340_vm2, %v9754_v20 }
 0x554   : > { %9755 = vmatmul.msk.bf16.vlgmr.msra.gmra.mxu0 %vm340_vm2, %v9754_v20  ;;  %9758 = vmatmul.msk.bf16.vlgmr.msra.gmra.mxu3 %vm340_vm2, %v9754_v20  ;;  %v5579_v32 = vpop.permute.xlu0 %5578  ;;  %v5744_v11 = vpop.permute.xlu2 %5743 }
 0x555   : > { %5622 = vmatpush.bf16.msra.mxu0 %v5592_v51  ;;  %5635 = vmatpush.bf16.msra.mxu1 %v5595_v0  ;;  %v5575_v5 = vpop.permute.xlu1 %5574  ;;  %v5587_v60 = vsel %vm987_vm6, %v5577_v27, %v5579_v32 }
 0x556   : > { %5661 = vmatpush.bf16.msra.mxu3 %v5601_v19  ;;  %v5586_v33 = vsel %vm987_vm6, %v5575_v5, %v5577_v27  ;;  %v5613_v55 = vsel %vm344_vm1, %v5587_v60, 0 }
 0x557   : > { %v5610_v61 = vsel %vm344_vm1, %v5586_v33, 0  ;;  %v12299_v33 = vld [vmem:[%s13789_s3 + $0x14] sm:$0xf] }
 0x55a   : > { %6413 = vrot.lane.b32.xlu0 %v11924_v63, %s10029_s23  ;;  %6411 = vrot.lane.b32.xlu2 %v11922_v29, %s10029_s23 }
 0x55b   : > { %6409 = vrot.lane.b32.xlu1 %v11926_v31, %s10029_s23  ;;  %9761 = vmatmul.msk.bf16.vlgmr.msrb.gmra.mxu2 %vm340_vm2, %v9754_v20 }
 0x55c   : > { %5700 = vmatpush.bf16.msrb.mxu2 %v5610_v61  ;;  %v5736_v21 = vpop.permute.xlu0 %5735  ;;  %v5901_v15 = vpop.permute.xlu2 %5900 }
 0x55d   : > { %v5573_v23 = vpop.permute.xlu1 %5572  ;;  %v5749_v42 = vsel %vm1155_vm7, %v5734_v3, %v5736_v21 }
 0x55e   : > { %v5584_v46 = vsel %vm987_vm6, %v5571_v35, %v5573_v23  ;;  %v5585_v22 = vsel %vm987_vm6, %v5573_v23, %v5575_v5  ;;  %v5765_v4 = vsel %vm344_vm1, %v5749_v42, 0  ;;  %vm13830_vm6 = vmmov %vm13826_vm0 }
 0x55f   : > { %v5604_v39 = vsel %vm344_vm1, %v5584_v46, 0  ;;  %v5607_v26 = vsel %vm344_vm1, %v5585_v22, 0 }
 0x560   : > { %v12213_v17 = vpop.f32.mrf.mxu0 }
 0x562   : > { %6570 = vrot.lane.b32.xlu0 %v11905_v49, %s10030_s6  ;;  %6568 = vrot.lane.b32.xlu2 %v11903_v57, %s10030_s6 }
 0x563   : > { %6407 = vrot.lane.b32.xlu1 %v11934_v25, %s10029_s23  ;;  %9760 = vmatmul.msk.bf16.vlgmr.msrb.gmra.mxu1 %vm340_vm2, %v9754_v20 }
 0x564   : > { %9759 = vmatmul.msk.bf16.vlgmr.msrb.gmra.mxu0 %vm340_vm2, %v9754_v20  ;;  %9762 = vmatmul.msk.bf16.vlgmr.msrb.gmra.mxu3 %vm340_vm2, %v9754_v20  ;;  %v5732_v48 = vpop.permute.xlu0 %5731  ;;  %v5897_v46 = vpop.permute.xlu2 %5896 }
 0x565   : > { %5674 = vmatpush.bf16.msrb.mxu0 %v5604_v39  ;;  %5687 = vmatpush.bf16.msrb.mxu1 %v5607_v26  ;;  %v5738_v44 = vpop.permute.xlu1 %5737  ;;  %v5747_v54 = vsel %vm1155_vm7, %v5730_v52, %v5732_v48  ;;  %v5748_v53 = vsel %vm1155_vm7, %v5732_v48, %v5734_v3 }
 0x566   : > { %5713 = vmatpush.bf16.msrb.mxu3 %v5613_v55  ;;  %v5750_v58 = vsel %vm1155_vm7, %v5736_v21, %v5738_v44  ;;  %v5759_v36 = vsel %vm344_vm1, %v5747_v54, 0  ;;  %v5762_v7 = vsel %vm344_vm1, %v5748_v53, 0 }
 0x567   : > { %v5768_v9 = vsel %vm344_vm1, %v5750_v58, 0 }
 0x568   : > { %v4976_v50 = vpop.f32.mrf.mxu0 }
 0x569   : > { %v12234_v16 = vpop.f32.mrf.mxu1 }
 0x56a   : > { %6566 = vrot.lane.b32.xlu0 %v11893_v41, %s10030_s6  ;;  %6564 = vrot.lane.b32.xlu2 %v11911_v18, %s10030_s6 }
 0x56b   : > { %6572 = vrot.lane.b32.xlu1 %v11913_v28, %s10030_s6  ;;  %9766 = vmatmul.msk.bf16.vlgmr.msra.gmra.mxu2 %vm340_vm2, %v9763_v43 }
 0x56c   : > { %5815 = vmatpush.bf16.msra.mxu2 %v5765_v4  ;;  %v5746_v1 = vpop.permute.xlu0 %5745 }
 0x56d   : > { %v5742_v45 = vpop.permute.xlu1 %5741  ;;  %v5754_v35 = vsel %vm1155_vm7, %v5744_v11, %v5746_v1 }
 0x56e   : > { %v12244_v56 = vpop.f32.mrf.mxu2  ;;  %v5753_v62 = vsel %vm1155_vm7, %v5742_v45, %v5744_v11  ;;  %v5780_v51 = vsel %vm344_vm1, %v5754_v35, 0 }
 0x56f   : > { %v5777_v6 = vsel %vm344_vm1, %v5753_v62, 0 }
 0x571   : > { %v4989_v2 = vpop.f32.mrf.mxu1 }
 0x572   : > { %6580 = vrot.lane.b32.xlu0 %v11924_v63, %s10030_s6  ;;  %6578 = vrot.lane.b32.xlu2 %v11922_v29, %s10030_s6 }
 0x573   : > { %6576 = vrot.lane.b32.xlu1 %v11926_v31, %s10030_s6  ;;  %9765 = vmatmul.msk.bf16.vlgmr.msra.gmra.mxu1 %vm340_vm2, %v9763_v43 }
 0x574   : > { %9764 = vmatmul.msk.bf16.vlgmr.msra.gmra.mxu0 %vm340_vm2, %v9763_v43  ;;  %9767 = vmatmul.msk.bf16.vlgmr.msra.gmra.mxu3 %vm340_vm2, %v9763_v43  ;;  %v5903_v8 = vpop.permute.xlu0 %5902 }
 0x575   : > { %5789 = vmatpush.bf16.msra.mxu0 %v5759_v36  ;;  %5802 = vmatpush.bf16.msra.mxu1 %v5762_v7  ;;  %v5740_v13 = vpop.permute.xlu1 %5739  ;;  %v5916_v5 = vsel %vm1323_vm8, %v5901_v15, %v5903_v8 }
 0x576   : > { %5828 = vmatpush.bf16.msra.mxu3 %v5768_v9  ;;  %v5002_v59 = vpop.f32.mrf.mxu2  ;;  %v12261_v38 = vpop.f32.mrf.mxu3  ;;  %v5751_v20 = vsel %vm1155_vm7, %v5738_v44, %v5740_v13  ;;  %v5752_v24 = vsel %vm1155_vm7, %v5740_v13, %v5742_v45  ;;  %v5932_v23 = vsel %vm344_vm1, %v5916_v5, 0  ;;  %vm13831_vm7 = vmmov %vm13826_vm0 }
 0x577   : > { %v5771_v40 = vsel %vm344_vm1, %v5751_v20, 0  ;;  %v5774_v47 = vsel %vm344_vm1, %v5752_v24, 0 }
 0x57a   : > { %6737 = vrot.lane.b32.xlu0 %v11905_v49, %s10031_s14  ;;  %6735 = vrot.lane.b32.xlu2 %v11903_v57, %s10031_s14 }
 0x57b   : > { %6574 = vrot.lane.b32.xlu1 %v11934_v25, %s10030_s6  ;;  %9770 = vmatmul.msk.bf16.vlgmr.msrb.gmra.mxu2 %vm340_vm2, %v9763_v43  ;;  %s13843_s6 = smov 28  }
 0x57c   : > { %5867 = vmatpush.bf16.msrb.mxu2 %v5777_v6  ;;  %v5899_v22 = vpop.permute.xlu0 %5898 }
 0x57d   : > { %v5905_v61 = vpop.permute.xlu1 %5904  ;;  %v5914_v26 = vsel %vm1323_vm8, %v5897_v46, %v5899_v22  ;;  %v5915_v55 = vsel %vm1323_vm8, %v5899_v22, %v5901_v15 }
 0x57e   : > { %v5015_v12 = vpop.f32.mrf.mxu3  ;;  %v12272_v30 = vpop.f32.mrf.mxu2  ;;  %v5917_v50 = vsel %vm1323_vm8, %v5903_v8, %v5905_v61 }
 0x57f   : > { %v5935_v52 = vsel %vm344_vm1, %v5917_v50, 0 }
 0x580   : > { %v12274_v14 = vpop.f32.mrf.mxu1 }
 0x581   : > { %v12278_v34 = vpop.f32.mrf.mxu0 }
 0x582   : > { %6733 = vrot.lane.b32.xlu0 %v11893_v41, %s10031_s14  ;;  %6731 = vrot.lane.b32.xlu2 %v11911_v18, %s10031_s14 }
 0x583   : > { %6739 = vrot.lane.b32.xlu1 %v11913_v28, %s10031_s14  ;;  %9769 = vmatmul.msk.bf16.vlgmr.msrb.gmra.mxu1 %vm340_vm2, %v9763_v43 }
 0x584   : > { %9768 = vmatmul.msk.bf16.vlgmr.msrb.gmra.mxu0 %vm340_vm2, %v9763_v43  ;;  %9771 = vmatmul.msk.bf16.vlgmr.msrb.gmra.mxu3 %vm340_vm2, %v9763_v43  ;;  %v5913_v36 = vpop.permute.xlu0 %5912 }
 0x585   : > { %5841 = vmatpush.bf16.msrb.mxu0 %v5771_v40  ;;  %5854 = vmatpush.bf16.msrb.mxu1 %v5774_v47  ;;  %v5909_v4 = vpop.permute.xlu1 %5908 }
 0x586   : > { %5880 = vmatpush.bf16.msrb.mxu3 %v5780_v51  ;;  %v5054_v0 = vpop.f32.mrf.mxu2 }
 0x587   : > { %v12293_v19 = vpop.f32.mrf.mxu3  ;;  %v12384_v0 = vld [vmem:[%s13789_s3 + $0x18] sm:$0xf] }
 0x588   : > { %v5041_v27 = vpop.f32.mrf.mxu1 }
 0x589   : > { %v5028_v32 = vpop.f32.mrf.mxu0 }
 0x58a   : > { %6747 = vrot.lane.b32.xlu0 %v11924_v63, %s10031_s14  ;;  %6745 = vrot.lane.b32.xlu2 %v11922_v29, %s10031_s14 }
 0x58b   : > { %6743 = vrot.lane.b32.xlu1 %v11926_v31, %s10031_s14  ;;  %9775 = vmatmul.msk.bf16.vlgmr.msra.gmra.mxu2 %vm340_vm2, %v12299_v33 }
 0x58c   : > { %5982 = vmatpush.bf16.msra.mxu2 %v5932_v23 }
 0x58d   : > { %v5907_v9 = vpop.permute.xlu1 %5906 }
 0x58e   : > { %v5157_v60 = vpop.f32.mrf.mxu2  ;;  %v5918_v1 = vsel %vm1323_vm8, %v5905_v61, %v5907_v9 }
 0x58f   : > { %v5067_v3 = vpop.f32.mrf.mxu3  ;;  %v12311_v21 = vadd.f32 %v5157_v60, %v12244_v56  ;;  %v5911_v56 = vpop.permute.xlu2 %5910  ;;  %v5938_v24 = vsel %vm344_vm1, %v5918_v1, 0 }
 0x590   : > { %v5144_v39 = vpop.f32.mrf.mxu1  ;;  %v5920_v53 = vsel %vm1323_vm8, %v5909_v4, %v5911_v56  ;;  %v5921_v12 = vsel %vm1323_vm8, %v5911_v56, %v5913_v36 }
 0x591   : > { %v5131_v42 = vpop.f32.mrf.mxu0  ;;  %v12316_v43 = vadd.f32 %v5144_v39, %v12234_v16  ;;  %v5929_v16 = vsel %vm344_vm1, %v5915_v55, 0  ;;  %v5944_v7 = vsel %vm344_vm1, %v5920_v53, 0  ;;  %v5947_v35 = vsel %vm344_vm1, %v5921_v12, 0 }
 0x592   : > { %v12320_v44 = vadd.f32 %v5131_v42, %v12213_v17  ;;  %6904 = vrot.lane.b32.xlu0 %v11905_v49, %s10032_s18  ;;  %6902 = vrot.lane.b32.xlu2 %v11903_v57, %s10032_s18  ;;  %v5926_v17 = vsel %vm344_vm1, %v5914_v26, 0 }
 0x593   : > { %6741 = vrot.lane.b32.xlu1 %v11934_v25, %s10031_s14  ;;  %9774 = vmatmul.msk.bf16.vlgmr.msra.gmra.mxu1 %vm340_vm2, %v12299_v33 }
 0x594   : > { %9773 = vmatmul.msk.bf16.vlgmr.msra.gmra.mxu0 %vm340_vm2, %v12299_v33  ;;  %9776 = vmatmul.msk.bf16.vlgmr.msra.gmra.mxu3 %vm340_vm2, %v12299_v33 }
 0x595   : > { %5956 = vmatpush.bf16.msra.mxu0 %v5926_v17  ;;  %5969 = vmatpush.bf16.msra.mxu1 %v5929_v16  ;;  %v6072_v27 = vpop.permute.xlu1 %6071 }
 0x596   : > { %5995 = vmatpush.bf16.msra.mxu3 %v5935_v52  ;;  %v5159_v48 = vpop.f32.mrf.mxu2 }
 0x597   : > { %v5170_v54 = vpop.f32.mrf.mxu3 }
 0x598   : > { %v12339_v2 = vadd.f32 %v5170_v54, %v12261_v38  ;;  %v5146_v58 = vpop.f32.mrf.mxu1 }
 0x599   : > { %v5133_v45 = vpop.f32.mrf.mxu0 }
 0x59a   : > { %6900 = vrot.lane.b32.xlu0 %v11893_v41, %s10032_s18  ;;  %6898 = vrot.lane.b32.xlu2 %v11911_v18, %s10032_s18  ;;  %v5919_v18 = vsel %vm1323_vm8, %v5907_v9, %v5909_v4  ;;  %vm13832_vm8 = vmmov %vm13826_vm0 }
 0x59b   : > { %6906 = vrot.lane.b32.xlu1 %v11913_v28, %s10032_s18  ;;  %9779 = vmatmul.msk.bf16.vlgmr.msrb.gmra.mxu2 %vm340_vm2, %v12299_v33 }
 0x59c   : > { %6034 = vmatpush.bf16.msrb.mxu2 %v5944_v7 }
 0x59e   : > { %v5209_v59 = vpop.f32.mrf.mxu2 }
 0x59f   : > { %v5172_v38 = vpop.f32.mrf.mxu3  ;;  %v12351_v11 = vadd.f32 %v5209_v59, %v12272_v30  ;;  %v6068_v30 = vpop.permute.xlu2 %6067 }
 0x5a0   : > { %v5196_v62 = vpop.f32.mrf.mxu1 }
 0x5a1   : > { %v5183_v6 = vpop.f32.mrf.mxu0  ;;  %v12356_v13 = vadd.f32 %v5196_v62, %v12274_v14  ;;  %v6070_v14 = vpop.permute.xlu0 %6069 }
 0x5a2   : > { %v12360_v20 = vadd.f32 %v5183_v6, %v12278_v34  ;;  %6914 = vrot.lane.b32.xlu0 %v11924_v63, %s10032_s18  ;;  %6912 = vrot.lane.b32.xlu2 %v11922_v29, %s10032_s18  ;;  %v5941_v34 = vsel %vm344_vm1, %v5919_v18, 0  ;;  %v6083_v40 = vsel %vm1491_vm9, %v6068_v30, %v6070_v14  ;;  %v6084_v55 = vsel %vm1491_vm9, %v6070_v14, %v6072_v27 }
 0x5a3   : > { %6910 = vrot.lane.b32.xlu1 %v11926_v31, %s10032_s18  ;;  %9778 = vmatmul.msk.bf16.vlgmr.msrb.gmra.mxu1 %vm340_vm2, %v12299_v33  ;;  %v6102_v4 = vsel %vm344_vm1, %v6084_v55, 0 }
 0x5a4   : > { %9777 = vmatmul.msk.bf16.vlgmr.msrb.gmra.mxu0 %vm340_vm2, %v12299_v33  ;;  %9780 = vmatmul.msk.bf16.vlgmr.msrb.gmra.mxu3 %vm340_vm2, %v12299_v33 }
 0x5a5   : > { %6008 = vmatpush.bf16.msrb.mxu0 %v5938_v24  ;;  %6021 = vmatpush.bf16.msrb.mxu1 %v5941_v34 }
 0x5a6   : > { %6047 = vmatpush.bf16.msrb.mxu3 %v5947_v35  ;;  %v5211_v15 = vpop.f32.mrf.mxu2 }
 0x5a7   : > { %v5222_v8 = vpop.f32.mrf.mxu3  ;;  %v6064_v33 = vpop.permute.xlu2 %6063 }
 0x5a8   : > { %v12379_v47 = vadd.f32 %v5222_v8, %v12293_v19  ;;  %v5198_v51 = vpop.f32.mrf.mxu1  ;;  %v6099_v19 = vsel %vm344_vm1, %v6083_v40, 0  ;;  %v12472_v40 = vld [vmem:[%s13789_s3 + $0x1c] sm:$0xf] }
 0x5a9   : > { %v5185_v5 = vpop.f32.mrf.mxu0  ;;  %v6066_v32 = vpop.permute.xlu0 %6065 }
 0x5aa   : > { %7214 = vrot.lane.b32.xlu0 %v11913_v28, %s10033_s24  ;;  %7212 = vrot.lane.b32.xlu2 %v11905_v49, %s10033_s24  ;;  %v6081_v60 = vsel %vm1491_vm9, %v6064_v33, %v6066_v32  ;;  %v6082_v3 = vsel %vm1491_vm9, %v6066_v32, %v6068_v30 }
 0x5ab   : > { %6908 = vrot.lane.b32.xlu1 %v11934_v25, %s10032_s18  ;;  %9784 = vmatmul.msk.bf16.vlgmr.msra.gmra.mxu2 %vm340_vm2, %v12384_v0  ;;  %v6093_v50 = vsel %vm344_vm1, %v6081_v60, 0 }
 0x5ac   : > { %6149 = vmatpush.bf16.msra.mxu2 %v6099_v19 }
 0x5ae   : > { %v5316_v61 = vpop.f32.mrf.mxu2 }
 0x5af   : > { %v5224_v23 = vpop.f32.mrf.mxu3  ;;  %v12396_v46 = vadd.f32 %v5316_v61, %v12311_v21  ;;  %v7206_v21 = vunpack.c.h.b16 %v11919_v10  ;;  %v6078_v16 = vpop.permute.xlu2 %6077 }
 0x5b0   : > { %v5303_v22 = vpop.f32.mrf.mxu1 }
 0x5b1   : > { %v5290_v39 = vpop.f32.mrf.mxu0  ;;  %v12401_v26 = vadd.f32 %v5303_v22, %v12316_v43  ;;  %v6076_v43 = vpop.permute.xlu1 %6075  ;;  %v12423_v10 = vpack.c.b16 %v7206_v21, %v7206_v21 }
 0x5b2   : > { %v12405_v42 = vadd.f32 %v5290_v39, %v12320_v44  ;;  %7210 = vrot.lane.b32.xlu0 %v11903_v57, %s10033_s24  ;;  %7208 = vrot.lane.b32.xlu2 %v11893_v41, %s10033_s24  ;;  %v6096_v44 = vsel %vm344_vm1, %v6082_v3, 0  ;;  %v6087_v48 = vsel %vm1491_vm9, %v6076_v43, %v6078_v16  ;;  %v6080_v58 = vpop.permute.xlu0 %6079 }
 0x5b3   : > { %7216 = vrot.lane.b32.xlu1 %v11934_v25, %s10033_s24  ;;  %9783 = vmatmul.msk.bf16.vlgmr.msra.gmra.mxu1 %vm340_vm2, %v12384_v0  ;;  %v6111_v45 = vsel %vm344_vm1, %v6087_v48, 0  ;;  %v6088_v6 = vsel %vm1491_vm9, %v6078_v16, %v6080_v58 }
 0x5b4   : > { %9782 = vmatmul.msk.bf16.vlgmr.msra.gmra.mxu0 %vm340_vm2, %v12384_v0  ;;  %9785 = vmatmul.msk.bf16.vlgmr.msra.gmra.mxu3 %vm340_vm2, %v12384_v0  ;;  %v6114_v14 = vsel %vm344_vm1, %v6088_v6, 0 }
 0x5b5   : > { %6123 = vmatpush.bf16.msra.mxu0 %v6093_v50  ;;  %6136 = vmatpush.bf16.msra.mxu1 %v6096_v44 }
 0x5b6   : > { %6162 = vmatpush.bf16.msra.mxu3 %v6102_v4  ;;  %v5318_v17 = vpop.f32.mrf.mxu2 }
 0x5b7   : > { %v5329_v52 = vpop.f32.mrf.mxu3 }
 0x5b8   : > { %v12427_v56 = vadd.f32 %v5329_v52, %v12339_v2  ;;  %v5305_v54 = vpop.f32.mrf.mxu1 }
 0x5b9   : > { %v5292_v53 = vpop.f32.mrf.mxu0  ;;  %v6074_v2 = vpop.permute.xlu1 %6073 }
 0x5ba   : > { %7224 = vrot.lane.b32.xlu0 %v12423_v10, %s10033_s24  ;;  %7222 = vrot.lane.b32.xlu2 %v11924_v63, %s10033_s24  ;;  %v6085_v38 = vsel %vm1491_vm9, %v6072_v27, %v6074_v2  ;;  %v6086_v62 = vsel %vm1491_vm9, %v6074_v2, %v6076_v43  ;;  %vm13833_vm9 = vmmov %vm13826_vm0 }
 0x5bb   : > { %7220 = vrot.lane.b32.xlu1 %v11922_v29, %s10033_s24  ;;  %9788 = vmatmul.msk.bf16.vlgmr.msrb.gmra.mxu2 %vm340_vm2, %v12384_v0  ;;  %v6108_v30 = vsel %vm344_vm1, %v6086_v62, 0 }
 0x5bc   : > { %6201 = vmatpush.bf16.msrb.mxu2 %v6111_v45 }
 0x5be   : > { %v5368_v36 = vpop.f32.mrf.mxu2 }
 0x5bf   : > { %v5331_v7 = vpop.f32.mrf.mxu3  ;;  %v12439_v9 = vadd.f32 %v5368_v36, %v12351_v11  ;;  %v6235_v11 = vpop.permute.xlu2 %6234 }
 0x5c0   : > { %v5355_v59 = vpop.f32.mrf.mxu1 }
 0x5c1   : > { %v5342_v1 = vpop.f32.mrf.mxu0  ;;  %v12444_v18 = vadd.f32 %v5355_v59, %v12356_v13  ;;  %v6237_v13 = vpop.permute.xlu0 %6236 }
 0x5c2   : > { %v12448_v12 = vadd.f32 %v5342_v1, %v12360_v20  ;;  %7381 = vrot.lane.b32.xlu0 %v11913_v28, %s10034_s29  ;;  %7379 = vrot.lane.b32.xlu2 %v11905_v49, %s10034_s29  ;;  %v6105_v20 = vsel %vm344_vm1, %v6085_v38, 0  ;;  %v6250_v35 = vsel %vm1659_vm10, %v6235_v11, %v6237_v13 }
 0x5c3   : > { %7218 = vrot.lane.b32.xlu1 %v11926_v31, %s10033_s24  ;;  %9787 = vmatmul.msk.bf16.vlgmr.msrb.gmra.mxu1 %vm340_vm2, %v12384_v0 }
 0x5c4   : > { %9786 = vmatmul.msk.bf16.vlgmr.msrb.gmra.mxu0 %vm340_vm2, %v12384_v0  ;;  %9789 = vmatmul.msk.bf16.vlgmr.msrb.gmra.mxu3 %vm340_vm2, %v12384_v0  ;;  %v6239_v0 = vpop.permute.xlu1 %6238 }
 0x5c5   : > { %6175 = vmatpush.bf16.msrb.mxu0 %v6105_v20  ;;  %6188 = vmatpush.bf16.msrb.mxu1 %v6108_v30  ;;  %v6251_v39 = vsel %vm1659_vm10, %v6237_v13, %v6239_v0 }
 0x5c6   : > { %6214 = vmatpush.bf16.msrb.mxu3 %v6114_v14  ;;  %v5370_v24 = vpop.f32.mrf.mxu2  ;;  %v6269_v21 = vsel %vm344_vm1, %v6251_v39, 0 }
 0x5c7   : > { %v5381_v34 = vpop.f32.mrf.mxu3  ;;  %v6231_v5 = vpop.permute.xlu2 %6230 }
 0x5c8   : > { %v12467_v15 = vadd.f32 %v5381_v34, %v12379_v47  ;;  %v5357_v8 = vpop.f32.mrf.mxu1  ;;  %v6266_v47 = vsel %vm344_vm1, %v6250_v35, 0  ;;  %v12557_v34 = vld [vmem:[%s13789_s3 + $0x20] sm:$0xf] }
 0x5c9   : > { %v5344_v51 = vpop.f32.mrf.mxu0  ;;  %v6233_v27 = vpop.permute.xlu0 %6232 }
 0x5ca   : > { %7377 = vrot.lane.b32.xlu0 %v11903_v57, %s10034_s29  ;;  %7375 = vrot.lane.b32.xlu2 %v11893_v41, %s10034_s29  ;;  %v6248_v23 = vsel %vm1659_vm10, %v6231_v5, %v6233_v27  ;;  %v6249_v22 = vsel %vm1659_vm10, %v6233_v27, %v6235_v11 }
 0x5cb   : > { %7383 = vrot.lane.b32.xlu1 %v11934_v25, %s10034_s29  ;;  %9793 = vmatmul.msk.bf16.vlgmr.msra.gmra.mxu2 %vm340_vm2, %v12472_v40 }
 0x5cc   : > { %6316 = vmatpush.bf16.msra.mxu2 %v6266_v47 }
 0x5ce   : > { %v5483_v19 = vpop.f32.mrf.mxu2 }
 0x5cf   : > { %v5383_v33 = vpop.f32.mrf.mxu3  ;;  %v12484_v32 = vadd.f32 %v5483_v19, %v12396_v46  ;;  %v6243_v46 = vpop.permute.xlu1 %6242 }
 0x5d0   : > { %v5470_v61 = vpop.f32.mrf.mxu1  ;;  %v6245_v50 = vpop.permute.xlu2 %6244 }
 0x5d1   : > { %v5457_v60 = vpop.f32.mrf.mxu0  ;;  %v12489_v3 = vadd.f32 %v5470_v61, %v12401_v26  ;;  %v6260_v26 = vsel %vm344_vm1, %v6248_v23, 0  ;;  %v6254_v4 = vsel %vm1659_vm10, %v6243_v46, %v6245_v50  ;;  %v6247_v48 = vpop.permute.xlu0 %6246 }
 0x5d2   : > { %v12493_v55 = vadd.f32 %v5457_v60, %v12405_v42  ;;  %7391 = vrot.lane.b32.xlu0 %v12423_v10, %s10034_s29  ;;  %7389 = vrot.lane.b32.xlu2 %v11924_v63, %s10034_s29  ;;  %v6263_v42 = vsel %vm344_vm1, %v6249_v22, 0  ;;  %v6278_v54 = vsel %vm344_vm1, %v6254_v4, 0  ;;  %v6255_v62 = vsel %vm1659_vm10, %v6245_v50, %v6247_v48 }
 0x5d3   : > { %7387 = vrot.lane.b32.xlu1 %v11922_v29, %s10034_s29  ;;  %9792 = vmatmul.msk.bf16.vlgmr.msra.gmra.mxu1 %vm340_vm2, %v12472_v40  ;;  %v6281_v11 = vsel %vm344_vm1, %v6255_v62, 0 }
 0x5d4   : > { %9791 = vmatmul.msk.bf16.vlgmr.msra.gmra.mxu0 %vm340_vm2, %v12472_v40  ;;  %9794 = vmatmul.msk.bf16.vlgmr.msra.gmra.mxu3 %vm340_vm2, %v12472_v40 }
 0x5d5   : > { %6290 = vmatpush.bf16.msra.mxu0 %v6260_v26  ;;  %6303 = vmatpush.bf16.msra.mxu1 %v6263_v42 }
 0x5d6   : > { %6329 = vmatpush.bf16.msra.mxu3 %v6269_v21  ;;  %v5485_v43 = vpop.f32.mrf.mxu2 }
 0x5d7   : > { %v5496_v44 = vpop.f32.mrf.mxu3 }
 0x5d8   : > { %v12512_v17 = vadd.f32 %v5496_v44, %v12427_v56  ;;  %v5472_v16 = vpop.f32.mrf.mxu1  ;;  %v6241_v56 = vpop.permute.xlu1 %6240 }
 0x5d9   : > { %v5459_v52 = vpop.f32.mrf.mxu0  ;;  %v6252_v36 = vsel %vm1659_vm10, %v6239_v0, %v6241_v56  ;;  %v6253_v7 = vsel %vm1659_vm10, %v6241_v56, %v6243_v46  ;;  %vm13834_vm10 = vcmask 7168  }
 0x5da   : > { %7548 = vrot.lane.b32.xlu0 %v11913_v28, %s10035_s20  ;;  %7546 = vrot.lane.b32.xlu2 %v11905_v49, %s10035_s20  ;;  %v6272_v6 = vsel %vm344_vm1, %v6252_v36, 0  ;;  %vm13837_vm15 = vmmov %vm13834_vm10 }
 0x5db   : > { %7385 = vrot.lane.b32.xlu1 %v11926_v31, %s10034_s29  ;;  %9797 = vmatmul.msk.bf16.vlgmr.msrb.gmra.mxu2 %vm340_vm2, %v12472_v40  ;;  %vm13839_vm14 = vmmov %vm13834_vm10 }
 0x5dc   : > { %6368 = vmatpush.bf16.msrb.mxu2 %v6278_v54  ;;  %vm13840_vm13 = vmmov %vm13834_vm10 }
 0x5de   : > { %v5535_v53 = vpop.f32.mrf.mxu2 }
 0x5df   : > { %v5498_v58 = vpop.f32.mrf.mxu3  ;;  %v12524_v45 = vadd.f32 %v5535_v53, %v12439_v9  ;;  %v6402_v9 = vpop.permute.xlu2 %6401 }
 0x5e0   : > { %v5522_v2 = vpop.f32.mrf.mxu1  ;;  %v6406_v8 = vpop.permute.xlu1 %6405 }
 0x5e1   : > { %v5509_v59 = vpop.f32.mrf.mxu0  ;;  %v12529_v38 = vadd.f32 %v5522_v2, %v12444_v18  ;;  %v6404_v18 = vpop.permute.xlu0 %6403 }
 0x5e2   : > { %v12533_v1 = vadd.f32 %v5509_v59, %v12448_v12  ;;  %7544 = vrot.lane.b32.xlu0 %v11903_v57, %s10035_s20  ;;  %7542 = vrot.lane.b32.xlu2 %v11893_v41, %s10035_s20  ;;  %v6275_v12 = vsel %vm344_vm1, %v6253_v7, 0  ;;  %v6417_v30 = vsel %vm1827_vm11, %v6402_v9, %v6404_v18  ;;  %v6418_v22 = vsel %vm1827_vm11, %v6404_v18, %v6406_v8 }
 0x5e3   : > { %7550 = vrot.lane.b32.xlu1 %v11934_v25, %s10035_s20  ;;  %9796 = vmatmul.msk.bf16.vlgmr.msrb.gmra.mxu1 %vm340_vm2, %v12472_v40 }
 0x5e4   : > { %9795 = vmatmul.msk.bf16.vlgmr.msrb.gmra.mxu0 %vm340_vm2, %v12472_v40  ;;  %9798 = vmatmul.msk.bf16.vlgmr.msrb.gmra.mxu3 %vm340_vm2, %v12472_v40 }
 0x5e5   : > { %6342 = vmatpush.bf16.msrb.mxu0 %v6272_v6  ;;  %6355 = vmatpush.bf16.msrb.mxu1 %v6275_v12 }
 0x5e6   : > { %6381 = vmatpush.bf16.msrb.mxu3 %v6281_v11  ;;  %v5537_v13 = vpop.f32.mrf.mxu2 }
 0x5e7   : > { %v5548_v20 = vpop.f32.mrf.mxu3  ;;  %v6398_v40 = vpop.permute.xlu2 %6397 }
 0x5e8   : > { %v12552_v14 = vadd.f32 %v5548_v20, %v12467_v15  ;;  %v5524_v24 = vpop.f32.mrf.mxu1  ;;  %v6433_v15 = vsel %vm344_vm1, %v6417_v30, 0  ;;  %v12642_v20 = vld [vmem:[%s13789_s3 + $0x24] sm:$0xf] }
 0x5e9   : > { %v5511_v35 = vpop.f32.mrf.mxu0  ;;  %v6400_v51 = vpop.permute.xlu0 %6399 }
 0x5ea   : > { %7558 = vrot.lane.b32.xlu0 %v12423_v10, %s10035_s20  ;;  %7556 = vrot.lane.b32.xlu2 %v11924_v63, %s10035_s20  ;;  %v6415_v19 = vsel %vm1827_vm11, %v6398_v40, %v6400_v51  ;;  %v6416_v33 = vsel %vm1827_vm11, %v6400_v51, %v6402_v9 }
 0x5eb   : > { %7554 = vrot.lane.b32.xlu1 %v11922_v29, %s10035_s20  ;;  %9802 = vmatmul.msk.bf16.vlgmr.msra.gmra.mxu2 %vm340_vm2, %v12557_v34  ;;  %v6430_v39 = vsel %vm344_vm1, %v6416_v33, 0 }
 0x5ec   : > { %6483 = vmatpush.bf16.msra.mxu2 %v6433_v15 }
 0x5ee   : > { %v5650_v0 = vpop.f32.mrf.mxu2 }
 0x5ef   : > { %v5550_v47 = vpop.f32.mrf.mxu3  ;;  %v12569_v5 = vadd.f32 %v5650_v0, %v12484_v32  ;;  %v6410_v32 = vpop.permute.xlu1 %6409 }
 0x5f0   : > { %v5637_v27 = vpop.f32.mrf.mxu1  ;;  %v6412_v26 = vpop.permute.xlu2 %6411 }
 0x5f1   : > { %v5624_v61 = vpop.f32.mrf.mxu0  ;;  %v12574_v23 = vadd.f32 %v5637_v27, %v12489_v3  ;;  %v6427_v3 = vsel %vm344_vm1, %v6415_v19, 0  ;;  %v6421_v21 = vsel %vm1827_vm11, %v6410_v32, %v6412_v26  ;;  %v6414_v4 = vpop.permute.xlu0 %6413 }
 0x5f2   : > { %v12578_v60 = vadd.f32 %v5624_v61, %v12493_v55  ;;  %7715 = vrot.lane.b32.xlu0 %v11913_v28, %s13823_s8  ;;  %7713 = vrot.lane.b32.xlu2 %v11905_v49, %s13823_s8  ;;  %v6436_v55 = vsel %vm344_vm1, %v6418_v22, 0  ;;  %v6445_v16 = vsel %vm344_vm1, %v6421_v21, 0  ;;  %v6422_v7 = vsel %vm1827_vm11, %v6412_v26, %v6414_v4 }
 0x5f3   : > { %7552 = vrot.lane.b32.xlu1 %v11926_v31, %s10035_s20  ;;  %9801 = vmatmul.msk.bf16.vlgmr.msra.gmra.mxu1 %vm340_vm2, %v12557_v34  ;;  %s9972_s20 = sshll.u32 %s13951_s27, 6 }
 0x5f4   : > { %9800 = vmatmul.msk.bf16.vlgmr.msra.gmra.mxu0 %vm340_vm2, %v12557_v34  ;;  %9803 = vmatmul.msk.bf16.vlgmr.msra.gmra.mxu3 %vm340_vm2, %v12557_v34 }
 0x5f5   : > { %6457 = vmatpush.bf16.msra.mxu0 %v6427_v3  ;;  %6470 = vmatpush.bf16.msra.mxu1 %v6430_v39 }
 0x5f6   : > { %6496 = vmatpush.bf16.msra.mxu3 %v6436_v55  ;;  %v5652_v46 = vpop.f32.mrf.mxu2 }
 0x5f7   : > { %v5663_v42 = vpop.f32.mrf.mxu3 }
 0x5f8   : > { %v12597_v43 = vadd.f32 %v5663_v42, %v12512_v17  ;;  %v5639_v50 = vpop.f32.mrf.mxu1  ;;  %v6408_v17 = vpop.permute.xlu1 %6407 }
 0x5f9   : > { %v5626_v44 = vpop.f32.mrf.mxu0  ;;  %v6419_v53 = vsel %vm1827_vm11, %v6406_v8, %v6408_v17  ;;  %v6420_v58 = vsel %vm1827_vm11, %v6408_v17, %v6410_v32  ;;  %vm13835_vm11 = vmmov %vm13834_vm10 }
 0x5fa   : > { %7711 = vrot.lane.b32.xlu0 %v11903_v57, %s13823_s8  ;;  %7709 = vrot.lane.b32.xlu2 %v11893_v41, %s13823_s8  ;;  %v6439_v62 = vsel %vm344_vm1, %v6419_v53, 0  ;;  %v6442_v9 = vsel %vm344_vm1, %v6420_v58, 0 }
 0x5fb   : > { %7717 = vrot.lane.b32.xlu1 %v11934_v25, %s13823_s8  ;;  %9806 = vmatmul.msk.bf16.vlgmr.msrb.gmra.mxu2 %vm340_vm2, %v12557_v34 }
 0x5fc   : > { %6535 = vmatpush.bf16.msrb.mxu2 %v6445_v16 }
 0x5fe   : > { %v5702_v52 = vpop.f32.mrf.mxu2 }
 0x5ff   : > { %v5665_v48 = vpop.f32.mrf.mxu3  ;;  %v12609_v54 = vadd.f32 %v5702_v52, %v12524_v45  ;;  %v6569_v45 = vpop.permute.xlu2 %6568 }
 0x600   : > { %v5689_v56 = vpop.f32.mrf.mxu1  ;;  %v6573_v24 = vpop.permute.xlu1 %6572 }
 0x601   : > { %v5676_v2 = vpop.f32.mrf.mxu0  ;;  %v12614_v36 = vadd.f32 %v5689_v56, %v12529_v38  ;;  %v6571_v38 = vpop.permute.xlu0 %6570 }
 0x602   : > { %v12618_v59 = vadd.f32 %v5676_v2, %v12533_v1  ;;  %7725 = vrot.lane.b32.xlu0 %v12423_v10, %s13823_s8  ;;  %7723 = vrot.lane.b32.xlu2 %v11924_v63, %s13823_s8  ;;  %v6448_v1 = vsel %vm344_vm1, %v6422_v7, 0  ;;  %v6584_v12 = vsel %vm1995_vm12, %v6569_v45, %v6571_v38  ;;  %v6585_v33 = vsel %vm1995_vm12, %v6571_v38, %v6573_v24 }
 0x603   : > { %7721 = vrot.lane.b32.xlu1 %v11922_v29, %s13823_s8  ;;  %9805 = vmatmul.msk.bf16.vlgmr.msrb.gmra.mxu1 %vm340_vm2, %v12557_v34 }
 0x604   : > { %9804 = vmatmul.msk.bf16.vlgmr.msrb.gmra.mxu0 %vm340_vm2, %v12557_v34  ;;  %9807 = vmatmul.msk.bf16.vlgmr.msrb.gmra.mxu3 %vm340_vm2, %v12557_v34  ;;  %v6600_v34 = vsel %vm344_vm1, %v6584_v12, 0 }
 0x605   : > { %6509 = vmatpush.bf16.msrb.mxu0 %v6439_v62  ;;  %6522 = vmatpush.bf16.msrb.mxu1 %v6442_v9 }
 0x606   : > { %6548 = vmatpush.bf16.msrb.mxu3 %v6448_v1  ;;  %v5704_v18 = vpop.f32.mrf.mxu2 }
 0x607   : > { %v5715_v6 = vpop.f32.mrf.mxu3 }
 0x608   : > { %v12637_v11 = vadd.f32 %v5715_v6, %v12552_v14  ;;  %v5691_v13 = vpop.f32.mrf.mxu1  ;;  %v6565_v14 = vpop.permute.xlu2 %6564  ;;  %v12727_v6 = vld [vmem:[%s13789_s3 + $0x28] sm:$0xf] }
 0x609   : > { %v5678_v30 = vpop.f32.mrf.mxu0  ;;  %v6567_v35 = vpop.permute.xlu0 %6566 }
 0x60a   : > { %7882 = vrot.lane.b32.xlu0 %v11913_v28, %s13824_s10  ;;  %7880 = vrot.lane.b32.xlu2 %v11905_v49, %s13824_s10  ;;  %v6582_v0 = vsel %vm1995_vm12, %v6565_v14, %v6567_v35  ;;  %v6583_v47 = vsel %vm1995_vm12, %v6567_v35, %v6569_v45  ;;  %v6577_v22 = vpop.permute.xlu1 %6576 }
 0x60b   : > { %7719 = vrot.lane.b32.xlu1 %v11926_v31, %s13823_s8  ;;  %9811 = vmatmul.msk.bf16.vlgmr.msra.gmra.mxu2 %vm340_vm2, %v12642_v20 }
 0x60c   : > { %6650 = vmatpush.bf16.msra.mxu2 %v6600_v34 }
 0x60e   : > { %v5817_v8 = vpop.f32.mrf.mxu2 }
 0x60f   : > { %v5717_v15 = vpop.f32.mrf.mxu3  ;;  %v12654_v40 = vadd.f32 %v5817_v8, %v12569_v5  ;;  %v6594_v5 = vsel %vm344_vm1, %v6582_v0, 0 }
 0x610   : > { %v5804_v51 = vpop.f32.mrf.mxu1  ;;  %v6579_v3 = vpop.permute.xlu2 %6578 }
 0x611   : > { %v5791_v27 = vpop.f32.mrf.mxu0  ;;  %v12659_v19 = vadd.f32 %v5804_v51, %v12574_v23  ;;  %v6597_v23 = vsel %vm344_vm1, %v6583_v47, 0  ;;  %v6588_v55 = vsel %vm1995_vm12, %v6577_v22, %v6579_v3  ;;  %v6581_v21 = vpop.permute.xlu0 %6580 }
 0x612   : > { %v12663_v61 = vadd.f32 %v5791_v27, %v12578_v60  ;;  %7878 = vrot.lane.b32.xlu0 %v11903_v57, %s13824_s10  ;;  %7876 = vrot.lane.b32.xlu2 %v11893_v41, %s13824_s10  ;;  %v6603_v60 = vsel %vm344_vm1, %v6585_v33, 0  ;;  %v6612_v50 = vsel %vm344_vm1, %v6588_v55, 0  ;;  %v6589_v58 = vsel %vm1995_vm12, %v6579_v3, %v6581_v21 }
 0x613   : > { %7884 = vrot.lane.b32.xlu1 %v11934_v25, %s13824_s10  ;;  %9810 = vmatmul.msk.bf16.vlgmr.msra.gmra.mxu1 %vm340_vm2, %v12642_v20 }
 0x614   : > { %9809 = vmatmul.msk.bf16.vlgmr.msra.gmra.mxu0 %vm340_vm2, %v12642_v20  ;;  %9812 = vmatmul.msk.bf16.vlgmr.msra.gmra.mxu3 %vm340_vm2, %v12642_v20 }
 0x615   : > { %6624 = vmatpush.bf16.msra.mxu0 %v6594_v5  ;;  %6637 = vmatpush.bf16.msra.mxu1 %v6597_v23 }
 0x616   : > { %6663 = vmatpush.bf16.msra.mxu3 %v6603_v60  ;;  %v5819_v32 = vpop.f32.mrf.mxu2 }
 0x617   : > { %v5830_v39 = vpop.f32.mrf.mxu3 }
 0x618   : > { %v12682_v46 = vadd.f32 %v5830_v39, %v12597_v43  ;;  %v5806_v26 = vpop.f32.mrf.mxu1  ;;  %v6575_v43 = vpop.permute.xlu1 %6574 }
 0x619   : > { %v5793_v42 = vpop.f32.mrf.mxu0  ;;  %v6586_v52 = vsel %vm1995_vm12, %v6573_v24, %v6575_v43  ;;  %v6587_v48 = vsel %vm1995_vm12, %v6575_v43, %v6577_v22  ;;  %vm13836_vm12 = vmmov %vm13834_vm10 }
 0x61a   : > { %7892 = vrot.lane.b32.xlu0 %v12423_v10, %s13824_s10  ;;  %7890 = vrot.lane.b32.xlu2 %v11924_v63, %s13824_s10  ;;  %v6606_v7 = vsel %vm344_vm1, %v6586_v52, 0  ;;  %v6609_v45 = vsel %vm344_vm1, %v6587_v48, 0 }
 0x61b   : > { %7888 = vrot.lane.b32.xlu1 %v11922_v29, %s13824_s10  ;;  %9815 = vmatmul.msk.bf16.vlgmr.msrb.gmra.mxu2 %vm340_vm2, %v12642_v20 }
 0x61c   : > { %6702 = vmatpush.bf16.msrb.mxu2 %v6612_v50 }
 0x61e   : > { %v5869_v44 = vpop.f32.mrf.mxu2 }
 0x61f   : > { %v5832_v4 = vpop.f32.mrf.mxu3  ;;  %v12694_v16 = vadd.f32 %v5869_v44, %v12609_v54  ;;  %v6736_v54 = vpop.permute.xlu2 %6735 }
 0x620   : > { %v5856_v17 = vpop.f32.mrf.mxu1  ;;  %v6740_v13 = vpop.permute.xlu1 %6739 }
 0x621   : > { %v5843_v56 = vpop.f32.mrf.mxu0  ;;  %v12699_v53 = vadd.f32 %v5856_v17, %v12614_v36  ;;  %v6738_v36 = vpop.permute.xlu0 %6737 }
 0x622   : > { %v12703_v2 = vadd.f32 %v5843_v56, %v12618_v59  ;;  %8049 = vrot.lane.b32.xlu0 %v11913_v28, %s13825_s11  ;;  %8047 = vrot.lane.b32.xlu2 %v11905_v49, %s13825_s11  ;;  %v6615_v59 = vsel %vm344_vm1, %v6589_v58, 0  ;;  %v6751_v9 = vsel %vm13826_vm0, %v6736_v54, %v6738_v36  ;;  %v6752_v47 = vsel %vm13829_vm5, %v6738_v36, %v6740_v13  ;;  %vm13841_vm0 = vmmov %vm13834_vm10 }
 0x623   : > { %7886 = vrot.lane.b32.xlu1 %v11926_v31, %s13824_s10  ;;  %9814 = vmatmul.msk.bf16.vlgmr.msrb.gmra.mxu1 %vm340_vm2, %v12642_v20 }
 0x624   : > { %9813 = vmatmul.msk.bf16.vlgmr.msrb.gmra.mxu0 %vm340_vm2, %v12642_v20  ;;  %9816 = vmatmul.msk.bf16.vlgmr.msrb.gmra.mxu3 %vm340_vm2, %v12642_v20  ;;  %v6767_v20 = vsel %vm344_vm1, %v6751_v9, 0 }
 0x625   : > { %6676 = vmatpush.bf16.msrb.mxu0 %v6606_v7  ;;  %6689 = vmatpush.bf16.msrb.mxu1 %v6609_v45 }
 0x626   : > { %6715 = vmatpush.bf16.msrb.mxu3 %v6615_v59  ;;  %v5871_v38 = vpop.f32.mrf.mxu2 }
 0x627   : > { %v5882_v62 = vpop.f32.mrf.mxu3 }
 0x628   : > { %v12722_v1 = vadd.f32 %v5882_v62, %v12637_v11  ;;  %v5858_v18 = vpop.f32.mrf.mxu1  ;;  %v6732_v11 = vpop.permute.xlu2 %6731  ;;  %v12812_v62 = vld [vmem:[%s13789_s3 + $0x2c] sm:$0xf] }
 0x629   : > { %v5845_v12 = vpop.f32.mrf.mxu0  ;;  %v6734_v30 = vpop.permute.xlu0 %6733 }
 0x62a   : > { %8045 = vrot.lane.b32.xlu0 %v11903_v57, %s13825_s11  ;;  %8043 = vrot.lane.b32.xlu2 %v11893_v41, %s13825_s11  ;;  %v6749_v8 = vsel %vm13827_vm3, %v6732_v11, %v6734_v30  ;;  %v6750_v15 = vsel %vm13828_vm4, %v6734_v30, %v6736_v54  ;;  %v6744_v33 = vpop.permute.xlu1 %6743  ;;  %vm13842_vm3 = vmmov %vm13841_vm0  ;;  %vm13845_vm4 = vcmask 1039360  }
 0x62b   : > { %8051 = vrot.lane.b32.xlu1 %v11934_v25, %s13825_s11  ;;  %9820 = vmatmul.msk.bf16.vlgmr.msra.gmra.mxu2 %vm340_vm2, %v12727_v6  ;;  %vm13846_vm5 = vmmov %vm13845_vm4 }
 0x62c   : > { %6817 = vmatpush.bf16.msra.mxu2 %v6767_v20 }
 0x62e   : > { %v5984_v24 = vpop.f32.mrf.mxu2 }
 0x62f   : > { %v5884_v34 = vpop.f32.mrf.mxu3  ;;  %v12739_v14 = vadd.f32 %v5984_v24, %v12654_v40  ;;  %v6761_v40 = vsel %vm344_vm1, %v6749_v8, 0 }
 0x630   : > { %v5971_v35 = vpop.f32.mrf.mxu1  ;;  %v6746_v23 = vpop.permute.xlu2 %6745 }
 0x631   : > { %v5958_v51 = vpop.f32.mrf.mxu0  ;;  %v12744_v0 = vadd.f32 %v5971_v35, %v12659_v19  ;;  %v6764_v19 = vsel %vm344_vm1, %v6750_v15, 0  ;;  %v6755_v60 = vsel %vm13830_vm6, %v6744_v33, %v6746_v23  ;;  %v6748_v55 = vpop.permute.xlu0 %6747  ;;  %vm13847_vm6 = vmmov %vm13845_vm4 }
 0x632   : > { %v12748_v27 = vadd.f32 %v5958_v51, %v12663_v61  ;;  %8059 = vrot.lane.b32.xlu0 %v12423_v10, %s13825_s11  ;;  %8057 = vrot.lane.b32.xlu2 %v11924_v63, %s13825_s11  ;;  %v6770_v61 = vsel %vm344_vm1, %v6752_v47, 0  ;;  %v6779_v26 = vsel %vm344_vm1, %v6755_v60, 0  ;;  %v6756_v48 = vsel %vm13833_vm9, %v6746_v23, %v6748_v55  ;;  %vm13850_vm9 = vmmov %vm13845_vm4 }
 0x633   : > { %8055 = vrot.lane.b32.xlu1 %v11922_v29, %s13825_s11  ;;  %9819 = vmatmul.msk.bf16.vlgmr.msra.gmra.mxu1 %vm340_vm2, %v12727_v6 }
 0x634   : > { %9818 = vmatmul.msk.bf16.vlgmr.msra.gmra.mxu0 %vm340_vm2, %v12727_v6  ;;  %9821 = vmatmul.msk.bf16.vlgmr.msra.gmra.mxu3 %vm340_vm2, %v12727_v6 }
 0x635   : > { %6791 = vmatpush.bf16.msra.mxu0 %v6761_v40  ;;  %6804 = vmatpush.bf16.msra.mxu1 %v6764_v19 }
 0x636   : > { %6830 = vmatpush.bf16.msra.mxu3 %v6770_v61  ;;  %v5986_v5 = vpop.f32.mrf.mxu2 }
 0x637   : > { %v5997_v22 = vpop.f32.mrf.mxu3 }
 0x638   : > { %v12767_v32 = vadd.f32 %v5997_v22, %v12682_v46  ;;  %v5973_v3 = vpop.f32.mrf.mxu1  ;;  %v6742_v46 = vpop.permute.xlu1 %6741 }
 0x639   : > { %v5960_v39 = vpop.f32.mrf.mxu0  ;;  %v6753_v44 = vsel %vm13831_vm7, %v6740_v13, %v6742_v46  ;;  %v6754_v4 = vsel %vm13832_vm8, %v6742_v46, %v6744_v33  ;;  %vm13848_vm7 = vmmov %vm13845_vm4 }
 0x63a   : > { %8216 = vrot.lane.b32.xlu0 %v11913_v28, %s10039_s25  ;;  %8214 = vrot.lane.b32.xlu2 %v11905_v49, %s10039_s25  ;;  %v6773_v58 = vsel %vm344_vm1, %v6753_v44, 0  ;;  %v6776_v54 = vsel %vm344_vm1, %v6754_v4, 0  ;;  %vm13849_vm8 = vmmov %vm13845_vm4 }
 0x63b   : > { %8053 = vrot.lane.b32.xlu1 %v11926_v31, %s13825_s11  ;;  %9824 = vmatmul.msk.bf16.vlgmr.msrb.gmra.mxu2 %vm340_vm2, %v12727_v6  ;;  %s13748_s11 = scalar_lea.vmem %s13793_s7, %s9972_s20 }
 0x63c   : > { %6869 = vmatpush.bf16.msrb.mxu2 %v6779_v26 }
 0x63e   : > { %v6036_v42 = vpop.f32.mrf.mxu2 }
 0x63f   : > { %v5999_v21 = vpop.f32.mrf.mxu3  ;;  %v12779_v50 = vadd.f32 %v6036_v42, %v12694_v16  ;;  %v6903_v16 = vpop.permute.xlu2 %6902 }
 0x640   : > { %v6023_v43 = vpop.f32.mrf.mxu1  ;;  %v6907_v18 = vpop.permute.xlu1 %6906 }
 0x641   : > { %v6010_v17 = vpop.f32.mrf.mxu0  ;;  %v12784_v52 = vadd.f32 %v6023_v43, %v12699_v53  ;;  %v6905_v53 = vpop.permute.xlu0 %6904 }
 0x642   : > { %v12788_v56 = vadd.f32 %v6010_v17, %v12703_v2  ;;  %8212 = vrot.lane.b32.xlu0 %v11903_v57, %s10039_s25  ;;  %8210 = vrot.lane.b32.xlu2 %v11893_v41, %s10039_s25  ;;  %v6782_v2 = vsel %vm344_vm1, %v6756_v48, 0  ;;  %v6918_v45 = vsel %vm13834_vm10, %v6903_v16, %v6905_v53  ;;  %v6919_v15 = vsel %vm13837_vm15, %v6905_v53, %v6907_v18  ;;  %vm13851_vm10 = vmmov %vm13845_vm4 }
 0x643   : > { %8218 = vrot.lane.b32.xlu1 %v11934_v25, %s10039_s25  ;;  %9823 = vmatmul.msk.bf16.vlgmr.msrb.gmra.mxu1 %vm340_vm2, %v12727_v6 }
 0x644   : > { %9822 = vmatmul.msk.bf16.vlgmr.msrb.gmra.mxu0 %vm340_vm2, %v12727_v6  ;;  %9825 = vmatmul.msk.bf16.vlgmr.msrb.gmra.mxu3 %vm340_vm2, %v12727_v6  ;;  %v6934_v6 = vsel %vm344_vm1, %v6918_v45, 0 }
 0x645   : > { %6843 = vmatpush.bf16.msrb.mxu0 %v6773_v58  ;;  %6856 = vmatpush.bf16.msrb.mxu1 %v6776_v54  ;;  %v9835_v54 = vld [vmem:[%s13789_s3 + $0x30] sm:$0xf] }
 0x646   : > { %6882 = vmatpush.bf16.msrb.mxu3 %v6782_v2  ;;  %v6038_v36 = vpop.f32.mrf.mxu2 }
 0x647   : > { %v6049_v7 = vpop.f32.mrf.mxu3  ;;  %v7075_v36 = vsel %vm344_vm1, %v11905_v49, 0 }
 0x648   : > { %v12807_v59 = vadd.f32 %v6049_v7, %v12722_v1  ;;  %v6025_v38 = vpop.f32.mrf.mxu1  ;;  %v6899_v1 = vpop.permute.xlu2 %6898 }
 0x649   : > { %v6012_v9 = vpop.f32.mrf.mxu0  ;;  %v6901_v12 = vpop.permute.xlu0 %6900 }
 0x64a   : > { %8226 = vrot.lane.b32.xlu0 %v12423_v10, %s10039_s25  ;;  %8224 = vrot.lane.b32.xlu2 %v11924_v63, %s10039_s25  ;;  %v6916_v24 = vsel %vm13835_vm11, %v6899_v1, %v6901_v12  ;;  %v6917_v34 = vsel %vm13836_vm12, %v6901_v12, %v6903_v16  ;;  %v6911_v47 = vpop.permute.xlu1 %6910  ;;  %v7072_v1 = vsel %vm344_vm1, %v11903_v57, 0  ;;  %v7078_v12 = vsel %vm344_vm1, %v11913_v28, 0  ;;  %vm13852_vm11 = vmmov %vm13845_vm4 }
 0x64b   : > { %8222 = vrot.lane.b32.xlu1 %v11922_v29, %s10039_s25  ;;  %9829 = vmatmul.msk.bf16.vlgmr.msra.gmra.mxu2 %vm340_vm2, %v12812_v62  ;;  %vm13853_vm12 = vcmask 973824  }
 0x64c   : > { %6984 = vmatpush.bf16.msra.mxu2 %v6934_v6  ;;  %v7069_v6 = vsel %vm344_vm1, %v11893_v41, 0  ;;  %vm13854_vm15 = vmmov %vm13853_vm12 }
 0x64e   : > { %v6151_v13 = vpop.f32.mrf.mxu2 }
 0x64f   : > { %v6051_v20 = vpop.f32.mrf.mxu3  ;;  %v12824_v11 = vadd.f32 %v6151_v13, %v12739_v14  ;;  %v6928_v14 = vsel %vm344_vm1, %v6916_v24, 0 }
 0x650   : > { %v6138_v30 = vpop.f32.mrf.mxu1  ;;  %v6913_v19 = vpop.permute.xlu2 %6912 }
 0x651   : > { %v6125_v35 = vpop.f32.mrf.mxu0  ;;  %v12829_v8 = vadd.f32 %v6138_v30, %v12744_v0  ;;  %v6931_v0 = vsel %vm344_vm1, %v6917_v34, 0  ;;  %v6922_v61 = vsel %vm13839_vm14, %v6911_v47, %v6913_v19  ;;  %v6915_v39 = vpop.permute.xlu0 %6914  ;;  %v7087_v34 = vsel %vm344_vm1, %v11922_v29, 0  ;;  %vm13855_vm14 = vmmov %vm13853_vm12 }
 0x652   : > { %v12833_v51 = vadd.f32 %v6125_v35, %v12748_v27  ;;  %8383 = vrot.lane.b32.xlu0 %v11913_v28, %s13838_s22  ;;  %8381 = vrot.lane.b32.xlu2 %v11905_v49, %s13838_s22  ;;  %v6937_v27 = vsel %vm344_vm1, %v6919_v15, 0  ;;  %v6946_v60 = vsel %vm344_vm1, %v6922_v61, 0  ;;  %v6909_v3 = vpop.permute.xlu1 %6908  ;;  %v6923_v4 = vsel %vm13842_vm3, %v6913_v19, %v6915_v39 }
 0x653   : > { %8220 = vrot.lane.b32.xlu1 %v11926_v31, %s10039_s25  ;;  %9828 = vmatmul.msk.bf16.vlgmr.msra.gmra.mxu1 %vm340_vm2, %v12812_v62  ;;  %v6920_v42 = vsel %vm13840_vm13, %v6907_v18, %v6909_v3  ;;  %v6921_v21 = vsel %vm13841_vm0, %v6909_v3, %v6911_v47  ;;  %v6949_v48 = vsel %vm344_vm1, %v6923_v4, 0  ;;  %v7081_v19 = vsel %vm344_vm1, %v11934_v25, 0  ;;  %vm13856_vm13 = vmmov %vm13853_vm12 }
 0x654   : > { %9827 = vmatmul.msk.bf16.vlgmr.msra.gmra.mxu0 %vm340_vm2, %v12812_v62  ;;  %9830 = vmatmul.msk.bf16.vlgmr.msra.gmra.mxu3 %vm340_vm2, %v12812_v62  ;;  %v7090_v61 = vsel %vm344_vm1, %v11924_v63, 0  ;;  %vm13857_vm0 = vmmov %vm13853_vm12 }
 0x655   : > { %6958 = vmatpush.bf16.msra.mxu0 %v6928_v14  ;;  %6971 = vmatpush.bf16.msra.mxu1 %v6931_v0  ;;  %vm13858_vm3 = vmmov %vm13857_vm0 }
 0x656   : > { %6997 = vmatpush.bf16.msra.mxu3 %v6937_v27  ;;  %v6153_v40 = vpop.f32.mrf.mxu2 }
 0x657   : > { %v6164_v33 = vpop.f32.mrf.mxu3 }
 0x658   : > { %v12852_v5 = vadd.f32 %v6164_v33, %v12767_v32  ;;  %v6140_v23 = vpop.f32.mrf.mxu1  ;;  %v7213_v27 = vpop.permute.xlu2 %7212  ;;  %v7084_v33 = vsel %vm344_vm1, %v11926_v31, 0 }
 0x659   : > { %v6127_v22 = vpop.f32.mrf.mxu0  ;;  %v7215_v40 = vpop.permute.xlu0 %7214 }
 0x65a   : > { %8379 = vrot.lane.b32.xlu0 %v11903_v57, %s13838_s22  ;;  %8377 = vrot.lane.b32.xlu2 %v11893_v41, %s13838_s22  ;;  %v7228_v22 = vsel %vm13845_vm4, %v7213_v27, %v7215_v40  ;;  %vm13859_vm4 = vmmov %vm13857_vm0 }
 0x65b   : > { %8385 = vrot.lane.b32.xlu1 %v11934_v25, %s13838_s22  ;;  %9833 = vmatmul.msk.bf16.vlgmr.msrb.gmra.mxu2 %vm340_vm2, %v12812_v62 }
 0x65c   : > { %7036 = vmatpush.bf16.msrb.mxu2 %v6946_v60 }
 0x65e   : > { %v6203_v32 = vpop.f32.mrf.mxu2 }
 0x65f   : > { %v6166_v55 = vpop.f32.mrf.mxu3  ;;  %v12864_v26 = vadd.f32 %v6203_v32, %v12779_v50  ;;  %v6940_v50 = vsel %vm344_vm1, %v6920_v42, 0  ;;  %v12966_v32 = vld [vmem:[%s13789_s3 + $0x34] sm:$0xf] }
 0x660   : > { %v6190_v46 = vpop.f32.mrf.mxu1  ;;  %v7217_v55 = vpop.permute.xlu1 %7216 }
 0x661   : > { %v6177_v43 = vpop.f32.mrf.mxu0  ;;  %v6225_v44 = vadd.f32 %v6190_v46, %v12784_v52  ;;  %v6943_v52 = vsel %vm344_vm1, %v6921_v21, 0  ;;  %v7209_v46 = vpop.permute.xlu2 %7208 }
 0x662   : > { %v6224_v17 = vadd.f32 %v6177_v43, %v12788_v56  ;;  %8393 = vrot.lane.b32.xlu0 %v12423_v10, %s13838_s22  ;;  %8391 = vrot.lane.b32.xlu2 %v11924_v63, %s13838_s22  ;;  %v7211_v42 = vpop.permute.xlu0 %7210 }
 0x663   : > { %8389 = vrot.lane.b32.xlu1 %v11922_v29, %s13838_s22  ;;  %9832 = vmatmul.msk.bf16.vlgmr.msrb.gmra.mxu1 %vm340_vm2, %v12812_v62 }
 0x664   : > { %9831 = vmatmul.msk.bf16.vlgmr.msrb.gmra.mxu0 %vm340_vm2, %v12812_v62  ;;  %9834 = vmatmul.msk.bf16.vlgmr.msrb.gmra.mxu3 %vm340_vm2, %v12812_v62 }
 0x665   : > { %7010 = vmatpush.bf16.msrb.mxu0 %v6940_v50  ;;  %7023 = vmatpush.bf16.msrb.mxu1 %v6943_v52  ;;  %v7227_v50 = vsel %vm13847_vm6, %v7211_v42, %v7213_v27  ;;  %vm13861_vm6 = vcmask 965632  }
 0x666   : > { %7049 = vmatpush.bf16.msrb.mxu3 %v6949_v48  ;;  %v6205_v56 = vpop.f32.mrf.mxu2 }
 0x667   : > { %v6216_v16 = vpop.f32.mrf.mxu3  ;;  %v7229_v56 = vsel %vm13848_vm7, %v7215_v40, %v7217_v55  ;;  %vm13863_vm7 = vmmov %vm13861_vm6 }
 0x668   : > { %v12887_v53 = vadd.f32 %v6216_v16, %v12807_v59  ;;  %v6192_v58 = vpop.f32.mrf.mxu1 }
 0x669   : > { %v6179_v2 = vpop.f32.mrf.mxu0  ;;  %v7241_v58 = vsel %vm344_vm1, %v7227_v50, 0 }
 0x66a   : > { %8550 = vrot.lane.b32.xlu0 %v11913_v28, %s13843_s6  ;;  %8548 = vrot.lane.b32.xlu2 %v11905_v49, %s13843_s6  ;;  %v7247_v2 = vsel %vm344_vm1, %v7229_v56, 0 }
 0x66b   : > { %8387 = vrot.lane.b32.xlu1 %v11926_v31, %s13838_s22  ;;  %9838 = vmatmul.msk.bf16.vlgmr.msra.gmra.mxu2 %vm340_vm2, %v9835_v54 }
 0x66c   : > { %7125 = vmatpush.bf16.msra.mxu2 %v7075_v36 }
 0x66e   : > { %v6318_v7 = vpop.f32.mrf.mxu2 }
 0x66f   : > { %v6218_v45 = vpop.f32.mrf.mxu3  ;;  %v12902_v59 = vadd.f32 %v6318_v7, %v12824_v11  ;;  %v7223_v7 = vpop.permute.xlu2 %7222 }
 0x670   : > { %v6305_v38 = vpop.f32.mrf.mxu1 }
 0x671   : > { %v6292_v62 = vpop.f32.mrf.mxu0  ;;  %v12905_v9 = vadd.f32 %v6305_v38, %v12829_v8 }
 0x672   : > { %v12908_v18 = vadd.f32 %v6292_v62, %v12833_v51  ;;  %8546 = vrot.lane.b32.xlu0 %v11903_v57, %s13843_s6  ;;  %8544 = vrot.lane.b32.xlu2 %v11893_v41, %s13843_s6 }
 0x673   : > { %8552 = vrot.lane.b32.xlu1 %v11934_v25, %s13843_s6  ;;  %9837 = vmatmul.msk.bf16.vlgmr.msra.gmra.mxu1 %vm340_vm2, %v9835_v54 }
 0x674   : > { %9836 = vmatmul.msk.bf16.vlgmr.msra.gmra.mxu0 %vm340_vm2, %v9835_v54  ;;  %9839 = vmatmul.msk.bf16.vlgmr.msra.gmra.mxu3 %vm340_vm2, %v9835_v54 }
 0x675   : > { %7099 = vmatpush.bf16.msra.mxu0 %v7069_v6  ;;  %7112 = vmatpush.bf16.msra.mxu1 %v7072_v1 }
 0x676   : > { %7138 = vmatpush.bf16.msra.mxu3 %v7078_v12  ;;  %v6320_v13 = vpop.f32.mrf.mxu2 }
 0x677   : > { %v6331_v20 = vpop.f32.mrf.mxu3 }
 0x678   : > { %v12926_v11 = vadd.f32 %v6331_v20, %v12852_v5  ;;  %v6307_v30 = vpop.f32.mrf.mxu1 }
 0x679   : > { %v6294_v24 = vpop.f32.mrf.mxu0 }
 0x67a   : > { %8560 = vrot.lane.b32.xlu0 %v12423_v10, %s13843_s6  ;;  %8558 = vrot.lane.b32.xlu2 %v11924_v63, %s13843_s6 }
 0x67b   : > { %8556 = vrot.lane.b32.xlu1 %v11922_v29, %s13843_s6  ;;  %9842 = vmatmul.msk.bf16.vlgmr.msrb.gmra.mxu2 %vm340_vm2, %v9835_v54 }
 0x67c   : > { %7177 = vmatpush.bf16.msrb.mxu2 %v7087_v34 }
 0x67e   : > { %v6370_v35 = vpop.f32.mrf.mxu2 }
 0x67f   : > { %v6333_v8 = vpop.f32.mrf.mxu3  ;;  %v12938_v15 = vadd.f32 %v6370_v35, %v12864_v26  ;;  %v7244_v26 = vsel %vm344_vm1, %v7228_v22, 0 }
 0x680   : > { %v6357_v51 = vpop.f32.mrf.mxu1 }
 0x681   : > { %v6344_v14 = vpop.f32.mrf.mxu0  ;;  %v12940_v0 = vadd.f32 %v6357_v51, %v6225_v44 }
 0x682   : > { %v12942_v47 = vadd.f32 %v6344_v14, %v6224_v17  ;;  %8717 = vrot.lane.b32.xlu0 %v11913_v28, %s13844_s15  ;;  %8715 = vrot.lane.b32.xlu2 %v11905_v49, %s13844_s15  ;;  %v7226_v17 = vsel %vm13846_vm5, %v7209_v46, %v7211_v42  ;;  %vm13860_vm5 = vmmov %vm13857_vm0 }
 0x683   : > { %8554 = vrot.lane.b32.xlu1 %v11926_v31, %s13843_s6  ;;  %9841 = vmatmul.msk.bf16.vlgmr.msrb.gmra.mxu1 %vm340_vm2, %v9835_v54 }
 0x684   : > { %9840 = vmatmul.msk.bf16.vlgmr.msrb.gmra.mxu0 %vm340_vm2, %v9835_v54  ;;  %9843 = vmatmul.msk.bf16.vlgmr.msrb.gmra.mxu3 %vm340_vm2, %v9835_v54  ;;  %v7221_v54 = vpop.permute.xlu1 %7220 }
 0x685   : > { %7151 = vmatpush.bf16.msrb.mxu0 %v7081_v19  ;;  %7164 = vmatpush.bf16.msrb.mxu1 %v7084_v33 }
 0x686   : > { %7190 = vmatpush.bf16.msrb.mxu3 %v7090_v61  ;;  %v6372_v5 = vpop.f32.mrf.mxu2 }
 0x687   : > { %v6383_v23 = vpop.f32.mrf.mxu3 }
 0x688   : > { %v12961_v60 = vadd.f32 %v6383_v23, %v12887_v53  ;;  %v6359_v3 = vpop.f32.mrf.mxu1  ;;  %v7238_v53 = vsel %vm344_vm1, %v7226_v17, 0  ;;  %v13051_v23 = vld [vmem:[%s13789_s3 + $0x38] sm:$0xf] }
 0x689   : > { %v6346_v39 = vpop.f32.mrf.mxu0 }
 0x68a   : > { %8713 = vrot.lane.b32.xlu0 %v11903_v57, %s13844_s15  ;;  %8711 = vrot.lane.b32.xlu2 %v11893_v41, %s13844_s15 }
 0x68b   : > { %8719 = vrot.lane.b32.xlu1 %v11934_v25, %s13844_s15  ;;  %9847 = vmatmul.msk.bf16.vlgmr.msra.gmra.mxu2 %vm340_vm2, %v12966_v32 }
 0x68c   : > { %7294 = vmatpush.bf16.msra.mxu2 %v7244_v26  ;;  %v7219_v1 = vpop.permute.xlu1 %7218 }
 0x68d   : > { %v7230_v30 = vsel %vm13850_vm9, %v7217_v55, %v7219_v1  ;;  %v7231_v24 = vsel %vm13851_vm10, %v7219_v1, %v7221_v54  ;;  %vm13865_vm9 = vmmov %vm13861_vm6 }
 0x68e   : > { %v6485_v21 = vpop.f32.mrf.mxu2  ;;  %v7253_v27 = vsel %vm344_vm1, %v7231_v24, 0  ;;  %vm13866_vm10 = vmmov %vm13861_vm6 }
 0x68f   : > { %v6385_v43 = vpop.f32.mrf.mxu3  ;;  %v12978_v44 = vadd.f32 %v6485_v21, %v12902_v59  ;;  %v7232_v59 = vsel %vm13849_vm8, %v7221_v54, %v7223_v7  ;;  %vm13864_vm8 = vmmov %vm13861_vm6 }
 0x690   : > { %v6472_v4 = vpop.f32.mrf.mxu1  ;;  %v7256_v6 = vsel %vm344_vm1, %v7232_v59, 0 }
 0x691   : > { %v6459_v52 = vpop.f32.mrf.mxu0  ;;  %v12983_v48 = vadd.f32 %v6472_v4, %v12905_v9 }
 0x692   : > { %v12987_v16 = vadd.f32 %v6459_v52, %v12908_v18  ;;  %8727 = vrot.lane.b32.xlu0 %v12423_v10, %s13844_s15  ;;  %8725 = vrot.lane.b32.xlu2 %v11924_v63, %s13844_s15  ;;  %v7225_v18 = vpop.permute.xlu0 %7224 }
 0x693   : > { %8723 = vrot.lane.b32.xlu1 %v11922_v29, %s13844_s15  ;;  %9846 = vmatmul.msk.bf16.vlgmr.msra.gmra.mxu1 %vm340_vm2, %v12966_v32  ;;  %v7233_v8 = vsel %vm13852_vm11, %v7223_v7, %v7225_v18  ;;  %vm13867_vm11 = vmmov %vm13861_vm6 }
 0x694   : > { %9845 = vmatmul.msk.bf16.vlgmr.msra.gmra.mxu0 %vm340_vm2, %v12966_v32  ;;  %9848 = vmatmul.msk.bf16.vlgmr.msra.gmra.mxu3 %vm340_vm2, %v12966_v32  ;;  %v7384_v3 = vpop.permute.xlu1 %7383 }
 0x695   : > { %7268 = vmatpush.bf16.msra.mxu0 %v7238_v53  ;;  %7281 = vmatpush.bf16.msra.mxu1 %v7241_v58 }
 0x696   : > { %7307 = vmatpush.bf16.msra.mxu3 %v7247_v2  ;;  %v6487_v36 = vpop.f32.mrf.mxu2 }
 0x697   : > { %v6498_v45 = vpop.f32.mrf.mxu3 }
 0x698   : > { %v13006_v38 = vadd.f32 %v6498_v45, %v12926_v11  ;;  %v6474_v62 = vpop.f32.mrf.mxu1 }
 0x699   : > { %v6461_v9 = vpop.f32.mrf.mxu0 }
 0x69a   : > { %8884 = vrot.lane.b32.xlu0 %v11913_v28, %s10043_s28  ;;  %8882 = vrot.lane.b32.xlu2 %v11905_v49, %s10043_s28  ;;  %v7382_v14 = vpop.permute.xlu0 %7381 }
 0x69b   : > { %8721 = vrot.lane.b32.xlu1 %v11926_v31, %s13844_s15  ;;  %9851 = vmatmul.msk.bf16.vlgmr.msrb.gmra.mxu2 %vm340_vm2, %v12966_v32  ;;  %v7396_v50 = vsel %vm13856_vm13, %v7382_v14, %v7384_v3 }
 0x69c   : > { %7346 = vmatpush.bf16.msrb.mxu2 %v7256_v6  ;;  %v7388_v56 = vpop.permute.xlu1 %7387 }
 0x69e   : > { %v6537_v12 = vpop.f32.mrf.mxu2 }
 0x69f   : > { %v6500_v13 = vpop.f32.mrf.mxu3  ;;  %v13018_v20 = vadd.f32 %v6537_v12, %v12938_v15  ;;  %v7380_v15 = vpop.permute.xlu2 %7379 }
 0x6a0   : > { %v6524_v11 = vpop.f32.mrf.mxu1  ;;  %v7395_v33 = vsel %vm13853_vm12, %v7380_v15, %v7382_v14  ;;  %vm13868_vm12 = vmmov %vm13861_vm6 }
 0x6a1   : > { %v6511_v34 = vpop.f32.mrf.mxu0  ;;  %v13023_v35 = vadd.f32 %v6524_v11, %v12940_v0  ;;  %v7250_v0 = vsel %vm344_vm1, %v7230_v30, 0 }
 0x6a2   : > { %v13027_v51 = vadd.f32 %v6511_v34, %v12942_v47  ;;  %8880 = vrot.lane.b32.xlu0 %v11903_v57, %s10043_s28  ;;  %8878 = vrot.lane.b32.xlu2 %v11893_v41, %s10043_s28  ;;  %v7259_v47 = vsel %vm344_vm1, %v7233_v8, 0  ;;  %v7378_v39 = vpop.permute.xlu0 %7377 }
 0x6a3   : > { %8886 = vrot.lane.b32.xlu1 %v11934_v25, %s10043_s28  ;;  %9850 = vmatmul.msk.bf16.vlgmr.msrb.gmra.mxu1 %vm340_vm2, %v12966_v32  ;;  %v7394_v43 = vsel %vm13855_vm14, %v7378_v39, %v7380_v15  ;;  %vm13870_vm14 = vcmask 957440  }
 0x6a4   : > { %9849 = vmatmul.msk.bf16.vlgmr.msrb.gmra.mxu0 %vm340_vm2, %v12966_v32  ;;  %9852 = vmatmul.msk.bf16.vlgmr.msrb.gmra.mxu3 %vm340_vm2, %v12966_v32  ;;  %v7411_v32 = vsel %vm344_vm1, %v7395_v33, 0  ;;  %vm13871_vm13 = vmmov %vm13870_vm14 }
 0x6a5   : > { %7320 = vmatpush.bf16.msrb.mxu0 %v7250_v0  ;;  %7333 = vmatpush.bf16.msrb.mxu1 %v7253_v27 }
 0x6a6   : > { %7359 = vmatpush.bf16.msrb.mxu3 %v7259_v47  ;;  %v6539_v40 = vpop.f32.mrf.mxu2 }
 0x6a7   : > { %v6550_v19 = vpop.f32.mrf.mxu3 }
 0x6a8   : > { %v13046_v61 = vadd.f32 %v6550_v19, %v12961_v60  ;;  %v6526_v5 = vpop.f32.mrf.mxu1  ;;  %v7376_v60 = vpop.permute.xlu2 %7375  ;;  %v13136_v19 = vld [vmem:[%s13789_s3 + $0x3c] sm:$0xf] }
 0x6a9   : > { %v6513_v22 = vpop.f32.mrf.mxu0  ;;  %v7393_v21 = vsel %vm13854_vm15, %v7376_v60, %v7378_v39  ;;  %vm13869_vm15 = vmmov %vm13861_vm6 }
 0x6aa   : > { %8894 = vrot.lane.b32.xlu0 %v12423_v10, %s10043_s28  ;;  %8892 = vrot.lane.b32.xlu2 %v11924_v63, %s10043_s28  ;;  %v7392_v59 = vpop.permute.xlu0 %7391 }
 0x6ab   : > { %8890 = vrot.lane.b32.xlu1 %v11922_v29, %s10043_s28  ;;  %9856 = vmatmul.msk.bf16.vlgmr.msra.gmra.mxu2 %vm340_vm2, %v13051_v23 }
 0x6ac   : > { %7461 = vmatpush.bf16.msra.mxu2 %v7411_v32 }
 0x6ae   : > { %v6652_v55 = vpop.f32.mrf.mxu2 }
 0x6af   : > { %v6552_v26 = vpop.f32.mrf.mxu3  ;;  %v13063_v46 = vadd.f32 %v6652_v55, %v12978_v44  ;;  %v7405_v44 = vsel %vm344_vm1, %v7393_v21, 0 }
 0x6b0   : > { %v6639_v42 = vpop.f32.mrf.mxu1  ;;  %v7390_v58 = vpop.permute.xlu2 %7389 }
 0x6b1   : > { %v6626_v4 = vpop.f32.mrf.mxu0  ;;  %v13068_v17 = vadd.f32 %v6639_v42, %v12983_v48  ;;  %v7408_v48 = vsel %vm344_vm1, %v7394_v43, 0  ;;  %v7399_v2 = vsel %vm13857_vm0, %v7388_v56, %v7390_v58  ;;  %v7400_v24 = vsel %vm13860_vm5, %v7390_v58, %v7392_v59  ;;  %vm13872_vm0 = vmmov %vm13871_vm13 }
 0x6b2   : > { %v13072_v52 = vadd.f32 %v6626_v4, %v12987_v16  ;;  %9051 = vrot.lane.b32.xlu0 %v11913_v28, %s10044_s21  ;;  %9049 = vrot.lane.b32.xlu2 %v11905_v49, %s10044_s21  ;;  %v7414_v16 = vsel %vm344_vm1, %v7396_v50, 0  ;;  %v7423_v62 = vsel %vm344_vm1, %v7399_v2, 0  ;;  %vm13875_vm5 = vmmov %vm13872_vm0 }
 0x6b3   : > { %8888 = vrot.lane.b32.xlu1 %v11926_v31, %s10043_s28  ;;  %9855 = vmatmul.msk.bf16.vlgmr.msra.gmra.mxu1 %vm340_vm2, %v13051_v23 }
 0x6b4   : > { %9854 = vmatmul.msk.bf16.vlgmr.msra.gmra.mxu0 %vm340_vm2, %v13051_v23  ;;  %9857 = vmatmul.msk.bf16.vlgmr.msra.gmra.mxu3 %vm340_vm2, %v13051_v23 }
 0x6b5   : > { %7435 = vmatpush.bf16.msra.mxu0 %v7405_v44  ;;  %7448 = vmatpush.bf16.msra.mxu1 %v7408_v48 }
 0x6b6   : > { %7474 = vmatpush.bf16.msra.mxu3 %v7414_v16  ;;  %v6654_v53 = vpop.f32.mrf.mxu2 }
 0x6b7   : > { %v6665_v54 = vpop.f32.mrf.mxu3 }
 0x6b8   : > { %v13091_v36 = vadd.f32 %v6665_v54, %v13006_v38  ;;  %v6641_v7 = vpop.f32.mrf.mxu1  ;;  %v7386_v38 = vpop.permute.xlu1 %7385 }
 0x6b9   : > { %v6628_v45 = vpop.f32.mrf.mxu0  ;;  %v7397_v12 = vsel %vm13858_vm3, %v7384_v3, %v7386_v38  ;;  %v7398_v13 = vsel %vm13859_vm4, %v7386_v38, %v7388_v56  ;;  %vm13873_vm3 = vmmov %vm13872_vm0 }
 0x6ba   : > { %9047 = vrot.lane.b32.xlu0 %v11903_v57, %s10044_s21  ;;  %9045 = vrot.lane.b32.xlu2 %v11893_v41, %s10044_s21  ;;  %v7417_v8 = vsel %vm344_vm1, %v7397_v12, 0  ;;  %v7420_v15 = vsel %vm344_vm1, %v7398_v13, 0  ;;  %vm13874_vm4 = vmmov %vm13872_vm0 }
 0x6bb   : > { %9053 = vrot.lane.b32.xlu1 %v11934_v25, %s10044_s21  ;;  %9860 = vmatmul.msk.bf16.vlgmr.msrb.gmra.mxu2 %vm340_vm2, %v13051_v23 }
 0x6bc   : > { %7513 = vmatpush.bf16.msrb.mxu2 %v7423_v62 }
 0x6be   : > { %v6704_v9 = vpop.f32.mrf.mxu2 }
 0x6bf   : > { %v6667_v18 = vpop.f32.mrf.mxu3  ;;  %v13103_v6 = vadd.f32 %v6704_v9, %v13018_v20  ;;  %v7547_v20 = vpop.permute.xlu2 %7546 }
 0x6c0   : > { %v6691_v1 = vpop.f32.mrf.mxu1  ;;  %v7551_v5 = vpop.permute.xlu1 %7550 }
 0x6c1   : > { %v6678_v11 = vpop.f32.mrf.mxu0  ;;  %v13108_v30 = vadd.f32 %v6691_v1, %v13023_v35  ;;  %v7549_v35 = vpop.permute.xlu0 %7548 }
 0x6c2   : > { %v13112_v34 = vadd.f32 %v6678_v11, %v13027_v51  ;;  %9061 = vrot.lane.b32.xlu0 %v12423_v10, %s10044_s21  ;;  %9059 = vrot.lane.b32.xlu2 %v11924_v63, %s10044_s21  ;;  %v7426_v51 = vsel %vm344_vm1, %v7400_v24, 0  ;;  %v7562_v27 = vsel %vm13861_vm6, %v7547_v20, %v7549_v35  ;;  %v7563_v42 = vsel %vm13865_vm9, %v7549_v35, %v7551_v5  ;;  %vm13876_vm6 = vmmov %vm13872_vm0 }
 0x6c3   : > { %9057 = vrot.lane.b32.xlu1 %v11922_v29, %s10044_s21  ;;  %9859 = vmatmul.msk.bf16.vlgmr.msrb.gmra.mxu1 %vm340_vm2, %v13051_v23 }
 0x6c4   : > { %9858 = vmatmul.msk.bf16.vlgmr.msrb.gmra.mxu0 %vm340_vm2, %v13051_v23  ;;  %9861 = vmatmul.msk.bf16.vlgmr.msrb.gmra.mxu3 %vm340_vm2, %v13051_v23  ;;  %v7578_v23 = vsel %vm344_vm1, %v7562_v27, 0 }
 0x6c5   : > { %7487 = vmatpush.bf16.msrb.mxu0 %v7417_v8  ;;  %7500 = vmatpush.bf16.msrb.mxu1 %v7420_v15 }
 0x6c6   : > { %7526 = vmatpush.bf16.msrb.mxu3 %v7426_v51  ;;  %v6706_v14 = vpop.f32.mrf.mxu2 }
 0x6c7   : > { %v6717_v0 = vpop.f32.mrf.mxu3 }
 0x6c8   : > { %v13131_v47 = vadd.f32 %v6717_v0, %v13046_v61  ;;  %v6693_v40 = vpop.f32.mrf.mxu1  ;;  %v7543_v61 = vpop.permute.xlu2 %7542 }
 0x6c9   : > { %v6680_v33 = vpop.f32.mrf.mxu0  ;;  %v7545_v22 = vpop.permute.xlu0 %7544 }
 0x6ca   : > { %9218 = vrot.lane.b32.xlu0 %v11913_v28, %s13862_s30  ;;  %9216 = vrot.lane.b32.xlu2 %v11905_v49, %s13862_s30  ;;  %v7560_v39 = vsel %vm13863_vm7, %v7543_v61, %v7545_v22  ;;  %v7561_v49 = vsel %vm13864_vm8, %v7545_v22, %v7547_v20  ;;  %v7555_v4 = vpop.permute.xlu1 %7554  ;;  %vm13877_vm7 = vmmov %vm13872_vm0  ;;  %vm13878_vm8 = vcmask 318464  }
 0x6cb   : > { %9055 = vrot.lane.b32.xlu1 %v11926_v31, %s10044_s21  ;;  %9865 = vmatmul.msk.bf16.vlgmr.msra.gmra.mxu2 %vm340_vm2, %v13136_v19  ;;  %v7575_v43 = vsel %vm344_vm1, %v7561_v49, 0  ;;  %vm13879_vm9 = vmmov %vm13878_vm8 }
 0x6cc   : > { %7628 = vmatpush.bf16.msra.mxu2 %v7578_v23 }
 0x6ce   : > { %v6819_v3 = vpop.f32.mrf.mxu2 }
 0x6cf   : > { %v6719_v32 = vpop.f32.mrf.mxu3  ;;  %v13148_v60 = vadd.f32 %v6819_v3, %v13063_v46  ;;  %v7572_v46 = vsel %vm344_vm1, %v7560_v39, 0 }
 0x6d0   : > { %v6806_v28 = vpop.f32.mrf.mxu1 }
 0x6d1   : > { %v6793_v55 = vpop.f32.mrf.mxu0  ;;  %v13153_v26 = vadd.f32 %v6806_v28, %v13068_v17  ;;  %v7559_v56 = vpop.permute.xlu0 %7558 }
 0x6d2   : > { %v13157_v21 = vadd.f32 %v6793_v55, %v13072_v52  ;;  %9214 = vrot.lane.b32.xlu0 %v11903_v57, %s13862_s30  ;;  %9212 = vrot.lane.b32.xlu2 %v11893_v41, %s13862_s30  ;;  %v7581_v57 = vsel %vm344_vm1, %v7563_v42, 0  ;;  %v7553_v53 = vpop.permute.xlu1 %7552 }
 0x6d3   : > { %9220 = vrot.lane.b32.xlu1 %v11934_v25, %s13862_s30  ;;  %9864 = vmatmul.msk.bf16.vlgmr.msra.gmra.mxu1 %vm340_vm2, %v13136_v19  ;;  %v7557_v25 = vpop.permute.xlu2 %7556 }
 0x6d4   : > { %9863 = vmatmul.msk.bf16.vlgmr.msra.gmra.mxu0 %vm340_vm2, %v13136_v19  ;;  %9866 = vmatmul.msk.bf16.vlgmr.msra.gmra.mxu3 %vm340_vm2, %v13136_v19  ;;  %v7566_v50 = vsel %vm13866_vm10, %v7555_v4, %v7557_v25  ;;  %vm13880_vm10 = vmmov %vm13878_vm8 }
 0x6d5   : > { %7602 = vmatpush.bf16.msra.mxu0 %v7572_v46  ;;  %7615 = vmatpush.bf16.msra.mxu1 %v7575_v43  ;;  %v7590_v16 = vsel %vm344_vm1, %v7566_v50, 0 }
 0x6d6   : > { %7641 = vmatpush.bf16.msra.mxu3 %v7581_v57  ;;  %v6821_v41 = vpop.f32.mrf.mxu2 }
 0x6d7   : > { %v6832_v17 = vpop.f32.mrf.mxu3 }
 0x6d8   : > { %v13176_v52 = vadd.f32 %v6832_v17, %v13091_v36  ;;  %v6808_v44 = vpop.f32.mrf.mxu1 }
 0x6d9   : > { %v6795_v48 = vpop.f32.mrf.mxu0  ;;  %v7716_v38 = vpop.permute.xlu0 %7715 }
 0x6da   : > { %9228 = vrot.lane.b32.xlu0 %v12423_v10, %s13862_s30  ;;  %9226 = vrot.lane.b32.xlu2 %v11924_v63, %s13862_s30  ;;  %v7564_v10 = vsel %vm13867_vm11, %v7551_v5, %v7553_v53  ;;  %v7565_v63 = vsel %vm13868_vm12, %v7553_v53, %v7555_v4  ;;  %vm13881_vm11 = vmmov %vm13878_vm8 }
 0x6db   : > { %9224 = vrot.lane.b32.xlu1 %v11922_v29, %s13862_s30  ;;  %9869 = vmatmul.msk.bf16.vlgmr.msrb.gmra.mxu2 %vm340_vm2, %v13136_v19  ;;  %v7567_v29 = vsel %vm13869_vm15, %v7557_v25, %v7559_v56  ;;  %v7714_v62 = vpop.permute.xlu2 %7713  ;;  %v7584_v9 = vsel %vm344_vm1, %v7564_v10, 0  ;;  %v7587_v18 = vsel %vm344_vm1, %v7565_v63, 0  ;;  %vm13882_vm12 = vmmov %vm13878_vm8 }
 0x6dc   : > { %7680 = vmatpush.bf16.msrb.mxu2 %v7590_v16  ;;  %v7729_v12 = vsel %vm13870_vm14, %v7714_v62, %v7716_v38  ;;  %vm13883_vm15 = vmmov %vm13878_vm8 }
 0x6dd   : > { %v7745_v20 = vsel %vm344_vm1, %v7729_v12, 0  ;;  %vm13884_vm14 = vmmov %vm13878_vm8 }
 0x6de   : > { %v6871_v58 = vpop.f32.mrf.mxu2 }
 0x6df   : > { %v6834_v54 = vpop.f32.mrf.mxu3  ;;  %v13188_v2 = vadd.f32 %v6871_v58, %v13103_v6  ;;  %v7593_v6 = vsel %vm344_vm1, %v7567_v29, 0 }
 0x6e0   : > { %v6858_v36 = vpop.f32.mrf.mxu1 }
 0x6e1   : > { %v6845_v7 = vpop.f32.mrf.mxu0  ;;  %v13193_v45 = vadd.f32 %v6858_v36, %v13108_v30  ;;  %v9871_v30 = vld [vmem:[%s13789_s3 + $0x40] sm:$0xf]  ;;  %v7712_v8 = vpop.permute.xlu0 %7711 }
 0x6e2   : > { %v13197_v59 = vadd.f32 %v6845_v7, %v13112_v34  ;;  %v7718_v34 = vpop.permute.xlu1 %7717 }
 0x6e3   : > { %9222 = vrot.lane.b32.xlu1 %v11926_v31, %s13862_s30  ;;  %9868 = vmatmul.msk.bf16.vlgmr.msrb.gmra.mxu1 %vm340_vm2, %v13136_v19  ;;  %v7710_v35 = vpop.permute.xlu2 %7709  ;;  %v7730_v33 = vsel %vm13873_vm3, %v7716_v38, %v7718_v34 }
 0x6e4   : > { %9867 = vmatmul.msk.bf16.vlgmr.msrb.gmra.mxu0 %vm340_vm2, %v13136_v19  ;;  %9870 = vmatmul.msk.bf16.vlgmr.msrb.gmra.mxu3 %vm340_vm2, %v13136_v19  ;;  %v7727_v27 = vsel %vm13871_vm13, %v7710_v35, %v7712_v8  ;;  %v7748_v3 = vsel %vm344_vm1, %v7730_v33, 0  ;;  %vm13885_vm13 = vmmov %vm13878_vm8 }
 0x6e5   : > { %7654 = vmatpush.bf16.msrb.mxu0 %v7584_v9  ;;  %7667 = vmatpush.bf16.msrb.mxu1 %v7587_v18  ;;  %v7739_v23 = vsel %vm344_vm1, %v7727_v27, 0 }
 0x6e6   : > { %7693 = vmatpush.bf16.msrb.mxu3 %v7593_v6  ;;  %v6873_v31 = vpop.f32.mrf.mxu2 }
 0x6e7   : > { %v6884_v1 = vpop.f32.mrf.mxu3 }
 0x6e8   : > { %v13212_v13 = vadd.f32 %v6884_v1, %v13131_v47  ;;  %v6860_v11 = vpop.f32.mrf.mxu1  ;;  %v7728_v47 = vsel %vm13872_vm0, %v7712_v8, %v7714_v62  ;;  %vm13886_vm0 = vcmask 310272  }
 0x6e9   : > { %v6847_v24 = vpop.f32.mrf.mxu0  ;;  %v7742_v61 = vsel %vm344_vm1, %v7728_v47, 0  ;;  %v7726_v42 = vpop.permute.xlu0 %7725  ;;  %vm13887_vm3 = vmmov %vm13886_vm0 }
 0x6ea   : > { %v7722_v22 = vpop.permute.xlu1 %7721 }
 0x6eb   : > { %9874 = vmatmul.msk.bf16.vlgmr.msra.gmra.mxu2 %vm340_vm2, %v9871_v30 }
 0x6ec   : > { %7795 = vmatpush.bf16.msra.mxu2 %v7745_v20 }
 0x6ee   : > { %v6986_v15 = vpop.f32.mrf.mxu2 }
 0x6ef   : > { %v6886_v51 = vpop.f32.mrf.mxu3  ;;  %v13220_v14 = vadd.f32 %v6986_v15, %v13148_v60  ;;  %v7724_v60 = vpop.permute.xlu2 %7723 }
 0x6f0   : > { %v6973_v0 = vpop.f32.mrf.mxu1  ;;  %v7733_v39 = vsel %vm13874_vm4, %v7722_v22, %v7724_v60  ;;  %v7734_v44 = vsel %vm13877_vm7, %v7724_v60, %v7726_v42  ;;  %vm13888_vm4 = vmmov %vm13886_vm0 }
 0x6f1   : > { %v6960_v40 = vpop.f32.mrf.mxu0  ;;  %v13225_v19 = vadd.f32 %v6973_v0, %v13153_v26  ;;  %v7883_v16 = vpop.permute.xlu0 %7882  ;;  %v7760_v54 = vsel %vm344_vm1, %v7734_v44, 0  ;;  %vm13891_vm7 = vmmov %vm13886_vm0 }
 0x6f2   : > { %v13229_v5 = vadd.f32 %v6960_v40, %v13157_v21  ;;  %v7757_v21 = vsel %vm344_vm1, %v7733_v39, 0  ;;  %v7720_v46 = vpop.permute.xlu1 %7719 }
 0x6f3   : > { %9873 = vmatmul.msk.bf16.vlgmr.msra.gmra.mxu1 %vm340_vm2, %v9871_v30  ;;  %v7731_v25 = vsel %vm13875_vm5, %v7718_v34, %v7720_v46  ;;  %v7732_v17 = vsel %vm13876_vm6, %v7720_v46, %v7722_v22  ;;  %vm13889_vm5 = vmmov %vm13886_vm0 }
 0x6f4   : > { %9872 = vmatmul.msk.bf16.vlgmr.msra.gmra.mxu0 %vm340_vm2, %v9871_v30  ;;  %9875 = vmatmul.msk.bf16.vlgmr.msra.gmra.mxu3 %vm340_vm2, %v9871_v30  ;;  %v7751_v53 = vsel %vm344_vm1, %v7731_v25, 0  ;;  %v7754_v58 = vsel %vm344_vm1, %v7732_v17, 0  ;;  %vm13890_vm6 = vmmov %vm13886_vm0 }
 0x6f5   : > { %7769 = vmatpush.bf16.msra.mxu0 %v7739_v23  ;;  %7782 = vmatpush.bf16.msra.mxu1 %v7742_v61 }
 0x6f6   : > { %7808 = vmatpush.bf16.msra.mxu3 %v7748_v3  ;;  %v6988_v32 = vpop.f32.mrf.mxu2 }
 0x6f7   : > { %v6999_v28 = vpop.f32.mrf.mxu3  ;;  %v7881_v56 = vpop.permute.xlu2 %7880 }
 0x6f8   : > { %v13239_v49 = vadd.f32 %v6999_v28, %v13176_v52  ;;  %v6975_v55 = vpop.f32.mrf.mxu1  ;;  %v7896_v10 = vsel %vm13878_vm8, %v7881_v56, %v7883_v16  ;;  %vm13892_vm8 = vmmov %vm13886_vm0 }
 0x6f9   : > { %v6962_v26 = vpop.f32.mrf.mxu0  ;;  %v7912_v62 = vsel %vm344_vm1, %v7896_v10, 0  ;;  %v7879_v9 = vpop.permute.xlu0 %7878 }
 0x6fb   : > { %9878 = vmatmul.msk.bf16.vlgmr.msrb.gmra.mxu2 %vm340_vm2, %v9871_v30 }
 0x6fc   : > { %7847 = vmatpush.bf16.msrb.mxu2 %v7757_v21 }
 0x6fe   : > { %v7038_v43 = vpop.f32.mrf.mxu2 }
 0x6ff   : > { %v7001_v4 = vpop.f32.mrf.mxu3  ;;  %v13244_v57 = vadd.f32 %v7038_v43, %v13188_v2  ;;  %v7877_v38 = vpop.permute.xlu2 %7876 }
 0x700   : > { %v7025_v41 = vpop.f32.mrf.mxu1  ;;  %v7894_v12 = vsel %vm13879_vm9, %v7877_v38, %v7879_v9  ;;  %vm13893_vm9 = vmmov %vm13886_vm0 }
 0x701   : > { %v7012_v50 = vpop.f32.mrf.mxu0  ;;  %v13249_v52 = vadd.f32 %v7025_v41, %v13193_v45  ;;  %v9880_v45 = vld [vmem:[%s13789_s3 + $0x44] sm:$0xf]  ;;  %v7906_v20 = vsel %vm344_vm1, %v7894_v12, 0  ;;  %v7893_v33 = vpop.permute.xlu0 %7892 }
 0x702   : > { %v13253_v48 = vadd.f32 %v7012_v50, %v13197_v59  ;;  %v7885_v59 = vpop.permute.xlu1 %7884 }
 0x703   : > { %9877 = vmatmul.msk.bf16.vlgmr.msrb.gmra.mxu1 %vm340_vm2, %v9871_v30  ;;  %v7897_v24 = vsel %vm13881_vm11, %v7883_v16, %v7885_v59 }
 0x704   : > { %9876 = vmatmul.msk.bf16.vlgmr.msrb.gmra.mxu0 %vm340_vm2, %v9871_v30  ;;  %9879 = vmatmul.msk.bf16.vlgmr.msrb.gmra.mxu3 %vm340_vm2, %v9871_v30  ;;  %v7915_v15 = vsel %vm344_vm1, %v7897_v24, 0 }
 0x705   : > { %7821 = vmatpush.bf16.msrb.mxu0 %v7751_v53  ;;  %7834 = vmatpush.bf16.msrb.mxu1 %v7754_v58 }
 0x706   : > { %7860 = vmatpush.bf16.msrb.mxu3 %v7760_v54  ;;  %v7040_v2 = vpop.f32.mrf.mxu2 }
 0x707   : > { %v7051_v36 = vpop.f32.mrf.mxu3 }
 0x708   : > { %v13263_v63 = vadd.f32 %v7051_v36, %v13212_v13  ;;  %v7027_v7 = vpop.f32.mrf.mxu1  ;;  %v7895_v13 = vsel %vm13880_vm10, %v7879_v9, %v7881_v56  ;;  %vm13894_vm10 = vcmask 302080  }
 0x709   : > { %v7014_v29 = vpop.f32.mrf.mxu0  ;;  %v7909_v35 = vsel %vm344_vm1, %v7895_v13, 0  ;;  %v8050_v21 = vpop.permute.xlu0 %8049  ;;  %vm13895_vm11 = vmmov %vm13894_vm10 }
 0x70a   : > { %v7889_v8 = vpop.permute.xlu1 %7888 }
 0x70b   : > { %9883 = vmatmul.msk.bf16.vlgmr.msra.gmra.mxu2 %vm340_vm2, %v9880_v45 }
 0x70c   : > { %7962 = vmatpush.bf16.msra.mxu2 %v7912_v62 }
 0x70e   : > { %v7127_v18 = vpop.f32.mrf.mxu2 }
 0x70f   : > { %v7053_v6 = vpop.f32.mrf.mxu3  ;;  %v13271_v31 = vadd.f32 %v7127_v18, %v13220_v14  ;;  %v7891_v14 = vpop.permute.xlu2 %7890 }
 0x710   : > { %v7114_v1 = vpop.f32.mrf.mxu1  ;;  %v7900_v27 = vsel %vm13882_vm12, %v7889_v8, %v7891_v14  ;;  %v7901_v55 = vsel %vm13885_vm13, %v7891_v14, %v7893_v33  ;;  %vm13896_vm12 = vmmov %vm13894_vm10 }
 0x711   : > { %v7101_v11 = vpop.f32.mrf.mxu0  ;;  %v13276_v30 = vadd.f32 %v7114_v1, %v13225_v19  ;;  %v7927_v4 = vsel %vm344_vm1, %v7901_v55, 0  ;;  %v8046_v53 = vpop.permute.xlu0 %8045  ;;  %vm13899_vm13 = vmmov %vm13894_vm10 }
 0x712   : > { %v13280_v34 = vadd.f32 %v7101_v11, %v13229_v5  ;;  %v7924_v5 = vsel %vm344_vm1, %v7900_v27, 0  ;;  %v7887_v23 = vpop.permute.xlu1 %7886 }
 0x713   : > { %9882 = vmatmul.msk.bf16.vlgmr.msra.gmra.mxu1 %vm340_vm2, %v9880_v45  ;;  %v7898_v60 = vsel %vm13883_vm15, %v7885_v59, %v7887_v23  ;;  %v7899_v28 = vsel %vm13884_vm14, %v7887_v23, %v7889_v8  ;;  %vm13897_vm15 = vmmov %vm13894_vm10 }
 0x714   : > { %9881 = vmatmul.msk.bf16.vlgmr.msra.gmra.mxu0 %vm340_vm2, %v9880_v45  ;;  %9884 = vmatmul.msk.bf16.vlgmr.msra.gmra.mxu3 %vm340_vm2, %v9880_v45  ;;  %v7918_v46 = vsel %vm344_vm1, %v7898_v60, 0  ;;  %v7921_v43 = vsel %vm344_vm1, %v7899_v28, 0  ;;  %vm13898_vm14 = vmmov %vm13894_vm10 }
 0x715   : > { %7936 = vmatpush.bf16.msra.mxu0 %v7906_v20  ;;  %7949 = vmatpush.bf16.msra.mxu1 %v7909_v35 }
 0x716   : > { %7975 = vmatpush.bf16.msra.mxu3 %v7915_v15  ;;  %v7129_v51 = vpop.f32.mrf.mxu2 }
 0x717   : > { %v7140_v0 = vpop.f32.mrf.mxu3  ;;  %v8048_v42 = vpop.permute.xlu2 %8047 }
 0x718   : > { %v13290_v47 = vadd.f32 %v7140_v0, %v13239_v49  ;;  %v7116_v40 = vpop.f32.mrf.mxu1  ;;  %v8063_v25 = vsel %vm13886_vm0, %v8048_v42, %v8050_v21  ;;  %vm13900_vm0 = vmmov %vm13894_vm10 }
 0x719   : > { %v7103_v19 = vpop.f32.mrf.mxu0  ;;  %v8079_v56 = vsel %vm344_vm1, %v8063_v25, 0  ;;  %v8060_v24 = vpop.permute.xlu0 %8059 }
 0x71b   : > { %9887 = vmatmul.msk.bf16.vlgmr.msrb.gmra.mxu2 %vm340_vm2, %v9880_v45 }
 0x71c   : > { %8014 = vmatpush.bf16.msrb.mxu2 %v7924_v5 }
 0x71e   : > { %v7179_v61 = vpop.f32.mrf.mxu2 }
 0x71f   : > { %v7142_v22 = vpop.f32.mrf.mxu3  ;;  %v13295_v3 = vadd.f32 %v7179_v61, %v13244_v57  ;;  %v8044_v16 = vpop.permute.xlu2 %8043 }
 0x720   : > { %v7166_v32 = vpop.f32.mrf.mxu1  ;;  %v8061_v10 = vsel %vm13887_vm3, %v8044_v16, %v8046_v53  ;;  %vm13901_vm3 = vmmov %vm13900_vm0 }
 0x721   : > { %v7153_v39 = vpop.f32.mrf.mxu0  ;;  %v13300_v49 = vadd.f32 %v7166_v32, %v13249_v52  ;;  %v9889_v52 = vld [vmem:[%s13789_s3 + $0x48] sm:$0xf]  ;;  %v8073_v62 = vsel %vm344_vm1, %v8061_v10, 0  ;;  %v8217_v5 = vpop.permute.xlu0 %8216 }
 0x722   : > { %v13304_v26 = vadd.f32 %v7153_v39, %v13253_v48  ;;  %v8052_v48 = vpop.permute.xlu1 %8051 }
 0x723   : > { %9886 = vmatmul.msk.bf16.vlgmr.msrb.gmra.mxu1 %vm340_vm2, %v9880_v45  ;;  %v8064_v29 = vsel %vm13889_vm5, %v8050_v21, %v8052_v48 }
 0x724   : > { %9885 = vmatmul.msk.bf16.vlgmr.msrb.gmra.mxu0 %vm340_vm2, %v9880_v45  ;;  %9888 = vmatmul.msk.bf16.vlgmr.msrb.gmra.mxu3 %vm340_vm2, %v9880_v45  ;;  %v8082_v18 = vsel %vm344_vm1, %v8064_v29, 0 }
 0x725   : > { %7988 = vmatpush.bf16.msrb.mxu0 %v7918_v46  ;;  %8001 = vmatpush.bf16.msrb.mxu1 %v7921_v43 }
 0x726   : > { %8027 = vmatpush.bf16.msrb.mxu3 %v7927_v4  ;;  %v7181_v57 = vpop.f32.mrf.mxu2 }
 0x727   : > { %v7192_v41 = vpop.f32.mrf.mxu3 }
 0x728   : > { %v13314_v17 = vadd.f32 %v7192_v41, %v13263_v63  ;;  %v7168_v50 = vpop.f32.mrf.mxu1  ;;  %v8062_v63 = vsel %vm13888_vm4, %v8046_v53, %v8048_v42  ;;  %vm13902_vm4 = vcmask 236544  }
 0x729   : > { %v7155_v44 = vpop.f32.mrf.mxu0  ;;  %v8076_v38 = vsel %vm344_vm1, %v8062_v63, 0  ;;  %v8213_v46 = vpop.permute.xlu0 %8212  ;;  %vm13903_vm5 = vmmov %vm13902_vm4 }
 0x72a   : > { %v8056_v9 = vpop.permute.xlu1 %8055 }
 0x72b   : > { %9892 = vmatmul.msk.bf16.vlgmr.msra.gmra.mxu2 %vm340_vm2, %v9889_v52 }
 0x72c   : > { %8129 = vmatpush.bf16.msra.mxu2 %v8079_v56 }
 0x72e   : > { %v7296_v58 = vpop.f32.mrf.mxu2 }
 0x72f   : > { %v7194_v54 = vpop.f32.mrf.mxu3  ;;  %v13322_v2 = vadd.f32 %v7296_v58, %v13271_v31  ;;  %v8058_v31 = vpop.permute.xlu2 %8057 }
 0x730   : > { %v7283_v36 = vpop.f32.mrf.mxu1  ;;  %v8067_v12 = vsel %vm13890_vm6, %v8056_v9, %v8058_v31  ;;  %v8068_v40 = vsel %vm13893_vm9, %v8058_v31, %v8060_v24  ;;  %vm13904_vm6 = vmmov %vm13902_vm4 }
 0x731   : > { %v7270_v7 = vpop.f32.mrf.mxu0  ;;  %v13327_v45 = vadd.f32 %v7283_v36, %v13276_v30  ;;  %v8094_v22 = vsel %vm344_vm1, %v8068_v40, 0  ;;  %v8227_v29 = vpop.permute.xlu0 %8226  ;;  %vm13907_vm9 = vmmov %vm13902_vm4 }
 0x732   : > { %v13331_v59 = vadd.f32 %v7270_v7, %v13280_v34  ;;  %v8091_v34 = vsel %vm344_vm1, %v8067_v12, 0  ;;  %v8054_v20 = vpop.permute.xlu1 %8053 }
 0x733   : > { %9891 = vmatmul.msk.bf16.vlgmr.msra.gmra.mxu1 %vm340_vm2, %v9889_v52  ;;  %v8065_v14 = vsel %vm13891_vm7, %v8052_v48, %v8054_v20  ;;  %v8066_v0 = vsel %vm13892_vm8, %v8054_v20, %v8056_v9  ;;  %vm13905_vm7 = vmmov %vm13902_vm4 }
 0x734   : > { %9890 = vmatmul.msk.bf16.vlgmr.msra.gmra.mxu0 %vm340_vm2, %v9889_v52  ;;  %9893 = vmatmul.msk.bf16.vlgmr.msra.gmra.mxu3 %vm340_vm2, %v9889_v52  ;;  %v8085_v23 = vsel %vm344_vm1, %v8065_v14, 0  ;;  %v8088_v61 = vsel %vm344_vm1, %v8066_v0, 0  ;;  %vm13906_vm8 = vmmov %vm13902_vm4 }
 0x735   : > { %8103 = vmatpush.bf16.msra.mxu0 %v8073_v62  ;;  %8116 = vmatpush.bf16.msra.mxu1 %v8076_v38 }
 0x736   : > { %8142 = vmatpush.bf16.msra.mxu3 %v8082_v18  ;;  %v7298_v6 = vpop.f32.mrf.mxu2 }
 0x737   : > { %v7309_v1 = vpop.f32.mrf.mxu3  ;;  %v8215_v33 = vpop.permute.xlu2 %8214 }
 0x738   : > { %v13341_v13 = vadd.f32 %v7309_v1, %v13290_v47  ;;  %v7285_v11 = vpop.f32.mrf.mxu1  ;;  %v8230_v60 = vsel %vm13894_vm10, %v8215_v33, %v8217_v5  ;;  %vm13908_vm10 = vmmov %vm13902_vm4 }
 0x739   : > { %v7272_v30 = vpop.f32.mrf.mxu0  ;;  %v8246_v42 = vsel %vm344_vm1, %v8230_v60, 0 }
 0x73b   : > { %9896 = vmatmul.msk.bf16.vlgmr.msrb.gmra.mxu2 %vm340_vm2, %v9889_v52 }
 0x73c   : > { %8181 = vmatpush.bf16.msrb.mxu2 %v8091_v34  ;;  %v8384_v34 = vpop.permute.xlu0 %8383 }
 0x73e   : > { %v7348_v35 = vpop.f32.mrf.mxu2 }
 0x73f   : > { %v7311_v8 = vpop.f32.mrf.mxu3  ;;  %v13346_v15 = vadd.f32 %v7348_v35, %v13295_v3  ;;  %v8211_v21 = vpop.permute.xlu2 %8210 }
 0x740   : > { %v7335_v51 = vpop.f32.mrf.mxu1  ;;  %v8228_v25 = vsel %vm13895_vm11, %v8211_v21, %v8213_v46  ;;  %vm13909_vm11 = vmmov %vm13902_vm4 }
 0x741   : > { %v7322_v27 = vpop.f32.mrf.mxu0  ;;  %v13351_v47 = vadd.f32 %v7335_v51, %v13300_v49  ;;  %v9898_v49 = vld [vmem:[%s13789_s3 + $0x4c] sm:$0xf]  ;;  %v8240_v56 = vsel %vm344_vm1, %v8228_v25, 0 }
 0x742   : > { %v13355_v19 = vadd.f32 %v7322_v27, %v13304_v26  ;;  %v8219_v26 = vpop.permute.xlu1 %8218 }
 0x743   : > { %9895 = vmatmul.msk.bf16.vlgmr.msrb.gmra.mxu1 %vm340_vm2, %v9889_v52  ;;  %v8231_v44 = vsel %vm13897_vm15, %v8217_v5, %v8219_v26 }
 0x744   : > { %9894 = vmatmul.msk.bf16.vlgmr.msrb.gmra.mxu0 %vm340_vm2, %v9889_v52  ;;  %9897 = vmatmul.msk.bf16.vlgmr.msrb.gmra.mxu3 %vm340_vm2, %v9889_v52  ;;  %v8249_v58 = vsel %vm344_vm1, %v8231_v44, 0 }
 0x745   : > { %8155 = vmatpush.bf16.msrb.mxu0 %v8085_v23  ;;  %8168 = vmatpush.bf16.msrb.mxu1 %v8088_v61  ;;  %v8380_v23 = vpop.permute.xlu0 %8379 }
 0x746   : > { %8194 = vmatpush.bf16.msrb.mxu3 %v8094_v22  ;;  %v7350_v3 = vpop.f32.mrf.mxu2 }
 0x747   : > { %v7361_v32 = vpop.f32.mrf.mxu3 }
 0x748   : > { %v13365_v28 = vadd.f32 %v7361_v32, %v13314_v17  ;;  %v7337_v39 = vpop.f32.mrf.mxu1  ;;  %v8229_v17 = vsel %vm13896_vm12, %v8213_v46, %v8215_v33  ;;  %vm13910_vm12 = vcmask 228352  }
 0x749   : > { %v7324_v55 = vpop.f32.mrf.mxu0  ;;  %v8243_v16 = vsel %vm344_vm1, %v8229_v17, 0  ;;  %vm13911_vm15 = vmmov %vm13910_vm12 }
 0x74a   : > { %v8223_v53 = vpop.permute.xlu1 %8222 }
 0x74b   : > { %9901 = vmatmul.msk.bf16.vlgmr.msra.gmra.mxu2 %vm340_vm2, %v9898_v49 }
 0x74c   : > { %8296 = vmatpush.bf16.msra.mxu2 %v8246_v42 }
 0x74d   : > { %v8394_v44 = vpop.permute.xlu0 %8393 }
 0x74e   : > { %v7463_v43 = vpop.f32.mrf.mxu2 }
 0x74f   : > { %v7363_v4 = vpop.f32.mrf.mxu3  ;;  %v13373_v57 = vadd.f32 %v7463_v43, %v13322_v2  ;;  %v8225_v2 = vpop.permute.xlu2 %8224 }
 0x750   : > { %v7450_v41 = vpop.f32.mrf.mxu1  ;;  %v8234_v10 = vsel %vm13898_vm14, %v8223_v53, %v8225_v2  ;;  %v8235_v11 = vsel %vm13901_vm3, %v8225_v2, %v8227_v29  ;;  %vm13912_vm14 = vmmov %vm13910_vm12 }
 0x751   : > { %v7437_v50 = vpop.f32.mrf.mxu0  ;;  %v13378_v52 = vadd.f32 %v7450_v41, %v13327_v45  ;;  %v8261_v8 = vsel %vm344_vm1, %v8235_v11, 0 }
 0x752   : > { %v13382_v48 = vadd.f32 %v7437_v50, %v13331_v59  ;;  %v8258_v59 = vsel %vm344_vm1, %v8234_v10, 0  ;;  %v8221_v62 = vpop.permute.xlu1 %8220 }
 0x753   : > { %9900 = vmatmul.msk.bf16.vlgmr.msra.gmra.mxu1 %vm340_vm2, %v9898_v49  ;;  %v8232_v31 = vsel %vm13899_vm13, %v8219_v26, %v8221_v62  ;;  %v8233_v1 = vsel %vm13900_vm0, %v8221_v62, %v8223_v53  ;;  %vm13913_vm13 = vmmov %vm13910_vm12 }
 0x754   : > { %9899 = vmatmul.msk.bf16.vlgmr.msra.gmra.mxu0 %vm340_vm2, %v9898_v49  ;;  %9902 = vmatmul.msk.bf16.vlgmr.msra.gmra.mxu3 %vm340_vm2, %v9898_v49  ;;  %v8252_v20 = vsel %vm344_vm1, %v8232_v31, 0  ;;  %v8255_v35 = vsel %vm344_vm1, %v8233_v1, 0  ;;  %vm13914_vm0 = vmmov %vm13910_vm12 }
 0x755   : > { %8270 = vmatpush.bf16.msra.mxu0 %v8240_v56  ;;  %8283 = vmatpush.bf16.msra.mxu1 %v8243_v16  ;;  %vm13915_vm3 = vmmov %vm13914_vm0 }
 0x756   : > { %8309 = vmatpush.bf16.msra.mxu3 %v8249_v58  ;;  %v7465_v54 = vpop.f32.mrf.mxu2 }
 0x757   : > { %v7476_v36 = vpop.f32.mrf.mxu3  ;;  %v8382_v24 = vpop.permute.xlu2 %8381 }
 0x758   : > { %v13392_v63 = vadd.f32 %v7476_v36, %v13341_v13  ;;  %v7452_v7 = vpop.f32.mrf.mxu1  ;;  %v8397_v14 = vsel %vm13902_vm4, %v8382_v24, %v8384_v34  ;;  %vm13916_vm4 = vmmov %vm13914_vm0 }
 0x759   : > { %v7439_v45 = vpop.f32.mrf.mxu0  ;;  %v8413_v33 = vsel %vm344_vm1, %v8397_v14, 0 }
 0x75b   : > { %9905 = vmatmul.msk.bf16.vlgmr.msrb.gmra.mxu2 %vm340_vm2, %v9898_v49 }
 0x75c   : > { %8348 = vmatpush.bf16.msrb.mxu2 %v8258_v59  ;;  %v8551_v59 = vpop.permute.xlu0 %8550 }
 0x75e   : > { %v7515_v38 = vpop.f32.mrf.mxu2 }
 0x75f   : > { %v7478_v9 = vpop.f32.mrf.mxu3  ;;  %v13397_v18 = vadd.f32 %v7515_v38, %v13346_v15  ;;  %v8378_v5 = vpop.permute.xlu2 %8377 }
 0x760   : > { %v7502_v6 = vpop.f32.mrf.mxu1  ;;  %v8395_v60 = vsel %vm13903_vm5, %v8378_v5, %v8380_v23  ;;  %vm13917_vm5 = vmmov %vm13914_vm0 }
 0x761   : > { %v7489_v12 = vpop.f32.mrf.mxu0  ;;  %v13402_v13 = vadd.f32 %v7502_v6, %v13351_v47  ;;  %v9907_v47 = vld [vmem:[%s13789_s3 + $0x50] sm:$0xf]  ;;  %v8407_v42 = vsel %vm344_vm1, %v8395_v60, 0 }
 0x762   : > { %v13406_v30 = vadd.f32 %v7489_v12, %v13355_v19  ;;  %v8386_v19 = vpop.permute.xlu1 %8385 }
 0x763   : > { %9904 = vmatmul.msk.bf16.vlgmr.msrb.gmra.mxu1 %vm340_vm2, %v9898_v49  ;;  %v8398_v55 = vsel %vm13905_vm7, %v8384_v34, %v8386_v19 }
 0x764   : > { %9903 = vmatmul.msk.bf16.vlgmr.msrb.gmra.mxu0 %vm340_vm2, %v9898_v49  ;;  %9906 = vmatmul.msk.bf16.vlgmr.msrb.gmra.mxu3 %vm340_vm2, %v9898_v49  ;;  %v8416_v43 = vsel %vm344_vm1, %v8398_v55, 0 }
 0x765   : > { %8322 = vmatpush.bf16.msrb.mxu0 %v8252_v20  ;;  %8335 = vmatpush.bf16.msrb.mxu1 %v8255_v35  ;;  %v8547_v20 = vpop.permute.xlu0 %8546 }
 0x766   : > { %8361 = vmatpush.bf16.msrb.mxu3 %v8261_v8  ;;  %v7517_v15 = vpop.f32.mrf.mxu2 }
 0x767   : > { %v7528_v51 = vpop.f32.mrf.mxu3 }
 0x768   : > { %v13416_v0 = vadd.f32 %v7528_v51, %v13365_v28  ;;  %v7504_v27 = vpop.f32.mrf.mxu1  ;;  %v8396_v28 = vsel %vm13904_vm6, %v8380_v23, %v8382_v24  ;;  %vm13918_vm6 = vcmask 220160  }
 0x769   : > { %v7491_v40 = vpop.f32.mrf.mxu0  ;;  %v8410_v21 = vsel %vm344_vm1, %v8396_v28, 0  ;;  %vm13919_vm7 = vmmov %vm13918_vm6 }
 0x76a   : > { %v8390_v46 = vpop.permute.xlu1 %8389 }
 0x76b   : > { %9910 = vmatmul.msk.bf16.vlgmr.msra.gmra.mxu2 %vm340_vm2, %v9907_v47 }
 0x76c   : > { %8463 = vmatpush.bf16.msra.mxu2 %v8413_v33 }
 0x76d   : > { %v8561_v55 = vpop.permute.xlu0 %8560 }
 0x76e   : > { %v7630_v61 = vpop.f32.mrf.mxu2 }
 0x76f   : > { %v7530_v22 = vpop.f32.mrf.mxu3  ;;  %v13424_v3 = vadd.f32 %v7630_v61, %v13373_v57  ;;  %v8392_v57 = vpop.permute.xlu2 %8391 }
 0x770   : > { %v7617_v32 = vpop.f32.mrf.mxu1  ;;  %v8401_v25 = vsel %vm13906_vm8, %v8390_v46, %v8392_v57  ;;  %v8402_v7 = vsel %vm13909_vm11, %v8392_v57, %v8394_v44  ;;  %vm13920_vm8 = vmmov %vm13918_vm6 }
 0x771   : > { %v7604_v39 = vpop.f32.mrf.mxu0  ;;  %v13429_v49 = vadd.f32 %v7617_v32, %v13378_v52  ;;  %v8428_v9 = vsel %vm344_vm1, %v8402_v7, 0  ;;  %vm13923_vm11 = vmmov %vm13918_vm6 }
 0x772   : > { %v13433_v26 = vadd.f32 %v7604_v39, %v13382_v48  ;;  %v8425_v48 = vsel %vm344_vm1, %v8401_v25, 0  ;;  %v8388_v56 = vpop.permute.xlu1 %8387 }
 0x773   : > { %9909 = vmatmul.msk.bf16.vlgmr.msra.gmra.mxu1 %vm340_vm2, %v9907_v47  ;;  %v8399_v2 = vsel %vm13907_vm9, %v8386_v19, %v8388_v56  ;;  %v8400_v36 = vsel %vm13908_vm10, %v8388_v56, %v8390_v46  ;;  %vm13921_vm9 = vmmov %vm13918_vm6 }
 0x774   : > { %9908 = vmatmul.msk.bf16.vlgmr.msra.gmra.mxu0 %vm340_vm2, %v9907_v47  ;;  %9911 = vmatmul.msk.bf16.vlgmr.msra.gmra.mxu3 %vm340_vm2, %v9907_v47  ;;  %v8419_v62 = vsel %vm344_vm1, %v8399_v2, 0  ;;  %v8422_v38 = vsel %vm344_vm1, %v8400_v36, 0  ;;  %vm13922_vm10 = vmmov %vm13918_vm6 }
 0x775   : > { %8437 = vmatpush.bf16.msra.mxu0 %v8407_v42  ;;  %8450 = vmatpush.bf16.msra.mxu1 %v8410_v21 }
 0x776   : > { %8476 = vmatpush.bf16.msra.mxu3 %v8416_v43  ;;  %v7632_v4 = vpop.f32.mrf.mxu2 }
 0x777   : > { %v7643_v41 = vpop.f32.mrf.mxu3  ;;  %v8549_v29 = vpop.permute.xlu2 %8548 }
 0x778   : > { %v13443_v17 = vadd.f32 %v7643_v41, %v13392_v63  ;;  %v7619_v50 = vpop.f32.mrf.mxu1  ;;  %v8564_v31 = vsel %vm13910_vm12, %v8549_v29, %v8551_v59  ;;  %vm13924_vm12 = vmmov %vm13918_vm6 }
 0x779   : > { %v7606_v52 = vpop.f32.mrf.mxu0  ;;  %v8580_v24 = vsel %vm344_vm1, %v8564_v31, 0 }
 0x77b   : > { %9914 = vmatmul.msk.bf16.vlgmr.msrb.gmra.mxu2 %vm340_vm2, %v9907_v47 }
 0x77c   : > { %8515 = vmatpush.bf16.msrb.mxu2 %v8425_v48  ;;  %v8718_v48 = vpop.permute.xlu0 %8717 }
 0x77e   : > { %v7682_v16 = vpop.f32.mrf.mxu2 }
 0x77f   : > { %v7645_v53 = vpop.f32.mrf.mxu3  ;;  %v13448_v58 = vadd.f32 %v7682_v16, %v13397_v18  ;;  %v8545_v34 = vpop.permute.xlu2 %8544 }
 0x780   : > { %v7669_v54 = vpop.f32.mrf.mxu1  ;;  %v8562_v14 = vsel %vm13911_vm15, %v8545_v34, %v8547_v20  ;;  %vm13925_vm15 = vmmov %vm13918_vm6 }
 0x781   : > { %v7656_v10 = vpop.f32.mrf.mxu0  ;;  %v13453_v63 = vadd.f32 %v7669_v54, %v13402_v13  ;;  %v9916_v13 = vld [vmem:[%s13789_s3 + $0x54] sm:$0xf]  ;;  %v8574_v33 = vsel %vm344_vm1, %v8562_v14, 0 }
 0x782   : > { %v13457_v45 = vadd.f32 %v7656_v10, %v13406_v30  ;;  %v8553_v30 = vpop.permute.xlu1 %8552 }
 0x783   : > { %9913 = vmatmul.msk.bf16.vlgmr.msrb.gmra.mxu1 %vm340_vm2, %v9907_v47  ;;  %v8565_v40 = vsel %vm13913_vm13, %v8551_v59, %v8553_v30 }
 0x784   : > { %9912 = vmatmul.msk.bf16.vlgmr.msrb.gmra.mxu0 %vm340_vm2, %v9907_v47  ;;  %9915 = vmatmul.msk.bf16.vlgmr.msrb.gmra.mxu3 %vm340_vm2, %v9907_v47  ;;  %v8583_v61 = vsel %vm344_vm1, %v8565_v40, 0 }
 0x785   : > { %8489 = vmatpush.bf16.msrb.mxu0 %v8419_v62  ;;  %8502 = vmatpush.bf16.msrb.mxu1 %v8422_v38  ;;  %v8714_v62 = vpop.permute.xlu0 %8713 }
 0x786   : > { %8528 = vmatpush.bf16.msrb.mxu3 %v8428_v9  ;;  %v7684_v18 = vpop.f32.mrf.mxu2 }
 0x787   : > { %v7695_v6 = vpop.f32.mrf.mxu3 }
 0x788   : > { %v13467_v1 = vadd.f32 %v7695_v6, %v13416_v0  ;;  %v7671_v12 = vpop.f32.mrf.mxu1  ;;  %v8563_v0 = vsel %vm13912_vm14, %v8547_v20, %v8549_v29  ;;  %vm13926_vm14 = vcmask 154624  }
 0x789   : > { %v7658_v11 = vpop.f32.mrf.mxu0  ;;  %v8577_v5 = vsel %vm344_vm1, %v8563_v0, 0  ;;  %vm13927_vm13 = vmmov %vm13926_vm14 }
 0x78a   : > { %v8557_v23 = vpop.permute.xlu1 %8556 }
 0x78b   : > { %9919 = vmatmul.msk.bf16.vlgmr.msra.gmra.mxu2 %vm340_vm2, %v9916_v13 }
 0x78c   : > { %8630 = vmatpush.bf16.msra.mxu2 %v8580_v24 }
 0x78d   : > { %v8728_v40 = vpop.permute.xlu0 %8727 }
 0x78e   : > { %v7797_v35 = vpop.f32.mrf.mxu2 }
 0x78f   : > { %v7697_v8 = vpop.f32.mrf.mxu3  ;;  %v13475_v15 = vadd.f32 %v7797_v35, %v13424_v3  ;;  %v8559_v3 = vpop.permute.xlu2 %8558 }
 0x790   : > { %v7784_v51 = vpop.f32.mrf.mxu1  ;;  %v8568_v60 = vsel %vm13914_vm0, %v8557_v23, %v8559_v3  ;;  %v8569_v50 = vsel %vm13917_vm5, %v8559_v3, %v8561_v55  ;;  %vm13928_vm0 = vmmov %vm13927_vm13 }
 0x791   : > { %v7771_v27 = vpop.f32.mrf.mxu0  ;;  %v13480_v47 = vadd.f32 %v7784_v51, %v13429_v49  ;;  %v8595_v53 = vsel %vm344_vm1, %v8569_v50, 0  ;;  %vm13931_vm5 = vmmov %vm13928_vm0 }
 0x792   : > { %v13484_v19 = vadd.f32 %v7771_v27, %v13433_v26  ;;  %v8592_v26 = vsel %vm344_vm1, %v8568_v60, 0  ;;  %v8555_v42 = vpop.permute.xlu1 %8554 }
 0x793   : > { %9918 = vmatmul.msk.bf16.vlgmr.msra.gmra.mxu1 %vm340_vm2, %v9916_v13  ;;  %v8566_v57 = vsel %vm13915_vm3, %v8553_v30, %v8555_v42  ;;  %v8567_v41 = vsel %vm13916_vm4, %v8555_v42, %v8557_v23  ;;  %vm13929_vm3 = vmmov %vm13928_vm0 }
 0x794   : > { %9917 = vmatmul.msk.bf16.vlgmr.msra.gmra.mxu0 %vm340_vm2, %v9916_v13  ;;  %9920 = vmatmul.msk.bf16.vlgmr.msra.gmra.mxu3 %vm340_vm2, %v9916_v13  ;;  %v8586_v56 = vsel %vm344_vm1, %v8566_v57, 0  ;;  %v8589_v16 = vsel %vm344_vm1, %v8567_v41, 0  ;;  %vm13930_vm4 = vmmov %vm13928_vm0 }
 0x795   : > { %8604 = vmatpush.bf16.msra.mxu0 %v8574_v33  ;;  %8617 = vmatpush.bf16.msra.mxu1 %v8577_v5 }
 0x796   : > { %8643 = vmatpush.bf16.msra.mxu3 %v8583_v61  ;;  %v7799_v22 = vpop.f32.mrf.mxu2 }
 0x797   : > { %v7810_v32 = vpop.f32.mrf.mxu3  ;;  %v8716_v44 = vpop.permute.xlu2 %8715 }
 0x798   : > { %v13494_v28 = vadd.f32 %v7810_v32, %v13443_v17  ;;  %v7786_v39 = vpop.f32.mrf.mxu1  ;;  %v8731_v2 = vsel %vm13918_vm6, %v8716_v44, %v8718_v48  ;;  %vm13932_vm6 = vmmov %vm13928_vm0 }
 0x799   : > { %v7773_v49 = vpop.f32.mrf.mxu0  ;;  %v8747_v29 = vsel %vm344_vm1, %v8731_v2, 0 }
 0x79b   : > { %9923 = vmatmul.msk.bf16.vlgmr.msrb.gmra.mxu2 %vm340_vm2, %v9916_v13 }
 0x79c   : > { %8682 = vmatpush.bf16.msrb.mxu2 %v8592_v26  ;;  %v8885_v26 = vpop.permute.xlu0 %8884 }
 0x79e   : > { %v7849_v21 = vpop.f32.mrf.mxu2 }
 0x79f   : > { %v7812_v46 = vpop.f32.mrf.mxu3  ;;  %v13499_v43 = vadd.f32 %v7849_v21, %v13448_v58  ;;  %v8712_v59 = vpop.permute.xlu2 %8711 }
 0x7a0   : > { %v7836_v4 = vpop.f32.mrf.mxu1  ;;  %v8729_v31 = vsel %vm13919_vm7, %v8712_v59, %v8714_v62  ;;  %vm13933_vm7 = vmmov %vm13928_vm0 }
 0x7a1   : > { %v7823_v25 = vpop.f32.mrf.mxu0  ;;  %v13504_v17 = vadd.f32 %v7836_v4, %v13453_v63  ;;  %v9925_v63 = vld [vmem:[%s13789_s3 + $0x58] sm:$0xf]  ;;  %v8741_v24 = vsel %vm344_vm1, %v8729_v31, 0 }
 0x7a2   : > { %v13508_v52 = vadd.f32 %v7823_v25, %v13457_v45  ;;  %v8720_v45 = vpop.permute.xlu1 %8719 }
 0x7a3   : > { %9922 = vmatmul.msk.bf16.vlgmr.msrb.gmra.mxu1 %vm340_vm2, %v9916_v13  ;;  %v8732_v11 = vsel %vm13921_vm9, %v8718_v48, %v8720_v45 }
 0x7a4   : > { %9921 = vmatmul.msk.bf16.vlgmr.msrb.gmra.mxu0 %vm340_vm2, %v9916_v13  ;;  %9924 = vmatmul.msk.bf16.vlgmr.msrb.gmra.mxu3 %vm340_vm2, %v9916_v13  ;;  %v8750_v35 = vsel %vm344_vm1, %v8732_v11, 0 }
 0x7a5   : > { %8656 = vmatpush.bf16.msrb.mxu0 %v8586_v56  ;;  %8669 = vmatpush.bf16.msrb.mxu1 %v8589_v16  ;;  %v8881_v56 = vpop.permute.xlu0 %8880 }
 0x7a6   : > { %8695 = vmatpush.bf16.msrb.mxu3 %v8595_v53  ;;  %v7851_v58 = vpop.f32.mrf.mxu2 }
 0x7a7   : > { %v7862_v54 = vpop.f32.mrf.mxu3 }
 0x7a8   : > { %v13518_v36 = vadd.f32 %v7862_v54, %v13467_v1  ;;  %v7838_v10 = vpop.f32.mrf.mxu1  ;;  %v8730_v1 = vsel %vm13920_vm8, %v8714_v62, %v8716_v44  ;;  %vm13934_vm8 = vcmask 146432  }
 0x7a9   : > { %v7825_v7 = vpop.f32.mrf.mxu0  ;;  %v8744_v34 = vsel %vm344_vm1, %v8730_v1, 0  ;;  %vm13935_vm9 = vmmov %vm13934_vm8 }
 0x7aa   : > { %v8724_v20 = vpop.permute.xlu1 %8723 }
 0x7ab   : > { %9928 = vmatmul.msk.bf16.vlgmr.msra.gmra.mxu2 %vm340_vm2, %v9925_v63 }
 0x7ac   : > { %8797 = vmatpush.bf16.msra.mxu2 %v8747_v29 }
 0x7ad   : > { %v8895_v11 = vpop.permute.xlu0 %8894 }
 0x7ae   : > { %v7964_v38 = vpop.f32.mrf.mxu2 }
 0x7af   : > { %v7864_v9 = vpop.f32.mrf.mxu3  ;;  %v13526_v18 = vadd.f32 %v7964_v38, %v13475_v15  ;;  %v8726_v15 = vpop.permute.xlu2 %8725 }
 0x7b0   : > { %v7951_v6 = vpop.f32.mrf.mxu1  ;;  %v8735_v14 = vsel %vm13922_vm10, %v8724_v20, %v8726_v15  ;;  %v8736_v39 = vsel %vm13925_vm15, %v8726_v15, %v8728_v40  ;;  %vm13936_vm10 = vmmov %vm13934_vm8 }
 0x7b1   : > { %v7938_v12 = vpop.f32.mrf.mxu0  ;;  %v13531_v13 = vadd.f32 %v7951_v6, %v13480_v47  ;;  %v8762_v46 = vsel %vm344_vm1, %v8736_v39, 0  ;;  %vm13939_vm15 = vmmov %vm13934_vm8 }
 0x7b2   : > { %v13535_v30 = vadd.f32 %v7938_v12, %v13484_v19  ;;  %v8759_v19 = vsel %vm344_vm1, %v8735_v14, 0  ;;  %v8722_v33 = vpop.permute.xlu1 %8721 }
 0x7b3   : > { %9927 = vmatmul.msk.bf16.vlgmr.msra.gmra.mxu1 %vm340_vm2, %v9925_v63  ;;  %v8733_v3 = vsel %vm13923_vm11, %v8720_v45, %v8722_v33  ;;  %v8734_v32 = vsel %vm13924_vm12, %v8722_v33, %v8724_v20  ;;  %vm13937_vm11 = vmmov %vm13934_vm8 }
 0x7b4   : > { %9926 = vmatmul.msk.bf16.vlgmr.msra.gmra.mxu0 %vm340_vm2, %v9925_v63  ;;  %9929 = vmatmul.msk.bf16.vlgmr.msra.gmra.mxu3 %vm340_vm2, %v9925_v63  ;;  %v8753_v42 = vsel %vm344_vm1, %v8733_v3, 0  ;;  %v8756_v21 = vsel %vm344_vm1, %v8734_v32, 0  ;;  %vm13938_vm12 = vmmov %vm13934_vm8 }
 0x7b5   : > { %8771 = vmatpush.bf16.msra.mxu0 %v8741_v24  ;;  %8784 = vmatpush.bf16.msra.mxu1 %v8744_v34 }
 0x7b6   : > { %8810 = vmatpush.bf16.msra.mxu3 %v8750_v35  ;;  %v7966_v8 = vpop.f32.mrf.mxu2 }
 0x7b7   : > { %v7977_v51 = vpop.f32.mrf.mxu3  ;;  %v8883_v55 = vpop.permute.xlu2 %8882 }
 0x7b8   : > { %v13545_v0 = vadd.f32 %v7977_v51, %v13494_v28  ;;  %v7953_v27 = vpop.f32.mrf.mxu1  ;;  %v8898_v57 = vsel %vm13926_vm14, %v8883_v55, %v8885_v26  ;;  %vm13940_vm14 = vmmov %vm13934_vm8 }
 0x7b9   : > { %v7940_v47 = vpop.f32.mrf.mxu0  ;;  %v8914_v44 = vsel %vm344_vm1, %v8898_v57, 0 }
 0x7bb   : > { %9932 = vmatmul.msk.bf16.vlgmr.msrb.gmra.mxu2 %vm340_vm2, %v9925_v63 }
 0x7bc   : > { %8849 = vmatpush.bf16.msrb.mxu2 %v8759_v19  ;;  %v9052_v19 = vpop.permute.xlu0 %9051 }
 0x7be   : > { %v8016_v5 = vpop.f32.mrf.mxu2 }
 0x7bf   : > { %v7979_v23 = vpop.f32.mrf.mxu3  ;;  %v13550_v61 = vadd.f32 %v8016_v5, %v13499_v43  ;;  %v8879_v48 = vpop.permute.xlu2 %8878 }
 0x7c0   : > { %v8003_v22 = vpop.f32.mrf.mxu1  ;;  %v8896_v2 = vsel %vm13927_vm13, %v8879_v48, %v8881_v56  ;;  %vm13941_vm13 = vmmov %vm13934_vm8 }
 0x7c1   : > { %v7990_v60 = vpop.f32.mrf.mxu0  ;;  %v13555_v28 = vadd.f32 %v8003_v22, %v13504_v17  ;;  %v9934_v17 = vld [vmem:[%s13789_s3 + $0x5c] sm:$0xf]  ;;  %v8908_v29 = vsel %vm344_vm1, %v8896_v2, 0 }
 0x7c2   : > { %v13559_v49 = vadd.f32 %v7990_v60, %v13508_v52  ;;  %v8887_v52 = vpop.permute.xlu1 %8886 }
 0x7c3   : > { %9931 = vmatmul.msk.bf16.vlgmr.msrb.gmra.mxu1 %vm340_vm2, %v9925_v63  ;;  %v8899_v7 = vsel %vm13929_vm3, %v8885_v26, %v8887_v52 }
 0x7c4   : > { %9930 = vmatmul.msk.bf16.vlgmr.msrb.gmra.mxu0 %vm340_vm2, %v9925_v63  ;;  %9933 = vmatmul.msk.bf16.vlgmr.msrb.gmra.mxu3 %vm340_vm2, %v9925_v63  ;;  %v8917_v38 = vsel %vm344_vm1, %v8899_v7, 0 }
 0x7c5   : > { %8823 = vmatpush.bf16.msrb.mxu0 %v8753_v42  ;;  %8836 = vmatpush.bf16.msrb.mxu1 %v8756_v21  ;;  %v9048_v42 = vpop.permute.xlu0 %9047 }
 0x7c6   : > { %8862 = vmatpush.bf16.msrb.mxu3 %v8762_v46  ;;  %v8018_v43 = vpop.f32.mrf.mxu2 }
 0x7c7   : > { %v8029_v4 = vpop.f32.mrf.mxu3 }
 0x7c8   : > { %v13569_v41 = vadd.f32 %v8029_v4, %v13518_v36  ;;  %v8005_v25 = vpop.f32.mrf.mxu1  ;;  %v8897_v36 = vsel %vm13928_vm0, %v8881_v56, %v8883_v55  ;;  %vm13942_vm0 = vcmask 138240  }
 0x7c9   : > { %v7992_v50 = vpop.f32.mrf.mxu0  ;;  %v8911_v59 = vsel %vm344_vm1, %v8897_v36, 0  ;;  %vm13943_vm3 = vmmov %vm13942_vm0 }
 0x7ca   : > { %v8891_v62 = vpop.permute.xlu1 %8890 }
 0x7cb   : > { %9937 = vmatmul.msk.bf16.vlgmr.msra.gmra.mxu2 %vm340_vm2, %v9934_v17 }
 0x7cc   : > { %8964 = vmatpush.bf16.msra.mxu2 %v8914_v44 }
 0x7cd   : > { %v9062_v7 = vpop.permute.xlu0 %9061 }
 0x7ce   : > { %v8131_v16 = vpop.f32.mrf.mxu2 }
 0x7cf   : > { %v8031_v53 = vpop.f32.mrf.mxu3  ;;  %v13577_v58 = vadd.f32 %v8131_v16, %v13526_v18  ;;  %v8893_v18 = vpop.permute.xlu2 %8892 }
 0x7d0   : > { %v8118_v54 = vpop.f32.mrf.mxu1  ;;  %v8902_v31 = vsel %vm13930_vm4, %v8891_v62, %v8893_v18  ;;  %v8903_v27 = vsel %vm13933_vm7, %v8893_v18, %v8895_v11  ;;  %vm13944_vm4 = vmmov %vm13942_vm0 }
 0x7d1   : > { %v8105_v10 = vpop.f32.mrf.mxu0  ;;  %v13582_v63 = vadd.f32 %v8118_v54, %v13531_v13  ;;  %v8929_v23 = vsel %vm344_vm1, %v8903_v27, 0  ;;  %vm13947_vm7 = vmmov %vm13942_vm0 }
 0x7d2   : > { %v13586_v45 = vadd.f32 %v8105_v10, %v13535_v30  ;;  %v8926_v30 = vsel %vm344_vm1, %v8902_v31, 0  ;;  %v8889_v24 = vpop.permute.xlu1 %8888 }
 0x7d3   : > { %9936 = vmatmul.msk.bf16.vlgmr.msra.gmra.mxu1 %vm340_vm2, %v9934_v17  ;;  %v8900_v15 = vsel %vm13931_vm5, %v8887_v52, %v8889_v24  ;;  %v8901_v51 = vsel %vm13932_vm6, %v8889_v24, %v8891_v62  ;;  %vm13945_vm5 = vmmov %vm13942_vm0 }
 0x7d4   : > { %9935 = vmatmul.msk.bf16.vlgmr.msra.gmra.mxu0 %vm340_vm2, %v9934_v17  ;;  %9938 = vmatmul.msk.bf16.vlgmr.msra.gmra.mxu3 %vm340_vm2, %v9934_v17  ;;  %v8920_v33 = vsel %vm344_vm1, %v8900_v15, 0  ;;  %v8923_v5 = vsel %vm344_vm1, %v8901_v51, 0  ;;  %vm13946_vm6 = vmmov %vm13942_vm0 }
 0x7d5   : > { %8938 = vmatpush.bf16.msra.mxu0 %v8908_v29  ;;  %8951 = vmatpush.bf16.msra.mxu1 %v8911_v59 }
 0x7d6   : > { %8977 = vmatpush.bf16.msra.mxu3 %v8917_v38  ;;  %v8133_v9 = vpop.f32.mrf.mxu2 }
 0x7d7   : > { %v8144_v6 = vpop.f32.mrf.mxu3  ;;  %v9050_v40 = vpop.permute.xlu2 %9049 }
 0x7d8   : > { %v13596_v1 = vadd.f32 %v8144_v6, %v13545_v0  ;;  %v8120_v12 = vpop.f32.mrf.mxu1  ;;  %v9065_v3 = vsel %vm13934_vm8, %v9050_v40, %v9052_v19  ;;  %vm13948_vm8 = vmmov %vm13942_vm0 }
 0x7d9   : > { %v8107_v13 = vpop.f32.mrf.mxu0  ;;  %v9081_v55 = vsel %vm344_vm1, %v9065_v3, 0 }
 0x7db   : > { %9941 = vmatmul.msk.bf16.vlgmr.msrb.gmra.mxu2 %vm340_vm2, %v9934_v17 }
 0x7dc   : > { %9016 = vmatpush.bf16.msrb.mxu2 %v8926_v30  ;;  %v9219_v30 = vpop.permute.xlu0 %9218 }
 0x7de   : > { %v8183_v34 = vpop.f32.mrf.mxu2 }
 0x7df   : > { %v8146_v20 = vpop.f32.mrf.mxu3  ;;  %v13601_v35 = vadd.f32 %v8183_v34, %v13550_v61  ;;  %v9046_v26 = vpop.permute.xlu2 %9045 }
 0x7e0   : > { %v8170_v8 = vpop.f32.mrf.mxu1  ;;  %v9063_v57 = vsel %vm13935_vm9, %v9046_v26, %v9048_v42  ;;  %vm13949_vm9 = vmmov %vm13942_vm0 }
 0x7e1   : > { %v8157_v14 = vpop.f32.mrf.mxu0  ;;  %v13606_v0 = vadd.f32 %v8170_v8, %v13555_v28  ;;  %v9943_v28 = vld [vmem:[%s13789_s3 + $0x60] sm:$0xf]  ;;  %v9075_v44 = vsel %vm344_vm1, %v9063_v57, 0 }
 0x7e2   : > { %v13610_v47 = vadd.f32 %v8157_v14, %v13559_v49  ;;  %v9054_v49 = vpop.permute.xlu1 %9053 }
 0x7e3   : > { %9940 = vmatmul.msk.bf16.vlgmr.msrb.gmra.mxu1 %vm340_vm2, %v9934_v17  ;;  %v9066_v50 = vsel %vm13937_vm11, %v9052_v19, %v9054_v49 }
 0x7e4   : > { %9939 = vmatmul.msk.bf16.vlgmr.msrb.gmra.mxu0 %vm340_vm2, %v9934_v17  ;;  %9942 = vmatmul.msk.bf16.vlgmr.msrb.gmra.mxu3 %vm340_vm2, %v9934_v17  ;;  %v9084_v16 = vsel %vm344_vm1, %v9066_v50, 0 }
 0x7e5   : > { %8990 = vmatpush.bf16.msrb.mxu0 %v8920_v33  ;;  %9003 = vmatpush.bf16.msrb.mxu1 %v8923_v5  ;;  %v9215_v33 = vpop.permute.xlu0 %9214 }
 0x7e6   : > { %9029 = vmatpush.bf16.msrb.mxu3 %v8929_v23  ;;  %v8185_v61 = vpop.f32.mrf.mxu2 }
 0x7e7   : > { %v8196_v22 = vpop.f32.mrf.mxu3 }
 0x7e8   : > { %v13620_v32 = vadd.f32 %v8196_v22, %v13569_v41  ;;  %v8172_v60 = vpop.f32.mrf.mxu1  ;;  %v9064_v41 = vsel %vm13936_vm10, %v9048_v42, %v9050_v40 }
 0x7e9   : > { %v8159_v39 = vpop.f32.mrf.mxu0  ;;  %v9078_v48 = vsel %vm344_vm1, %v9064_v41, 0 }
 0x7ea   : > { %v9058_v56 = vpop.permute.xlu1 %9057 }
 0x7eb   : > { %9946 = vmatmul.msk.bf16.vlgmr.msra.gmra.mxu2 %vm340_vm2, %v9943_v28 }
 0x7ec   : > { %9131 = vmatpush.bf16.msra.mxu2 %v9081_v55 }
 0x7ee   : > { %v8298_v21 = vpop.f32.mrf.mxu2 }
 0x7ef   : > { %v8198_v46 = vpop.f32.mrf.mxu3  ;;  %v13628_v43 = vadd.f32 %v8298_v21, %v13577_v58  ;;  %v9060_v58 = vpop.permute.xlu2 %9059 }
 0x7f0   : > { %v8285_v4 = vpop.f32.mrf.mxu1  ;;  %v9069_v2 = vsel %vm13938_vm12, %v9058_v56, %v9060_v58  ;;  %v9070_v12 = vsel %vm13941_vm13, %v9060_v58, %v9062_v7 }
 0x7f1   : > { %v8272_v25 = vpop.f32.mrf.mxu0  ;;  %v13633_v17 = vadd.f32 %v8285_v4, %v13582_v63  ;;  %v9096_v20 = vsel %vm344_vm1, %v9070_v12, 0 }
 0x7f2   : > { %v13637_v52 = vadd.f32 %v8272_v25, %v13586_v45  ;;  %v9093_v45 = vsel %vm344_vm1, %v9069_v2, 0  ;;  %v9056_v29 = vpop.permute.xlu1 %9055 }
 0x7f3   : > { %9945 = vmatmul.msk.bf16.vlgmr.msra.gmra.mxu1 %vm340_vm2, %v9943_v28  ;;  %v9067_v18 = vsel %vm13939_vm15, %v9054_v49, %v9056_v29  ;;  %v9068_v6 = vsel %vm13940_vm14, %v9056_v29, %v9058_v56 }
 0x7f4   : > { %9944 = vmatmul.msk.bf16.vlgmr.msra.gmra.mxu0 %vm340_vm2, %v9943_v28  ;;  %9947 = vmatmul.msk.bf16.vlgmr.msra.gmra.mxu3 %vm340_vm2, %v9943_v28  ;;  %v9087_v24 = vsel %vm344_vm1, %v9067_v18, 0  ;;  %v9090_v34 = vsel %vm344_vm1, %v9068_v6, 0  ;;  %v9961_v18 = vld [vmem:[%s13789_s3 + $0x68] sm:$0xf] }
 0x7f5   : > { %9105 = vmatpush.bf16.msra.mxu0 %v9075_v44  ;;  %9118 = vmatpush.bf16.msra.mxu1 %v9078_v48  ;;  %v9229_v48 = vpop.permute.xlu0 %9228 }
 0x7f6   : > { %9144 = vmatpush.bf16.msra.mxu3 %v9084_v16  ;;  %v8300_v53 = vpop.f32.mrf.mxu2 }
 0x7f7   : > { %v8311_v54 = vpop.f32.mrf.mxu3  ;;  %v9217_v11 = vpop.permute.xlu2 %9216 }
 0x7f8   : > { %v13647_v36 = vadd.f32 %v8311_v54, %v13596_v1  ;;  %v8287_v10 = vpop.f32.mrf.mxu1  ;;  %v9232_v15 = vsel %vm13942_vm0, %v9217_v11, %v9219_v30 }
 0x7f9   : > { %v8274_v63 = vpop.f32.mrf.mxu0  ;;  %v9248_v40 = vsel %vm344_vm1, %v9232_v15, 0 }
 0x7fb   : > { %9950 = vmatmul.msk.bf16.vlgmr.msrb.gmra.mxu2 %vm340_vm2, %v9943_v28 }
 0x7fc   : > { %9183 = vmatpush.bf16.msrb.mxu2 %v9093_v45 }
 0x7fe   : > { %v8350_v59 = vpop.f32.mrf.mxu2 }
 0x7ff   : > { %v8313_v62 = vpop.f32.mrf.mxu3  ;;  %v13652_v38 = vadd.f32 %v8350_v59, %v13601_v35  ;;  %v9213_v19 = vpop.permute.xlu2 %9212 }
 0x800   : > { %v8337_v9 = vpop.f32.mrf.mxu1  ;;  %v9230_v3 = vsel %vm13943_vm3, %v9213_v19, %v9215_v33 }
 0x801   : > { %v8324_v31 = vpop.f32.mrf.mxu0  ;;  %v13657_v1 = vadd.f32 %v8337_v9, %v13606_v0  ;;  %v9952_v0 = vld [vmem:[%s13789_s3 + $0x64] sm:$0xf]  ;;  %v9242_v55 = vsel %vm344_vm1, %v9230_v3, 0 }
 0x802   : > { %v13661_v13 = vadd.f32 %v8324_v31, %v13610_v47  ;;  %v9221_v47 = vpop.permute.xlu1 %9220 }
 0x803   : > { %9949 = vmatmul.msk.bf16.vlgmr.msrb.gmra.mxu1 %vm340_vm2, %v9943_v28  ;;  %v9233_v39 = vsel %vm13945_vm5, %v9219_v30, %v9221_v47 }
 0x804   : > { %9948 = vmatmul.msk.bf16.vlgmr.msrb.gmra.mxu0 %vm340_vm2, %v9943_v28  ;;  %9951 = vmatmul.msk.bf16.vlgmr.msrb.gmra.mxu3 %vm340_vm2, %v9943_v28  ;;  %v9251_v21 = vsel %vm344_vm1, %v9233_v39, 0 }
 0x805   : > { %9157 = vmatpush.bf16.msrb.mxu0 %v9087_v24  ;;  %9170 = vmatpush.bf16.msrb.mxu1 %v9090_v34  ;;  %v9377_v34 = vld [vmem:[%s13790_s4] sm:$0xff] }
 0x806   : > { %9196 = vmatpush.bf16.msrb.mxu3 %v9096_v20  ;;  %v8352_v35 = vpop.f32.mrf.mxu2  ;;  %9380 = vperm.xlu2 %10010, %v9377_v34  }
 0x807   : > { %v8363_v8 = vpop.f32.mrf.mxu3 }
 0x808   : > { %v13671_v51 = vadd.f32 %v8363_v8, %v13620_v32  ;;  %v8339_v14 = vpop.f32.mrf.mxu1  ;;  %v9231_v32 = vsel %vm13944_vm4, %v9215_v33, %v9217_v11 }
 0x809   : > { %v8326_v27 = vpop.f32.mrf.mxu0  ;;  %v9245_v26 = vsel %vm344_vm1, %v9231_v32, 0 }
 0x80a   : > { %v9225_v42 = vpop.permute.xlu1 %9224 }
 0x80b   : > { %9955 = vmatmul.msk.bf16.vlgmr.msra.gmra.mxu2 %vm340_vm2, %v9952_v0 }
 0x80c   : > { %9298 = vmatpush.bf16.msra.mxu2 %v9248_v40 }
 0x80e   : > { %v8465_v5 = vpop.f32.mrf.mxu2 }
 0x80f   : > { %v8365_v23 = vpop.f32.mrf.mxu3  ;;  %v8536_v61 = vadd.f32 %v8465_v5, %v13628_v43  ;;  %v9227_v43 = vpop.permute.xlu2 %9226 }
 0x810   : > { %v8452_v22 = vpop.f32.mrf.mxu1  ;;  %v9236_v57 = vsel %vm13946_vm6, %v9225_v42, %v9227_v43  ;;  %v9237_v10 = vsel %vm13949_vm9, %v9227_v43, %v9229_v48 }
 0x811   : > { %v8439_v60 = vpop.f32.mrf.mxu0  ;;  %v8535_v28 = vadd.f32 %v8452_v22, %v13633_v17  ;;  %v9260_v50 = vsel %vm344_vm1, %v9236_v57, 0  ;;  %v9263_v29 = vsel %vm344_vm1, %v9237_v10, 0 }
 0x812   : > { %v8534_v49 = vadd.f32 %v8439_v60, %v13637_v52  ;;  %v9223_v52 = vpop.permute.xlu1 %9222 }
 0x813   : > { %9954 = vmatmul.msk.bf16.vlgmr.msra.gmra.mxu1 %vm340_vm2, %v9952_v0  ;;  %v9234_v58 = vsel %vm13947_vm7, %v9221_v47, %v9223_v52  ;;  %v9235_v54 = vsel %vm13948_vm8, %v9223_v52, %v9225_v42 }
 0x814   : > { %9953 = vmatmul.msk.bf16.vlgmr.msra.gmra.mxu0 %vm340_vm2, %v9952_v0  ;;  %9956 = vmatmul.msk.bf16.vlgmr.msra.gmra.mxu3 %vm340_vm2, %v9952_v0  ;;  %v9254_v7 = vsel %vm344_vm1, %v9234_v58, 0  ;;  %v9257_v45 = vsel %vm344_vm1, %v9235_v54, 0 }
 0x815   : > { %9272 = vmatpush.bf16.msra.mxu0 %v9242_v55  ;;  %9285 = vmatpush.bf16.msra.mxu1 %v9245_v26 }
 0x816   : > { %9311 = vmatpush.bf16.msra.mxu3 %v9251_v21  ;;  %v8467_v46 = vpop.f32.mrf.mxu2 }
 0x817   : > { %v8478_v4 = vpop.f32.mrf.mxu3 }
 0x818   : > { %v8537_v41 = vadd.f32 %v8478_v4, %v13647_v36  ;;  %v8454_v25 = vpop.f32.mrf.mxu1 }
 0x819   : > { %v8441_v17 = vpop.f32.mrf.mxu0 }
 0x81b   : > { %9959 = vmatmul.msk.bf16.vlgmr.msrb.gmra.mxu2 %vm340_vm2, %v9952_v0 }
 0x81c   : > { %9350 = vmatpush.bf16.msrb.mxu2 %v9260_v50 }
 0x81e   : > { %v8517_v44 = vpop.f32.mrf.mxu2 }
 0x81f   : > { %v8480_v56 = vpop.f32.mrf.mxu3  ;;  %v8540_v16 = vadd.f32 %v8517_v44, %v13652_v38 }
 0x820   : > { %v8504_v53 = vpop.f32.mrf.mxu1 }
 0x821   : > { %v8491_v2 = vpop.f32.mrf.mxu0  ;;  %v8539_v36 = vadd.f32 %v8504_v53, %v13657_v1 }
 0x822   : > { %v8538_v63 = vadd.f32 %v8491_v2, %v13661_v13 }
 0x823   : > { %9958 = vmatmul.msk.bf16.vlgmr.msrb.gmra.mxu1 %vm340_vm2, %v9952_v0 }
 0x824   : > { %9957 = vmatmul.msk.bf16.vlgmr.msrb.gmra.mxu0 %vm340_vm2, %v9952_v0  ;;  %9960 = vmatmul.msk.bf16.vlgmr.msrb.gmra.mxu3 %vm340_vm2, %v9952_v0 }
 0x825   : > { %9324 = vmatpush.bf16.msrb.mxu0 %v9254_v7  ;;  %9337 = vmatpush.bf16.msrb.mxu1 %v9257_v45 }
 0x826   : > { %9363 = vmatpush.bf16.msrb.mxu3 %v9263_v29  ;;  %v8519_v59 = vpop.f32.mrf.mxu2 }
 0x827   : > { %v8530_v62 = vpop.f32.mrf.mxu3 }
 0x828   : > { %v8541_v38 = vadd.f32 %v8530_v62, %v13671_v51  ;;  %v8506_v9 = vpop.f32.mrf.mxu1 }
 0x829   : > { %v8493_v6 = vpop.f32.mrf.mxu0 }
 0x82b   : > { %9964 = vmatmul.msk.bf16.vlgmr.msra.gmra.mxu2 %vm340_vm2, %v9961_v18 }
 0x82e   : > { %v8632_v31 = vpop.f32.mrf.mxu2 }
 0x82f   : > { %v8532_v1 = vpop.f32.mrf.mxu3  ;;  %v8703_v12 = vadd.f32 %v8632_v31, %v8536_v61 }
 0x830   : > { %v8619_v13 = vpop.f32.mrf.mxu1 }
 0x831   : > { %v8606_v11 = vpop.f32.mrf.mxu0  ;;  %v8702_v30 = vadd.f32 %v8619_v13, %v8535_v28 }
 0x832   : > { %v8701_v24 = vadd.f32 %v8606_v11, %v8534_v49 }
 0x833   : > { %9963 = vmatmul.msk.bf16.vlgmr.msra.gmra.mxu1 %vm340_vm2, %v9961_v18 }
 0x834   : > { %9962 = vmatmul.msk.bf16.vlgmr.msra.gmra.mxu0 %vm340_vm2, %v9961_v18  ;;  %9965 = vmatmul.msk.bf16.vlgmr.msra.gmra.mxu3 %vm340_vm2, %v9961_v18 }
 0x836   : > { %v8634_v20 = vpop.f32.mrf.mxu2 }
 0x837   : > { %v8645_v35 = vpop.f32.mrf.mxu3 }
 0x838   : > { %v8704_v8 = vadd.f32 %v8645_v35, %v8537_v41  ;;  %v8621_v15 = vpop.f32.mrf.mxu1 }
 0x839   : > { %v8608_v51 = vpop.f32.mrf.mxu0 }
 0x83b   : > { %9968 = vmatmul.msk.bf16.vlgmr.msrb.gmra.mxu2 %vm340_vm2, %v9961_v18 }
 0x83e   : > { %v8684_v14 = vpop.f32.mrf.mxu2 }
 0x83f   : > { %v8647_v0 = vpop.f32.mrf.mxu3  ;;  %v8707_v27 = vadd.f32 %v8684_v14, %v8540_v16 }
 0x840   : > { %v8671_v47 = vpop.f32.mrf.mxu1 }
 0x841   : > { %v8658_v40 = vpop.f32.mrf.mxu0  ;;  %v8706_v19 = vadd.f32 %v8671_v47, %v8539_v36 }
 0x842   : > { %v8705_v33 = vadd.f32 %v8658_v40, %v8538_v63 }
 0x843   : > { %9967 = vmatmul.msk.bf16.vlgmr.msrb.gmra.mxu1 %vm340_vm2, %v9961_v18 }
 0x844   : > { %9966 = vmatmul.msk.bf16.vlgmr.msrb.gmra.mxu0 %vm340_vm2, %v9961_v18  ;;  %9969 = vmatmul.msk.bf16.vlgmr.msrb.gmra.mxu3 %vm340_vm2, %v9961_v18 }
 0x846   : > { %v8686_v5 = vpop.f32.mrf.mxu2 }
 0x847   : > { %v8697_v23 = vpop.f32.mrf.mxu3 }
 0x848   : > { %v8708_v61 = vadd.f32 %v8697_v23, %v8541_v38  ;;  %v8673_v22 = vpop.f32.mrf.mxu1 }
 0x849   : > { %v8660_v3 = vpop.f32.mrf.mxu0 }
 0x84e   : > { %v8799_v32 = vpop.f32.mrf.mxu2 }
 0x84f   : > { %v8699_v60 = vpop.f32.mrf.mxu3  ;;  %v8870_v28 = vadd.f32 %v8799_v32, %v8703_v12 }
 0x850   : > { %v8786_v39 = vpop.f32.mrf.mxu1 }
 0x851   : > { %v8773_v49 = vpop.f32.mrf.mxu0  ;;  %v8869_v55 = vadd.f32 %v8786_v39, %v8702_v30 }
 0x852   : > { %v8868_v26 = vadd.f32 %v8773_v49, %v8701_v24 }
 0x856   : > { %v8801_v42 = vpop.f32.mrf.mxu2 }
 0x857   : > { %v8812_v21 = vpop.f32.mrf.mxu3 }
 0x858   : > { %v13721_v46 = vadd.f32 %v8812_v21, %v8704_v8  ;;  %v8788_v43 = vpop.f32.mrf.mxu1 }
 0x859   : > { %v8775_v4 = vpop.f32.mrf.mxu0 }
 0x85e   : > { %v8851_v57 = vpop.f32.mrf.mxu2 }
 0x85f   : > { %v8814_v41 = vpop.f32.mrf.mxu3  ;;  %v13723_v25 = vadd.f32 %v8851_v57, %v8707_v27 }
 0x860   : > { %v8838_v17 = vpop.f32.mrf.mxu1  ;;  %v13741_v22 = vpop.permute.xlu2 %9380 }
 0x861   : > { %v8825_v50 = vpop.f32.mrf.mxu0  ;;  %v13725_v52 = vadd.f32 %v8838_v17, %v8706_v19 }
 0x862   : > { %v13727_v44 = vadd.f32 %v8825_v50, %v8705_v33 }
 0x866   : > { %v8853_v48 = vpop.f32.mrf.mxu2 }
 0x867   : > { %v8864_v56 = vpop.f32.mrf.mxu3 }
 0x868   : > { %v13729_v16 = vadd.f32 %v8864_v56, %v8708_v61  ;;  %v8840_v53 = vpop.f32.mrf.mxu1 }
 0x869   : > { %v8827_v58 = vpop.f32.mrf.mxu0 }
 0x86e   : > { %v8966_v54 = vpop.f32.mrf.mxu2 }
 0x86f   : > { %v8866_v2 = vpop.f32.mrf.mxu3  ;;  %v9037_v19 = vadd.f32 %v8966_v54, %v8870_v28 }
 0x870   : > { %v8953_v36 = vpop.f32.mrf.mxu1 }
 0x871   : > { %v8940_v10 = vpop.f32.mrf.mxu0  ;;  %v9036_v33 = vadd.f32 %v8953_v36, %v8869_v55 }
 0x872   : > { %v9035_v23 = vadd.f32 %v8940_v10, %v8868_v26 }
 0x876   : > { %v8968_v63 = vpop.f32.mrf.mxu2 }
 0x877   : > { %v8979_v7 = vpop.f32.mrf.mxu3 }
 0x878   : > { %v8955_v45 = vpop.f32.mrf.mxu1  ;;  %v9038_v26 = vadd.f32 %v8979_v7, %v13721_v46 }
 0x879   : > { %v8942_v29 = vpop.f32.mrf.mxu0 }
 0x87e   : > { %v13731_v59 = vpop.f32.mrf.mxu2 }
 0x87f   : > { %v8981_v62 = vpop.f32.mrf.mxu3  ;;  %v9041_v63 = vadd.f32 %v13731_v59, %v13723_v25 }
 0x880   : > { %v13733_v38 = vpop.f32.mrf.mxu1 }
 0x881   : > { %v13735_v9 = vpop.f32.mrf.mxu0  ;;  %v9040_v45 = vadd.f32 %v13733_v38, %v13725_v52 }
 0x882   : > { %v9039_v62 = vadd.f32 %v13735_v9, %v13727_v44 }
 0x886   : > { %v9020_v18 = vpop.f32.mrf.mxu2 }
 0x887   : > { %v13737_v6 = vpop.f32.mrf.mxu3 }
 0x888   : > { %v9007_v31 = vpop.f32.mrf.mxu1  ;;  %v9042_v38 = vadd.f32 %v13737_v6, %v13729_v16 }
 0x889   : > { %v8994_v1 = vpop.f32.mrf.mxu0 }
 0x88e   : > { %v9133_v12 = vpop.f32.mrf.mxu2 }
 0x88f   : > { %v9033_v13 = vpop.f32.mrf.mxu3  ;;  %v9204_v5 = vadd.f32 %v9133_v12, %v9037_v19 }
 0x890   : > { %v9120_v11 = vpop.f32.mrf.mxu1 }
 0x891   : > { %v9107_v30 = vpop.f32.mrf.mxu0  ;;  %v9203_v3 = vadd.f32 %v9120_v11, %v9036_v33 }
 0x892   : > { %v9202_v39 = vadd.f32 %v9107_v30, %v9035_v23 }
 0x896   : > { %v9135_v24 = vpop.f32.mrf.mxu2 }
 0x897   : > { %v9146_v34 = vpop.f32.mrf.mxu3 }
 0x898   : > { %v9122_v20 = vpop.f32.mrf.mxu1  ;;  %v9205_v50 = vadd.f32 %v9146_v34, %v9038_v26 }
 0x899   : > { %v9109_v35 = vpop.f32.mrf.mxu0 }
 0x89e   : > { %v9185_v8 = vpop.f32.mrf.mxu2 }
 0x89f   : > { %v9148_v15 = vpop.f32.mrf.mxu3  ;;  %v9208_v29 = vadd.f32 %v9185_v8, %v9041_v63 }
 0x8a0   : > { %v9172_v51 = vpop.f32.mrf.mxu1 }
 0x8a1   : > { %v9159_v14 = vpop.f32.mrf.mxu0  ;;  %v9207_v1 = vadd.f32 %v9172_v51, %v9040_v45 }
 0x8a2   : > { %v9206_v11 = vadd.f32 %v9159_v14, %v9039_v62 }
 0x8a6   : > { %v9187_v0 = vpop.f32.mrf.mxu2 }
 0x8a7   : > { %v13739_v27 = vpop.f32.mrf.mxu3 }
 0x8a8   : > { %v9174_v47 = vpop.f32.mrf.mxu1  ;;  %v9209_v8 = vadd.f32 %v13739_v27, %v9042_v38 }
 0x8a9   : > { %v9161_v40 = vpop.f32.mrf.mxu0 }
 0x8ae   : > { %v9300_v61 = vpop.f32.mrf.mxu2 }
 0x8af   : > { %v9200_v32 = vpop.f32.mrf.mxu3  ;;  %v9371_v60 = vadd.f32 %v9300_v61, %v9204_v5 }
 0x8b0   : > { %v9287_v49 = vpop.f32.mrf.mxu1 }
 0x8b1   : > { %v9274_v42 = vpop.f32.mrf.mxu0  ;;  %v9370_v21 = vadd.f32 %v9287_v49, %v9203_v3  ;;  %v9385_v43 = vadd.f32 %v13741_v22, %v9371_v60 }
 0x8b2   : > { %v9369_v4 = vadd.f32 %v9274_v42, %v9202_v39 }
 0x8b3   : > { %v9384_v28 = vadd.f32 %v13741_v22, %v9370_v21  ;;  %vm9393_vm1 = vcmp.gt.f32.partialorder %v9385_v43, 0.0  ;;  %v9401_v55 = vmul.f32 %v9385_v43, %v11861_v37 }
 0x8b4   : > { %v9383_v57 = vadd.f32 %v13741_v22, %v9369_v4 }
 0x8b5   : > { %vm9392_vm2 = vcmp.gt.f32.partialorder %v9384_v28, 0.0  ;;  %v9400_v41 = vmul.f32 %v9384_v28, %v11861_v37  ;;  %v9409_v17 = vsel %vm9393_vm1, %v9385_v43, %v9401_v55 }
 0x8b6   : > { %vm9391_vm10 = vcmp.gt.f32.partialorder %v9383_v57, 0.0  ;;  %v9399_v48 = vmul.f32 %v9383_v57, %v11861_v37  ;;  %9417 = vst [vmem:[%s13748_s11 + $0x10] sm:$0xff] %v9409_v17  ;;  %v9302_v56 = vpop.f32.mrf.mxu2 }
 0x8b7   : > { %v9408_v53 = vsel %vm9392_vm2, %v9384_v28, %v9400_v41  ;;  %v9313_v58 = vpop.f32.mrf.mxu3 }
 0x8b8   : > { %v9407_v54 = vsel %vm9391_vm10, %v9383_v57, %v9399_v48  ;;  %9416 = vst [vmem:[%s13748_s11 + $0x8] sm:$0xff] %v9408_v53  ;;  %v9372_v2 = vadd.f32 %v9313_v58, %v9205_v50  ;;  %v9289_v46 = vpop.f32.mrf.mxu1 }
 0x8b9   : > { %9415 = vst [vmem:[%s13748_s11] sm:$0xff] %v9407_v54  ;;  %v9276_v36 = vpop.f32.mrf.mxu0 }
 0x8ba   : > { %v9386_v10 = vadd.f32 %v13741_v22, %v9372_v2 }
 0x8bc   : > { %vm9394_vm11 = vcmp.gt.f32.partialorder %v9386_v10, 0.0  ;;  %v9402_v7 = vmul.f32 %v9386_v10, %v11861_v37 }
 0x8be   : > { %v9410_v18 = vsel %vm9394_vm11, %v9386_v10, %v9402_v7  ;;  %v9352_v31 = vpop.f32.mrf.mxu2 }
 0x8bf   : > { %9418 = vst [vmem:[%s13748_s11 + $0x18] sm:$0xff] %v9410_v18  ;;  %v9315_v12 = vpop.f32.mrf.mxu3  ;;  %v9375_v13 = vadd.f32 %v9352_v31, %v9208_v29 }
 0x8c0   : > { %v9339_v30 = vpop.f32.mrf.mxu1 }
 0x8c1   : > { %v9389_v25 = vadd.f32 %v13741_v22, %v9375_v13  ;;  %v9326_v59 = vpop.f32.mrf.mxu0  ;;  %v9374_v24 = vadd.f32 %v9339_v30, %v9207_v1 }
 0x8c2   : > { %v9373_v34 = vadd.f32 %v9326_v59, %v9206_v11 }
 0x8c3   : > { %vm9397_vm12 = vcmp.gt.f32.partialorder %v9389_v25, 0.0  ;;  %v9405_v52 = vmul.f32 %v9389_v25, %v11861_v37  ;;  %v9388_v44 = vadd.f32 %v13741_v22, %v9374_v24 }
 0x8c4   : > { %v9387_v9 = vadd.f32 %v13741_v22, %v9373_v34 }
 0x8c5   : > { %v9413_v20 = vsel %vm9397_vm12, %v9389_v25, %v9405_v52  ;;  %vm9396_vm15 = vcmp.gt.f32.partialorder %v9388_v44, 0.0  ;;  %v9404_v35 = vmul.f32 %v9388_v44, %v11861_v37 }
 0x8c6   : > { %9421 = vst [vmem:[%s13748_s11 + $0x30] sm:$0xff] %v9413_v20  ;;  %vm9395_vm14 = vcmp.gt.f32.partialorder %v9387_v9, 0.0  ;;  %v9403_v15 = vmul.f32 %v9387_v9, %v11861_v37  ;;  %v9354_v51 = vpop.f32.mrf.mxu2 }
 0x8c7   : > { %v9412_v14 = vsel %vm9396_vm15, %v9388_v44, %v9404_v35  ;;  %v9365_v0 = vpop.f32.mrf.mxu3 }
 0x8c8   : > { %v9411_v47 = vsel %vm9395_vm14, %v9387_v9, %v9403_v15  ;;  %9420 = vst [vmem:[%s13748_s11 + $0x28] sm:$0xff] %v9412_v14  ;;  %v9376_v16 = vadd.f32 %v9365_v0, %v9209_v8  ;;  %v9341_v6 = vpop.f32.mrf.mxu1 }
 0x8c9   : > { %9419 = vst [vmem:[%s13748_s11 + $0x20] sm:$0xff] %v9411_v47  ;;  %v9328_v40 = vpop.f32.mrf.mxu0 }
 0x8ca   : > { %v9390_v19 = vadd.f32 %v13741_v22, %v9376_v16 }
 0x8cc   : > { %vm9398_vm13 = vcmp.gt.f32.partialorder %v9390_v19, 0.0  ;;  %v9406_v33 = vmul.f32 %v9390_v19, %v11861_v37 }
 0x8ce   : > { %v9414_v27 = vsel %vm9398_vm13, %v9390_v19, %v9406_v33 }
 0x8cf   : > { %9422 = vst [vmem:[%s13748_s11 + $0x38] sm:$0xff] %v9414_v27  ;;  %v9367_v5 = vpop.f32.mrf.mxu3 }
 0x8d0 PF: > { %s18_s26 = sadd.s32 1, %s10018_s26  }
 0x8d1   : > { %p15_p4 = scmp.ge.s32.totalorder %s18_s26, 4  }
 0x8d3   :  { %17 = sbr.rel (!%p15_p4) target bundleno = 2 (0x2), region = 130 }

</bundles_post_ra>
